<compile_context>
chip_gen: v6e
topology: v6e:2x2x1
jax: 0.10.0
libtpu: 0.0.40
codegen_flags: <defaults>
</compile_context>

<pallas_src>
import jax
import jax.numpy as jnp
from jax.experimental import pallas as pl
from jax.experimental.pallas import tpu as pltpu

LANE = 128
VMEM_LIMIT = 32 * 1024 * 1024   # safe on v5e/v6e/v7x; all block footprints are << this

LIF_ALPHA = 0.3
LIF_THETA = 0.5
LIF_VRESET = 0.0


def _round_up(x, m):
    return ((x + m - 1) // m) * m


# ----------------------------------------------------------------------------
# Pallas kernels
# ----------------------------------------------------------------------------

def _gemm_bias_kernel(a_ref, w_ref, b_ref, o_ref):
    acc = jnp.dot(a_ref[...], w_ref[...], preferred_element_type=jnp.float32)
    o_ref[...] = (acc + b_ref[...]).astype(o_ref.dtype)


def pallas_gemm_bias(a, w, b):
    """a:(M,K)bf16 @ w:(K,N)bf16 + b:(N,)f32 -> (M,N) bf16 (downsample 1x1 convs)."""
    M, K = a.shape
    N = w.shape[1]
    Mp = _round_up(M, 8)
    tm = 256 if Mp >= 512 else Mp       # >=2 row tiles at M>=512 (feeds both v7x TCs)
    Mp = _round_up(Mp, tm)
    if Mp != M:
        a = jnp.pad(a, ((0, Mp - M), (0, 0)))
    out = pl.pallas_call(
        _gemm_bias_kernel,
        out_shape=jax.ShapeDtypeStruct((Mp, N), jnp.bfloat16),
        grid=(Mp // tm,),
        in_specs=[pl.BlockSpec((tm, K), lambda i: (i, 0)),
                  pl.BlockSpec((K, N), lambda i: (0, 0)),
                  pl.BlockSpec((1, N), lambda i: (0, 0))],
        out_specs=pl.BlockSpec((tm, N), lambda i: (i, 0)),
        compiler_params=pltpu.CompilerParams(
            dimension_semantics=("parallel",),
            vmem_limit_bytes=VMEM_LIMIT),
    )(a, w, b.reshape(1, N))
    return out[:M] if Mp != M else out


def _make_gemm_lif_kernel(has_res):
    """Conv-as-GEMM (+bias [+residual]) fused with the LIF time recurrence."""

    def body(a_ref, w_ref, b_ref, r_ref, o_ref, v_ref):
        @pl.when(pl.program_id(1) == 0)
        def _():
            v_ref[...] = jnp.zeros_like(v_ref)

        acc = jnp.dot(a_ref[0], w_ref[...], preferred_element_type=jnp.float32)
        acc = acc + b_ref[...]
        if r_ref is not None:
            acc = acc + r_ref[0].astype(jnp.float32)   # CompatOp.add before lif3
        v = v_ref[...] * LIF_ALPHA + acc
        spike = v >= LIF_THETA
        v_ref[...] = jnp.where(spike, jnp.float32(LIF_VRESET), v)
        o_ref[0] = spike.astype(o_ref.dtype)

    if has_res:
        def kernel(a_ref, w_ref, b_ref, r_ref, o_ref, v_ref):
            body(a_ref, w_ref, b_ref, r_ref, o_ref, v_ref)
    else:
        def kernel(a_ref, w_ref, b_ref, o_ref, v_ref):
            body(a_ref, w_ref, b_ref, None, o_ref, v_ref)
    return kernel


def pallas_gemm_bias_lif(a_tmk, w, b, residual=None):
    """A:(T,M,K)bf16 @ w:(K,N)bf16 + b [+ residual:(T,M,N)] -> LIF over T -> (T,M,N) bf16.

    grid = (M_tiles 'parallel', T 'arbitrary'); f32 membrane scratch (tm,N) in
    VMEM persists across T.  Row tile covers the whole per-time-step M when it
    fits, capped so the f32 accumulator stays <= 128x256 elements.
    """
    T, M, K = a_tmk.shape
    N = w.shape[1]
    tm_cap = max(8, (LANE * 256 // N) // 8 * 8)   # 256 for N=128, 128 for N=256
    Mp = _round_up(M, 8)
    tm = min(Mp, tm_cap)
    Mp = _round_up(Mp, tm)
    if Mp != M:
        a_tmk = jnp.pad(a_tmk, ((0, 0), (0, Mp - M), (0, 0)))
        if residual is not None:
            residual = jnp.pad(residual, ((0, 0), (0, Mp - M), (0, 0)))

    in_specs = [pl.BlockSpec((1, tm, K), lambda m, t: (t, m, 0)),
                pl.BlockSpec((K, N), lambda m, t: (0, 0)),
                pl.BlockSpec((1, N), lambda m, t: (0, 0))]
    args = [a_tmk, w, b.reshape(1, N)]
    if residual is not None:
        in_specs.append(pl.BlockSpec((1, tm, N), lambda m, t: (t, m, 0)))
        args.append(residual)

    out = pl.pallas_call(
        _make_gemm_lif_kernel(residual is not None),
        out_shape=jax.ShapeDtypeStruct((T, Mp, N), jnp.bfloat16),
        grid=(Mp // tm, T),
        in_specs=in_specs,
        out_specs=pl.BlockSpec((1, tm, N), lambda m, t: (t, m, 0)),
        scratch_shapes=[pltpu.VMEM((tm, N), jnp.float32)],
        compiler_params=pltpu.CompilerParams(
            dimension_semantics=("parallel", "arbitrary"),
            vmem_limit_bytes=VMEM_LIMIT),
    )(*args)
    return out[:, :M] if Mp != M else out


def _make_maxpool_kernel(tap_lists, Ho, Wo):
    n_ph = len(tap_lists)

    def kernel(*refs):
        phase_refs = refs[:n_ph]
        o_ref = refs[n_ph]
        acc = None
        for p in range(n_ph):
            ph = phase_refs[p]
            for (qy, qx) in tap_lists[p]:
                sl = ph[:, qy:qy + Ho, qx:qx + Wo, :]
                acc = sl if acc is None else jnp.maximum(acc, sl)
        o_ref[...] = acc

    return kernel


def _phase_split(xp, kh, kw, stride):
    """Split a spatially padded NHWC tensor into stride x stride phases so every
    window tap becomes an unstrided slice of one phase (no 9x staging)."""
    phases, tap_lists = [], []
    for a in range(stride):
        for bb in range(stride):
            taps = [(dy // stride, dx // stride)
                    for dy in range(kh) for dx in range(kw)
                    if dy % stride == a and dx % stride == bb]
            if not taps:
                continue
            phases.append(xp[:, a::stride, bb::stride, :])
            tap_lists.append(taps)
    return phases, tap_lists


def maxpool2d_3x3_s2_p1(x):
    """MaxPool2d(3,2,1); several images per grid step (lane-dense blocks)."""
    N, H, W, C = x.shape
    Ho = (H + 2 - 3) // 2 + 1
    Wo = (W + 2 - 3) // 2 + 1
    xp = jnp.pad(x, ((0, 0), (1, 1), (1, 1), (0, 0)), constant_values=-jnp.inf)
    phases, tap_lists = _phase_split(xp, 3, 3, 2)
    nb = 4 if N % 4 == 0 else (2 if N % 2 == 0 else 1)
    kernel = _make_maxpool_kernel(tuple(tuple(t) for t in tap_lists), Ho, Wo)
    in_specs = [pl.BlockSpec((nb,) + p.shape[1:], lambda n: (n, 0, 0, 0)) for p in phases]
    return pl.pallas_call(
        kernel,
        out_shape=jax.ShapeDtypeStruct((N, Ho, Wo, C), x.dtype),
        grid=(N // nb,),
        in_specs=in_specs,
        out_specs=pl.BlockSpec((nb, Ho, Wo, C), lambda n: (n, 0, 0, 0)),
        compiler_params=pltpu.CompilerParams(
            dimension_semantics=("parallel",),
            vmem_limit_bytes=VMEM_LIMIT),
    )(*phases)


def _make_gap_fc_kernel(inv_denom):
    def kernel(x_ref, w_ref, b_ref, o_ref):
        feat = jnp.sum(x_ref[...].astype(jnp.float32), axis=1) * inv_denom
        o_ref[...] = jnp.dot(feat, w_ref[...],
                             preferred_element_type=jnp.float32) + b_ref[...]
    return kernel


def pallas_gap_fc(x_bsc, w, b, denom):
    """GlobalAvgPool over (T,H,W) + Linear in a single grid step.

    x_bsc: (B, T*H*W, C) bf16; FC output width padded to 128 (caller slices)."""
    B, S, C = x_bsc.shape
    Np = w.shape[1]
    return pl.pallas_call(
        _make_gap_fc_kernel(1.0 / denom),
        out_shape=jax.ShapeDtypeStruct((B, Np), jnp.float32),
        grid=(1,),
        in_specs=[pl.BlockSpec((B, S, C), lambda i: (0, 0, 0)),
                  pl.BlockSpec((C, Np), lambda i: (0, 0)),
                  pl.BlockSpec((1, Np), lambda i: (0, 0))],
        out_specs=pl.BlockSpec((B, Np), lambda i: (0, 0)),
        compiler_params=pltpu.CompilerParams(
            dimension_semantics=("arbitrary",),
            vmem_limit_bytes=VMEM_LIMIT),
    )(x_bsc, w, b.reshape(1, Np))


# ----------------------------------------------------------------------------
# Conv wrappers (im2col in XLA is tiny at these activation sizes)
# ----------------------------------------------------------------------------

def _im2col(x, kh, kw, stride, pad):
    TB, H, W, Cin = x.shape
    Ho = (H + 2 * pad - kh) // stride + 1
    Wo = (W + 2 * pad - kw) // stride + 1
    xp = jnp.pad(x, ((0, 0), (pad, pad), (pad, pad), (0, 0)))
    cols = [xp[:, dy:dy + stride * (Ho - 1) + 1:stride,
               dx:dx + stride * (Wo - 1) + 1:stride, :]
            for dy in range(kh) for dx in range(kw)]
    a = jnp.concatenate(cols, axis=-1)                # (TB, Ho, Wo, kh*kw*Cin)
    return a.reshape(TB, Ho * Wo, kh * kw * Cin), Ho, Wo


def conv1x1_lif(x, w, b, T, residual=None):
    """Conv2d 1x1 + BN (folded) + optional residual + Lif2d, one fused kernel."""
    TB, H, W, Cin = x.shape
    Cout = w.shape[1]
    B = TB // T
    a = x.reshape(T, B * H * W, Cin)
    r = residual.reshape(T, B * H * W, Cout) if residual is not None else None
    y = pallas_gemm_bias_lif(a, w, b, residual=r)
    return y.reshape(TB, H, W, Cout)


def conv3x3_lif(x, w_flat, b, stride, T):
    """Conv2d 3x3 (stride s, pad 1) + BN (folded) + Lif2d as tap-packed GEMM + LIF."""
    TB, H, W, Cin = x.shape
    Cout = w_flat.shape[1]
    B = TB // T
    a, Ho, Wo = _im2col(x, 3, 3, stride, 1)
    a = a.reshape(T, B * Ho * Wo, 9 * Cin)
    y = pallas_gemm_bias_lif(a, w_flat, b)
    return y.reshape(TB, Ho, Wo, Cout)


def stem_conv_lif(x, w_flat, b, T):
    """Stem Conv2d(Cin, stem, 7, 2, 3) + BN (folded) + Lif2d; K padded 98 -> 128."""
    TB, H, W, Cin = x.shape
    Kp, Cout = w_flat.shape
    B = TB // T
    a, Ho, Wo = _im2col(x, 7, 7, 2, 3)
    K = a.shape[-1]
    if Kp != K:
        a = jnp.pad(a, ((0, 0), (0, 0), (0, Kp - K)))
    a = a.reshape(T, B * Ho * Wo, Kp)
    y = pallas_gemm_bias_lif(a, w_flat, b)
    return y.reshape(TB, Ho, Wo, Cout)


def conv1x1(x, w, b):
    """Downsample 1x1 Conv+BN (no LIF) as a flat lane-dense GEMM."""
    TB, H, W, Cin = x.shape
    Cout = w.shape[1]
    y = pallas_gemm_bias(x.reshape(TB * H * W, Cin), w, b)
    return y.reshape(TB, H, W, Cout)


def avgpool2d_s(x, s):
    """nn.AvgPool2d(s, ceil_mode=True) for the downsample path."""
    if s == 1:
        return x
    # TODO(synk): ceil_mode partial windows unhandled (H, W divisible by s for these shapes).
    N, H, W, C = x.shape
    return (x.reshape(N, H // s, s, W // s, s, C)
              .astype(jnp.float32).mean(axis=(2, 4)).astype(x.dtype))


def bottleneck_forward(x, blk, stride, T):
    out = conv1x1_lif(x, blk["c1w"], blk["c1b"], T)            # conv1 + lif1
    out = conv3x3_lif(out, blk["c2w"], blk["c2b"], stride, T)  # conv2 + lif2
    if "dw" in blk:
        identity = avgpool2d_s(x, stride)
        identity = conv1x1(identity, blk["dw"], blk["db"])
    else:
        identity = x
    # conv3 (1x1) + residual add (CompatOp.add) + lif3, fused in one kernel
    return conv1x1_lif(out, blk["c3w"], blk["c3b"], T, residual=identity)


# ----------------------------------------------------------------------------
# Deterministic parameter construction (shapes follow ResNetLif.__init__, depth=50)
# ----------------------------------------------------------------------------

def _conv_bn_params(key, kh, kw, cin, cout):
    k1, k2, k3, k4, k5, k6 = jax.random.split(key, 6)
    fan_in = float(kh * kw * cin)
    return dict(
        w=jax.random.normal(k1, (kh, kw, cin, cout), jnp.float32) / jnp.sqrt(fan_in),
        b=0.01 * jax.random.normal(k2, (cout,), jnp.float32),
        gamma=1.0 + 0.1 * jax.random.normal(k3, (cout,), jnp.float32),
        beta=0.05 * jax.random.normal(k4, (cout,), jnp.float32),
        mean=0.05 * jax.random.normal(k5, (cout,), jnp.float32),
        var=1.0 + 0.1 * jnp.abs(jax.random.normal(k6, (cout,), jnp.float32)),
    )


def build_params(key, nclass=10, input_channels=2, stem_channels=8, base_channels=8):
    expansion = 4                      # Bottleneck.expansion
    layers_cfg = (3, 4, 6, 3)          # depth = 50
    strides = (1, 2, 2, 2)
    keys = iter(jax.random.split(key, 256))

    params = {}
    params["stem"] = _conv_bn_params(next(keys), 7, 7, input_channels, stem_channels)

    layers = []
    ci = stem_channels
    co = base_channels * expansion
    for li in range(4):
        blocks = []
        for bi in range(layers_cfg[li]):
            s = strides[li] if bi == 0 else 1
            bin_ci = ci if bi == 0 else co
            mid = co // expansion
            blk = dict(
                conv1=_conv_bn_params(next(keys), 1, 1, bin_ci, mid),
                conv2=_conv_bn_params(next(keys), 3, 3, mid, mid),
                conv3=_conv_bn_params(next(keys), 1, 1, mid, co),
                downsample=None,
                stride=s,
            )
            if bi == 0 and (s != 1 or bin_ci != co):
                blk["downsample"] = _conv_bn_params(next(keys), 1, 1, bin_ci, co)
            blocks.append(blk)
        layers.append(blocks)
        ci = co
        if li < 3:
            co = co * 2
    params["layers"] = layers

    kw_, kb_ = jax.random.split(next(keys))
    params["fc_w"] = jax.random.normal(kw_, (co, nclass), jnp.float32) / jnp.sqrt(float(co))
    params["fc_b"] = 0.01 * jax.random.normal(kb_, (nclass,), jnp.float32)
    return params


# ----------------------------------------------------------------------------
# Inference-time parameter prep: fold BN, pad channels to 128, flatten, cast bf16
# ----------------------------------------------------------------------------

def _fold_bn(p, eps=1e-5):
    scale = p["gamma"] / jnp.sqrt(p["var"] + eps)
    return p["w"] * scale, (p["b"] - p["mean"]) * scale + p["beta"]


def _pad_w(w, cin_p, cout_p):
    kh, kw, cin, cout = w.shape
    w = jnp.pad(w, ((0, 0), (0, 0), (0, cin_p - cin), (0, cout_p - cout)))
    return w.astype(jnp.bfloat16)


def _pad_b(b, cout_p):
    return jnp.pad(b, (0, cout_p - b.shape[0])).astype(jnp.float32)


def prepare_inference_params(params):
    prep = {}
    sw, sb = _fold_bn(params["stem"])
    kh, kw_, cin, cout = sw.shape
    cout_p = _round_up(cout, LANE)
    K = kh * kw_ * cin
    Kp = _round_up(K, LANE)
    wf = jnp.pad(sw, ((0, 0), (0, 0), (0, 0), (0, cout_p - cout))).reshape(K, cout_p)
    wf = jnp.pad(wf, ((0, Kp - K), (0, 0))).astype(jnp.bfloat16)
    prep["stem"] = dict(w=wf, b=_pad_b(sb, cout_p))

    cur = cout_p
    layers = []
    for blocks in params["layers"]:
        pbs = []
        for blk in blocks:
            w1, b1 = _fold_bn(blk["conv1"])
            w2, b2 = _fold_bn(blk["conv2"])
            w3, b3 = _fold_bn(blk["conv3"])
            midp = _round_up(w1.shape[-1], LANE)
            cop = _round_up(w3.shape[-1], LANE)
            pb = dict(
                c1w=_pad_w(w1, cur, midp).reshape(cur, midp),   c1b=_pad_b(b1, midp),
                c2w=_pad_w(w2, midp, midp).reshape(9 * midp, midp), c2b=_pad_b(b2, midp),
                c3w=_pad_w(w3, midp, cop).reshape(midp, cop),   c3b=_pad_b(b3, cop),
            )
            if blk["downsample"] is not None:
                wd, bd = _fold_bn(blk["downsample"])
                pb["dw"] = _pad_w(wd, cur, cop).reshape(cur, cop)
                pb["db"] = _pad_b(bd, cop)
            pbs.append(pb)
            cur = cop
        layers.append(pbs)
    prep["layers"] = layers

    ncls = params["fc_w"].shape[1]
    nclsp = _round_up(ncls, LANE)
    prep["fc_w"] = jnp.pad(params["fc_w"],
                           ((0, cur - params["fc_w"].shape[0]), (0, nclsp - ncls))
                           ).astype(jnp.float32)
    prep["fc_b"] = jnp.pad(params["fc_b"], (0, nclsp - ncls)).astype(jnp.float32)
    return prep


# ----------------------------------------------------------------------------
# ResNetLif-50 forward
# ----------------------------------------------------------------------------

LAYER_STRIDES = (1, 2, 2, 2)


def resnetlif50_forward(prep, x_btchw, nclass):
    """x_btchw: (B, T, C, H, W) float32  ->  logits (B, nclass) float32."""
    B, T, C, H, W = x_btchw.shape
    # x.transpose(0, 1).view(t*b, c, h, w), then NCHW -> NHWC, cast to bf16
    x = jnp.transpose(x_btchw, (1, 0, 2, 3, 4)).reshape(T * B, C, H, W)
    x = jnp.transpose(x, (0, 2, 3, 1)).astype(jnp.bfloat16)

    # stem: Conv2d(Cin, stem, 7, 2, 3)+BN + Lif2d (one kernel), then MaxPool2d(3,2,1)
    x = stem_conv_lif(x, prep["stem"]["w"], prep["stem"]["b"], T)
    x = maxpool2d_3x3_s2_p1(x)

    for li, blocks in enumerate(prep["layers"]):
        for bi, blk in enumerate(blocks):
            stride = LAYER_STRIDES[li] if bi == 0 else 1
            x = bottleneck_forward(x, blk, stride, T)

    # GlobalAvgPoolVideo (mean over T, H, W) fused with the final Linear (padded to 128).
    TB, h, w, c = x.shape
    feats = x.reshape(T, B, h * w, c)
    feats = jnp.transpose(feats, (1, 0, 2, 3)).reshape(B, T * h * w, c)
    logits = pallas_gap_fc(feats, prep["fc_w"], prep["fc_b"], denom=T * h * w)
    return logits[:, :nclass]


# ----------------------------------------------------------------------------
# Main
# ----------------------------------------------------------------------------

if __name__ == "__main__":
    key = jax.random.PRNGKey(0)
    kx, kp = jax.random.split(key)

    # Small shapes consistent with the module: (B, T, C, H, W); DVS-style 2-channel frames.
    B, T, C, H, W = 2, 4, 2, 32, 32
    NCLASS = 10

    x = jax.random.normal(kx, (B, T, C, H, W), jnp.float32)
    params = build_params(kp, nclass=NCLASS, input_channels=C,
                          stem_channels=8, base_channels=8)
    prep = prepare_inference_params(params)

    fwd = jax.jit(resnetlif50_forward, static_argnames=("nclass",))
    out = jax.block_until_ready(fwd(prep, x, nclass=NCLASS))
    assert out.shape == (B, NCLASS)
    assert jnp.all(jnp.isfinite(out))
    print("KERNEL_OK")
</pallas_src>

<mosaic_0001>
module attributes {stable_mosaic.version = 11 : i64} {
  func.func @kernel(%arg0: i32, %arg1: i32, %arg2: memref<1x256x128xbf16, #tpu.memory_space<vmem>>, %arg3: memref<128x128xbf16, #tpu.memory_space<vmem>>, %arg4: memref<1x128xf32, #tpu.memory_space<vmem>>, %arg5: memref<1x256x128xbf16, #tpu.memory_space<vmem>>, %arg6: memref<256x128xf32, #tpu.memory_space<vmem>>) attributes {dimension_semantics = [#tpu.dimension_semantics<parallel>, #tpu.dimension_semantics<arbitrary>], iteration_bounds = array<i64: 2, 4>, scalar_prefetch = 0 : i64, scratch_operands = 1 : i64, tpu.core_type = #tpu.core_type<tc>, window_params = [{transform_indices = @transform_0, window_bounds = array<i64: 1, 256, 128>}, {pipeline_mode = #tpu.pipeline_mode<synchronous>, transform_indices = @transform_1, window_bounds = array<i64: 128, 128>}, {pipeline_mode = #tpu.pipeline_mode<synchronous>, transform_indices = @transform_2, window_bounds = array<i64: 1, 128>}, {transform_indices = @transform_3, window_bounds = array<i64: 1, 256, 128>}]} {
    %c0_i32 = arith.constant 0 : i32
    %0 = arith.cmpi eq, %arg1, %c0_i32 : i32
    %1 = arith.extui %0 : i1 to i32
    %c0_i32_0 = arith.constant 0 : i32
    %2 = arith.cmpi ne, %1, %c0_i32_0 : i32
    scf.if %2 {
      %cst_17 = arith.constant 0.000000e+00 : f32
      %25 = vector.broadcast %cst_17 : f32 to vector<256x128xf32>
      %c0_18 = arith.constant 0 : index
      %c0_19 = arith.constant 0 : index
      %26 = vector.load %arg6[%c0_18, %c0_19] : memref<256x128xf32, #tpu.memory_space<vmem>>, vector<256x128xf32>
      tpu.vector_store %arg6[%c0_18, %c0_19], %25 {strides = array<i32>} : memref<256x128xf32, #tpu.memory_space<vmem>>, vector<256x128xf32>,
    } else {
    }
    %c0 = arith.constant 0 : index
    %c0_1 = arith.constant 0 : index
    %c0_2 = arith.constant 0 : index
    %3 = vector.load %arg2[%c0, %c0_1, %c0_2] : memref<1x256x128xbf16, #tpu.memory_space<vmem>>, vector<1x256x128xbf16>
    %4 = vector.shape_cast %3 : vector<1x256x128xbf16> to vector<256x128xbf16>
    %c0_3 = arith.constant 0 : index
    %c0_4 = arith.constant 0 : index
    %5 = vector.load %arg3[%c0_3, %c0_4] : memref<128x128xbf16, #tpu.memory_space<vmem>>, vector<128x128xbf16>
    %cst = arith.constant dense<0.000000e+00> : vector<256x128xf32>
    %6 = tpu.matmul %4, %5, %cst {dimension_numbers = #tpu.dot_dimension_numbers<[1], [0], [0], [1], [0, 0, 1, 1], [], []>} : vector<256x128xbf16>, vector<128x128xbf16>, vector<256x128xf32> -> vector<256x128xf32>
    %c0_5 = arith.constant 0 : index
    %c0_6 = arith.constant 0 : index
    %7 = vector.load %arg4[%c0_5, %c0_6] : memref<1x128xf32, #tpu.memory_space<vmem>>, vector<1x128xf32>
    %8 = vector.broadcast %7 : vector<1x128xf32> to vector<256x128xf32>
    %9 = arith.addf %6, %8 : vector<256x128xf32>
    %c0_7 = arith.constant 0 : index
    %c0_8 = arith.constant 0 : index
    %10 = vector.load %arg6[%c0_7, %c0_8] : memref<256x128xf32, #tpu.memory_space<vmem>>, vector<256x128xf32>
    %cst_9 = arith.constant 3.000000e-01 : f32
    %11 = vector.broadcast %cst_9 : f32 to vector<256x128xf32>
    %12 = arith.mulf %10, %11 : vector<256x128xf32>
    %13 = arith.addf %12, %9 : vector<256x128xf32>
    %cst_10 = arith.constant 5.000000e-01 : f32
    %14 = vector.broadcast %cst_10 : f32 to vector<256x128xf32>
    %15 = arith.cmpf oge, %13, %14 : vector<256x128xf32>
    %cst_11 = arith.constant 0.000000e+00 : f32
    %16 = vector.broadcast %cst_11 : f32 to vector<256x128xf32>
    %17 = arith.select %15, %16, %13 : vector<256x128xi1>, vector<256x128xf32>
    %c0_12 = arith.constant 0 : index
    %c0_13 = arith.constant 0 : index
    %18 = vector.load %arg6[%c0_12, %c0_13] : memref<256x128xf32, #tpu.memory_space<vmem>>, vector<256x128xf32>
    tpu.vector_store %arg6[%c0_12, %c0_13], %17 {strides = array<i32>} : memref<256x128xf32, #tpu.memory_space<vmem>>, vector<256x128xf32>,
    %19 = arith.extui %15 : vector<256x128xi1> to vector<256x128xi32>
    %20 = arith.sitofp %19 : vector<256x128xi32> to vector<256x128xf32>
    %21 = arith.truncf %20 : vector<256x128xf32> to vector<256x128xbf16>
    %c0_14 = arith.constant 0 : index
    %c0_15 = arith.constant 0 : index
    %c0_16 = arith.constant 0 : index
    %22 = vector.load %arg5[%c0_14, %c0_15, %c0_16] : memref<1x256x128xbf16, #tpu.memory_space<vmem>>, vector<1x256x128xbf16>
    %23 = vector.shape_cast %22 : vector<1x256x128xbf16> to vector<256x128xbf16>
    %24 = vector.shape_cast %21 : vector<256x128xbf16> to vector<1x256x128xbf16>
    tpu.vector_store %arg5[%c0_14, %c0_15, %c0_16], %24 {strides = array<i32>} : memref<1x256x128xbf16, #tpu.memory_space<vmem>>, vector<1x256x128xbf16>,
    return
  }
  func.func @transform_0(%arg0: i32, %arg1: i32) -> (i32, i32, i32) {
    %c0_i32 = arith.constant 0 : i32
    %c0_i32_0 = arith.constant 0 : i32
    return %arg1, %arg0, %c0_i32 : i32, i32, i32
  }
  func.func @transform_1(%arg0: i32, %arg1: i32) -> (i32, i32) {
    %c0_i32 = arith.constant 0 : i32
    %c0_i32_0 = arith.constant 0 : i32
    %c0_i32_1 = arith.constant 0 : i32
    return %c0_i32, %c0_i32_0 : i32, i32
  }
  func.func @transform_2(%arg0: i32, %arg1: i32) -> (i32, i32) {
    %c0_i32 = arith.constant 0 : i32
    %c0_i32_0 = arith.constant 0 : i32
    %c0_i32_1 = arith.constant 0 : i32
    return %c0_i32, %c0_i32_0 : i32, i32
  }
  func.func @transform_3(%arg0: i32, %arg1: i32) -> (i32, i32, i32) {
    %c0_i32 = arith.constant 0 : i32
    %c0_i32_0 = arith.constant 0 : i32
    return %arg1, %arg0, %c0_i32 : i32, i32, i32
  }
}

module attributes {stable_mosaic.version = 11 : i64} {
  func.func @kernel(%arg0: i32, %arg1: memref<4x9x9x128xbf16, #tpu.memory_space<vmem>>, %arg2: memref<4x9x9x128xbf16, #tpu.memory_space<vmem>>, %arg3: memref<4x9x9x128xbf16, #tpu.memory_space<vmem>>, %arg4: memref<4x9x9x128xbf16, #tpu.memory_space<vmem>>, %arg5: memref<4x8x8x128xbf16, #tpu.memory_space<vmem>>) attributes {dimension_semantics = [#tpu.dimension_semantics<parallel>], iteration_bounds = array<i64: 2>, scalar_prefetch = 0 : i64, scratch_operands = 0 : i64, tpu.core_type = #tpu.core_type<tc>, window_params = [{transform_indices = @transform_0, window_bounds = array<i64: 4, 9, 9, 128>}, {transform_indices = @transform_1, window_bounds = array<i64: 4, 9, 9, 128>}, {transform_indices = @transform_2, window_bounds = array<i64: 4, 9, 9, 128>}, {transform_indices = @transform_3, window_bounds = array<i64: 4, 9, 9, 128>}, {transform_indices = @transform_4, window_bounds = array<i64: 4, 8, 8, 128>}]} {
    %c0 = arith.constant 0 : index
    %c0_0 = arith.constant 0 : index
    %c0_1 = arith.constant 0 : index
    %c0_2 = arith.constant 0 : index
    %0 = vector.load %arg1[%c0, %c0_0, %c0_1, %c0_2] : memref<4x9x9x128xbf16, #tpu.memory_space<vmem>>, vector<4x8x8x128xbf16>
    %c0_3 = arith.constant 0 : index
    %c0_4 = arith.constant 0 : index
    %c1 = arith.constant 1 : index
    %c0_5 = arith.constant 0 : index
    %1 = vector.load %arg1[%c0_3, %c0_4, %c1, %c0_5] : memref<4x9x9x128xbf16, #tpu.memory_space<vmem>>, vector<4x8x8x128xbf16>
    %2 = arith.maximumf %0, %1 : vector<4x8x8x128xbf16>
    %c0_6 = arith.constant 0 : index
    %c1_7 = arith.constant 1 : index
    %c0_8 = arith.constant 0 : index
    %c0_9 = arith.constant 0 : index
    %3 = vector.load %arg1[%c0_6, %c1_7, %c0_8, %c0_9] : memref<4x9x9x128xbf16, #tpu.memory_space<vmem>>, vector<4x8x8x128xbf16>
    %4 = arith.maximumf %2, %3 : vector<4x8x8x128xbf16>
    %c0_10 = arith.constant 0 : index
    %c1_11 = arith.constant 1 : index
    %c1_12 = arith.constant 1 : index
    %c0_13 = arith.constant 0 : index
    %5 = vector.load %arg1[%c0_10, %c1_11, %c1_12, %c0_13] : memref<4x9x9x128xbf16, #tpu.memory_space<vmem>>, vector<4x8x8x128xbf16>
    %6 = arith.maximumf %4, %5 : vector<4x8x8x128xbf16>
    %c0_14 = arith.constant 0 : index
    %c0_15 = arith.constant 0 : index
    %c0_16 = arith.constant 0 : index
    %c0_17 = arith.constant 0 : index
    %7 = vector.load %arg2[%c0_14, %c0_15, %c0_16, %c0_17] : memref<4x9x9x128xbf16, #tpu.memory_space<vmem>>, vector<4x8x8x128xbf16>
    %8 = arith.maximumf %6, %7 : vector<4x8x8x128xbf16>
    %c0_18 = arith.constant 0 : index
    %c1_19 = arith.constant 1 : index
    %c0_20 = arith.constant 0 : index
    %c0_21 = arith.constant 0 : index
    %9 = vector.load %arg2[%c0_18, %c1_19, %c0_20, %c0_21] : memref<4x9x9x128xbf16, #tpu.memory_space<vmem>>, vector<4x8x8x128xbf16>
    %10 = arith.maximumf %8, %9 : vector<4x8x8x128xbf16>
    %c0_22 = arith.constant 0 : index
    %c0_23 = arith.constant 0 : index
    %c0_24 = arith.constant 0 : index
    %c0_25 = arith.constant 0 : index
    %11 = vector.load %arg3[%c0_22, %c0_23, %c0_24, %c0_25] : memref<4x9x9x128xbf16, #tpu.memory_space<vmem>>, vector<4x8x8x128xbf16>
    %12 = arith.maximumf %10, %11 : vector<4x8x8x128xbf16>
    %c0_26 = arith.constant 0 : index
    %c0_27 = arith.constant 0 : index
    %c1_28 = arith.constant 1 : index
    %c0_29 = arith.constant 0 : index
    %13 = vector.load %arg3[%c0_26, %c0_27, %c1_28, %c0_29] : memref<4x9x9x128xbf16, #tpu.memory_space<vmem>>, vector<4x8x8x128xbf16>
    %14 = arith.maximumf %12, %13 : vector<4x8x8x128xbf16>
    %c0_30 = arith.constant 0 : index
    %c0_31 = arith.constant 0 : index
    %c0_32 = arith.constant 0 : index
    %c0_33 = arith.constant 0 : index
    %15 = vector.load %arg4[%c0_30, %c0_31, %c0_32, %c0_33] : memref<4x9x9x128xbf16, #tpu.memory_space<vmem>>, vector<4x8x8x128xbf16>
    %16 = arith.maximumf %14, %15 : vector<4x8x8x128xbf16>
    %c0_34 = arith.constant 0 : index
    %c0_35 = arith.constant 0 : index
    %c0_36 = arith.constant 0 : index
    %c0_37 = arith.constant 0 : index
    %17 = vector.load %arg5[%c0_34, %c0_35, %c0_36, %c0_37] : memref<4x8x8x128xbf16, #tpu.memory_space<vmem>>, vector<4x8x8x128xbf16>
    tpu.vector_store %arg5[%c0_34, %c0_35, %c0_36, %c0_37], %16 {strides = array<i32>} : memref<4x8x8x128xbf16, #tpu.memory_space<vmem>>, vector<4x8x8x128xbf16>,
    return
  }
  func.func @transform_0(%arg0: i32) -> (i32, i32, i32, i32) {
    %c0_i32 = arith.constant 0 : i32
    %c0_i32_0 = arith.constant 0 : i32
    %c0_i32_1 = arith.constant 0 : i32
    %c0_i32_2 = arith.constant 0 : i32
    return %arg0, %c0_i32, %c0_i32_0, %c0_i32_1 : i32, i32, i32, i32
  }
  func.func @transform_1(%arg0: i32) -> (i32, i32, i32, i32) {
    %c0_i32 = arith.constant 0 : i32
    %c0_i32_0 = arith.constant 0 : i32
    %c0_i32_1 = arith.constant 0 : i32
    %c0_i32_2 = arith.constant 0 : i32
    return %arg0, %c0_i32, %c0_i32_0, %c0_i32_1 : i32, i32, i32, i32
  }
  func.func @transform_2(%arg0: i32) -> (i32, i32, i32, i32) {
    %c0_i32 = arith.constant 0 : i32
    %c0_i32_0 = arith.constant 0 : i32
    %c0_i32_1 = arith.constant 0 : i32
    %c0_i32_2 = arith.constant 0 : i32
    return %arg0, %c0_i32, %c0_i32_0, %c0_i32_1 : i32, i32, i32, i32
  }
  func.func @transform_3(%arg0: i32) -> (i32, i32, i32, i32) {
    %c0_i32 = arith.constant 0 : i32
    %c0_i32_0 = arith.constant 0 : i32
    %c0_i32_1 = arith.constant 0 : i32
    %c0_i32_2 = arith.constant 0 : i32
    return %arg0, %c0_i32, %c0_i32_0, %c0_i32_1 : i32, i32, i32, i32
  }
  func.func @transform_4(%arg0: i32) -> (i32, i32, i32, i32) {
    %c0_i32 = arith.constant 0 : i32
    %c0_i32_0 = arith.constant 0 : i32
    %c0_i32_1 = arith.constant 0 : i32
    %c0_i32_2 = arith.constant 0 : i32
    return %arg0, %c0_i32, %c0_i32_0, %c0_i32_1 : i32, i32, i32, i32
  }
}

module attributes {stable_mosaic.version = 11 : i64} {
  func.func @kernel(%arg0: i32, %arg1: i32, %arg2: memref<1x128x128xbf16, #tpu.memory_space<vmem>>, %arg3: memref<128x128xbf16, #tpu.memory_space<vmem>>, %arg4: memref<1x128xf32, #tpu.memory_space<vmem>>, %arg5: memref<1x128x128xbf16, #tpu.memory_space<vmem>>, %arg6: memref<128x128xf32, #tpu.memory_space<vmem>>) attributes {dimension_semantics = [#tpu.dimension_semantics<parallel>, #tpu.dimension_semantics<arbitrary>], iteration_bounds = array<i64: 1, 4>, scalar_prefetch = 0 : i64, scratch_operands = 1 : i64, tpu.core_type = #tpu.core_type<tc>, window_params = [{transform_indices = @transform_0, window_bounds = array<i64: 1, 128, 128>}, {pipeline_mode = #tpu.pipeline_mode<synchronous>, transform_indices = @transform_1, window_bounds = array<i64: 128, 128>}, {pipeline_mode = #tpu.pipeline_mode<synchronous>, transform_indices = @transform_2, window_bounds = array<i64: 1, 128>}, {transform_indices = @transform_3, window_bounds = array<i64: 1, 128, 128>}]} {
    %c0_i32 = arith.constant 0 : i32
    %0 = arith.cmpi eq, %arg1, %c0_i32 : i32
    %1 = arith.extui %0 : i1 to i32
    %c0_i32_0 = arith.constant 0 : i32
    %2 = arith.cmpi ne, %1, %c0_i32_0 : i32
    scf.if %2 {
      %cst_17 = arith.constant 0.000000e+00 : f32
      %25 = vector.broadcast %cst_17 : f32 to vector<128x128xf32>
      %c0_18 = arith.constant 0 : index
      %c0_19 = arith.constant 0 : index
      %26 = vector.load %arg6[%c0_18, %c0_19] : memref<128x128xf32, #tpu.memory_space<vmem>>, vector<128x128xf32>
      tpu.vector_store %arg6[%c0_18, %c0_19], %25 {strides = array<i32>} : memref<128x128xf32, #tpu.memory_space<vmem>>, vector<128x128xf32>,
    } else {
    }
    %c0 = arith.constant 0 : index
    %c0_1 = arith.constant 0 : index
    %c0_2 = arith.constant 0 : index
    %3 = vector.load %arg2[%c0, %c0_1, %c0_2] : memref<1x128x128xbf16, #tpu.memory_space<vmem>>, vector<1x128x128xbf16>
    %4 = vector.shape_cast %3 : vector<1x128x128xbf16> to vector<128x128xbf16>
    %c0_3 = arith.constant 0 : index
    %c0_4 = arith.constant 0 : index
    %5 = vector.load %arg3[%c0_3, %c0_4] : memref<128x128xbf16, #tpu.memory_space<vmem>>, vector<128x128xbf16>
    %cst = arith.constant dense<0.000000e+00> : vector<128x128xf32>
    %6 = tpu.matmul %4, %5, %cst {dimension_numbers = #tpu.dot_dimension_numbers<[1], [0], [0], [1], [0, 0, 1, 1], [], []>} : vector<128x128xbf16>, vector<128x128xbf16>, vector<128x128xf32> -> vector<128x128xf32>
    %c0_5 = arith.constant 0 : index
    %c0_6 = arith.constant 0 : index
    %7 = vector.load %arg4[%c0_5, %c0_6] : memref<1x128xf32, #tpu.memory_space<vmem>>, vector<1x128xf32>
    %8 = vector.broadcast %7 : vector<1x128xf32> to vector<128x128xf32>
    %9 = arith.addf %6, %8 : vector<128x128xf32>
    %c0_7 = arith.constant 0 : index
    %c0_8 = arith.constant 0 : index
    %10 = vector.load %arg6[%c0_7, %c0_8] : memref<128x128xf32, #tpu.memory_space<vmem>>, vector<128x128xf32>
    %cst_9 = arith.constant 3.000000e-01 : f32
    %11 = vector.broadcast %cst_9 : f32 to vector<128x128xf32>
    %12 = arith.mulf %10, %11 : vector<128x128xf32>
    %13 = arith.addf %12, %9 : vector<128x128xf32>
    %cst_10 = arith.constant 5.000000e-01 : f32
    %14 = vector.broadcast %cst_10 : f32 to vector<128x128xf32>
    %15 = arith.cmpf oge, %13, %14 : vector<128x128xf32>
    %cst_11 = arith.constant 0.000000e+00 : f32
    %16 = vector.broadcast %cst_11 : f32 to vector<128x128xf32>
    %17 = arith.select %15, %16, %13 : vector<128x128xi1>, vector<128x128xf32>
    %c0_12 = arith.constant 0 : index
    %c0_13 = arith.constant 0 : index
    %18 = vector.load %arg6[%c0_12, %c0_13] : memref<128x128xf32, #tpu.memory_space<vmem>>, vector<128x128xf32>
    tpu.vector_store %arg6[%c0_12, %c0_13], %17 {strides = array<i32>} : memref<128x128xf32, #tpu.memory_space<vmem>>, vector<128x128xf32>,
    %19 = arith.extui %15 : vector<128x128xi1> to vector<128x128xi32>
    %20 = arith.sitofp %19 : vector<128x128xi32> to vector<128x128xf32>
    %21 = arith.truncf %20 : vector<128x128xf32> to vector<128x128xbf16>
    %c0_14 = arith.constant 0 : index
    %c0_15 = arith.constant 0 : index
    %c0_16 = arith.constant 0 : index
    %22 = vector.load %arg5[%c0_14, %c0_15, %c0_16] : memref<1x128x128xbf16, #tpu.memory_space<vmem>>, vector<1x128x128xbf16>
    %23 = vector.shape_cast %22 : vector<1x128x128xbf16> to vector<128x128xbf16>
    %24 = vector.shape_cast %21 : vector<128x128xbf16> to vector<1x128x128xbf16>
    tpu.vector_store %arg5[%c0_14, %c0_15, %c0_16], %24 {strides = array<i32>} : memref<1x128x128xbf16, #tpu.memory_space<vmem>>, vector<1x128x128xbf16>,
    return
  }
  func.func @transform_0(%arg0: i32, %arg1: i32) -> (i32, i32, i32) {
    %c0_i32 = arith.constant 0 : i32
    %c0_i32_0 = arith.constant 0 : i32
    return %arg1, %arg0, %c0_i32 : i32, i32, i32
  }
  func.func @transform_1(%arg0: i32, %arg1: i32) -> (i32, i32) {
    %c0_i32 = arith.constant 0 : i32
    %c0_i32_0 = arith.constant 0 : i32
    %c0_i32_1 = arith.constant 0 : i32
    return %c0_i32, %c0_i32_0 : i32, i32
  }
  func.func @transform_2(%arg0: i32, %arg1: i32) -> (i32, i32) {
    %c0_i32 = arith.constant 0 : i32
    %c0_i32_0 = arith.constant 0 : i32
    %c0_i32_1 = arith.constant 0 : i32
    return %c0_i32, %c0_i32_0 : i32, i32
  }
  func.func @transform_3(%arg0: i32, %arg1: i32) -> (i32, i32, i32) {
    %c0_i32 = arith.constant 0 : i32
    %c0_i32_0 = arith.constant 0 : i32
    return %arg1, %arg0, %c0_i32 : i32, i32, i32
  }
}

module attributes {stable_mosaic.version = 11 : i64} {
  func.func @_gemm_bias_kernel(%arg0: i32, %arg1: memref<256x128xbf16, #tpu.memory_space<vmem>>, %arg2: memref<128x128xbf16, #tpu.memory_space<vmem>>, %arg3: memref<1x128xf32, #tpu.memory_space<vmem>>, %arg4: memref<256x128xbf16, #tpu.memory_space<vmem>>) attributes {dimension_semantics = [#tpu.dimension_semantics<parallel>], iteration_bounds = array<i64: 2>, scalar_prefetch = 0 : i64, scratch_operands = 0 : i64, tpu.core_type = #tpu.core_type<tc>, window_params = [{transform_indices = @transform_0, window_bounds = array<i64: 256, 128>}, {pipeline_mode = #tpu.pipeline_mode<synchronous>, transform_indices = @transform_1, window_bounds = array<i64: 128, 128>}, {pipeline_mode = #tpu.pipeline_mode<synchronous>, transform_indices = @transform_2, window_bounds = array<i64: 1, 128>}, {transform_indices = @transform_3, window_bounds = array<i64: 256, 128>}]} {
    %c0 = arith.constant 0 : index
    %c0_0 = arith.constant 0 : index
    %0 = vector.load %arg1[%c0, %c0_0] : memref<256x128xbf16, #tpu.memory_space<vmem>>, vector<256x128xbf16>
    %c0_1 = arith.constant 0 : index
    %c0_2 = arith.constant 0 : index
    %1 = vector.load %arg2[%c0_1, %c0_2] : memref<128x128xbf16, #tpu.memory_space<vmem>>, vector<128x128xbf16>
    %cst = arith.constant dense<0.000000e+00> : vector<256x128xf32>
    %2 = tpu.matmul %0, %1, %cst {dimension_numbers = #tpu.dot_dimension_numbers<[1], [0], [0], [1], [0, 0, 1, 1], [], []>} : vector<256x128xbf16>, vector<128x128xbf16>, vector<256x128xf32> -> vector<256x128xf32>
    %c0_3 = arith.constant 0 : index
    %c0_4 = arith.constant 0 : index
    %3 = vector.load %arg3[%c0_3, %c0_4] : memref<1x128xf32, #tpu.memory_space<vmem>>, vector<1x128xf32>
    %4 = vector.broadcast %3 : vector<1x128xf32> to vector<256x128xf32>
    %5 = arith.addf %2, %4 : vector<256x128xf32>
    %6 = arith.truncf %5 : vector<256x128xf32> to vector<256x128xbf16>
    %c0_5 = arith.constant 0 : index
    %c0_6 = arith.constant 0 : index
    %7 = vector.load %arg4[%c0_5, %c0_6] : memref<256x128xbf16, #tpu.memory_space<vmem>>, vector<256x128xbf16>
    tpu.vector_store %arg4[%c0_5, %c0_6], %6 {strides = array<i32>} : memref<256x128xbf16, #tpu.memory_space<vmem>>, vector<256x128xbf16>,
    return
  }
  func.func @transform_0(%arg0: i32) -> (i32, i32) {
    %c0_i32 = arith.constant 0 : i32
    %c0_i32_0 = arith.constant 0 : i32
    return %arg0, %c0_i32 : i32, i32
  }
  func.func @transform_1(%arg0: i32) -> (i32, i32) {
    %c0_i32 = arith.constant 0 : i32
    %c0_i32_0 = arith.constant 0 : i32
    %c0_i32_1 = arith.constant 0 : i32
    return %c0_i32, %c0_i32_0 : i32, i32
  }
  func.func @transform_2(%arg0: i32) -> (i32, i32) {
    %c0_i32 = arith.constant 0 : i32
    %c0_i32_0 = arith.constant 0 : i32
    %c0_i32_1 = arith.constant 0 : i32
    return %c0_i32, %c0_i32_0 : i32, i32
  }
  func.func @transform_3(%arg0: i32) -> (i32, i32) {
    %c0_i32 = arith.constant 0 : i32
    %c0_i32_0 = arith.constant 0 : i32
    return %arg0, %c0_i32 : i32, i32
  }
}

module attributes {stable_mosaic.version = 11 : i64} {
  func.func @kernel(%arg0: i32, %arg1: i32, %arg2: memref<1x128x1152xbf16, #tpu.memory_space<vmem>>, %arg3: memref<1152x128xbf16, #tpu.memory_space<vmem>>, %arg4: memref<1x128xf32, #tpu.memory_space<vmem>>, %arg5: memref<1x128x128xbf16, #tpu.memory_space<vmem>>, %arg6: memref<128x128xf32, #tpu.memory_space<vmem>>) attributes {dimension_semantics = [#tpu.dimension_semantics<parallel>, #tpu.dimension_semantics<arbitrary>], iteration_bounds = array<i64: 1, 4>, scalar_prefetch = 0 : i64, scratch_operands = 1 : i64, tpu.core_type = #tpu.core_type<tc>, window_params = [{transform_indices = @transform_0, window_bounds = array<i64: 1, 128, 1152>}, {pipeline_mode = #tpu.pipeline_mode<synchronous>, transform_indices = @transform_1, window_bounds = array<i64: 1152, 128>}, {pipeline_mode = #tpu.pipeline_mode<synchronous>, transform_indices = @transform_2, window_bounds = array<i64: 1, 128>}, {transform_indices = @transform_3, window_bounds = array<i64: 1, 128, 128>}]} {
    %c0_i32 = arith.constant 0 : i32
    %0 = arith.cmpi eq, %arg1, %c0_i32 : i32
    %1 = arith.extui %0 : i1 to i32
    %c0_i32_0 = arith.constant 0 : i32
    %2 = arith.cmpi ne, %1, %c0_i32_0 : i32
    scf.if %2 {
      %cst_17 = arith.constant 0.000000e+00 : f32
      %25 = vector.broadcast %cst_17 : f32 to vector<128x128xf32>
      %c0_18 = arith.constant 0 : index
      %c0_19 = arith.constant 0 : index
      %26 = vector.load %arg6[%c0_18, %c0_19] : memref<128x128xf32, #tpu.memory_space<vmem>>, vector<128x128xf32>
      tpu.vector_store %arg6[%c0_18, %c0_19], %25 {strides = array<i32>} : memref<128x128xf32, #tpu.memory_space<vmem>>, vector<128x128xf32>,
    } else {
    }
    %c0 = arith.constant 0 : index
    %c0_1 = arith.constant 0 : index
    %c0_2 = arith.constant 0 : index
    %3 = vector.load %arg2[%c0, %c0_1, %c0_2] : memref<1x128x1152xbf16, #tpu.memory_space<vmem>>, vector<1x128x1152xbf16>
    %4 = vector.shape_cast %3 : vector<1x128x1152xbf16> to vector<128x1152xbf16>
    %c0_3 = arith.constant 0 : index
    %c0_4 = arith.constant 0 : index
    %5 = vector.load %arg3[%c0_3, %c0_4] : memref<1152x128xbf16, #tpu.memory_space<vmem>>, vector<1152x128xbf16>
    %cst = arith.constant dense<0.000000e+00> : vector<128x128xf32>
    %6 = tpu.matmul %4, %5, %cst {dimension_numbers = #tpu.dot_dimension_numbers<[1], [0], [0], [1], [0, 0, 1, 1], [], []>} : vector<128x1152xbf16>, vector<1152x128xbf16>, vector<128x128xf32> -> vector<128x128xf32>
    %c0_5 = arith.constant 0 : index
    %c0_6 = arith.constant 0 : index
    %7 = vector.load %arg4[%c0_5, %c0_6] : memref<1x128xf32, #tpu.memory_space<vmem>>, vector<1x128xf32>
    %8 = vector.broadcast %7 : vector<1x128xf32> to vector<128x128xf32>
    %9 = arith.addf %6, %8 : vector<128x128xf32>
    %c0_7 = arith.constant 0 : index
    %c0_8 = arith.constant 0 : index
    %10 = vector.load %arg6[%c0_7, %c0_8] : memref<128x128xf32, #tpu.memory_space<vmem>>, vector<128x128xf32>
    %cst_9 = arith.constant 3.000000e-01 : f32
    %11 = vector.broadcast %cst_9 : f32 to vector<128x128xf32>
    %12 = arith.mulf %10, %11 : vector<128x128xf32>
    %13 = arith.addf %12, %9 : vector<128x128xf32>
    %cst_10 = arith.constant 5.000000e-01 : f32
    %14 = vector.broadcast %cst_10 : f32 to vector<128x128xf32>
    %15 = arith.cmpf oge, %13, %14 : vector<128x128xf32>
    %cst_11 = arith.constant 0.000000e+00 : f32
    %16 = vector.broadcast %cst_11 : f32 to vector<128x128xf32>
    %17 = arith.select %15, %16, %13 : vector<128x128xi1>, vector<128x128xf32>
    %c0_12 = arith.constant 0 : index
    %c0_13 = arith.constant 0 : index
    %18 = vector.load %arg6[%c0_12, %c0_13] : memref<128x128xf32, #tpu.memory_space<vmem>>, vector<128x128xf32>
    tpu.vector_store %arg6[%c0_12, %c0_13], %17 {strides = array<i32>} : memref<128x128xf32, #tpu.memory_space<vmem>>, vector<128x128xf32>,
    %19 = arith.extui %15 : vector<128x128xi1> to vector<128x128xi32>
    %20 = arith.sitofp %19 : vector<128x128xi32> to vector<128x128xf32>
    %21 = arith.truncf %20 : vector<128x128xf32> to vector<128x128xbf16>
    %c0_14 = arith.constant 0 : index
    %c0_15 = arith.constant 0 : index
    %c0_16 = arith.constant 0 : index
    %22 = vector.load %arg5[%c0_14, %c0_15, %c0_16] : memref<1x128x128xbf16, #tpu.memory_space<vmem>>, vector<1x128x128xbf16>
    %23 = vector.shape_cast %22 : vector<1x128x128xbf16> to vector<128x128xbf16>
    %24 = vector.shape_cast %21 : vector<128x128xbf16> to vector<1x128x128xbf16>
    tpu.vector_store %arg5[%c0_14, %c0_15, %c0_16], %24 {strides = array<i32>} : memref<1x128x128xbf16, #tpu.memory_space<vmem>>, vector<1x128x128xbf16>,
    return
  }
  func.func @transform_0(%arg0: i32, %arg1: i32) -> (i32, i32, i32) {
    %c0_i32 = arith.constant 0 : i32
    %c0_i32_0 = arith.constant 0 : i32
    return %arg1, %arg0, %c0_i32 : i32, i32, i32
  }
  func.func @transform_1(%arg0: i32, %arg1: i32) -> (i32, i32) {
    %c0_i32 = arith.constant 0 : i32
    %c0_i32_0 = arith.constant 0 : i32
    %c0_i32_1 = arith.constant 0 : i32
    return %c0_i32, %c0_i32_0 : i32, i32
  }
  func.func @transform_2(%arg0: i32, %arg1: i32) -> (i32, i32) {
    %c0_i32 = arith.constant 0 : i32
    %c0_i32_0 = arith.constant 0 : i32
    %c0_i32_1 = arith.constant 0 : i32
    return %c0_i32, %c0_i32_0 : i32, i32
  }
  func.func @transform_3(%arg0: i32, %arg1: i32) -> (i32, i32, i32) {
    %c0_i32 = arith.constant 0 : i32
    %c0_i32_0 = arith.constant 0 : i32
    return %arg1, %arg0, %c0_i32 : i32, i32, i32
  }
}

module attributes {stable_mosaic.version = 11 : i64} {
  func.func @kernel(%arg0: i32, %arg1: i32, %arg2: memref<1x128x128xbf16, #tpu.memory_space<vmem>>, %arg3: memref<128x128xbf16, #tpu.memory_space<vmem>>, %arg4: memref<1x128xf32, #tpu.memory_space<vmem>>, %arg5: memref<1x128x128xbf16, #tpu.memory_space<vmem>>, %arg6: memref<1x128x128xbf16, #tpu.memory_space<vmem>>, %arg7: memref<128x128xf32, #tpu.memory_space<vmem>>) attributes {dimension_semantics = [#tpu.dimension_semantics<parallel>, #tpu.dimension_semantics<arbitrary>], iteration_bounds = array<i64: 1, 4>, scalar_prefetch = 0 : i64, scratch_operands = 1 : i64, tpu.core_type = #tpu.core_type<tc>, window_params = [{transform_indices = @transform_0, window_bounds = array<i64: 1, 128, 128>}, {pipeline_mode = #tpu.pipeline_mode<synchronous>, transform_indices = @transform_1, window_bounds = array<i64: 128, 128>}, {pipeline_mode = #tpu.pipeline_mode<synchronous>, transform_indices = @transform_2, window_bounds = array<i64: 1, 128>}, {transform_indices = @transform_3, window_bounds = array<i64: 1, 128, 128>}, {transform_indices = @transform_4, window_bounds = array<i64: 1, 128, 128>}]} {
    %c0_i32 = arith.constant 0 : i32
    %0 = arith.cmpi eq, %arg1, %c0_i32 : i32
    %1 = arith.extui %0 : i1 to i32
    %c0_i32_0 = arith.constant 0 : i32
    %2 = arith.cmpi ne, %1, %c0_i32_0 : i32
    scf.if %2 {
      %cst_20 = arith.constant 0.000000e+00 : f32
      %29 = vector.broadcast %cst_20 : f32 to vector<128x128xf32>
      %c0_21 = arith.constant 0 : index
      %c0_22 = arith.constant 0 : index
      %30 = vector.load %arg7[%c0_21, %c0_22] : memref<128x128xf32, #tpu.memory_space<vmem>>, vector<128x128xf32>
      tpu.vector_store %arg7[%c0_21, %c0_22], %29 {strides = array<i32>} : memref<128x128xf32, #tpu.memory_space<vmem>>, vector<128x128xf32>,
    } else {
    }
    %c0 = arith.constant 0 : index
    %c0_1 = arith.constant 0 : index
    %c0_2 = arith.constant 0 : index
    %3 = vector.load %arg2[%c0, %c0_1, %c0_2] : memref<1x128x128xbf16, #tpu.memory_space<vmem>>, vector<1x128x128xbf16>
    %4 = vector.shape_cast %3 : vector<1x128x128xbf16> to vector<128x128xbf16>
    %c0_3 = arith.constant 0 : index
    %c0_4 = arith.constant 0 : index
    %5 = vector.load %arg3[%c0_3, %c0_4] : memref<128x128xbf16, #tpu.memory_space<vmem>>, vector<128x128xbf16>
    %cst = arith.constant dense<0.000000e+00> : vector<128x128xf32>
    %6 = tpu.matmul %4, %5, %cst {dimension_numbers = #tpu.dot_dimension_numbers<[1], [0], [0], [1], [0, 0, 1, 1], [], []>} : vector<128x128xbf16>, vector<128x128xbf16>, vector<128x128xf32> -> vector<128x128xf32>
    %c0_5 = arith.constant 0 : index
    %c0_6 = arith.constant 0 : index
    %7 = vector.load %arg4[%c0_5, %c0_6] : memref<1x128xf32, #tpu.memory_space<vmem>>, vector<1x128xf32>
    %8 = vector.broadcast %7 : vector<1x128xf32> to vector<128x128xf32>
    %9 = arith.addf %6, %8 : vector<128x128xf32>
    %c0_7 = arith.constant 0 : index
    %c0_8 = arith.constant 0 : index
    %c0_9 = arith.constant 0 : index
    %10 = vector.load %arg5[%c0_7, %c0_8, %c0_9] : memref<1x128x128xbf16, #tpu.memory_space<vmem>>, vector<1x128x128xbf16>
    %11 = vector.shape_cast %10 : vector<1x128x128xbf16> to vector<128x128xbf16>
    %12 = arith.extf %11 : vector<128x128xbf16> to vector<128x128xf32>
    %13 = arith.addf %9, %12 : vector<128x128xf32>
    %c0_10 = arith.constant 0 : index
    %c0_11 = arith.constant 0 : index
    %14 = vector.load %arg7[%c0_10, %c0_11] : memref<128x128xf32, #tpu.memory_space<vmem>>, vector<128x128xf32>
    %cst_12 = arith.constant 3.000000e-01 : f32
    %15 = vector.broadcast %cst_12 : f32 to vector<128x128xf32>
    %16 = arith.mulf %14, %15 : vector<128x128xf32>
    %17 = arith.addf %16, %13 : vector<128x128xf32>
    %cst_13 = arith.constant 5.000000e-01 : f32
    %18 = vector.broadcast %cst_13 : f32 to vector<128x128xf32>
    %19 = arith.cmpf oge, %17, %18 : vector<128x128xf32>
    %cst_14 = arith.constant 0.000000e+00 : f32
    %20 = vector.broadcast %cst_14 : f32 to vector<128x128xf32>
    %21 = arith.select %19, %20, %17 : vector<128x128xi1>, vector<128x128xf32>
    %c0_15 = arith.constant 0 : index
    %c0_16 = arith.constant 0 : index
    %22 = vector.load %arg7[%c0_15, %c0_16] : memref<128x128xf32, #tpu.memory_space<vmem>>, vector<128x128xf32>
    tpu.vector_store %arg7[%c0_15, %c0_16], %21 {strides = array<i32>} : memref<128x128xf32, #tpu.memory_space<vmem>>, vector<128x128xf32>,
    %23 = arith.extui %19 : vector<128x128xi1> to vector<128x128xi32>
    %24 = arith.sitofp %23 : vector<128x128xi32> to vector<128x128xf32>
    %25 = arith.truncf %24 : vector<128x128xf32> to vector<128x128xbf16>
    %c0_17 = arith.constant 0 : index
    %c0_18 = arith.constant 0 : index
    %c0_19 = arith.constant 0 : index
    %26 = vector.load %arg6[%c0_17, %c0_18, %c0_19] : memref<1x128x128xbf16, #tpu.memory_space<vmem>>, vector<1x128x128xbf16>
    %27 = vector.shape_cast %26 : vector<1x128x128xbf16> to vector<128x128xbf16>
    %28 = vector.shape_cast %25 : vector<128x128xbf16> to vector<1x128x128xbf16>
    tpu.vector_store %arg6[%c0_17, %c0_18, %c0_19], %28 {strides = array<i32>} : memref<1x128x128xbf16, #tpu.memory_space<vmem>>, vector<1x128x128xbf16>,
    return
  }
  func.func @transform_0(%arg0: i32, %arg1: i32) -> (i32, i32, i32) {
    %c0_i32 = arith.constant 0 : i32
    %c0_i32_0 = arith.constant 0 : i32
    return %arg1, %arg0, %c0_i32 : i32, i32, i32
  }
  func.func @transform_1(%arg0: i32, %arg1: i32) -> (i32, i32) {
    %c0_i32 = arith.constant 0 : i32
    %c0_i32_0 = arith.constant 0 : i32
    %c0_i32_1 = arith.constant 0 : i32
    return %c0_i32, %c0_i32_0 : i32, i32
  }
  func.func @transform_2(%arg0: i32, %arg1: i32) -> (i32, i32) {
    %c0_i32 = arith.constant 0 : i32
    %c0_i32_0 = arith.constant 0 : i32
    %c0_i32_1 = arith.constant 0 : i32
    return %c0_i32, %c0_i32_0 : i32, i32
  }
  func.func @transform_3(%arg0: i32, %arg1: i32) -> (i32, i32, i32) {
    %c0_i32 = arith.constant 0 : i32
    %c0_i32_0 = arith.constant 0 : i32
    return %arg1, %arg0, %c0_i32 : i32, i32, i32
  }
  func.func @transform_4(%arg0: i32, %arg1: i32) -> (i32, i32, i32) {
    %c0_i32 = arith.constant 0 : i32
    %c0_i32_0 = arith.constant 0 : i32
    return %arg1, %arg0, %c0_i32 : i32, i32, i32
  }
}

module attributes {stable_mosaic.version = 11 : i64} {
  func.func @_gemm_bias_kernel(%arg0: i32, %arg1: memref<128x128xbf16, #tpu.memory_space<vmem>>, %arg2: memref<128x128xbf16, #tpu.memory_space<vmem>>, %arg3: memref<1x128xf32, #tpu.memory_space<vmem>>, %arg4: memref<128x128xbf16, #tpu.memory_space<vmem>>) attributes {dimension_semantics = [#tpu.dimension_semantics<parallel>], iteration_bounds = array<i64: 1>, scalar_prefetch = 0 : i64, scratch_operands = 0 : i64, tpu.core_type = #tpu.core_type<tc>, window_params = [{transform_indices = @transform_0, window_bounds = array<i64: 128, 128>}, {pipeline_mode = #tpu.pipeline_mode<synchronous>, transform_indices = @transform_1, window_bounds = array<i64: 128, 128>}, {pipeline_mode = #tpu.pipeline_mode<synchronous>, transform_indices = @transform_2, window_bounds = array<i64: 1, 128>}, {transform_indices = @transform_3, window_bounds = array<i64: 128, 128>}]} {
    %c0 = arith.constant 0 : index
    %c0_0 = arith.constant 0 : index
    %0 = vector.load %arg1[%c0, %c0_0] : memref<128x128xbf16, #tpu.memory_space<vmem>>, vector<128x128xbf16>
    %c0_1 = arith.constant 0 : index
    %c0_2 = arith.constant 0 : index
    %1 = vector.load %arg2[%c0_1, %c0_2] : memref<128x128xbf16, #tpu.memory_space<vmem>>, vector<128x128xbf16>
    %cst = arith.constant dense<0.000000e+00> : vector<128x128xf32>
    %2 = tpu.matmul %0, %1, %cst {dimension_numbers = #tpu.dot_dimension_numbers<[1], [0], [0], [1], [0, 0, 1, 1], [], []>} : vector<128x128xbf16>, vector<128x128xbf16>, vector<128x128xf32> -> vector<128x128xf32>
    %c0_3 = arith.constant 0 : index
    %c0_4 = arith.constant 0 : index
    %3 = vector.load %arg3[%c0_3, %c0_4] : memref<1x128xf32, #tpu.memory_space<vmem>>, vector<1x128xf32>
    %4 = vector.broadcast %3 : vector<1x128xf32> to vector<128x128xf32>
    %5 = arith.addf %2, %4 : vector<128x128xf32>
    %6 = arith.truncf %5 : vector<128x128xf32> to vector<128x128xbf16>
    %c0_5 = arith.constant 0 : index
    %c0_6 = arith.constant 0 : index
    %7 = vector.load %arg4[%c0_5, %c0_6] : memref<128x128xbf16, #tpu.memory_space<vmem>>, vector<128x128xbf16>
    tpu.vector_store %arg4[%c0_5, %c0_6], %6 {strides = array<i32>} : memref<128x128xbf16, #tpu.memory_space<vmem>>, vector<128x128xbf16>,
    return
  }
  func.func @transform_0(%arg0: i32) -> (i32, i32) {
    %c0_i32 = arith.constant 0 : i32
    %c0_i32_0 = arith.constant 0 : i32
    return %arg0, %c0_i32 : i32, i32
  }
  func.func @transform_1(%arg0: i32) -> (i32, i32) {
    %c0_i32 = arith.constant 0 : i32
    %c0_i32_0 = arith.constant 0 : i32
    %c0_i32_1 = arith.constant 0 : i32
    return %c0_i32, %c0_i32_0 : i32, i32
  }
  func.func @transform_2(%arg0: i32) -> (i32, i32) {
    %c0_i32 = arith.constant 0 : i32
    %c0_i32_0 = arith.constant 0 : i32
    %c0_i32_1 = arith.constant 0 : i32
    return %c0_i32, %c0_i32_0 : i32, i32
  }
  func.func @transform_3(%arg0: i32) -> (i32, i32) {
    %c0_i32 = arith.constant 0 : i32
    %c0_i32_0 = arith.constant 0 : i32
    return %arg0, %c0_i32 : i32, i32
  }
}

module attributes {stable_mosaic.version = 11 : i64} {
  func.func @kernel(%arg0: i32, %arg1: i32, %arg2: memref<1x32x1152xbf16, #tpu.memory_space<vmem>>, %arg3: memref<1152x128xbf16, #tpu.memory_space<vmem>>, %arg4: memref<1x128xf32, #tpu.memory_space<vmem>>, %arg5: memref<1x32x128xbf16, #tpu.memory_space<vmem>>, %arg6: memref<32x128xf32, #tpu.memory_space<vmem>>) attributes {dimension_semantics = [#tpu.dimension_semantics<parallel>, #tpu.dimension_semantics<arbitrary>], iteration_bounds = array<i64: 1, 4>, scalar_prefetch = 0 : i64, scratch_operands = 1 : i64, tpu.core_type = #tpu.core_type<tc>, window_params = [{transform_indices = @transform_0, window_bounds = array<i64: 1, 32, 1152>}, {pipeline_mode = #tpu.pipeline_mode<synchronous>, transform_indices = @transform_1, window_bounds = array<i64: 1152, 128>}, {pipeline_mode = #tpu.pipeline_mode<synchronous>, transform_indices = @transform_2, window_bounds = array<i64: 1, 128>}, {transform_indices = @transform_3, window_bounds = array<i64: 1, 32, 128>}]} {
    %c0_i32 = arith.constant 0 : i32
    %0 = arith.cmpi eq, %arg1, %c0_i32 : i32
    %1 = arith.extui %0 : i1 to i32
    %c0_i32_0 = arith.constant 0 : i32
    %2 = arith.cmpi ne, %1, %c0_i32_0 : i32
    scf.if %2 {
      %cst_17 = arith.constant 0.000000e+00 : f32
      %25 = vector.broadcast %cst_17 : f32 to vector<32x128xf32>
      %c0_18 = arith.constant 0 : index
      %c0_19 = arith.constant 0 : index
      %26 = vector.load %arg6[%c0_18, %c0_19] : memref<32x128xf32, #tpu.memory_space<vmem>>, vector<32x128xf32>
      tpu.vector_store %arg6[%c0_18, %c0_19], %25 {strides = array<i32>} : memref<32x128xf32, #tpu.memory_space<vmem>>, vector<32x128xf32>,
    } else {
    }
    %c0 = arith.constant 0 : index
    %c0_1 = arith.constant 0 : index
    %c0_2 = arith.constant 0 : index
    %3 = vector.load %arg2[%c0, %c0_1, %c0_2] : memref<1x32x1152xbf16, #tpu.memory_space<vmem>>, vector<1x32x1152xbf16>
    %4 = vector.shape_cast %3 : vector<1x32x1152xbf16> to vector<32x1152xbf16>
    %c0_3 = arith.constant 0 : index
    %c0_4 = arith.constant 0 : index
    %5 = vector.load %arg3[%c0_3, %c0_4] : memref<1152x128xbf16, #tpu.memory_space<vmem>>, vector<1152x128xbf16>
    %cst = arith.constant dense<0.000000e+00> : vector<32x128xf32>
    %6 = tpu.matmul %4, %5, %cst {dimension_numbers = #tpu.dot_dimension_numbers<[1], [0], [0], [1], [0, 0, 1, 1], [], []>} : vector<32x1152xbf16>, vector<1152x128xbf16>, vector<32x128xf32> -> vector<32x128xf32>
    %c0_5 = arith.constant 0 : index
    %c0_6 = arith.constant 0 : index
    %7 = vector.load %arg4[%c0_5, %c0_6] : memref<1x128xf32, #tpu.memory_space<vmem>>, vector<1x128xf32>
    %8 = vector.broadcast %7 : vector<1x128xf32> to vector<32x128xf32>
    %9 = arith.addf %6, %8 : vector<32x128xf32>
    %c0_7 = arith.constant 0 : index
    %c0_8 = arith.constant 0 : index
    %10 = vector.load %arg6[%c0_7, %c0_8] : memref<32x128xf32, #tpu.memory_space<vmem>>, vector<32x128xf32>
    %cst_9 = arith.constant 3.000000e-01 : f32
    %11 = vector.broadcast %cst_9 : f32 to vector<32x128xf32>
    %12 = arith.mulf %10, %11 : vector<32x128xf32>
    %13 = arith.addf %12, %9 : vector<32x128xf32>
    %cst_10 = arith.constant 5.000000e-01 : f32
    %14 = vector.broadcast %cst_10 : f32 to vector<32x128xf32>
    %15 = arith.cmpf oge, %13, %14 : vector<32x128xf32>
    %cst_11 = arith.constant 0.000000e+00 : f32
    %16 = vector.broadcast %cst_11 : f32 to vector<32x128xf32>
    %17 = arith.select %15, %16, %13 : vector<32x128xi1>, vector<32x128xf32>
    %c0_12 = arith.constant 0 : index
    %c0_13 = arith.constant 0 : index
    %18 = vector.load %arg6[%c0_12, %c0_13] : memref<32x128xf32, #tpu.memory_space<vmem>>, vector<32x128xf32>
    tpu.vector_store %arg6[%c0_12, %c0_13], %17 {strides = array<i32>} : memref<32x128xf32, #tpu.memory_space<vmem>>, vector<32x128xf32>,
    %19 = arith.extui %15 : vector<32x128xi1> to vector<32x128xi32>
    %20 = arith.sitofp %19 : vector<32x128xi32> to vector<32x128xf32>
    %21 = arith.truncf %20 : vector<32x128xf32> to vector<32x128xbf16>
    %c0_14 = arith.constant 0 : index
    %c0_15 = arith.constant 0 : index
    %c0_16 = arith.constant 0 : index
    %22 = vector.load %arg5[%c0_14, %c0_15, %c0_16] : memref<1x32x128xbf16, #tpu.memory_space<vmem>>, vector<1x32x128xbf16>
    %23 = vector.shape_cast %22 : vector<1x32x128xbf16> to vector<32x128xbf16>
    %24 = vector.shape_cast %21 : vector<32x128xbf16> to vector<1x32x128xbf16>
    tpu.vector_store %arg5[%c0_14, %c0_15, %c0_16], %24 {strides = array<i32>} : memref<1x32x128xbf16, #tpu.memory_space<vmem>>, vector<1x32x128xbf16>,
    return
  }
  func.func @transform_0(%arg0: i32, %arg1: i32) -> (i32, i32, i32) {
    %c0_i32 = arith.constant 0 : i32
    %c0_i32_0 = arith.constant 0 : i32
    return %arg1, %arg0, %c0_i32 : i32, i32, i32
  }
  func.func @transform_1(%arg0: i32, %arg1: i32) -> (i32, i32) {
    %c0_i32 = arith.constant 0 : i32
    %c0_i32_0 = arith.constant 0 : i32
    %c0_i32_1 = arith.constant 0 : i32
    return %c0_i32, %c0_i32_0 : i32, i32
  }
  func.func @transform_2(%arg0: i32, %arg1: i32) -> (i32, i32) {
    %c0_i32 = arith.constant 0 : i32
    %c0_i32_0 = arith.constant 0 : i32
    %c0_i32_1 = arith.constant 0 : i32
    return %c0_i32, %c0_i32_0 : i32, i32
  }
  func.func @transform_3(%arg0: i32, %arg1: i32) -> (i32, i32, i32) {
    %c0_i32 = arith.constant 0 : i32
    %c0_i32_0 = arith.constant 0 : i32
    return %arg1, %arg0, %c0_i32 : i32, i32, i32
  }
}

module attributes {stable_mosaic.version = 11 : i64} {
  func.func @kernel(%arg0: i32, %arg1: i32, %arg2: memref<1x32x128xbf16, #tpu.memory_space<vmem>>, %arg3: memref<128x128xbf16, #tpu.memory_space<vmem>>, %arg4: memref<1x128xf32, #tpu.memory_space<vmem>>, %arg5: memref<1x32x128xbf16, #tpu.memory_space<vmem>>, %arg6: memref<1x32x128xbf16, #tpu.memory_space<vmem>>, %arg7: memref<32x128xf32, #tpu.memory_space<vmem>>) attributes {dimension_semantics = [#tpu.dimension_semantics<parallel>, #tpu.dimension_semantics<arbitrary>], iteration_bounds = array<i64: 1, 4>, scalar_prefetch = 0 : i64, scratch_operands = 1 : i64, tpu.core_type = #tpu.core_type<tc>, window_params = [{transform_indices = @transform_0, window_bounds = array<i64: 1, 32, 128>}, {pipeline_mode = #tpu.pipeline_mode<synchronous>, transform_indices = @transform_1, window_bounds = array<i64: 128, 128>}, {pipeline_mode = #tpu.pipeline_mode<synchronous>, transform_indices = @transform_2, window_bounds = array<i64: 1, 128>}, {transform_indices = @transform_3, window_bounds = array<i64: 1, 32, 128>}, {transform_indices = @transform_4, window_bounds = array<i64: 1, 32, 128>}]} {
    %c0_i32 = arith.constant 0 : i32
    %0 = arith.cmpi eq, %arg1, %c0_i32 : i32
    %1 = arith.extui %0 : i1 to i32
    %c0_i32_0 = arith.constant 0 : i32
    %2 = arith.cmpi ne, %1, %c0_i32_0 : i32
    scf.if %2 {
      %cst_20 = arith.constant 0.000000e+00 : f32
      %29 = vector.broadcast %cst_20 : f32 to vector<32x128xf32>
      %c0_21 = arith.constant 0 : index
      %c0_22 = arith.constant 0 : index
      %30 = vector.load %arg7[%c0_21, %c0_22] : memref<32x128xf32, #tpu.memory_space<vmem>>, vector<32x128xf32>
      tpu.vector_store %arg7[%c0_21, %c0_22], %29 {strides = array<i32>} : memref<32x128xf32, #tpu.memory_space<vmem>>, vector<32x128xf32>,
    } else {
    }
    %c0 = arith.constant 0 : index
    %c0_1 = arith.constant 0 : index
    %c0_2 = arith.constant 0 : index
    %3 = vector.load %arg2[%c0, %c0_1, %c0_2] : memref<1x32x128xbf16, #tpu.memory_space<vmem>>, vector<1x32x128xbf16>
    %4 = vector.shape_cast %3 : vector<1x32x128xbf16> to vector<32x128xbf16>
    %c0_3 = arith.constant 0 : index
    %c0_4 = arith.constant 0 : index
    %5 = vector.load %arg3[%c0_3, %c0_4] : memref<128x128xbf16, #tpu.memory_space<vmem>>, vector<128x128xbf16>
    %cst = arith.constant dense<0.000000e+00> : vector<32x128xf32>
    %6 = tpu.matmul %4, %5, %cst {dimension_numbers = #tpu.dot_dimension_numbers<[1], [0], [0], [1], [0, 0, 1, 1], [], []>} : vector<32x128xbf16>, vector<128x128xbf16>, vector<32x128xf32> -> vector<32x128xf32>
    %c0_5 = arith.constant 0 : index
    %c0_6 = arith.constant 0 : index
    %7 = vector.load %arg4[%c0_5, %c0_6] : memref<1x128xf32, #tpu.memory_space<vmem>>, vector<1x128xf32>
    %8 = vector.broadcast %7 : vector<1x128xf32> to vector<32x128xf32>
    %9 = arith.addf %6, %8 : vector<32x128xf32>
    %c0_7 = arith.constant 0 : index
    %c0_8 = arith.constant 0 : index
    %c0_9 = arith.constant 0 : index
    %10 = vector.load %arg5[%c0_7, %c0_8, %c0_9] : memref<1x32x128xbf16, #tpu.memory_space<vmem>>, vector<1x32x128xbf16>
    %11 = vector.shape_cast %10 : vector<1x32x128xbf16> to vector<32x128xbf16>
    %12 = arith.extf %11 : vector<32x128xbf16> to vector<32x128xf32>
    %13 = arith.addf %9, %12 : vector<32x128xf32>
    %c0_10 = arith.constant 0 : index
    %c0_11 = arith.constant 0 : index
    %14 = vector.load %arg7[%c0_10, %c0_11] : memref<32x128xf32, #tpu.memory_space<vmem>>, vector<32x128xf32>
    %cst_12 = arith.constant 3.000000e-01 : f32
    %15 = vector.broadcast %cst_12 : f32 to vector<32x128xf32>
    %16 = arith.mulf %14, %15 : vector<32x128xf32>
    %17 = arith.addf %16, %13 : vector<32x128xf32>
    %cst_13 = arith.constant 5.000000e-01 : f32
    %18 = vector.broadcast %cst_13 : f32 to vector<32x128xf32>
    %19 = arith.cmpf oge, %17, %18 : vector<32x128xf32>
    %cst_14 = arith.constant 0.000000e+00 : f32
    %20 = vector.broadcast %cst_14 : f32 to vector<32x128xf32>
    %21 = arith.select %19, %20, %17 : vector<32x128xi1>, vector<32x128xf32>
    %c0_15 = arith.constant 0 : index
    %c0_16 = arith.constant 0 : index
    %22 = vector.load %arg7[%c0_15, %c0_16] : memref<32x128xf32, #tpu.memory_space<vmem>>, vector<32x128xf32>
    tpu.vector_store %arg7[%c0_15, %c0_16], %21 {strides = array<i32>} : memref<32x128xf32, #tpu.memory_space<vmem>>, vector<32x128xf32>,
    %23 = arith.extui %19 : vector<32x128xi1> to vector<32x128xi32>
    %24 = arith.sitofp %23 : vector<32x128xi32> to vector<32x128xf32>
    %25 = arith.truncf %24 : vector<32x128xf32> to vector<32x128xbf16>
    %c0_17 = arith.constant 0 : index
    %c0_18 = arith.constant 0 : index
    %c0_19 = arith.constant 0 : index
    %26 = vector.load %arg6[%c0_17, %c0_18, %c0_19] : memref<1x32x128xbf16, #tpu.memory_space<vmem>>, vector<1x32x128xbf16>
    %27 = vector.shape_cast %26 : vector<1x32x128xbf16> to vector<32x128xbf16>
    %28 = vector.shape_cast %25 : vector<32x128xbf16> to vector<1x32x128xbf16>
    tpu.vector_store %arg6[%c0_17, %c0_18, %c0_19], %28 {strides = array<i32>} : memref<1x32x128xbf16, #tpu.memory_space<vmem>>, vector<1x32x128xbf16>,
    return
  }
  func.func @transform_0(%arg0: i32, %arg1: i32) -> (i32, i32, i32) {
    %c0_i32 = arith.constant 0 : i32
    %c0_i32_0 = arith.constant 0 : i32
    return %arg1, %arg0, %c0_i32 : i32, i32, i32
  }
  func.func @transform_1(%arg0: i32, %arg1: i32) -> (i32, i32) {
    %c0_i32 = arith.constant 0 : i32
    %c0_i32_0 = arith.constant 0 : i32
    %c0_i32_1 = arith.constant 0 : i32
    return %c0_i32, %c0_i32_0 : i32, i32
  }
  func.func @transform_2(%arg0: i32, %arg1: i32) -> (i32, i32) {
    %c0_i32 = arith.constant 0 : i32
    %c0_i32_0 = arith.constant 0 : i32
    %c0_i32_1 = arith.constant 0 : i32
    return %c0_i32, %c0_i32_0 : i32, i32
  }
  func.func @transform_3(%arg0: i32, %arg1: i32) -> (i32, i32, i32) {
    %c0_i32 = arith.constant 0 : i32
    %c0_i32_0 = arith.constant 0 : i32
    return %arg1, %arg0, %c0_i32 : i32, i32, i32
  }
  func.func @transform_4(%arg0: i32, %arg1: i32) -> (i32, i32, i32) {
    %c0_i32 = arith.constant 0 : i32
    %c0_i32_0 = arith.constant 0 : i32
    return %arg1, %arg0, %c0_i32 : i32, i32, i32
  }
}

module attributes {stable_mosaic.version = 11 : i64} {
  func.func @kernel(%arg0: i32, %arg1: i32, %arg2: memref<1x32x128xbf16, #tpu.memory_space<vmem>>, %arg3: memref<128x128xbf16, #tpu.memory_space<vmem>>, %arg4: memref<1x128xf32, #tpu.memory_space<vmem>>, %arg5: memref<1x32x128xbf16, #tpu.memory_space<vmem>>, %arg6: memref<32x128xf32, #tpu.memory_space<vmem>>) attributes {dimension_semantics = [#tpu.dimension_semantics<parallel>, #tpu.dimension_semantics<arbitrary>], iteration_bounds = array<i64: 1, 4>, scalar_prefetch = 0 : i64, scratch_operands = 1 : i64, tpu.core_type = #tpu.core_type<tc>, window_params = [{transform_indices = @transform_0, window_bounds = array<i64: 1, 32, 128>}, {pipeline_mode = #tpu.pipeline_mode<synchronous>, transform_indices = @transform_1, window_bounds = array<i64: 128, 128>}, {pipeline_mode = #tpu.pipeline_mode<synchronous>, transform_indices = @transform_2, window_bounds = array<i64: 1, 128>}, {transform_indices = @transform_3, window_bounds = array<i64: 1, 32, 128>}]} {
    %c0_i32 = arith.constant 0 : i32
    %0 = arith.cmpi eq, %arg1, %c0_i32 : i32
    %1 = arith.extui %0 : i1 to i32
    %c0_i32_0 = arith.constant 0 : i32
    %2 = arith.cmpi ne, %1, %c0_i32_0 : i32
    scf.if %2 {
      %cst_17 = arith.constant 0.000000e+00 : f32
      %25 = vector.broadcast %cst_17 : f32 to vector<32x128xf32>
      %c0_18 = arith.constant 0 : index
      %c0_19 = arith.constant 0 : index
      %26 = vector.load %arg6[%c0_18, %c0_19] : memref<32x128xf32, #tpu.memory_space<vmem>>, vector<32x128xf32>
      tpu.vector_store %arg6[%c0_18, %c0_19], %25 {strides = array<i32>} : memref<32x128xf32, #tpu.memory_space<vmem>>, vector<32x128xf32>,
    } else {
    }
    %c0 = arith.constant 0 : index
    %c0_1 = arith.constant 0 : index
    %c0_2 = arith.constant 0 : index
    %3 = vector.load %arg2[%c0, %c0_1, %c0_2] : memref<1x32x128xbf16, #tpu.memory_space<vmem>>, vector<1x32x128xbf16>
    %4 = vector.shape_cast %3 : vector<1x32x128xbf16> to vector<32x128xbf16>
    %c0_3 = arith.constant 0 : index
    %c0_4 = arith.constant 0 : index
    %5 = vector.load %arg3[%c0_3, %c0_4] : memref<128x128xbf16, #tpu.memory_space<vmem>>, vector<128x128xbf16>
    %cst = arith.constant dense<0.000000e+00> : vector<32x128xf32>
    %6 = tpu.matmul %4, %5, %cst {dimension_numbers = #tpu.dot_dimension_numbers<[1], [0], [0], [1], [0, 0, 1, 1], [], []>} : vector<32x128xbf16>, vector<128x128xbf16>, vector<32x128xf32> -> vector<32x128xf32>
    %c0_5 = arith.constant 0 : index
    %c0_6 = arith.constant 0 : index
    %7 = vector.load %arg4[%c0_5, %c0_6] : memref<1x128xf32, #tpu.memory_space<vmem>>, vector<1x128xf32>
    %8 = vector.broadcast %7 : vector<1x128xf32> to vector<32x128xf32>
    %9 = arith.addf %6, %8 : vector<32x128xf32>
    %c0_7 = arith.constant 0 : index
    %c0_8 = arith.constant 0 : index
    %10 = vector.load %arg6[%c0_7, %c0_8] : memref<32x128xf32, #tpu.memory_space<vmem>>, vector<32x128xf32>
    %cst_9 = arith.constant 3.000000e-01 : f32
    %11 = vector.broadcast %cst_9 : f32 to vector<32x128xf32>
    %12 = arith.mulf %10, %11 : vector<32x128xf32>
    %13 = arith.addf %12, %9 : vector<32x128xf32>
    %cst_10 = arith.constant 5.000000e-01 : f32
    %14 = vector.broadcast %cst_10 : f32 to vector<32x128xf32>
    %15 = arith.cmpf oge, %13, %14 : vector<32x128xf32>
    %cst_11 = arith.constant 0.000000e+00 : f32
    %16 = vector.broadcast %cst_11 : f32 to vector<32x128xf32>
    %17 = arith.select %15, %16, %13 : vector<32x128xi1>, vector<32x128xf32>
    %c0_12 = arith.constant 0 : index
    %c0_13 = arith.constant 0 : index
    %18 = vector.load %arg6[%c0_12, %c0_13] : memref<32x128xf32, #tpu.memory_space<vmem>>, vector<32x128xf32>
    tpu.vector_store %arg6[%c0_12, %c0_13], %17 {strides = array<i32>} : memref<32x128xf32, #tpu.memory_space<vmem>>, vector<32x128xf32>,
    %19 = arith.extui %15 : vector<32x128xi1> to vector<32x128xi32>
    %20 = arith.sitofp %19 : vector<32x128xi32> to vector<32x128xf32>
    %21 = arith.truncf %20 : vector<32x128xf32> to vector<32x128xbf16>
    %c0_14 = arith.constant 0 : index
    %c0_15 = arith.constant 0 : index
    %c0_16 = arith.constant 0 : index
    %22 = vector.load %arg5[%c0_14, %c0_15, %c0_16] : memref<1x32x128xbf16, #tpu.memory_space<vmem>>, vector<1x32x128xbf16>
    %23 = vector.shape_cast %22 : vector<1x32x128xbf16> to vector<32x128xbf16>
    %24 = vector.shape_cast %21 : vector<32x128xbf16> to vector<1x32x128xbf16>
    tpu.vector_store %arg5[%c0_14, %c0_15, %c0_16], %24 {strides = array<i32>} : memref<1x32x128xbf16, #tpu.memory_space<vmem>>, vector<1x32x128xbf16>,
    return
  }
  func.func @transform_0(%arg0: i32, %arg1: i32) -> (i32, i32, i32) {
    %c0_i32 = arith.constant 0 : i32
    %c0_i32_0 = arith.constant 0 : i32
    return %arg1, %arg0, %c0_i32 : i32, i32, i32
  }
  func.func @transform_1(%arg0: i32, %arg1: i32) -> (i32, i32) {
    %c0_i32 = arith.constant 0 : i32
    %c0_i32_0 = arith.constant 0 : i32
    %c0_i32_1 = arith.constant 0 : i32
    return %c0_i32, %c0_i32_0 : i32, i32
  }
  func.func @transform_2(%arg0: i32, %arg1: i32) -> (i32, i32) {
    %c0_i32 = arith.constant 0 : i32
    %c0_i32_0 = arith.constant 0 : i32
    %c0_i32_1 = arith.constant 0 : i32
    return %c0_i32, %c0_i32_0 : i32, i32
  }
  func.func @transform_3(%arg0: i32, %arg1: i32) -> (i32, i32, i32) {
    %c0_i32 = arith.constant 0 : i32
    %c0_i32_0 = arith.constant 0 : i32
    return %arg1, %arg0, %c0_i32 : i32, i32, i32
  }
}

module attributes {stable_mosaic.version = 11 : i64} {
  func.func @_gemm_bias_kernel(%arg0: i32, %arg1: memref<32x128xbf16, #tpu.memory_space<vmem>>, %arg2: memref<128x128xbf16, #tpu.memory_space<vmem>>, %arg3: memref<1x128xf32, #tpu.memory_space<vmem>>, %arg4: memref<32x128xbf16, #tpu.memory_space<vmem>>) attributes {dimension_semantics = [#tpu.dimension_semantics<parallel>], iteration_bounds = array<i64: 1>, scalar_prefetch = 0 : i64, scratch_operands = 0 : i64, tpu.core_type = #tpu.core_type<tc>, window_params = [{transform_indices = @transform_0, window_bounds = array<i64: 32, 128>}, {pipeline_mode = #tpu.pipeline_mode<synchronous>, transform_indices = @transform_1, window_bounds = array<i64: 128, 128>}, {pipeline_mode = #tpu.pipeline_mode<synchronous>, transform_indices = @transform_2, window_bounds = array<i64: 1, 128>}, {transform_indices = @transform_3, window_bounds = array<i64: 32, 128>}]} {
    %c0 = arith.constant 0 : index
    %c0_0 = arith.constant 0 : index
    %0 = vector.load %arg1[%c0, %c0_0] : memref<32x128xbf16, #tpu.memory_space<vmem>>, vector<32x128xbf16>
    %c0_1 = arith.constant 0 : index
    %c0_2 = arith.constant 0 : index
    %1 = vector.load %arg2[%c0_1, %c0_2] : memref<128x128xbf16, #tpu.memory_space<vmem>>, vector<128x128xbf16>
    %cst = arith.constant dense<0.000000e+00> : vector<32x128xf32>
    %2 = tpu.matmul %0, %1, %cst {dimension_numbers = #tpu.dot_dimension_numbers<[1], [0], [0], [1], [0, 0, 1, 1], [], []>} : vector<32x128xbf16>, vector<128x128xbf16>, vector<32x128xf32> -> vector<32x128xf32>
    %c0_3 = arith.constant 0 : index
    %c0_4 = arith.constant 0 : index
    %3 = vector.load %arg3[%c0_3, %c0_4] : memref<1x128xf32, #tpu.memory_space<vmem>>, vector<1x128xf32>
    %4 = vector.broadcast %3 : vector<1x128xf32> to vector<32x128xf32>
    %5 = arith.addf %2, %4 : vector<32x128xf32>
    %6 = arith.truncf %5 : vector<32x128xf32> to vector<32x128xbf16>
    %c0_5 = arith.constant 0 : index
    %c0_6 = arith.constant 0 : index
    %7 = vector.load %arg4[%c0_5, %c0_6] : memref<32x128xbf16, #tpu.memory_space<vmem>>, vector<32x128xbf16>
    tpu.vector_store %arg4[%c0_5, %c0_6], %6 {strides = array<i32>} : memref<32x128xbf16, #tpu.memory_space<vmem>>, vector<32x128xbf16>,
    return
  }
  func.func @transform_0(%arg0: i32) -> (i32, i32) {
    %c0_i32 = arith.constant 0 : i32
    %c0_i32_0 = arith.constant 0 : i32
    return %arg0, %c0_i32 : i32, i32
  }
  func.func @transform_1(%arg0: i32) -> (i32, i32) {
    %c0_i32 = arith.constant 0 : i32
    %c0_i32_0 = arith.constant 0 : i32
    %c0_i32_1 = arith.constant 0 : i32
    return %c0_i32, %c0_i32_0 : i32, i32
  }
  func.func @transform_2(%arg0: i32) -> (i32, i32) {
    %c0_i32 = arith.constant 0 : i32
    %c0_i32_0 = arith.constant 0 : i32
    %c0_i32_1 = arith.constant 0 : i32
    return %c0_i32, %c0_i32_0 : i32, i32
  }
  func.func @transform_3(%arg0: i32) -> (i32, i32) {
    %c0_i32 = arith.constant 0 : i32
    %c0_i32_0 = arith.constant 0 : i32
    return %arg0, %c0_i32 : i32, i32
  }
}

module attributes {stable_mosaic.version = 11 : i64} {
  func.func @kernel(%arg0: i32, %arg1: i32, %arg2: memref<1x8x128xbf16, #tpu.memory_space<vmem>>, %arg3: memref<128x128xbf16, #tpu.memory_space<vmem>>, %arg4: memref<1x128xf32, #tpu.memory_space<vmem>>, %arg5: memref<1x8x128xbf16, #tpu.memory_space<vmem>>, %arg6: memref<8x128xf32, #tpu.memory_space<vmem>>) attributes {dimension_semantics = [#tpu.dimension_semantics<parallel>, #tpu.dimension_semantics<arbitrary>], iteration_bounds = array<i64: 1, 4>, scalar_prefetch = 0 : i64, scratch_operands = 1 : i64, tpu.core_type = #tpu.core_type<tc>, window_params = [{transform_indices = @transform_0, window_bounds = array<i64: 1, 8, 128>}, {pipeline_mode = #tpu.pipeline_mode<synchronous>, transform_indices = @transform_1, window_bounds = array<i64: 128, 128>}, {pipeline_mode = #tpu.pipeline_mode<synchronous>, transform_indices = @transform_2, window_bounds = array<i64: 1, 128>}, {transform_indices = @transform_3, window_bounds = array<i64: 1, 8, 128>}]} {
    %c0_i32 = arith.constant 0 : i32
    %0 = arith.cmpi eq, %arg1, %c0_i32 : i32
    %1 = arith.extui %0 : i1 to i32
    %c0_i32_0 = arith.constant 0 : i32
    %2 = arith.cmpi ne, %1, %c0_i32_0 : i32
    scf.if %2 {
      %cst_17 = arith.constant 0.000000e+00 : f32
      %25 = vector.broadcast %cst_17 : f32 to vector<8x128xf32>
      %c0_18 = arith.constant 0 : index
      %c0_19 = arith.constant 0 : index
      %26 = vector.load %arg6[%c0_18, %c0_19] : memref<8x128xf32, #tpu.memory_space<vmem>>, vector<8x128xf32>
      tpu.vector_store %arg6[%c0_18, %c0_19], %25 {strides = array<i32>} : memref<8x128xf32, #tpu.memory_space<vmem>>, vector<8x128xf32>,
    } else {
    }
    %c0 = arith.constant 0 : index
    %c0_1 = arith.constant 0 : index
    %c0_2 = arith.constant 0 : index
    %3 = vector.load %arg2[%c0, %c0_1, %c0_2] : memref<1x8x128xbf16, #tpu.memory_space<vmem>>, vector<1x8x128xbf16>
    %4 = vector.shape_cast %3 : vector<1x8x128xbf16> to vector<8x128xbf16>
    %c0_3 = arith.constant 0 : index
    %c0_4 = arith.constant 0 : index
    %5 = vector.load %arg3[%c0_3, %c0_4] : memref<128x128xbf16, #tpu.memory_space<vmem>>, vector<128x128xbf16>
    %cst = arith.constant dense<0.000000e+00> : vector<8x128xf32>
    %6 = tpu.matmul %4, %5, %cst {dimension_numbers = #tpu.dot_dimension_numbers<[1], [0], [0], [1], [0, 0, 1, 1], [], []>} : vector<8x128xbf16>, vector<128x128xbf16>, vector<8x128xf32> -> vector<8x128xf32>
    %c0_5 = arith.constant 0 : index
    %c0_6 = arith.constant 0 : index
    %7 = vector.load %arg4[%c0_5, %c0_6] : memref<1x128xf32, #tpu.memory_space<vmem>>, vector<1x128xf32>
    %8 = vector.broadcast %7 : vector<1x128xf32> to vector<8x128xf32>
    %9 = arith.addf %6, %8 : vector<8x128xf32>
    %c0_7 = arith.constant 0 : index
    %c0_8 = arith.constant 0 : index
    %10 = vector.load %arg6[%c0_7, %c0_8] : memref<8x128xf32, #tpu.memory_space<vmem>>, vector<8x128xf32>
    %cst_9 = arith.constant 3.000000e-01 : f32
    %11 = vector.broadcast %cst_9 : f32 to vector<8x128xf32>
    %12 = arith.mulf %10, %11 : vector<8x128xf32>
    %13 = arith.addf %12, %9 : vector<8x128xf32>
    %cst_10 = arith.constant 5.000000e-01 : f32
    %14 = vector.broadcast %cst_10 : f32 to vector<8x128xf32>
    %15 = arith.cmpf oge, %13, %14 : vector<8x128xf32>
    %cst_11 = arith.constant 0.000000e+00 : f32
    %16 = vector.broadcast %cst_11 : f32 to vector<8x128xf32>
    %17 = arith.select %15, %16, %13 : vector<8x128xi1>, vector<8x128xf32>
    %c0_12 = arith.constant 0 : index
    %c0_13 = arith.constant 0 : index
    %18 = vector.load %arg6[%c0_12, %c0_13] : memref<8x128xf32, #tpu.memory_space<vmem>>, vector<8x128xf32>
    tpu.vector_store %arg6[%c0_12, %c0_13], %17 {strides = array<i32>} : memref<8x128xf32, #tpu.memory_space<vmem>>, vector<8x128xf32>,
    %19 = arith.extui %15 : vector<8x128xi1> to vector<8x128xi32>
    %20 = arith.sitofp %19 : vector<8x128xi32> to vector<8x128xf32>
    %21 = arith.truncf %20 : vector<8x128xf32> to vector<8x128xbf16>
    %c0_14 = arith.constant 0 : index
    %c0_15 = arith.constant 0 : index
    %c0_16 = arith.constant 0 : index
    %22 = vector.load %arg5[%c0_14, %c0_15, %c0_16] : memref<1x8x128xbf16, #tpu.memory_space<vmem>>, vector<1x8x128xbf16>
    %23 = vector.shape_cast %22 : vector<1x8x128xbf16> to vector<8x128xbf16>
    %24 = vector.shape_cast %21 : vector<8x128xbf16> to vector<1x8x128xbf16>
    tpu.vector_store %arg5[%c0_14, %c0_15, %c0_16], %24 {strides = array<i32>} : memref<1x8x128xbf16, #tpu.memory_space<vmem>>, vector<1x8x128xbf16>,
    return
  }
  func.func @transform_0(%arg0: i32, %arg1: i32) -> (i32, i32, i32) {
    %c0_i32 = arith.constant 0 : i32
    %c0_i32_0 = arith.constant 0 : i32
    return %arg1, %arg0, %c0_i32 : i32, i32, i32
  }
  func.func @transform_1(%arg0: i32, %arg1: i32) -> (i32, i32) {
    %c0_i32 = arith.constant 0 : i32
    %c0_i32_0 = arith.constant 0 : i32
    %c0_i32_1 = arith.constant 0 : i32
    return %c0_i32, %c0_i32_0 : i32, i32
  }
  func.func @transform_2(%arg0: i32, %arg1: i32) -> (i32, i32) {
    %c0_i32 = arith.constant 0 : i32
    %c0_i32_0 = arith.constant 0 : i32
    %c0_i32_1 = arith.constant 0 : i32
    return %c0_i32, %c0_i32_0 : i32, i32
  }
  func.func @transform_3(%arg0: i32, %arg1: i32) -> (i32, i32, i32) {
    %c0_i32 = arith.constant 0 : i32
    %c0_i32_0 = arith.constant 0 : i32
    return %arg1, %arg0, %c0_i32 : i32, i32, i32
  }
}

module attributes {stable_mosaic.version = 11 : i64} {
  func.func @kernel(%arg0: i32, %arg1: i32, %arg2: memref<1x8x1152xbf16, #tpu.memory_space<vmem>>, %arg3: memref<1152x128xbf16, #tpu.memory_space<vmem>>, %arg4: memref<1x128xf32, #tpu.memory_space<vmem>>, %arg5: memref<1x8x128xbf16, #tpu.memory_space<vmem>>, %arg6: memref<8x128xf32, #tpu.memory_space<vmem>>) attributes {dimension_semantics = [#tpu.dimension_semantics<parallel>, #tpu.dimension_semantics<arbitrary>], iteration_bounds = array<i64: 1, 4>, scalar_prefetch = 0 : i64, scratch_operands = 1 : i64, tpu.core_type = #tpu.core_type<tc>, window_params = [{transform_indices = @transform_0, window_bounds = array<i64: 1, 8, 1152>}, {pipeline_mode = #tpu.pipeline_mode<synchronous>, transform_indices = @transform_1, window_bounds = array<i64: 1152, 128>}, {pipeline_mode = #tpu.pipeline_mode<synchronous>, transform_indices = @transform_2, window_bounds = array<i64: 1, 128>}, {transform_indices = @transform_3, window_bounds = array<i64: 1, 8, 128>}]} {
    %c0_i32 = arith.constant 0 : i32
    %0 = arith.cmpi eq, %arg1, %c0_i32 : i32
    %1 = arith.extui %0 : i1 to i32
    %c0_i32_0 = arith.constant 0 : i32
    %2 = arith.cmpi ne, %1, %c0_i32_0 : i32
    scf.if %2 {
      %cst_17 = arith.constant 0.000000e+00 : f32
      %25 = vector.broadcast %cst_17 : f32 to vector<8x128xf32>
      %c0_18 = arith.constant 0 : index
      %c0_19 = arith.constant 0 : index
      %26 = vector.load %arg6[%c0_18, %c0_19] : memref<8x128xf32, #tpu.memory_space<vmem>>, vector<8x128xf32>
      tpu.vector_store %arg6[%c0_18, %c0_19], %25 {strides = array<i32>} : memref<8x128xf32, #tpu.memory_space<vmem>>, vector<8x128xf32>,
    } else {
    }
    %c0 = arith.constant 0 : index
    %c0_1 = arith.constant 0 : index
    %c0_2 = arith.constant 0 : index
    %3 = vector.load %arg2[%c0, %c0_1, %c0_2] : memref<1x8x1152xbf16, #tpu.memory_space<vmem>>, vector<1x8x1152xbf16>
    %4 = vector.shape_cast %3 : vector<1x8x1152xbf16> to vector<8x1152xbf16>
    %c0_3 = arith.constant 0 : index
    %c0_4 = arith.constant 0 : index
    %5 = vector.load %arg3[%c0_3, %c0_4] : memref<1152x128xbf16, #tpu.memory_space<vmem>>, vector<1152x128xbf16>
    %cst = arith.constant dense<0.000000e+00> : vector<8x128xf32>
    %6 = tpu.matmul %4, %5, %cst {dimension_numbers = #tpu.dot_dimension_numbers<[1], [0], [0], [1], [0, 0, 1, 1], [], []>} : vector<8x1152xbf16>, vector<1152x128xbf16>, vector<8x128xf32> -> vector<8x128xf32>
    %c0_5 = arith.constant 0 : index
    %c0_6 = arith.constant 0 : index
    %7 = vector.load %arg4[%c0_5, %c0_6] : memref<1x128xf32, #tpu.memory_space<vmem>>, vector<1x128xf32>
    %8 = vector.broadcast %7 : vector<1x128xf32> to vector<8x128xf32>
    %9 = arith.addf %6, %8 : vector<8x128xf32>
    %c0_7 = arith.constant 0 : index
    %c0_8 = arith.constant 0 : index
    %10 = vector.load %arg6[%c0_7, %c0_8] : memref<8x128xf32, #tpu.memory_space<vmem>>, vector<8x128xf32>
    %cst_9 = arith.constant 3.000000e-01 : f32
    %11 = vector.broadcast %cst_9 : f32 to vector<8x128xf32>
    %12 = arith.mulf %10, %11 : vector<8x128xf32>
    %13 = arith.addf %12, %9 : vector<8x128xf32>
    %cst_10 = arith.constant 5.000000e-01 : f32
    %14 = vector.broadcast %cst_10 : f32 to vector<8x128xf32>
    %15 = arith.cmpf oge, %13, %14 : vector<8x128xf32>
    %cst_11 = arith.constant 0.000000e+00 : f32
    %16 = vector.broadcast %cst_11 : f32 to vector<8x128xf32>
    %17 = arith.select %15, %16, %13 : vector<8x128xi1>, vector<8x128xf32>
    %c0_12 = arith.constant 0 : index
    %c0_13 = arith.constant 0 : index
    %18 = vector.load %arg6[%c0_12, %c0_13] : memref<8x128xf32, #tpu.memory_space<vmem>>, vector<8x128xf32>
    tpu.vector_store %arg6[%c0_12, %c0_13], %17 {strides = array<i32>} : memref<8x128xf32, #tpu.memory_space<vmem>>, vector<8x128xf32>,
    %19 = arith.extui %15 : vector<8x128xi1> to vector<8x128xi32>
    %20 = arith.sitofp %19 : vector<8x128xi32> to vector<8x128xf32>
    %21 = arith.truncf %20 : vector<8x128xf32> to vector<8x128xbf16>
    %c0_14 = arith.constant 0 : index
    %c0_15 = arith.constant 0 : index
    %c0_16 = arith.constant 0 : index
    %22 = vector.load %arg5[%c0_14, %c0_15, %c0_16] : memref<1x8x128xbf16, #tpu.memory_space<vmem>>, vector<1x8x128xbf16>
    %23 = vector.shape_cast %22 : vector<1x8x128xbf16> to vector<8x128xbf16>
    %24 = vector.shape_cast %21 : vector<8x128xbf16> to vector<1x8x128xbf16>
    tpu.vector_store %arg5[%c0_14, %c0_15, %c0_16], %24 {strides = array<i32>} : memref<1x8x128xbf16, #tpu.memory_space<vmem>>, vector<1x8x128xbf16>,
    return
  }
  func.func @transform_0(%arg0: i32, %arg1: i32) -> (i32, i32, i32) {
    %c0_i32 = arith.constant 0 : i32
    %c0_i32_0 = arith.constant 0 : i32
    return %arg1, %arg0, %c0_i32 : i32, i32, i32
  }
  func.func @transform_1(%arg0: i32, %arg1: i32) -> (i32, i32) {
    %c0_i32 = arith.constant 0 : i32
    %c0_i32_0 = arith.constant 0 : i32
    %c0_i32_1 = arith.constant 0 : i32
    return %c0_i32, %c0_i32_0 : i32, i32
  }
  func.func @transform_2(%arg0: i32, %arg1: i32) -> (i32, i32) {
    %c0_i32 = arith.constant 0 : i32
    %c0_i32_0 = arith.constant 0 : i32
    %c0_i32_1 = arith.constant 0 : i32
    return %c0_i32, %c0_i32_0 : i32, i32
  }
  func.func @transform_3(%arg0: i32, %arg1: i32) -> (i32, i32, i32) {
    %c0_i32 = arith.constant 0 : i32
    %c0_i32_0 = arith.constant 0 : i32
    return %arg1, %arg0, %c0_i32 : i32, i32, i32
  }
}

module attributes {stable_mosaic.version = 11 : i64} {
  func.func @kernel(%arg0: i32, %arg1: i32, %arg2: memref<1x8x128xbf16, #tpu.memory_space<vmem>>, %arg3: memref<128x128xbf16, #tpu.memory_space<vmem>>, %arg4: memref<1x128xf32, #tpu.memory_space<vmem>>, %arg5: memref<1x8x128xbf16, #tpu.memory_space<vmem>>, %arg6: memref<1x8x128xbf16, #tpu.memory_space<vmem>>, %arg7: memref<8x128xf32, #tpu.memory_space<vmem>>) attributes {dimension_semantics = [#tpu.dimension_semantics<parallel>, #tpu.dimension_semantics<arbitrary>], iteration_bounds = array<i64: 1, 4>, scalar_prefetch = 0 : i64, scratch_operands = 1 : i64, tpu.core_type = #tpu.core_type<tc>, window_params = [{transform_indices = @transform_0, window_bounds = array<i64: 1, 8, 128>}, {pipeline_mode = #tpu.pipeline_mode<synchronous>, transform_indices = @transform_1, window_bounds = array<i64: 128, 128>}, {pipeline_mode = #tpu.pipeline_mode<synchronous>, transform_indices = @transform_2, window_bounds = array<i64: 1, 128>}, {transform_indices = @transform_3, window_bounds = array<i64: 1, 8, 128>}, {transform_indices = @transform_4, window_bounds = array<i64: 1, 8, 128>}]} {
    %c0_i32 = arith.constant 0 : i32
    %0 = arith.cmpi eq, %arg1, %c0_i32 : i32
    %1 = arith.extui %0 : i1 to i32
    %c0_i32_0 = arith.constant 0 : i32
    %2 = arith.cmpi ne, %1, %c0_i32_0 : i32
    scf.if %2 {
      %cst_20 = arith.constant 0.000000e+00 : f32
      %29 = vector.broadcast %cst_20 : f32 to vector<8x128xf32>
      %c0_21 = arith.constant 0 : index
      %c0_22 = arith.constant 0 : index
      %30 = vector.load %arg7[%c0_21, %c0_22] : memref<8x128xf32, #tpu.memory_space<vmem>>, vector<8x128xf32>
      tpu.vector_store %arg7[%c0_21, %c0_22], %29 {strides = array<i32>} : memref<8x128xf32, #tpu.memory_space<vmem>>, vector<8x128xf32>,
    } else {
    }
    %c0 = arith.constant 0 : index
    %c0_1 = arith.constant 0 : index
    %c0_2 = arith.constant 0 : index
    %3 = vector.load %arg2[%c0, %c0_1, %c0_2] : memref<1x8x128xbf16, #tpu.memory_space<vmem>>, vector<1x8x128xbf16>
    %4 = vector.shape_cast %3 : vector<1x8x128xbf16> to vector<8x128xbf16>
    %c0_3 = arith.constant 0 : index
    %c0_4 = arith.constant 0 : index
    %5 = vector.load %arg3[%c0_3, %c0_4] : memref<128x128xbf16, #tpu.memory_space<vmem>>, vector<128x128xbf16>
    %cst = arith.constant dense<0.000000e+00> : vector<8x128xf32>
    %6 = tpu.matmul %4, %5, %cst {dimension_numbers = #tpu.dot_dimension_numbers<[1], [0], [0], [1], [0, 0, 1, 1], [], []>} : vector<8x128xbf16>, vector<128x128xbf16>, vector<8x128xf32> -> vector<8x128xf32>
    %c0_5 = arith.constant 0 : index
    %c0_6 = arith.constant 0 : index
    %7 = vector.load %arg4[%c0_5, %c0_6] : memref<1x128xf32, #tpu.memory_space<vmem>>, vector<1x128xf32>
    %8 = vector.broadcast %7 : vector<1x128xf32> to vector<8x128xf32>
    %9 = arith.addf %6, %8 : vector<8x128xf32>
    %c0_7 = arith.constant 0 : index
    %c0_8 = arith.constant 0 : index
    %c0_9 = arith.constant 0 : index
    %10 = vector.load %arg5[%c0_7, %c0_8, %c0_9] : memref<1x8x128xbf16, #tpu.memory_space<vmem>>, vector<1x8x128xbf16>
    %11 = vector.shape_cast %10 : vector<1x8x128xbf16> to vector<8x128xbf16>
    %12 = arith.extf %11 : vector<8x128xbf16> to vector<8x128xf32>
    %13 = arith.addf %9, %12 : vector<8x128xf32>
    %c0_10 = arith.constant 0 : index
    %c0_11 = arith.constant 0 : index
    %14 = vector.load %arg7[%c0_10, %c0_11] : memref<8x128xf32, #tpu.memory_space<vmem>>, vector<8x128xf32>
    %cst_12 = arith.constant 3.000000e-01 : f32
    %15 = vector.broadcast %cst_12 : f32 to vector<8x128xf32>
    %16 = arith.mulf %14, %15 : vector<8x128xf32>
    %17 = arith.addf %16, %13 : vector<8x128xf32>
    %cst_13 = arith.constant 5.000000e-01 : f32
    %18 = vector.broadcast %cst_13 : f32 to vector<8x128xf32>
    %19 = arith.cmpf oge, %17, %18 : vector<8x128xf32>
    %cst_14 = arith.constant 0.000000e+00 : f32
    %20 = vector.broadcast %cst_14 : f32 to vector<8x128xf32>
    %21 = arith.select %19, %20, %17 : vector<8x128xi1>, vector<8x128xf32>
    %c0_15 = arith.constant 0 : index
    %c0_16 = arith.constant 0 : index
    %22 = vector.load %arg7[%c0_15, %c0_16] : memref<8x128xf32, #tpu.memory_space<vmem>>, vector<8x128xf32>
    tpu.vector_store %arg7[%c0_15, %c0_16], %21 {strides = array<i32>} : memref<8x128xf32, #tpu.memory_space<vmem>>, vector<8x128xf32>,
    %23 = arith.extui %19 : vector<8x128xi1> to vector<8x128xi32>
    %24 = arith.sitofp %23 : vector<8x128xi32> to vector<8x128xf32>
    %25 = arith.truncf %24 : vector<8x128xf32> to vector<8x128xbf16>
    %c0_17 = arith.constant 0 : index
    %c0_18 = arith.constant 0 : index
    %c0_19 = arith.constant 0 : index
    %26 = vector.load %arg6[%c0_17, %c0_18, %c0_19] : memref<1x8x128xbf16, #tpu.memory_space<vmem>>, vector<1x8x128xbf16>
    %27 = vector.shape_cast %26 : vector<1x8x128xbf16> to vector<8x128xbf16>
    %28 = vector.shape_cast %25 : vector<8x128xbf16> to vector<1x8x128xbf16>
    tpu.vector_store %arg6[%c0_17, %c0_18, %c0_19], %28 {strides = array<i32>} : memref<1x8x128xbf16, #tpu.memory_space<vmem>>, vector<1x8x128xbf16>,
    return
  }
  func.func @transform_0(%arg0: i32, %arg1: i32) -> (i32, i32, i32) {
    %c0_i32 = arith.constant 0 : i32
    %c0_i32_0 = arith.constant 0 : i32
    return %arg1, %arg0, %c0_i32 : i32, i32, i32
  }
  func.func @transform_1(%arg0: i32, %arg1: i32) -> (i32, i32) {
    %c0_i32 = arith.constant 0 : i32
    %c0_i32_0 = arith.constant 0 : i32
    %c0_i32_1 = arith.constant 0 : i32
    return %c0_i32, %c0_i32_0 : i32, i32
  }
  func.func @transform_2(%arg0: i32, %arg1: i32) -> (i32, i32) {
    %c0_i32 = arith.constant 0 : i32
    %c0_i32_0 = arith.constant 0 : i32
    %c0_i32_1 = arith.constant 0 : i32
    return %c0_i32, %c0_i32_0 : i32, i32
  }
  func.func @transform_3(%arg0: i32, %arg1: i32) -> (i32, i32, i32) {
    %c0_i32 = arith.constant 0 : i32
    %c0_i32_0 = arith.constant 0 : i32
    return %arg1, %arg0, %c0_i32 : i32, i32, i32
  }
  func.func @transform_4(%arg0: i32, %arg1: i32) -> (i32, i32, i32) {
    %c0_i32 = arith.constant 0 : i32
    %c0_i32_0 = arith.constant 0 : i32
    return %arg1, %arg0, %c0_i32 : i32, i32, i32
  }
}

module attributes {stable_mosaic.version = 11 : i64} {
  func.func @kernel(%arg0: i32, %arg1: i32, %arg2: memref<1x8x256xbf16, #tpu.memory_space<vmem>>, %arg3: memref<256x128xbf16, #tpu.memory_space<vmem>>, %arg4: memref<1x128xf32, #tpu.memory_space<vmem>>, %arg5: memref<1x8x128xbf16, #tpu.memory_space<vmem>>, %arg6: memref<8x128xf32, #tpu.memory_space<vmem>>) attributes {dimension_semantics = [#tpu.dimension_semantics<parallel>, #tpu.dimension_semantics<arbitrary>], iteration_bounds = array<i64: 1, 4>, scalar_prefetch = 0 : i64, scratch_operands = 1 : i64, tpu.core_type = #tpu.core_type<tc>, window_params = [{transform_indices = @transform_0, window_bounds = array<i64: 1, 8, 256>}, {pipeline_mode = #tpu.pipeline_mode<synchronous>, transform_indices = @transform_1, window_bounds = array<i64: 256, 128>}, {pipeline_mode = #tpu.pipeline_mode<synchronous>, transform_indices = @transform_2, window_bounds = array<i64: 1, 128>}, {transform_indices = @transform_3, window_bounds = array<i64: 1, 8, 128>}]} {
    %c0_i32 = arith.constant 0 : i32
    %0 = arith.cmpi eq, %arg1, %c0_i32 : i32
    %1 = arith.extui %0 : i1 to i32
    %c0_i32_0 = arith.constant 0 : i32
    %2 = arith.cmpi ne, %1, %c0_i32_0 : i32
    scf.if %2 {
      %cst_17 = arith.constant 0.000000e+00 : f32
      %25 = vector.broadcast %cst_17 : f32 to vector<8x128xf32>
      %c0_18 = arith.constant 0 : index
      %c0_19 = arith.constant 0 : index
      %26 = vector.load %arg6[%c0_18, %c0_19] : memref<8x128xf32, #tpu.memory_space<vmem>>, vector<8x128xf32>
      tpu.vector_store %arg6[%c0_18, %c0_19], %25 {strides = array<i32>} : memref<8x128xf32, #tpu.memory_space<vmem>>, vector<8x128xf32>,
    } else {
    }
    %c0 = arith.constant 0 : index
    %c0_1 = arith.constant 0 : index
    %c0_2 = arith.constant 0 : index
    %3 = vector.load %arg2[%c0, %c0_1, %c0_2] : memref<1x8x256xbf16, #tpu.memory_space<vmem>>, vector<1x8x256xbf16>
    %4 = vector.shape_cast %3 : vector<1x8x256xbf16> to vector<8x256xbf16>
    %c0_3 = arith.constant 0 : index
    %c0_4 = arith.constant 0 : index
    %5 = vector.load %arg3[%c0_3, %c0_4] : memref<256x128xbf16, #tpu.memory_space<vmem>>, vector<256x128xbf16>
    %cst = arith.constant dense<0.000000e+00> : vector<8x128xf32>
    %6 = tpu.matmul %4, %5, %cst {dimension_numbers = #tpu.dot_dimension_numbers<[1], [0], [0], [1], [0, 0, 1, 1], [], []>} : vector<8x256xbf16>, vector<256x128xbf16>, vector<8x128xf32> -> vector<8x128xf32>
    %c0_5 = arith.constant 0 : index
    %c0_6 = arith.constant 0 : index
    %7 = vector.load %arg4[%c0_5, %c0_6] : memref<1x128xf32, #tpu.memory_space<vmem>>, vector<1x128xf32>
    %8 = vector.broadcast %7 : vector<1x128xf32> to vector<8x128xf32>
    %9 = arith.addf %6, %8 : vector<8x128xf32>
    %c0_7 = arith.constant 0 : index
    %c0_8 = arith.constant 0 : index
    %10 = vector.load %arg6[%c0_7, %c0_8] : memref<8x128xf32, #tpu.memory_space<vmem>>, vector<8x128xf32>
    %cst_9 = arith.constant 3.000000e-01 : f32
    %11 = vector.broadcast %cst_9 : f32 to vector<8x128xf32>
    %12 = arith.mulf %10, %11 : vector<8x128xf32>
    %13 = arith.addf %12, %9 : vector<8x128xf32>
    %cst_10 = arith.constant 5.000000e-01 : f32
    %14 = vector.broadcast %cst_10 : f32 to vector<8x128xf32>
    %15 = arith.cmpf oge, %13, %14 : vector<8x128xf32>
    %cst_11 = arith.constant 0.000000e+00 : f32
    %16 = vector.broadcast %cst_11 : f32 to vector<8x128xf32>
    %17 = arith.select %15, %16, %13 : vector<8x128xi1>, vector<8x128xf32>
    %c0_12 = arith.constant 0 : index
    %c0_13 = arith.constant 0 : index
    %18 = vector.load %arg6[%c0_12, %c0_13] : memref<8x128xf32, #tpu.memory_space<vmem>>, vector<8x128xf32>
    tpu.vector_store %arg6[%c0_12, %c0_13], %17 {strides = array<i32>} : memref<8x128xf32, #tpu.memory_space<vmem>>, vector<8x128xf32>,
    %19 = arith.extui %15 : vector<8x128xi1> to vector<8x128xi32>
    %20 = arith.sitofp %19 : vector<8x128xi32> to vector<8x128xf32>
    %21 = arith.truncf %20 : vector<8x128xf32> to vector<8x128xbf16>
    %c0_14 = arith.constant 0 : index
    %c0_15 = arith.constant 0 : index
    %c0_16 = arith.constant 0 : index
    %22 = vector.load %arg5[%c0_14, %c0_15, %c0_16] : memref<1x8x128xbf16, #tpu.memory_space<vmem>>, vector<1x8x128xbf16>
    %23 = vector.shape_cast %22 : vector<1x8x128xbf16> to vector<8x128xbf16>
    %24 = vector.shape_cast %21 : vector<8x128xbf16> to vector<1x8x128xbf16>
    tpu.vector_store %arg5[%c0_14, %c0_15, %c0_16], %24 {strides = array<i32>} : memref<1x8x128xbf16, #tpu.memory_space<vmem>>, vector<1x8x128xbf16>,
    return
  }
  func.func @transform_0(%arg0: i32, %arg1: i32) -> (i32, i32, i32) {
    %c0_i32 = arith.constant 0 : i32
    %c0_i32_0 = arith.constant 0 : i32
    return %arg1, %arg0, %c0_i32 : i32, i32, i32
  }
  func.func @transform_1(%arg0: i32, %arg1: i32) -> (i32, i32) {
    %c0_i32 = arith.constant 0 : i32
    %c0_i32_0 = arith.constant 0 : i32
    %c0_i32_1 = arith.constant 0 : i32
    return %c0_i32, %c0_i32_0 : i32, i32
  }
  func.func @transform_2(%arg0: i32, %arg1: i32) -> (i32, i32) {
    %c0_i32 = arith.constant 0 : i32
    %c0_i32_0 = arith.constant 0 : i32
    %c0_i32_1 = arith.constant 0 : i32
    return %c0_i32, %c0_i32_0 : i32, i32
  }
  func.func @transform_3(%arg0: i32, %arg1: i32) -> (i32, i32, i32) {
    %c0_i32 = arith.constant 0 : i32
    %c0_i32_0 = arith.constant 0 : i32
    return %arg1, %arg0, %c0_i32 : i32, i32, i32
  }
}

module attributes {stable_mosaic.version = 11 : i64} {
  func.func @kernel(%arg0: i32, %arg1: memref<2x4x256xbf16, #tpu.memory_space<vmem>>, %arg2: memref<256x128xf32, #tpu.memory_space<vmem>>, %arg3: memref<1x128xf32, #tpu.memory_space<vmem>>, %arg4: memref<2x128xf32, #tpu.memory_space<vmem>>) attributes {dimension_semantics = [#tpu.dimension_semantics<arbitrary>], iteration_bounds = array<i64: 1>, scalar_prefetch = 0 : i64, scratch_operands = 0 : i64, tpu.core_type = #tpu.core_type<tc>, window_params = [{pipeline_mode = #tpu.pipeline_mode<synchronous>, transform_indices = @transform_0, window_bounds = array<i64: 2, 4, 256>}, {pipeline_mode = #tpu.pipeline_mode<synchronous>, transform_indices = @transform_1, window_bounds = array<i64: 256, 128>}, {pipeline_mode = #tpu.pipeline_mode<synchronous>, transform_indices = @transform_2, window_bounds = array<i64: 1, 128>}, {pipeline_mode = #tpu.pipeline_mode<synchronous>, transform_indices = @transform_3, window_bounds = array<i64: 2, 128>}]} {
    %c0 = arith.constant 0 : index
    %c0_0 = arith.constant 0 : index
    %c0_1 = arith.constant 0 : index
    %0 = vector.load %arg1[%c0, %c0_0, %c0_1] : memref<2x4x256xbf16, #tpu.memory_space<vmem>>, vector<2x4x256xbf16>
    %1 = arith.extf %0 : vector<2x4x256xbf16> to vector<2x4x256xf32>
    %cst = arith.constant dense<0.000000e+00> : vector<2x256xf32>
    %2 = vector.multi_reduction <add>, %1, %cst [1] : vector<2x4x256xf32> to vector<2x256xf32>
    %cst_2 = arith.constant 2.500000e-01 : f32
    %3 = vector.broadcast %cst_2 : f32 to vector<2x256xf32>
    %4 = arith.mulf %2, %3 : vector<2x256xf32>
    %c0_3 = arith.constant 0 : index
    %c0_4 = arith.constant 0 : index
    %5 = vector.load %arg2[%c0_3, %c0_4] : memref<256x128xf32, #tpu.memory_space<vmem>>, vector<256x128xf32>
    %cst_5 = arith.constant dense<0.000000e+00> : vector<2x128xf32>
    %6 = tpu.matmul %4, %5, %cst_5 {dimension_numbers = #tpu.dot_dimension_numbers<[1], [0], [0], [1], [0, 0, 1, 1], [], []>} : vector<2x256xf32>, vector<256x128xf32>, vector<2x128xf32> -> vector<2x128xf32>
    %c0_6 = arith.constant 0 : index
    %c0_7 = arith.constant 0 : index
    %7 = vector.load %arg3[%c0_6, %c0_7] : memref<1x128xf32, #tpu.memory_space<vmem>>, vector<1x128xf32>
    %8 = vector.broadcast %7 : vector<1x128xf32> to vector<2x128xf32>
    %9 = arith.addf %6, %8 : vector<2x128xf32>
    %c0_8 = arith.constant 0 : index
    %c0_9 = arith.constant 0 : index
    %10 = vector.load %arg4[%c0_8, %c0_9] : memref<2x128xf32, #tpu.memory_space<vmem>>, vector<2x128xf32>
    tpu.vector_store %arg4[%c0_8, %c0_9], %9 {strides = array<i32>} : memref<2x128xf32, #tpu.memory_space<vmem>>, vector<2x128xf32>,
    return
  }
  func.func @transform_0(%arg0: i32) -> (i32, i32, i32) {
    %c0_i32 = arith.constant 0 : i32
    %c0_i32_0 = arith.constant 0 : i32
    %c0_i32_1 = arith.constant 0 : i32
    %c0_i32_2 = arith.constant 0 : i32
    return %c0_i32, %c0_i32_0, %c0_i32_1 : i32, i32, i32
  }
  func.func @transform_1(%arg0: i32) -> (i32, i32) {
    %c0_i32 = arith.constant 0 : i32
    %c0_i32_0 = arith.constant 0 : i32
    %c0_i32_1 = arith.constant 0 : i32
    return %c0_i32, %c0_i32_0 : i32, i32
  }
  func.func @transform_2(%arg0: i32) -> (i32, i32) {
    %c0_i32 = arith.constant 0 : i32
    %c0_i32_0 = arith.constant 0 : i32
    %c0_i32_1 = arith.constant 0 : i32
    return %c0_i32, %c0_i32_0 : i32, i32
  }
  func.func @transform_3(%arg0: i32) -> (i32, i32) {
    %c0_i32 = arith.constant 0 : i32
    %c0_i32_0 = arith.constant 0 : i32
    %c0_i32_1 = arith.constant 0 : i32
    return %c0_i32, %c0_i32_0 : i32, i32
  }
}

module attributes {stable_mosaic.version = 11 : i64} {
  func.func @_gemm_bias_kernel(%arg0: i32, %arg1: memref<8x128xbf16, #tpu.memory_space<vmem>>, %arg2: memref<128x256xbf16, #tpu.memory_space<vmem>>, %arg3: memref<1x256xf32, #tpu.memory_space<vmem>>, %arg4: memref<8x256xbf16, #tpu.memory_space<vmem>>) attributes {dimension_semantics = [#tpu.dimension_semantics<parallel>], iteration_bounds = array<i64: 1>, scalar_prefetch = 0 : i64, scratch_operands = 0 : i64, tpu.core_type = #tpu.core_type<tc>, window_params = [{transform_indices = @transform_0, window_bounds = array<i64: 8, 128>}, {pipeline_mode = #tpu.pipeline_mode<synchronous>, transform_indices = @transform_1, window_bounds = array<i64: 128, 256>}, {pipeline_mode = #tpu.pipeline_mode<synchronous>, transform_indices = @transform_2, window_bounds = array<i64: 1, 256>}, {transform_indices = @transform_3, window_bounds = array<i64: 8, 256>}]} {
    %c0 = arith.constant 0 : index
    %c0_0 = arith.constant 0 : index
    %0 = vector.load %arg1[%c0, %c0_0] : memref<8x128xbf16, #tpu.memory_space<vmem>>, vector<8x128xbf16>
    %c0_1 = arith.constant 0 : index
    %c0_2 = arith.constant 0 : index
    %1 = vector.load %arg2[%c0_1, %c0_2] : memref<128x256xbf16, #tpu.memory_space<vmem>>, vector<128x256xbf16>
    %cst = arith.constant dense<0.000000e+00> : vector<8x256xf32>
    %2 = tpu.matmul %0, %1, %cst {dimension_numbers = #tpu.dot_dimension_numbers<[1], [0], [0], [1], [0, 0, 1, 1], [], []>} : vector<8x128xbf16>, vector<128x256xbf16>, vector<8x256xf32> -> vector<8x256xf32>
    %c0_3 = arith.constant 0 : index
    %c0_4 = arith.constant 0 : index
    %3 = vector.load %arg3[%c0_3, %c0_4] : memref<1x256xf32, #tpu.memory_space<vmem>>, vector<1x256xf32>
    %4 = vector.broadcast %3 : vector<1x256xf32> to vector<8x256xf32>
    %5 = arith.addf %2, %4 : vector<8x256xf32>
    %6 = arith.truncf %5 : vector<8x256xf32> to vector<8x256xbf16>
    %c0_5 = arith.constant 0 : index
    %c0_6 = arith.constant 0 : index
    %7 = vector.load %arg4[%c0_5, %c0_6] : memref<8x256xbf16, #tpu.memory_space<vmem>>, vector<8x256xbf16>
    tpu.vector_store %arg4[%c0_5, %c0_6], %6 {strides = array<i32>} : memref<8x256xbf16, #tpu.memory_space<vmem>>, vector<8x256xbf16>,
    return
  }
  func.func @transform_0(%arg0: i32) -> (i32, i32) {
    %c0_i32 = arith.constant 0 : i32
    %c0_i32_0 = arith.constant 0 : i32
    return %arg0, %c0_i32 : i32, i32
  }
  func.func @transform_1(%arg0: i32) -> (i32, i32) {
    %c0_i32 = arith.constant 0 : i32
    %c0_i32_0 = arith.constant 0 : i32
    %c0_i32_1 = arith.constant 0 : i32
    return %c0_i32, %c0_i32_0 : i32, i32
  }
  func.func @transform_2(%arg0: i32) -> (i32, i32) {
    %c0_i32 = arith.constant 0 : i32
    %c0_i32_0 = arith.constant 0 : i32
    %c0_i32_1 = arith.constant 0 : i32
    return %c0_i32, %c0_i32_0 : i32, i32
  }
  func.func @transform_3(%arg0: i32) -> (i32, i32) {
    %c0_i32 = arith.constant 0 : i32
    %c0_i32_0 = arith.constant 0 : i32
    return %arg0, %c0_i32 : i32, i32
  }
}

module attributes {stable_mosaic.version = 11 : i64} {
  func.func @kernel(%arg0: i32, %arg1: i32, %arg2: memref<1x8x128xbf16, #tpu.memory_space<vmem>>, %arg3: memref<128x256xbf16, #tpu.memory_space<vmem>>, %arg4: memref<1x256xf32, #tpu.memory_space<vmem>>, %arg5: memref<1x8x256xbf16, #tpu.memory_space<vmem>>, %arg6: memref<1x8x256xbf16, #tpu.memory_space<vmem>>, %arg7: memref<8x256xf32, #tpu.memory_space<vmem>>) attributes {dimension_semantics = [#tpu.dimension_semantics<parallel>, #tpu.dimension_semantics<arbitrary>], iteration_bounds = array<i64: 1, 4>, scalar_prefetch = 0 : i64, scratch_operands = 1 : i64, tpu.core_type = #tpu.core_type<tc>, window_params = [{transform_indices = @transform_0, window_bounds = array<i64: 1, 8, 128>}, {pipeline_mode = #tpu.pipeline_mode<synchronous>, transform_indices = @transform_1, window_bounds = array<i64: 128, 256>}, {pipeline_mode = #tpu.pipeline_mode<synchronous>, transform_indices = @transform_2, window_bounds = array<i64: 1, 256>}, {transform_indices = @transform_3, window_bounds = array<i64: 1, 8, 256>}, {transform_indices = @transform_4, window_bounds = array<i64: 1, 8, 256>}]} {
    %c0_i32 = arith.constant 0 : i32
    %0 = arith.cmpi eq, %arg1, %c0_i32 : i32
    %1 = arith.extui %0 : i1 to i32
    %c0_i32_0 = arith.constant 0 : i32
    %2 = arith.cmpi ne, %1, %c0_i32_0 : i32
    scf.if %2 {
      %cst_20 = arith.constant 0.000000e+00 : f32
      %29 = vector.broadcast %cst_20 : f32 to vector<8x256xf32>
      %c0_21 = arith.constant 0 : index
      %c0_22 = arith.constant 0 : index
      %30 = vector.load %arg7[%c0_21, %c0_22] : memref<8x256xf32, #tpu.memory_space<vmem>>, vector<8x256xf32>
      tpu.vector_store %arg7[%c0_21, %c0_22], %29 {strides = array<i32>} : memref<8x256xf32, #tpu.memory_space<vmem>>, vector<8x256xf32>,
    } else {
    }
    %c0 = arith.constant 0 : index
    %c0_1 = arith.constant 0 : index
    %c0_2 = arith.constant 0 : index
    %3 = vector.load %arg2[%c0, %c0_1, %c0_2] : memref<1x8x128xbf16, #tpu.memory_space<vmem>>, vector<1x8x128xbf16>
    %4 = vector.shape_cast %3 : vector<1x8x128xbf16> to vector<8x128xbf16>
    %c0_3 = arith.constant 0 : index
    %c0_4 = arith.constant 0 : index
    %5 = vector.load %arg3[%c0_3, %c0_4] : memref<128x256xbf16, #tpu.memory_space<vmem>>, vector<128x256xbf16>
    %cst = arith.constant dense<0.000000e+00> : vector<8x256xf32>
    %6 = tpu.matmul %4, %5, %cst {dimension_numbers = #tpu.dot_dimension_numbers<[1], [0], [0], [1], [0, 0, 1, 1], [], []>} : vector<8x128xbf16>, vector<128x256xbf16>, vector<8x256xf32> -> vector<8x256xf32>
    %c0_5 = arith.constant 0 : index
    %c0_6 = arith.constant 0 : index
    %7 = vector.load %arg4[%c0_5, %c0_6] : memref<1x256xf32, #tpu.memory_space<vmem>>, vector<1x256xf32>
    %8 = vector.broadcast %7 : vector<1x256xf32> to vector<8x256xf32>
    %9 = arith.addf %6, %8 : vector<8x256xf32>
    %c0_7 = arith.constant 0 : index
    %c0_8 = arith.constant 0 : index
    %c0_9 = arith.constant 0 : index
    %10 = vector.load %arg5[%c0_7, %c0_8, %c0_9] : memref<1x8x256xbf16, #tpu.memory_space<vmem>>, vector<1x8x256xbf16>
    %11 = vector.shape_cast %10 : vector<1x8x256xbf16> to vector<8x256xbf16>
    %12 = arith.extf %11 : vector<8x256xbf16> to vector<8x256xf32>
    %13 = arith.addf %9, %12 : vector<8x256xf32>
    %c0_10 = arith.constant 0 : index
    %c0_11 = arith.constant 0 : index
    %14 = vector.load %arg7[%c0_10, %c0_11] : memref<8x256xf32, #tpu.memory_space<vmem>>, vector<8x256xf32>
    %cst_12 = arith.constant 3.000000e-01 : f32
    %15 = vector.broadcast %cst_12 : f32 to vector<8x256xf32>
    %16 = arith.mulf %14, %15 : vector<8x256xf32>
    %17 = arith.addf %16, %13 : vector<8x256xf32>
    %cst_13 = arith.constant 5.000000e-01 : f32
    %18 = vector.broadcast %cst_13 : f32 to vector<8x256xf32>
    %19 = arith.cmpf oge, %17, %18 : vector<8x256xf32>
    %cst_14 = arith.constant 0.000000e+00 : f32
    %20 = vector.broadcast %cst_14 : f32 to vector<8x256xf32>
    %21 = arith.select %19, %20, %17 : vector<8x256xi1>, vector<8x256xf32>
    %c0_15 = arith.constant 0 : index
    %c0_16 = arith.constant 0 : index
    %22 = vector.load %arg7[%c0_15, %c0_16] : memref<8x256xf32, #tpu.memory_space<vmem>>, vector<8x256xf32>
    tpu.vector_store %arg7[%c0_15, %c0_16], %21 {strides = array<i32>} : memref<8x256xf32, #tpu.memory_space<vmem>>, vector<8x256xf32>,
    %23 = arith.extui %19 : vector<8x256xi1> to vector<8x256xi32>
    %24 = arith.sitofp %23 : vector<8x256xi32> to vector<8x256xf32>
    %25 = arith.truncf %24 : vector<8x256xf32> to vector<8x256xbf16>
    %c0_17 = arith.constant 0 : index
    %c0_18 = arith.constant 0 : index
    %c0_19 = arith.constant 0 : index
    %26 = vector.load %arg6[%c0_17, %c0_18, %c0_19] : memref<1x8x256xbf16, #tpu.memory_space<vmem>>, vector<1x8x256xbf16>
    %27 = vector.shape_cast %26 : vector<1x8x256xbf16> to vector<8x256xbf16>
    %28 = vector.shape_cast %25 : vector<8x256xbf16> to vector<1x8x256xbf16>
    tpu.vector_store %arg6[%c0_17, %c0_18, %c0_19], %28 {strides = array<i32>} : memref<1x8x256xbf16, #tpu.memory_space<vmem>>, vector<1x8x256xbf16>,
    return
  }
  func.func @transform_0(%arg0: i32, %arg1: i32) -> (i32, i32, i32) {
    %c0_i32 = arith.constant 0 : i32
    %c0_i32_0 = arith.constant 0 : i32
    return %arg1, %arg0, %c0_i32 : i32, i32, i32
  }
  func.func @transform_1(%arg0: i32, %arg1: i32) -> (i32, i32) {
    %c0_i32 = arith.constant 0 : i32
    %c0_i32_0 = arith.constant 0 : i32
    %c0_i32_1 = arith.constant 0 : i32
    return %c0_i32, %c0_i32_0 : i32, i32
  }
  func.func @transform_2(%arg0: i32, %arg1: i32) -> (i32, i32) {
    %c0_i32 = arith.constant 0 : i32
    %c0_i32_0 = arith.constant 0 : i32
    %c0_i32_1 = arith.constant 0 : i32
    return %c0_i32, %c0_i32_0 : i32, i32
  }
  func.func @transform_3(%arg0: i32, %arg1: i32) -> (i32, i32, i32) {
    %c0_i32 = arith.constant 0 : i32
    %c0_i32_0 = arith.constant 0 : i32
    return %arg1, %arg0, %c0_i32 : i32, i32, i32
  }
  func.func @transform_4(%arg0: i32, %arg1: i32) -> (i32, i32, i32) {
    %c0_i32 = arith.constant 0 : i32
    %c0_i32_0 = arith.constant 0 : i32
    return %arg1, %arg0, %c0_i32 : i32, i32, i32
  }
}

</mosaic_0001>

<bundles_post_ra>
// kernel: resnetlif50_forward.55
= control target key start
LH: loop header
LB: loop body
LE: loop exit
PB: predicated region body
PF: predicated region fallthrough
CT: control target
= control target key end

     0   :  { %s1527_s12 = smov 0   ;;  %s1529_s13 = smov 0   ;;  %s1805_s0 = inlined_call_operand.vmem [shape: bf16[4,512,128], index: 0, kind: input, shape index: {}]   ;;  %s1806_s1 = inlined_call_operand.vmem [shape: bf16[128,128], index: 1, kind: input, shape index: {}]   ;;  %s1807_s2 = inlined_call_operand.vmem [shape: f32[1,128], index: 2, kind: input, shape index: {}]   ;;  %s1808_s3 = inlined_call_operand.vmem [shape: bf16[4,512,128], index: 3, kind: output, shape index: {}]  }
   0x1   :  { %s1531_s14 = smov 0   ;;  %s1533_s15 = smov 0  }
   0x2   :  { %s1535_s16 = smov 0  }
   0x3 LB: > { %s22_s17 = sadd.s32 1, %s1495_s14  ;;  %s25_s18 = sadd.s32 1, %s1499_s15  ;;  %s1503_s16 = sphi %s1535_s16, %s13_s16   ;;  %s1499_s15 = sphi %s1533_s15, %s1812_s15   ;;  %s1495_s14 = sphi %s1531_s14, %s1811_s14   ;;  %s1491_s13 = sphi %s1529_s13, %s1810_s13   ;;  %s1487_s12 = sphi %s1527_s12, %s1809_s12  }
   0x4   : > { %p23_p0 = scmp.ge.s32.totalorder %s22_s17, 4  ;;  %p1117_p1 = scmp.ge.s32.totalorder %s1503_s16, 1 }
   0x5   : > { %p158_p2 = scmp.lt.s32.totalorder %s1503_s16, 9 }
   0x6   : > { %s1814_s17 = smov (%p23_p0, %s22_s17), 0  ;;  %s1816_s18 = smov (!%p23_p0, %s25_s18), %s1499_s15 }
   0x7   : > { %p159_p3 = pnand %p1117_p1, %p158_p2  ;;  %p27_p4 = scmp.ge.s32.totalorder %s1816_s18, 2 }
   0x8   : > { %s1118_s19 = sshll.u32 (!%p159_p3), %s1491_s13, 5  ;;  %p191_p5 = scmp.lt.s32.totalorder (!%p159_p3), %s1487_s12, 3 }
   0x9   : > { %s1818_s18 = smov (%p27_p4, %s1816_s18), 0  ;;  %162 = sbr.rel (%p159_p3) target bundleno = 313 (0x139), region = 32 }
   0xa   : > { %p193_p6 = scmp.lt.s32.totalorder (!%p159_p3), %s1118_s19, 63  ;;  %p1124_p7 = scmp.ne.s32.totalorder (!%p159_p3), %s1487_s12, 0 }
   0xe   : > { %s192_s20 = scalar_select %p191_p5, %s1487_s12, 3 }
   0xf   : > { %s1820_s19 = smov (!%p193_p6, %s1118_s19), 63  ;;  %214 = sbr.rel (%p1124_p7) target bundleno = 37 (0x25), region = 36 }
  0x10   : > { %s1119_s21 = sshll.u32 %s192_s20, 6 }
  0x11   : > { %s196_s22 = sadd.s32 %s1119_s21, %s1820_s19 }
  0x12   : > { %s1120_s23 = sshll.u32 %s196_s22, 2 }
  0x13   : > { %s1560_s26 = scalar_lea.vmem %s1805_s0, %s1120_s23  ;;  %s1565_s29 = scalar_lea.vmem %s1808_s3, %s1120_s23 }
  0x14   : > { %v1505_v0 = vmov 0.0  }
  0x15   : > { %215 = vst [vmem:[#allocation2 + $0xb0] sm:$0xff] %v1505_v0  ;;  %216 = vst [vmem:[#allocation2] sm:$0xff] %v1505_v0 }
  0x16   : > { %217 = vst [vmem:[#allocation2 + $0xd8] sm:$0xff] %v1505_v0  ;;  %218 = vst [vmem:[#allocation2 + $0x18] sm:$0xff] %v1505_v0 }
  0x17   : > { %219 = vst [vmem:[#allocation2 + $0x50] sm:$0xff] %v1505_v0  ;;  %220 = vst [vmem:[#allocation2 + $0x68] sm:$0xff] %v1505_v0 }
  0x18   : > { %221 = vst [vmem:[#allocation2 + $0x30] sm:$0xff] %v1505_v0  ;;  %222 = vst [vmem:[#allocation2 + $0x48] sm:$0xff] %v1505_v0 }
  0x19   : > { %223 = vst [vmem:[#allocation2 + $0x80] sm:$0xff] %v1505_v0  ;;  %224 = vst [vmem:[#allocation2 + $0x88] sm:$0xff] %v1505_v0 }
  0x1a   : > { %225 = vst [vmem:[#allocation2 + $0xe8] sm:$0xff] %v1505_v0  ;;  %226 = vst [vmem:[#allocation2 + $0xb8] sm:$0xff] %v1505_v0 }
  0x1b   : > { %227 = vst [vmem:[#allocation2 + $0x60] sm:$0xff] %v1505_v0  ;;  %228 = vst [vmem:[#allocation2 + $0xf0] sm:$0xff] %v1505_v0 }
  0x1c   : > { %229 = vst [vmem:[#allocation2 + $0x8] sm:$0xff] %v1505_v0  ;;  %230 = vst [vmem:[#allocation2 + $0x78] sm:$0xff] %v1505_v0 }
  0x1d   : > { %231 = vst [vmem:[#allocation2 + $0x38] sm:$0xff] %v1505_v0  ;;  %232 = vst [vmem:[#allocation2 + $0x58] sm:$0xff] %v1505_v0 }
  0x1e   : > { %233 = vst [vmem:[#allocation2 + $0x40] sm:$0xff] %v1505_v0  ;;  %234 = vst [vmem:[#allocation2 + $0xc8] sm:$0xff] %v1505_v0 }
  0x1f   : > { %235 = vst [vmem:[#allocation2 + $0xe0] sm:$0xff] %v1505_v0  ;;  %236 = vst [vmem:[#allocation2 + $0x90] sm:$0xff] %v1505_v0 }
  0x20   : > { %237 = vst [vmem:[#allocation2 + $0x70] sm:$0xff] %v1505_v0  ;;  %238 = vst [vmem:[#allocation2 + $0xc0] sm:$0xff] %v1505_v0 }
  0x21   : > { %239 = vst [vmem:[#allocation2 + $0xa8] sm:$0xff] %v1505_v0  ;;  %240 = vst [vmem:[#allocation2 + $0xd0] sm:$0xff] %v1505_v0 }
  0x22   : > { %241 = vst [vmem:[#allocation2 + $0x10] sm:$0xff] %v1505_v0  ;;  %242 = vst [vmem:[#allocation2 + $0x28] sm:$0xff] %v1505_v0 }
  0x23   : > { %243 = vst [vmem:[#allocation2 + $0xa0] sm:$0xff] %v1505_v0  ;;  %244 = vst [vmem:[#allocation2 + $0xf8] sm:$0xff] %v1505_v0 }
  0x24   : > { %245 = vst [vmem:[#allocation2 + $0x20] sm:$0xff] %v1505_v0  ;;  %246 = vst [vmem:[#allocation2 + $0x98] sm:$0xff] %v1505_v0 }
  0x25 PF: > { %v1441_v1 = vld [vmem:[%s1806_s1 + $0x38] sm:$0xff]   ;;  %v1442_v2 = vld [vmem:[%s1806_s1 + $0x30] sm:$0xff]   ;;  %v1443_v3 = vld [vmem:[%s1806_s1 + $0x28] sm:$0xff]  }
  0x26   : > { %1335 = vmatprep.subr.bf16.mxu0 %v1441_v1  ;;  %1383 = vmatprep.subr.bf16.mxu1 %v1441_v1  ;;  %v1444_v4 = vld [vmem:[%s1806_s1 + $0x20] sm:$0xff]   ;;  %v1445_v7 = vld [vmem:[%s1806_s1 + $0x18] sm:$0xff]   ;;  %v1446_v8 = vld [vmem:[%s1806_s1 + $0x10] sm:$0xff]  }
  0x27   : > { %1336 = vmatpush3.bf16.msra.mxu0 %v1441_v1  ;;  %1391 = vmatpush3.bf16.msra.mxu1 %v1441_v1  ;;  %v1449_v5 = vld [vmem:[%s1560_s26] sm:$0xff]   ;;  %v1447_v9 = vld [vmem:[%s1806_s1 + $0x8] sm:$0xff]   ;;  %v1453_v13 = vld [vmem:[%s1560_s26 + $0x10] sm:$0xff]  }
  0x28   : > { %1337 = vmatprep.subr.bf16.mxu0 %v1442_v2  ;;  %1384 = vmatprep.subr.bf16.mxu1 %v1442_v2  ;;  %v1450_v6 = vld [vmem:[%s1560_s26 + $0x40] sm:$0xff]   ;;  %v1451_v11 = vld [vmem:[%s1560_s26 + $0x8] sm:$0xff]   ;;  %v1454_v14 = vld [vmem:[%s1560_s26 + $0x50] sm:$0xff]  }
  0x29   : > { %1351 = vmatprep.mubr.bf16.mxu0 %v1449_v5  ;;  %1367 = vmatprep.mubr.bf16.mxu1 %v1450_v6  ;;  %v1448_v10 = vld [vmem:[%s1806_s1] sm:$0xff]   ;;  %v1452_v12 = vld [vmem:[%s1560_s26 + $0x48] sm:$0xff]   ;;  %v1455_v15 = vld [vmem:[%s1560_s26 + $0x18] sm:$0xff]  }
  0x2a   : > { %v1456_v16 = vld [vmem:[%s1560_s26 + $0x58] sm:$0xff]   ;;  %v1457_v17 = vld [vmem:[%s1560_s26 + $0x20] sm:$0xff]   ;;  %v1459_v19 = vld [vmem:[%s1560_s26 + $0x28] sm:$0xff]  }
  0x2b   : > { %1338 = vmatpush3.bf16.msra.mxu0 %v1442_v2  ;;  %1392 = vmatpush3.bf16.msra.mxu1 %v1442_v2  ;;  %v1458_v18 = vld [vmem:[%s1560_s26 + $0x60] sm:$0xff]   ;;  %v1460_v20 = vld [vmem:[%s1560_s26 + $0x68] sm:$0xff]   ;;  %v1461_v21 = vld [vmem:[%s1560_s26 + $0x30] sm:$0xff]  }
  0x2c   : > { %1339 = vmatprep.subr.bf16.mxu0 %v1443_v3  ;;  %1385 = vmatprep.subr.bf16.mxu1 %v1443_v3  ;;  %v1462_v22 = vld [vmem:[%s1560_s26 + $0x70] sm:$0xff]   ;;  %v1463_v23 = vld [vmem:[%s1560_s26 + $0x38] sm:$0xff]   ;;  %v625_v26 = vld [vmem:[#allocation2 + $0x40] sm:$0xff] }
  0x2d   : > { %v1464_v24 = vld [vmem:[%s1560_s26 + $0x78] sm:$0xff]   ;;  %v607_v27 = vld [vmem:[#allocation2 + $0xb0] sm:$0xff]  ;;  %v626_v30 = vld [vmem:[#allocation2 + $0xc8] sm:$0xff]  ;;  %v657_v32 = vmul.f32 0.3, %v625_v26 }
  0x2e   : > { %v609_v25 = vld [vmem:[#allocation2 + $0xd8] sm:$0xff]  ;;  %v608_v33 = vld [vmem:[#allocation2] sm:$0xff]  ;;  %v1607_v35 = vmul.f32 0.3, %v607_v27  ;;  %v613_v37 = vld [vmem:[#allocation2 + $0x30] sm:$0xff] }
  0x2f   : > { %1340 = vmatpush3.bf16.msra.mxu0 %v1443_v3  ;;  %1393 = vmatpush3.bf16.msra.mxu1 %v1443_v3  ;;  %v623_v28 = vld [vmem:[#allocation2 + $0x38] sm:$0xff]  ;;  %v641_v31 = vmul.f32 0.3, %v609_v25  ;;  %v629_v38 = vld [vmem:[#allocation2 + $0x70] sm:$0xff]  ;;  %v1613_v40 = vmul.f32 0.3, %v626_v30 }
  0x30   : > { %1341 = vmatprep.subr.bf16.mxu0 %v1444_v4  ;;  %1386 = vmatprep.subr.bf16.mxu1 %v1444_v4  ;;  %v610_v29 = vld [vmem:[#allocation2 + $0x18] sm:$0xff]  ;;  %v1609_v36 = vmul.f32 0.3, %v623_v28  ;;  %v611_v41 = vld [vmem:[#allocation2 + $0x50] sm:$0xff]  ;;  %v627_v42 = vld [vmem:[#allocation2 + $0xe0] sm:$0xff] }
  0x31   : > { %v624_v34 = vld [vmem:[#allocation2 + $0x58] sm:$0xff]  ;;  %v1611_v39 = vmul.f32 0.3, %v610_v29  ;;  %v1615_v43 = vmul.f32 0.3, %v608_v33  ;;  %v614_v45 = vld [vmem:[#allocation2 + $0x48] sm:$0xff] }
  0x32   : > { %v1617_v44 = vmul.f32 0.3, %v624_v34  ;;  %v630_v46 = vld [vmem:[#allocation2 + $0xc0] sm:$0xff]  ;;  %v1619_v47 = vmul.f32 0.3, %v613_v37  ;;  %v612_v49 = vld [vmem:[#allocation2 + $0x68] sm:$0xff] }
  0x33   : > { %1342 = vmatpush3.bf16.msra.mxu0 %v1444_v4  ;;  %1394 = vmatpush3.bf16.msra.mxu1 %v1444_v4  ;;  %v1621_v48 = vmul.f32 0.3, %v629_v38  ;;  %v628_v50 = vld [vmem:[#allocation2 + $0x90] sm:$0xff]  ;;  %v1623_v51 = vmul.f32 0.3, %v611_v41  ;;  %v617_v53 = vld [vmem:[#allocation2 + $0xe8] sm:$0xff] }
  0x34   : > { %1343 = vmatprep.subr.bf16.mxu0 %v1445_v7  ;;  %1387 = vmatprep.subr.bf16.mxu1 %v1445_v7  ;;  %v1625_v52 = vmul.f32 0.3, %v627_v42  ;;  %v1627_v54 = vmul.f32 0.3, %v614_v45  ;;  %v1629_v55 = vmul.f32 0.3, %v630_v46 }
  0x35   : > { %v633_v56 = vld [vmem:[#allocation2 + $0x10] sm:$0xff]  ;;  %v615_v57 = vld [vmem:[#allocation2 + $0x80] sm:$0xff]  ;;  %v1636_v59 = vmul.f32 0.3, %v612_v49  ;;  %v1638_v60 = vmul.f32 0.3, %v628_v50 }
  0x36   : > { %v1634_v58 = vld [vmem:[%s1807_s2] ss:$0 sm:$0xff]  ;;  %v631_v61 = vld [vmem:[#allocation2 + $0xa8] sm:$0xff]  ;;  %v1640_v62 = vmul.f32 0.3, %v617_v53  ;;  %v618_v63 = vld [vmem:[#allocation2 + $0xb8] sm:$0xff] }
  0x37   : > { %1344 = vmatpush3.bf16.msra.mxu0 %v1445_v7  ;;  %1395 = vmatpush3.bf16.msra.mxu1 %v1445_v7  ;;  %v634_v0 = vld [vmem:[#allocation2 + $0x28] sm:$0xff]  ;;  %v1642_v2 = vmul.f32 0.3, %v633_v56  ;;  %v1644_v3 = vmul.f32 0.3, %v615_v57  ;;  %v632_v4 = vld [vmem:[#allocation2 + $0xd0] sm:$0xff] }
  0x38   : > { %1345 = vmatprep.subr.bf16.mxu0 %v1446_v8  ;;  %1388 = vmatprep.subr.bf16.mxu1 %v1446_v8  ;;  %v616_v1 = vld [vmem:[#allocation2 + $0x88] sm:$0xff]  ;;  %v1646_v5 = vmul.f32 0.3, %v631_v61  ;;  %v637_v7 = vld [vmem:[#allocation2 + $0x20] sm:$0xff]  ;;  %v620_v29 = vld [vmem:[#allocation2 + $0xf0] sm:$0xff]  ;;  %v1506_v57 = vmov 0.0  }
  0x39   : > { %v621_v6 = vld [vmem:[#allocation2 + $0x8] sm:$0xff]  ;;  %v636_v30 = vld [vmem:[#allocation2 + $0xf8] sm:$0xff]  ;;  %v1676_v50 = vmul.f32 0.3, %v620_v29 }
  0x3a   : > { %v1678_v53 = vmul.f32 0.3, %v636_v30 }
  0x3b   : > { %1346 = vmatpush3.bf16.msra.mxu0 %v1446_v8  ;;  %1396 = vmatpush3.bf16.msra.mxu1 %v1446_v8  ;;  %v619_v8 = vld [vmem:[#allocation2 + $0x60] sm:$0xff] }
  0x3c   : > { %1347 = vmatprep.subr.bf16.mxu0 %v1447_v9  ;;  %1389 = vmatprep.subr.bf16.mxu1 %v1447_v9 }
  0x3f   : > { %1348 = vmatpush3.bf16.msra.mxu0 %v1447_v9  ;;  %1397 = vmatpush3.bf16.msra.mxu1 %v1447_v9 }
  0x40   : > { %1349 = vmatprep.subr.bf16.mxu0 %v1448_v10  ;;  %1390 = vmatprep.subr.bf16.mxu1 %v1448_v10 }
  0x43   : > { %1350 = vmatpush3.bf16.msra.mxu0 %v1448_v10  ;;  %1398 = vmatpush3.bf16.msra.mxu1 %v1448_v10 }
  0x46   : > { %1352 = vmatmul.mubr.bf16.vlgmr.msra.gmra.mxu0 %v1451_v11  ;;  %1368 = vmatmul.mubr.bf16.vlgmr.msra.gmra.mxu1 %v1452_v12  ;;  %v1648_v11 = vmul.f32 0.3, %v618_v63  ;;  %v1650_v12 = vmul.f32 0.3, %v634_v0 }
  0x47   : > { %1355 = vmatprep.mubr.bf16.mxu0 %v1453_v13  ;;  %1371 = vmatprep.mubr.bf16.mxu1 %v1454_v14  ;;  %v1652_v13 = vmul.f32 0.3, %v616_v1 }
  0x4e   : > { %1356 = vmatmul.mubr.bf16.gmra.mxu0 %v1455_v15  ;;  %1372 = vmatmul.mubr.bf16.gmra.mxu1 %v1456_v16  ;;  %v1656_v16 = vmul.f32 0.3, %v632_v4 }
  0x4f   : > { %1359 = vmatprep.mubr.bf16.mxu0 %v1457_v17  ;;  %1375 = vmatprep.mubr.bf16.mxu1 %v1458_v18  ;;  %v635_v17 = vld [vmem:[#allocation2 + $0xa0] sm:$0xff]  ;;  %v622_v18 = vld [vmem:[#allocation2 + $0x78] sm:$0xff] }
  0x50   : > { %v1666_v37 = vmul.f32 0.3, %v635_v17  ;;  %v1668_v38 = vmul.f32 0.3, %v622_v18 }
  0x56   : > { %1360 = vmatmul.mubr.bf16.gmra.mxu0 %v1459_v19  ;;  %1376 = vmatmul.mubr.bf16.gmra.mxu1 %v1460_v20  ;;  %v638_v19 = vld [vmem:[#allocation2 + $0x98] sm:$0xff] }
  0x57   : > { %1363 = vmatprep.mubr.bf16.mxu0 %v1461_v21  ;;  %1379 = vmatprep.mubr.bf16.mxu1 %v1462_v22  ;;  %v1658_v22 = vmul.f32 0.3, %v621_v6  ;;  %v1670_v41 = vmul.f32 0.3, %v638_v19 }
  0x5e   : > { %1364 = vmatmul.mubr.bf16.gmra.mxu0 %v1463_v23  ;;  %1380 = vmatmul.mubr.bf16.gmra.mxu1 %v1464_v24  ;;  %v1660_v23 = vmul.f32 0.3, %v637_v7  ;;  %v1662_v24 = vmul.f32 0.3, %v619_v8 }
 0x106   : > { %v1353_v9 = vpop.f32.mrf.mxu0  ;;  %v1369_v10 = vpop.f32.mrf.mxu1 }
 0x107   : > { %v489_v14 = vadd.f32 %v1353_v9, %v1634_v58  ;;  %v553_v15 = vadd.f32 %v1369_v10, %v1634_v58 }
 0x108   : > { %v480_v20 = vpop.f32.mrf.mxu0  ;;  %v544_v21 = vpop.f32.mrf.mxu1 }
 0x109   : > { %v673_v25 = vadd.f32 %v641_v31, %v489_v14  ;;  %v689_v26 = vadd.f32 %v657_v32, %v553_v15  ;;  %v481_v27 = vadd.f32 %v1634_v58, %v480_v20  ;;  %v545_v28 = vadd.f32 %v1634_v58, %v544_v21 }
 0x10a   : > { %v1354_v33 = vpop.f32.mrf.mxu0  ;;  %v1370_v34 = vpop.f32.mrf.mxu1 }
 0x10b   : > { %vm705_vm0 = vcmp.ge.f32.partialorder %v673_v25, 0.5  ;;  %vm721_vm1 = vcmp.ge.f32.partialorder %v689_v26, 0.5  ;;  %v671_v42 = vadd.f32 %v1607_v35, %v481_v27  ;;  %v687_v31 = vadd.f32 %v1609_v36, %v545_v28 }
 0x10c   : > { %v737_v32 = vsel %vm705_vm0, 0.0, %v673_v25  ;;  %v753_v45 = vsel %vm721_vm1, 0.0, %v689_v26  ;;  %v483_v46 = vpop.f32.mrf.mxu0  ;;  %v547_v49 = vpop.f32.mrf.mxu1  ;;  %v492_v56 = vadd.f32 %v1354_v33, %v1634_v58  ;;  %v556_v35 = vadd.f32 %v1370_v34, %v1634_v58 }
 0x10d   : > { %769 = vst [vmem:[#allocation2 + $0xd8] sm:$0xff] %v737_v32  ;;  %785 = vst [vmem:[#allocation2 + $0x40] sm:$0xff] %v753_v45  ;;  %vm703_vm2 = vcmp.ge.f32.partialorder %v671_v42, 0.5  ;;  %vm719_vm3 = vcmp.ge.f32.partialorder %v687_v31, 0.5  ;;  %v1152_v36 = vsel %vm705_vm0, 1.0, %v1506_v57  ;;  %v1168_v61 = vsel %vm721_vm1, 1.0, %v1506_v57 }
 0x10e   : > { %v735_v63 = vsel %vm703_vm2, 0.0, %v671_v42  ;;  %v751_v0 = vsel %vm719_vm3, 0.0, %v687_v31  ;;  %v1357_v1 = vpop.f32.mrf.mxu0  ;;  %v1373_v4 = vpop.f32.mrf.mxu1  ;;  %v674_v6 = vadd.f32 %v1611_v39, %v492_v56  ;;  %v690_v7 = vadd.f32 %v1613_v40, %v556_v35 }
 0x10f   : > { %767 = vst [vmem:[#allocation2 + $0xb0] sm:$0xff] %v735_v63  ;;  %783 = vst [vmem:[#allocation2 + $0x38] sm:$0xff] %v751_v0  ;;  %v484_v8 = vadd.f32 %v1634_v58, %v483_v46  ;;  %v548_v9 = vadd.f32 %v1634_v58, %v547_v49  ;;  %v1150_v10 = vsel %vm703_vm2, 1.0, %v1506_v57  ;;  %v1166_v14 = vsel %vm719_vm3, 1.0, %v1506_v57 }
 0x110   : > { %v505_v15 = vadd.f32 %v1357_v1, %v1634_v58  ;;  %v569_v17 = vadd.f32 %v1373_v4, %v1634_v58  ;;  %v496_v18 = vpop.f32.mrf.mxu0  ;;  %v560_v19 = vpop.f32.mrf.mxu1  ;;  %vm706_vm4 = vcmp.ge.f32.partialorder %v674_v6, 0.5  ;;  %vm722_vm5 = vcmp.ge.f32.partialorder %v690_v7, 0.5 }
 0x111   : > { %v672_v39 = vadd.f32 %v1615_v43, %v484_v8  ;;  %v688_v40 = vadd.f32 %v1617_v44, %v548_v9  ;;  %v738_v20 = vsel %vm706_vm4, 0.0, %v674_v6  ;;  %v1153_v21 = vsel %vm706_vm4, 1.0, %v1506_v57 }
 0x112   : > { %v754_v25 = vsel %vm722_vm5, 0.0, %v690_v7  ;;  %v1169_v26 = vsel %vm722_vm5, 1.0, %v1506_v57  ;;  %v1358_v27 = vpop.f32.mrf.mxu0  ;;  %v1374_v28 = vpop.f32.mrf.mxu1  ;;  %770 = vst [vmem:[#allocation2 + $0x18] sm:$0xff] %v738_v20  ;;  %v1252_v29 = vpack.c.bf16 %v1153_v21, %v1152_v36  ;;  %v677_v46 = vadd.f32 %v1619_v47, %v505_v15 }
 0x113   : > { %786 = vst [vmem:[#allocation2 + $0xc8] sm:$0xff] %v754_v25  ;;  %v1276_v30 = vpack.c.bf16 %v1169_v26, %v1168_v61  ;;  %vm704_vm6 = vcmp.ge.f32.partialorder %v672_v39, 0.5  ;;  %vm720_vm7 = vcmp.ge.f32.partialorder %v688_v40, 0.5  ;;  %v693_v49 = vadd.f32 %v1621_v48, %v569_v17 }
 0x114   : > { %v736_v33 = vsel %vm704_vm6, 0.0, %v672_v39  ;;  %v1151_v43 = vsel %vm704_vm6, 1.0, %v1506_v57  ;;  %v752_v44 = vsel %vm720_vm7, 0.0, %v688_v40  ;;  %v1167_v34 = vsel %vm720_vm7, 1.0, %v1506_v57  ;;  %v499_v42 = vpop.f32.mrf.mxu0  ;;  %v563_v31 = vpop.f32.mrf.mxu1  ;;  %1296 = vst [vmem:[%s1565_s29 + $0x8] sm:$0xff] %v1252_v29  }
 0x115   : > { %1304 = vst [vmem:[%s1565_s29 + $0x48] sm:$0xff] %v1276_v30   ;;  %768 = vst [vmem:[#allocation2] sm:$0xff] %v736_v33  ;;  %v1249_v32 = vpack.c.bf16 %v1151_v43, %v1150_v10  ;;  %v1273_v45 = vpack.c.bf16 %v1167_v34, %v1166_v14  ;;  %v497_v56 = vadd.f32 %v1634_v58, %v496_v18  ;;  %vm709_vm8 = vcmp.ge.f32.partialorder %v677_v46, 0.5 }
 0x116   : > { %784 = vst [vmem:[#allocation2 + $0x58] sm:$0xff] %v752_v44  ;;  %v561_v35 = vadd.f32 %v1634_v58, %v560_v19  ;;  %v508_v36 = vadd.f32 %v1358_v27, %v1634_v58  ;;  %v572_v61 = vadd.f32 %v1374_v28, %v1634_v58  ;;  %v1361_v63 = vpop.f32.mrf.mxu0  ;;  %v1377_v0 = vpop.f32.mrf.mxu1  ;;  %vm725_vm9 = vcmp.ge.f32.partialorder %v693_v49, 0.5 }
 0x117   : > { %1250 = vst [vmem:[%s1565_s29] sm:$0xff] %v1249_v32   ;;  %1303 = vst [vmem:[%s1565_s29 + $0x40] sm:$0xff] %v1273_v45   ;;  %v500_v1 = vadd.f32 %v1634_v58, %v499_v42  ;;  %v564_v47 = vadd.f32 %v1634_v58, %v563_v31  ;;  %v741_v4 = vsel %vm709_vm8, 0.0, %v677_v46  ;;  %v1156_v48 = vsel %vm709_vm8, 1.0, %v1506_v57 }
 0x118   : > { %v757_v6 = vsel %vm725_vm9, 0.0, %v693_v49  ;;  %v1172_v7 = vsel %vm725_vm9, 1.0, %v1506_v57  ;;  %v512_v8 = vpop.f32.mrf.mxu0  ;;  %v576_v9 = vpop.f32.mrf.mxu1  ;;  %773 = vst [vmem:[#allocation2 + $0x30] sm:$0xff] %v741_v4  ;;  %v675_v10 = vadd.f32 %v1623_v51, %v497_v56  ;;  %v691_v14 = vadd.f32 %v1625_v52, %v561_v35 }
 0x119   : > { %789 = vst [vmem:[#allocation2 + $0x70] sm:$0xff] %v757_v6  ;;  %v678_v15 = vadd.f32 %v1627_v54, %v508_v36  ;;  %v694_v17 = vadd.f32 %v1629_v55, %v572_v61  ;;  %v676_v18 = vadd.f32 %v1636_v59, %v500_v1  ;;  %v692_v19 = vadd.f32 %v1638_v60, %v564_v47 }
 0x11a   : > { %v521_v39 = vadd.f32 %v1361_v63, %v1634_v58  ;;  %v585_v40 = vadd.f32 %v1377_v0, %v1634_v58  ;;  %v1362_v20 = vpop.f32.mrf.mxu0  ;;  %v1378_v21 = vpop.f32.mrf.mxu1  ;;  %vm707_vm10 = vcmp.ge.f32.partialorder %v675_v10, 0.5  ;;  %vm723_vm11 = vcmp.ge.f32.partialorder %v691_v14, 0.5 }
 0x11b   : > { %vm710_vm12 = vcmp.ge.f32.partialorder %v678_v15, 0.5  ;;  %vm726_vm13 = vcmp.ge.f32.partialorder %v694_v17, 0.5  ;;  %v739_v51 = vsel %vm707_vm10, 0.0, %v675_v10  ;;  %v1154_v52 = vsel %vm707_vm10, 1.0, %v1506_v57 }
 0x11c   : > { %v755_v54 = vsel %vm723_vm11, 0.0, %v691_v14  ;;  %v1170_v55 = vsel %vm723_vm11, 1.0, %v1506_v57  ;;  %v515_v25 = vpop.f32.mrf.mxu0  ;;  %v579_v59 = vpop.f32.mrf.mxu1  ;;  %771 = vst [vmem:[#allocation2 + $0x50] sm:$0xff] %v739_v51  ;;  %v742_v60 = vsel %vm710_vm12, 0.0, %v678_v15  ;;  %v1157_v26 = vsel %vm710_vm12, 1.0, %v1506_v57 }
 0x11d   : > { %787 = vst [vmem:[#allocation2 + $0xe0] sm:$0xff] %v755_v54  ;;  %v758_v27 = vsel %vm726_vm13, 0.0, %v694_v17  ;;  %v1173_v28 = vsel %vm726_vm13, 1.0, %v1506_v57  ;;  %774 = vst [vmem:[#allocation2 + $0x48] sm:$0xff] %v742_v60  ;;  %v1258_v29 = vpack.c.bf16 %v1157_v26, %v1156_v48  ;;  %vm708_vm14 = vcmp.ge.f32.partialorder %v676_v18, 0.5 }
 0x11e   : > { %790 = vst [vmem:[#allocation2 + $0xc0] sm:$0xff] %v758_v27  ;;  %v1282_v30 = vpack.c.bf16 %v1173_v28, %v1172_v7  ;;  %vm724_vm15 = vcmp.ge.f32.partialorder %v692_v19, 0.5  ;;  %v1365_v33 = vpop.f32.mrf.mxu0  ;;  %v1381_v43 = vpop.f32.mrf.mxu1  ;;  %v740_v44 = vsel %vm708_vm14, 0.0, %v676_v18  ;;  %v1155_v34 = vsel %vm708_vm14, 1.0, %v1506_v57 }
 0x11f   : > { %v756_v42 = vsel %vm724_vm15, 0.0, %v692_v19  ;;  %v1171_v31 = vsel %vm724_vm15, 1.0, %v1506_v57  ;;  %1298 = vst [vmem:[%s1565_s29 + $0x18] sm:$0xff] %v1258_v29   ;;  %772 = vst [vmem:[#allocation2 + $0x68] sm:$0xff] %v740_v44  ;;  %v1255_v32 = vpack.c.bf16 %v1155_v34, %v1154_v52  ;;  %v681_v46 = vadd.f32 %v1640_v62, %v521_v39 }
 0x120   : > { %1306 = vst [vmem:[%s1565_s29 + $0x58] sm:$0xff] %v1282_v30   ;;  %788 = vst [vmem:[#allocation2 + $0x90] sm:$0xff] %v756_v42  ;;  %v1279_v45 = vpack.c.bf16 %v1171_v31, %v1170_v55  ;;  %v697_v49 = vadd.f32 %v1642_v2, %v585_v40  ;;  %v513_v56 = vadd.f32 %v1634_v58, %v512_v8  ;;  %v528_v1 = vpop.f32.mrf.mxu0  ;;  %v592_v62 = vpop.f32.mrf.mxu1 }
 0x121   : > { %v577_v35 = vadd.f32 %v1634_v58, %v576_v9  ;;  %v524_v36 = vadd.f32 %v1362_v20, %v1634_v58  ;;  %v588_v61 = vadd.f32 %v1378_v21, %v1634_v58  ;;  %1297 = vst [vmem:[%s1565_s29 + $0x10] sm:$0xff] %v1255_v32   ;;  %vm713_vm0 = vcmp.ge.f32.partialorder %v681_v46, 0.5 }
 0x122   : > { %1305 = vst [vmem:[%s1565_s29 + $0x50] sm:$0xff] %v1279_v45   ;;  %vm729_vm1 = vcmp.ge.f32.partialorder %v697_v49, 0.5  ;;  %v516_v63 = vadd.f32 %v1634_v58, %v515_v25  ;;  %v580_v0 = vadd.f32 %v1634_v58, %v579_v59  ;;  %v745_v47 = vsel %vm713_vm0, 0.0, %v681_v46  ;;  %v1366_v18 = vpop.f32.mrf.mxu0 }
 0x123   : > { %v1160_v2 = vsel %vm713_vm0, 1.0, %v1506_v57  ;;  %v761_v4 = vsel %vm729_vm1, 0.0, %v697_v49  ;;  %v1176_v48 = vsel %vm729_vm1, 1.0, %v1506_v57  ;;  %777 = vst [vmem:[#allocation2 + $0xe8] sm:$0xff] %v745_v47  ;;  %v679_v6 = vadd.f32 %v1644_v3, %v513_v56  ;;  %v1382_v3 = vpop.f32.mrf.mxu1 }
 0x124   : > { %793 = vst [vmem:[#allocation2 + $0x10] sm:$0xff] %v761_v4  ;;  %v695_v7 = vadd.f32 %v1646_v5, %v577_v35  ;;  %v682_v8 = vadd.f32 %v1648_v11, %v524_v36  ;;  %v698_v9 = vadd.f32 %v1650_v12, %v588_v61  ;;  %v680_v10 = vadd.f32 %v1652_v13, %v516_v63  ;;  %v531_v25 = vpop.f32.mrf.mxu0 }
 0x125   : > { %v696_v14 = vadd.f32 %v1656_v16, %v580_v0  ;;  %v537_v15 = vadd.f32 %v1365_v33, %v1634_v58  ;;  %v601_v17 = vadd.f32 %v1381_v43, %v1634_v58  ;;  %vm711_vm2 = vcmp.ge.f32.partialorder %v679_v6, 0.5  ;;  %v595_v59 = vpop.f32.mrf.mxu1 }
 0x126   : > { %vm727_vm3 = vcmp.ge.f32.partialorder %v695_v7, 0.5  ;;  %vm714_vm4 = vcmp.ge.f32.partialorder %v682_v8, 0.5  ;;  %vm730_vm5 = vcmp.ge.f32.partialorder %v698_v9, 0.5  ;;  %v743_v19 = vsel %vm711_vm2, 0.0, %v679_v6 }
 0x127   : > { %v1158_v5 = vsel %vm711_vm2, 1.0, %v1506_v57  ;;  %v759_v11 = vsel %vm727_vm3, 0.0, %v695_v7  ;;  %v1174_v12 = vsel %vm727_vm3, 1.0, %v1506_v57  ;;  %775 = vst [vmem:[#allocation2 + $0x80] sm:$0xff] %v743_v19  ;;  %v746_v13 = vsel %vm714_vm4, 0.0, %v682_v8 }
 0x128   : > { %791 = vst [vmem:[#allocation2 + $0xa8] sm:$0xff] %v759_v11  ;;  %v1161_v16 = vsel %vm714_vm4, 1.0, %v1506_v57  ;;  %v762_v39 = vsel %vm730_vm5, 0.0, %v698_v9  ;;  %v1177_v40 = vsel %vm730_vm5, 1.0, %v1506_v57  ;;  %778 = vst [vmem:[#allocation2 + $0xb8] sm:$0xff] %v746_v13  ;;  %vm712_vm6 = vcmp.ge.f32.partialorder %v680_v10, 0.5 }
 0x129   : > { %v1264_v20 = vpack.c.bf16 %v1161_v16, %v1160_v2  ;;  %794 = vst [vmem:[#allocation2 + $0x28] sm:$0xff] %v762_v39  ;;  %v1288_v21 = vpack.c.bf16 %v1177_v40, %v1176_v48  ;;  %vm728_vm7 = vcmp.ge.f32.partialorder %v696_v14, 0.5  ;;  %v744_v51 = vsel %vm712_vm6, 0.0, %v680_v10 }
 0x12a   : > { %v1159_v52 = vsel %vm712_vm6, 1.0, %v1506_v57  ;;  %v760_v54 = vsel %vm728_vm7, 0.0, %v696_v14  ;;  %v1175_v55 = vsel %vm728_vm7, 1.0, %v1506_v57  ;;  %776 = vst [vmem:[#allocation2 + $0x88] sm:$0xff] %v744_v51  ;;  %v685_v27 = vadd.f32 %v1658_v22, %v537_v15 }
 0x12b   : > { %1300 = vst [vmem:[%s1565_s29 + $0x28] sm:$0xff] %v1264_v20   ;;  %1308 = vst [vmem:[%s1565_s29 + $0x68] sm:$0xff] %v1288_v21   ;;  %v1261_v60 = vpack.c.bf16 %v1159_v52, %v1158_v5  ;;  %v1285_v26 = vpack.c.bf16 %v1175_v55, %v1174_v12  ;;  %v701_v28 = vadd.f32 %v1660_v23, %v601_v17 }
 0x12c   : > { %792 = vst [vmem:[#allocation2 + $0xd0] sm:$0xff] %v760_v54  ;;  %v529_v29 = vadd.f32 %v1634_v58, %v528_v1  ;;  %v593_v30 = vadd.f32 %v1634_v58, %v592_v62  ;;  %v540_v33 = vadd.f32 %v1366_v18, %v1634_v58  ;;  %v604_v43 = vadd.f32 %v1382_v3, %v1634_v58 }
 0x12d   : > { %1299 = vst [vmem:[%s1565_s29 + $0x20] sm:$0xff] %v1261_v60   ;;  %1307 = vst [vmem:[%s1565_s29 + $0x60] sm:$0xff] %v1285_v26   ;;  %vm717_vm8 = vcmp.ge.f32.partialorder %v685_v27, 0.5  ;;  %vm733_vm9 = vcmp.ge.f32.partialorder %v701_v28, 0.5  ;;  %v532_v44 = vadd.f32 %v1634_v58, %v531_v25  ;;  %v596_v34 = vadd.f32 %v1634_v58, %v595_v59 }
 0x12e   : > { %v749_v42 = vsel %vm717_vm8, 0.0, %v685_v27  ;;  %v765_v22 = vsel %vm733_vm9, 0.0, %v701_v28  ;;  %v683_v23 = vadd.f32 %v1662_v24, %v529_v29  ;;  %v699_v31 = vadd.f32 %v1666_v37, %v593_v30 }
 0x12f   : > { %781 = vst [vmem:[#allocation2 + $0x8] sm:$0xff] %v749_v42  ;;  %797 = vst [vmem:[#allocation2 + $0x20] sm:$0xff] %v765_v22  ;;  %v686_v32 = vadd.f32 %v1668_v38, %v540_v33  ;;  %v702_v45 = vadd.f32 %v1670_v41, %v604_v43  ;;  %v1164_v46 = vsel %vm717_vm8, 1.0, %v1506_v57  ;;  %v1180_v49 = vsel %vm733_vm9, 1.0, %v1506_v57 }
 0x130   : > { %v684_v56 = vadd.f32 %v1676_v50, %v532_v44  ;;  %v700_v58 = vadd.f32 %v1678_v53, %v596_v34  ;;  %vm715_vm10 = vcmp.ge.f32.partialorder %v683_v23, 0.5  ;;  %vm731_vm11 = vcmp.ge.f32.partialorder %v699_v31, 0.5 }
 0x131   : > { %vm718_vm12 = vcmp.ge.f32.partialorder %v686_v32, 0.5  ;;  %vm734_vm13 = vcmp.ge.f32.partialorder %v702_v45, 0.5  ;;  %v747_v35 = vsel %vm715_vm10, 0.0, %v683_v23  ;;  %v1162_v24 = vsel %vm715_vm10, 1.0, %v1506_v57 }
 0x132   : > { %v763_v37 = vsel %vm731_vm11, 0.0, %v699_v31  ;;  %v1178_v38 = vsel %vm731_vm11, 1.0, %v1506_v57  ;;  %779 = vst [vmem:[#allocation2 + $0x60] sm:$0xff] %v747_v35  ;;  %v750_v41 = vsel %vm718_vm12, 0.0, %v686_v32  ;;  %v1165_v36 = vsel %vm718_vm12, 1.0, %v1506_v57 }
 0x133   : > { %795 = vst [vmem:[#allocation2 + $0xa0] sm:$0xff] %v763_v37  ;;  %v766_v50 = vsel %vm734_vm13, 0.0, %v702_v45  ;;  %v1181_v53 = vsel %vm734_vm13, 1.0, %v1506_v57  ;;  %782 = vst [vmem:[#allocation2 + $0x78] sm:$0xff] %v750_v41  ;;  %v1270_v61 = vpack.c.bf16 %v1165_v36, %v1164_v46  ;;  %vm716_vm14 = vcmp.ge.f32.partialorder %v684_v56, 0.5 }
 0x134   : > { %798 = vst [vmem:[#allocation2 + $0x98] sm:$0xff] %v766_v50  ;;  %v1294_v63 = vpack.c.bf16 %v1181_v53, %v1180_v49  ;;  %vm732_vm15 = vcmp.ge.f32.partialorder %v700_v58, 0.5  ;;  %v748_v0 = vsel %vm716_vm14, 0.0, %v684_v56  ;;  %v1163_v1 = vsel %vm716_vm14, 1.0, %v1506_v57 }
 0x135   : > { %v764_v62 = vsel %vm732_vm15, 0.0, %v700_v58  ;;  %v1179_v47 = vsel %vm732_vm15, 1.0, %v1506_v57  ;;  %1302 = vst [vmem:[%s1565_s29 + $0x38] sm:$0xff] %v1270_v61   ;;  %780 = vst [vmem:[#allocation2 + $0xf0] sm:$0xff] %v748_v0  ;;  %v1267_v2 = vpack.c.bf16 %v1163_v1, %v1162_v24 }
 0x136   : > { %1310 = vst [vmem:[%s1565_s29 + $0x78] sm:$0xff] %v1294_v63   ;;  %796 = vst [vmem:[#allocation2 + $0xf8] sm:$0xff] %v764_v62  ;;  %v1291_v4 = vpack.c.bf16 %v1179_v47, %v1178_v38 }
 0x137   : > { %1301 = vst [vmem:[%s1565_s29 + $0x30] sm:$0xff] %v1267_v2  }
 0x138   : > { %1309 = vst [vmem:[%s1565_s29 + $0x70] sm:$0xff] %v1291_v4  }
 0x139 PF: > { %s13_s16 = sadd.s32 1, %s1503_s16   ;;  %s1809_s12 = smov %s1495_s14 }
 0x13a   : > { %p10_p8 = scmp.ge.s32.totalorder %s13_s16, 10   ;;  %s1810_s13 = smov %s1499_s15 }
 0x13b   : > { %s1811_s14 = smov %s1814_s17  ;;  %s1812_s15 = smov %s1818_s18 }
 0x13c   :  { %12 = sbr.rel (!%p10_p8) target bundleno = 3 (0x3), region = 66 }

// kernel: resnetlif50_forward.57
= control target key start
LH: loop header
LB: loop body
LE: loop exit
PB: predicated region body
PF: predicated region fallthrough
CT: control target
= control target key end

     0   :  { %s1020_s12 = smov 0   ;;  %s1022_s13 = smov 0   ;;  %s1166_s0 = inlined_call_operand.vmem [shape: bf16[4,128,128], index: 0, kind: input, shape index: {}]   ;;  %s1167_s1 = inlined_call_operand.vmem [shape: bf16[128,128], index: 1, kind: input, shape index: {}]   ;;  %s1168_s2 = inlined_call_operand.vmem [shape: f32[1,128], index: 2, kind: input, shape index: {}]   ;;  %s1169_s3 = inlined_call_operand.vmem [shape: bf16[4,128,128], index: 3, kind: output, shape index: {}]  }
   0x1   :  { %s1024_s14 = smov 0  }
   0x2 LB: > { %s22_s15 = sadd.s32 1, %s992_s13  ;;  %p762_p0 = scmp.ge.s32.totalorder %s996_s14, 1  ;;  %s996_s14 = sphi %s1024_s14, %s13_s14   ;;  %s992_s13 = sphi %s1022_s13, %s1171_s13   ;;  %s988_s12 = sphi %s1020_s12, %s1170_s12  }
   0x3   : > { %p23_p1 = scmp.ge.s32.totalorder %s22_s15, 4  ;;  %p158_p2 = scmp.lt.s32.totalorder %s996_s14, 5 }
   0x5   : > { %s1173_s15 = smov (%p23_p1, %s22_s15), 0  ;;  %p159_p3 = pnand %p762_p0, %p158_p2 }
   0x6   : > { %p191_p4 = scmp.lt.s32.totalorder (!%p159_p3), %s988_s12, 3  ;;  %p767_p5 = scmp.ne.s32.totalorder (!%p159_p3), %s988_s12, 0 }
   0x7   : > { %162 = sbr.rel (%p159_p3) target bundleno = 281 (0x119), region = 32 }
   0xc   : > { %s192_s16 = scalar_select %p191_p4, %s988_s12, 3 }
   0xd   : > { %214 = sbr.rel (%p767_p5) target bundleno = 27 (0x1b), region = 36 }
   0xe   : > { %s819_s17 = sshll.u32 %s192_s16, 6 }
   0xf   : > { %s1041_s20 = scalar_lea.vmem %s1166_s0, %s819_s17  ;;  %s1046_s23 = scalar_lea.vmem %s1169_s3, %s819_s17 }
  0x12   : > { %v998_v0 = vmov 0.0  }
  0x13   : > { %215 = vst [vmem:[#allocation2 + $0x30] sm:$0xff] %v998_v0  ;;  %216 = vst [vmem:[#allocation2] sm:$0xff] %v998_v0 }
  0x14   : > { %217 = vst [vmem:[#allocation2 + $0x58] sm:$0xff] %v998_v0  ;;  %218 = vst [vmem:[#allocation2 + $0x18] sm:$0xff] %v998_v0 }
  0x15   : > { %219 = vst [vmem:[#allocation2 + $0x50] sm:$0xff] %v998_v0  ;;  %220 = vst [vmem:[#allocation2 + $0x68] sm:$0xff] %v998_v0 }
  0x16   : > { %221 = vst [vmem:[#allocation2 + $0x8] sm:$0xff] %v998_v0  ;;  %222 = vst [vmem:[#allocation2 + $0x48] sm:$0xff] %v998_v0 }
  0x17   : > { %223 = vst [vmem:[#allocation2 + $0x40] sm:$0xff] %v998_v0  ;;  %224 = vst [vmem:[#allocation2 + $0x20] sm:$0xff] %v998_v0 }
  0x18   : > { %225 = vst [vmem:[#allocation2 + $0x10] sm:$0xff] %v998_v0  ;;  %226 = vst [vmem:[#allocation2 + $0x38] sm:$0xff] %v998_v0 }
  0x19   : > { %227 = vst [vmem:[#allocation2 + $0x60] sm:$0xff] %v998_v0  ;;  %228 = vst [vmem:[#allocation2 + $0x70] sm:$0xff] %v998_v0 }
  0x1a   : > { %229 = vst [vmem:[#allocation2 + $0x78] sm:$0xff] %v998_v0  ;;  %230 = vst [vmem:[#allocation2 + $0x28] sm:$0xff] %v998_v0 }
  0x1b PF: > { %v958_v1 = vld [vmem:[%s1167_s1 + $0x38] sm:$0xff]   ;;  %v959_v2 = vld [vmem:[%s1167_s1 + $0x30] sm:$0xff]   ;;  %v960_v3 = vld [vmem:[%s1167_s1 + $0x28] sm:$0xff]  }
  0x1c   : > { %884 = vmatprep.subr.bf16.mxu0 %v958_v1  ;;  %916 = vmatprep.subr.bf16.mxu1 %v958_v1  ;;  %v961_v4 = vld [vmem:[%s1167_s1 + $0x20] sm:$0xff]   ;;  %v962_v7 = vld [vmem:[%s1167_s1 + $0x18] sm:$0xff]   ;;  %v963_v8 = vld [vmem:[%s1167_s1 + $0x10] sm:$0xff]  }
  0x1d   : > { %885 = vmatpush3.bf16.msra.mxu0 %v958_v1  ;;  %924 = vmatpush3.bf16.msra.mxu1 %v958_v1  ;;  %v966_v5 = vld [vmem:[%s1041_s20] sm:$0xff]   ;;  %v964_v9 = vld [vmem:[%s1167_s1 + $0x8] sm:$0xff]   ;;  %v970_v13 = vld [vmem:[%s1041_s20 + $0x10] sm:$0xff]  }
  0x1e   : > { %886 = vmatprep.subr.bf16.mxu0 %v959_v2  ;;  %917 = vmatprep.subr.bf16.mxu1 %v959_v2  ;;  %v967_v6 = vld [vmem:[%s1041_s20 + $0x20] sm:$0xff]   ;;  %v968_v11 = vld [vmem:[%s1041_s20 + $0x8] sm:$0xff]   ;;  %v971_v14 = vld [vmem:[%s1041_s20 + $0x30] sm:$0xff]  }
  0x1f   : > { %900 = vmatprep.mubr.bf16.mxu0 %v966_v5  ;;  %908 = vmatprep.mubr.bf16.mxu1 %v967_v6  ;;  %v965_v10 = vld [vmem:[%s1167_s1] sm:$0xff]   ;;  %v969_v12 = vld [vmem:[%s1041_s20 + $0x28] sm:$0xff]   ;;  %v972_v15 = vld [vmem:[%s1041_s20 + $0x18] sm:$0xff]   ;;  %v999_v6 = vmov 0.0  }
  0x20   : > { %v973_v16 = vld [vmem:[%s1041_s20 + $0x38] sm:$0xff]   ;;  %v473_v18 = vld [vmem:[#allocation2 + $0x10] sm:$0xff]  ;;  %v1083_v20 = vld [vmem:[%s1168_s2] ss:$0 sm:$0xff] }
  0x21   : > { %887 = vmatpush3.bf16.msra.mxu0 %v959_v2  ;;  %925 = vmatpush3.bf16.msra.mxu1 %v959_v2  ;;  %v465_v17 = vld [vmem:[#allocation2 + $0x58] sm:$0xff]  ;;  %v463_v19 = vld [vmem:[#allocation2 + $0x30] sm:$0xff]  ;;  %v471_v21 = vld [vmem:[#allocation2 + $0x40] sm:$0xff]  ;;  %v489_v26 = vmul.f32 0.3, %v473_v18 }
  0x22   : > { %888 = vmatprep.subr.bf16.mxu0 %v960_v3  ;;  %918 = vmatprep.subr.bf16.mxu1 %v960_v3  ;;  %v481_v22 = vmul.f32 0.3, %v465_v17  ;;  %v466_v23 = vld [vmem:[#allocation2 + $0x18] sm:$0xff]  ;;  %v464_v25 = vld [vmem:[#allocation2] sm:$0xff]  ;;  %v479_v27 = vmul.f32 0.3, %v463_v19 }
  0x23   : > { %v474_v24 = vld [vmem:[#allocation2 + $0x38] sm:$0xff]  ;;  %v472_v28 = vld [vmem:[#allocation2 + $0x20] sm:$0xff]  ;;  %v487_v29 = vmul.f32 0.3, %v471_v21  ;;  %v469_v30 = vld [vmem:[#allocation2 + $0x8] sm:$0xff] }
  0x24   : > { %v477_v31 = vld [vmem:[#allocation2 + $0x78] sm:$0xff]  ;;  %v467_v32 = vld [vmem:[#allocation2 + $0x50] sm:$0xff]  ;;  %v482_v35 = vmul.f32 0.3, %v466_v23  ;;  %v490_v36 = vmul.f32 0.3, %v474_v24 }
  0x25   : > { %889 = vmatpush3.bf16.msra.mxu0 %v960_v3  ;;  %926 = vmatpush3.bf16.msra.mxu1 %v960_v3  ;;  %v480_v37 = vmul.f32 0.3, %v464_v25  ;;  %v488_v40 = vmul.f32 0.3, %v472_v28  ;;  %v475_v41 = vld [vmem:[#allocation2 + $0x60] sm:$0xff]  ;;  %v470_v42 = vld [vmem:[#allocation2 + $0x48] sm:$0xff] }
  0x26   : > { %890 = vmatprep.subr.bf16.mxu0 %v961_v4  ;;  %919 = vmatprep.subr.bf16.mxu1 %v961_v4  ;;  %v478_v43 = vld [vmem:[#allocation2 + $0x28] sm:$0xff]  ;;  %v1087_v46 = vmul.f32 0.3, %v469_v30  ;;  %v1089_v47 = vmul.f32 0.3, %v477_v31  ;;  %v476_v54 = vld [vmem:[#allocation2 + $0x70] sm:$0xff] }
  0x27   : > { %v1091_v48 = vmul.f32 0.3, %v467_v32  ;;  %v468_v53 = vld [vmem:[#allocation2 + $0x68] sm:$0xff]  ;;  %v1095_v57 = vmul.f32 0.3, %v475_v41 }
  0x28   : > { %v1097_v58 = vmul.f32 0.3, %v470_v42  ;;  %v1099_v59 = vmul.f32 0.3, %v478_v43  ;;  %v1103_v2 = vmul.f32 0.3, %v468_v53 }
  0x29   : > { %891 = vmatpush3.bf16.msra.mxu0 %v961_v4  ;;  %927 = vmatpush3.bf16.msra.mxu1 %v961_v4  ;;  %v1105_v3 = vmul.f32 0.3, %v476_v54 }
  0x2a   : > { %892 = vmatprep.subr.bf16.mxu0 %v962_v7  ;;  %920 = vmatprep.subr.bf16.mxu1 %v962_v7 }
  0x2d   : > { %893 = vmatpush3.bf16.msra.mxu0 %v962_v7  ;;  %928 = vmatpush3.bf16.msra.mxu1 %v962_v7 }
  0x2e   : > { %894 = vmatprep.subr.bf16.mxu0 %v963_v8  ;;  %921 = vmatprep.subr.bf16.mxu1 %v963_v8 }
  0x31   : > { %895 = vmatpush3.bf16.msra.mxu0 %v963_v8  ;;  %929 = vmatpush3.bf16.msra.mxu1 %v963_v8 }
  0x32   : > { %896 = vmatprep.subr.bf16.mxu0 %v964_v9  ;;  %922 = vmatprep.subr.bf16.mxu1 %v964_v9 }
  0x35   : > { %897 = vmatpush3.bf16.msra.mxu0 %v964_v9  ;;  %930 = vmatpush3.bf16.msra.mxu1 %v964_v9 }
  0x36   : > { %898 = vmatprep.subr.bf16.mxu0 %v965_v10  ;;  %923 = vmatprep.subr.bf16.mxu1 %v965_v10 }
  0x39   : > { %899 = vmatpush3.bf16.msra.mxu0 %v965_v10  ;;  %931 = vmatpush3.bf16.msra.mxu1 %v965_v10 }
  0x3c   : > { %901 = vmatmul.mubr.bf16.vlgmr.msra.gmra.mxu0 %v968_v11  ;;  %909 = vmatmul.mubr.bf16.vlgmr.msra.gmra.mxu1 %v969_v12 }
  0x3d   : > { %904 = vmatprep.mubr.bf16.mxu0 %v970_v13  ;;  %912 = vmatprep.mubr.bf16.mxu1 %v971_v14 }
  0x44   : > { %905 = vmatmul.mubr.bf16.gmra.mxu0 %v972_v15  ;;  %913 = vmatmul.mubr.bf16.gmra.mxu1 %v973_v16 }
  0xfc   : > { %v902_v33 = vpop.f32.mrf.mxu0  ;;  %v910_v34 = vpop.f32.mrf.mxu1 }
  0xfd   : > { %v409_v38 = vadd.f32 %v902_v33, %v1083_v20  ;;  %v441_v39 = vadd.f32 %v910_v34, %v1083_v20 }
  0xfe   : > { %v400_v44 = vpop.f32.mrf.mxu0  ;;  %v432_v45 = vpop.f32.mrf.mxu1 }
  0xff   : > { %v497_v49 = vadd.f32 %v481_v22, %v409_v38  ;;  %v505_v50 = vadd.f32 %v489_v26, %v441_v39  ;;  %v401_v51 = vadd.f32 %v1083_v20, %v400_v44  ;;  %v433_v52 = vadd.f32 %v1083_v20, %v432_v45 }
 0x100   : > { %v903_v55 = vpop.f32.mrf.mxu0  ;;  %v911_v56 = vpop.f32.mrf.mxu1 }
 0x101   : > { %vm513_vm0 = vcmp.ge.f32.partialorder %v497_v49, 0.5  ;;  %vm521_vm1 = vcmp.ge.f32.partialorder %v505_v50, 0.5  ;;  %v495_v60 = vadd.f32 %v479_v27, %v401_v51  ;;  %v503_v61 = vadd.f32 %v487_v29, %v433_v52 }
 0x102   : > { %v529_v62 = vsel %vm513_vm0, 0.0, %v497_v49  ;;  %v537_v63 = vsel %vm521_vm1, 0.0, %v505_v50  ;;  %v403_v0 = vpop.f32.mrf.mxu0  ;;  %v435_v1 = vpop.f32.mrf.mxu1  ;;  %v412_v4 = vadd.f32 %v903_v55, %v1083_v20  ;;  %v444_v5 = vadd.f32 %v911_v56, %v1083_v20 }
 0x103   : > { %545 = vst [vmem:[#allocation2 + $0x58] sm:$0xff] %v529_v62  ;;  %553 = vst [vmem:[#allocation2 + $0x10] sm:$0xff] %v537_v63  ;;  %vm511_vm2 = vcmp.ge.f32.partialorder %v495_v60, 0.5  ;;  %vm519_vm3 = vcmp.ge.f32.partialorder %v503_v61, 0.5  ;;  %v787_v7 = vsel %vm513_vm0, 1.0, %v999_v6  ;;  %v795_v8 = vsel %vm521_vm1, 1.0, %v999_v6 }
 0x104   : > { %v527_v9 = vsel %vm511_vm2, 0.0, %v495_v60  ;;  %v535_v10 = vsel %vm519_vm3, 0.0, %v503_v61  ;;  %v906_v11 = vpop.f32.mrf.mxu0  ;;  %v914_v12 = vpop.f32.mrf.mxu1  ;;  %v498_v13 = vadd.f32 %v482_v35, %v412_v4  ;;  %v506_v14 = vadd.f32 %v490_v36, %v444_v5 }
 0x105   : > { %543 = vst [vmem:[#allocation2 + $0x30] sm:$0xff] %v527_v9  ;;  %551 = vst [vmem:[#allocation2 + $0x40] sm:$0xff] %v535_v10  ;;  %v404_v15 = vadd.f32 %v1083_v20, %v403_v0  ;;  %v436_v16 = vadd.f32 %v1083_v20, %v435_v1  ;;  %v785_v17 = vsel %vm511_vm2, 1.0, %v999_v6  ;;  %v793_v18 = vsel %vm519_vm3, 1.0, %v999_v6 }
 0x106   : > { %v425_v19 = vadd.f32 %v906_v11, %v1083_v20  ;;  %v457_v21 = vadd.f32 %v914_v12, %v1083_v20  ;;  %v416_v22 = vpop.f32.mrf.mxu0  ;;  %v448_v23 = vpop.f32.mrf.mxu1  ;;  %vm514_vm4 = vcmp.ge.f32.partialorder %v498_v13, 0.5  ;;  %vm522_vm5 = vcmp.ge.f32.partialorder %v506_v14, 0.5 }
 0x107   : > { %v496_v24 = vadd.f32 %v480_v37, %v404_v15  ;;  %v504_v25 = vadd.f32 %v488_v40, %v436_v16  ;;  %v530_v26 = vsel %vm514_vm4, 0.0, %v498_v13  ;;  %v788_v27 = vsel %vm514_vm4, 1.0, %v999_v6 }
 0x108   : > { %v538_v28 = vsel %vm522_vm5, 0.0, %v506_v14  ;;  %v796_v29 = vsel %vm522_vm5, 1.0, %v999_v6  ;;  %v907_v30 = vpop.f32.mrf.mxu0  ;;  %v915_v31 = vpop.f32.mrf.mxu1  ;;  %546 = vst [vmem:[#allocation2 + $0x18] sm:$0xff] %v530_v26  ;;  %v841_v32 = vpack.c.bf16 %v788_v27, %v787_v7  ;;  %v501_v42 = vadd.f32 %v1087_v46, %v425_v19 }
 0x109   : > { %554 = vst [vmem:[#allocation2 + $0x38] sm:$0xff] %v538_v28  ;;  %v853_v33 = vpack.c.bf16 %v796_v29, %v795_v8  ;;  %vm512_vm6 = vcmp.ge.f32.partialorder %v496_v24, 0.5  ;;  %vm520_vm7 = vcmp.ge.f32.partialorder %v504_v25, 0.5  ;;  %v509_v43 = vadd.f32 %v1089_v47, %v457_v21 }
 0x10a   : > { %v528_v34 = vsel %vm512_vm6, 0.0, %v496_v24  ;;  %v786_v35 = vsel %vm512_vm6, 1.0, %v999_v6  ;;  %v536_v36 = vsel %vm520_vm7, 0.0, %v504_v25  ;;  %v794_v37 = vsel %vm520_vm7, 1.0, %v999_v6  ;;  %v419_v38 = vpop.f32.mrf.mxu0  ;;  %v451_v39 = vpop.f32.mrf.mxu1  ;;  %861 = vst [vmem:[%s1046_s23 + $0x8] sm:$0xff] %v841_v32  }
 0x10b   : > { %865 = vst [vmem:[%s1046_s23 + $0x28] sm:$0xff] %v853_v33   ;;  %544 = vst [vmem:[#allocation2] sm:$0xff] %v528_v34  ;;  %v838_v40 = vpack.c.bf16 %v786_v35, %v785_v17  ;;  %v850_v41 = vpack.c.bf16 %v794_v37, %v793_v18  ;;  %v417_v44 = vadd.f32 %v1083_v20, %v416_v22  ;;  %vm517_vm8 = vcmp.ge.f32.partialorder %v501_v42, 0.5 }
 0x10c   : > { %552 = vst [vmem:[#allocation2 + $0x20] sm:$0xff] %v536_v36  ;;  %v449_v45 = vadd.f32 %v1083_v20, %v448_v23  ;;  %v428_v49 = vadd.f32 %v907_v30, %v1083_v20  ;;  %v460_v50 = vadd.f32 %v915_v31, %v1083_v20  ;;  %vm525_vm9 = vcmp.ge.f32.partialorder %v509_v43, 0.5 }
 0x10d   : > { %839 = vst [vmem:[%s1046_s23] sm:$0xff] %v838_v40   ;;  %864 = vst [vmem:[%s1046_s23 + $0x20] sm:$0xff] %v850_v41   ;;  %v420_v51 = vadd.f32 %v1083_v20, %v419_v38  ;;  %v452_v52 = vadd.f32 %v1083_v20, %v451_v39  ;;  %v533_v53 = vsel %vm517_vm8, 0.0, %v501_v42  ;;  %v541_v46 = vsel %vm525_vm9, 0.0, %v509_v43 }
 0x10e   : > { %549 = vst [vmem:[#allocation2 + $0x8] sm:$0xff] %v533_v53  ;;  %557 = vst [vmem:[#allocation2 + $0x78] sm:$0xff] %v541_v46  ;;  %v499_v47 = vadd.f32 %v1091_v48, %v417_v44  ;;  %v507_v54 = vadd.f32 %v1095_v57, %v449_v45  ;;  %v502_v55 = vadd.f32 %v1097_v58, %v428_v49  ;;  %v791_v60 = vsel %vm517_vm8, 1.0, %v999_v6 }
 0x10f   : > { %v510_v56 = vadd.f32 %v1099_v59, %v460_v50  ;;  %v799_v61 = vsel %vm525_vm9, 1.0, %v999_v6  ;;  %v500_v62 = vadd.f32 %v1103_v2, %v420_v51  ;;  %v508_v20 = vadd.f32 %v1105_v3, %v452_v52 }
 0x110   : > { %vm515_vm10 = vcmp.ge.f32.partialorder %v499_v47, 0.5  ;;  %vm523_vm11 = vcmp.ge.f32.partialorder %v507_v54, 0.5  ;;  %vm518_vm12 = vcmp.ge.f32.partialorder %v502_v55, 0.5 }
 0x111   : > { %vm526_vm13 = vcmp.ge.f32.partialorder %v510_v56, 0.5  ;;  %v531_v63 = vsel %vm515_vm10, 0.0, %v499_v47  ;;  %v789_v48 = vsel %vm515_vm10, 1.0, %v999_v6  ;;  %v539_v57 = vsel %vm523_vm11, 0.0, %v507_v54 }
 0x112   : > { %v797_v58 = vsel %vm523_vm11, 1.0, %v999_v6  ;;  %547 = vst [vmem:[#allocation2 + $0x50] sm:$0xff] %v531_v63  ;;  %555 = vst [vmem:[#allocation2 + $0x60] sm:$0xff] %v539_v57  ;;  %v534_v59 = vsel %vm518_vm12, 0.0, %v502_v55  ;;  %v792_v0 = vsel %vm518_vm12, 1.0, %v999_v6  ;;  %v542_v1 = vsel %vm526_vm13, 0.0, %v510_v56 }
 0x113   : > { %v800_v2 = vsel %vm526_vm13, 1.0, %v999_v6  ;;  %550 = vst [vmem:[#allocation2 + $0x48] sm:$0xff] %v534_v59  ;;  %v847_v3 = vpack.c.bf16 %v792_v0, %v791_v60  ;;  %558 = vst [vmem:[#allocation2 + $0x28] sm:$0xff] %v542_v1  ;;  %vm516_vm14 = vcmp.ge.f32.partialorder %v500_v62, 0.5  ;;  %vm524_vm15 = vcmp.ge.f32.partialorder %v508_v20, 0.5 }
 0x114   : > { %v859_v4 = vpack.c.bf16 %v800_v2, %v799_v61  ;;  %v532_v5 = vsel %vm516_vm14, 0.0, %v500_v62  ;;  %v790_v7 = vsel %vm516_vm14, 1.0, %v999_v6  ;;  %v540_v8 = vsel %vm524_vm15, 0.0, %v508_v20 }
 0x115   : > { %v798_v9 = vsel %vm524_vm15, 1.0, %v999_v6  ;;  %863 = vst [vmem:[%s1046_s23 + $0x18] sm:$0xff] %v847_v3   ;;  %548 = vst [vmem:[#allocation2 + $0x68] sm:$0xff] %v532_v5  ;;  %v844_v10 = vpack.c.bf16 %v790_v7, %v789_v48 }
 0x116   : > { %867 = vst [vmem:[%s1046_s23 + $0x38] sm:$0xff] %v859_v4   ;;  %556 = vst [vmem:[#allocation2 + $0x70] sm:$0xff] %v540_v8  ;;  %v856_v11 = vpack.c.bf16 %v798_v9, %v797_v58 }
 0x117   : > { %862 = vst [vmem:[%s1046_s23 + $0x10] sm:$0xff] %v844_v10  }
 0x118   : > { %866 = vst [vmem:[%s1046_s23 + $0x30] sm:$0xff] %v856_v11  }
 0x119 PF: > { %s13_s14 = sadd.s32 1, %s996_s14   ;;  %s1170_s12 = smov %s992_s13 }
 0x11a   : > { %p10_p6 = scmp.ge.s32.totalorder %s13_s14, 6   ;;  %s1171_s13 = smov %s1173_s15 }
 0x11c   :  { %12 = sbr.rel (!%p10_p6) target bundleno = 2 (0x2), region = 66 }

// kernel: resnetlif50_forward.56
= control target key start
LH: loop header
LB: loop body
LE: loop exit
PB: predicated region body
PF: predicated region fallthrough
CT: control target
= control target key end

     0   :  { %s2664_s15 = smov 0   ;;  %s5333_s0 = inlined_call_operand.vmem [shape: bf16[8,9,9,128], index: 0, kind: input, shape index: {}]   ;;  %s5334_s1 = inlined_call_operand.vmem [shape: bf16[8,9,9,128], index: 1, kind: input, shape index: {}]   ;;  %s5335_s2 = inlined_call_operand.vmem [shape: bf16[8,9,9,128], index: 2, kind: input, shape index: {}]   ;;  %s5336_s3 = inlined_call_operand.vmem [shape: bf16[8,9,9,128], index: 3, kind: input, shape index: {}]   ;;  %s5337_s4 = inlined_call_operand.vmem [shape: bf16[8,8,8,128], index: 4, kind: output, shape index: {}]  }
   0x1 LB: > { %s2396_s16 = sadd.s32 4294967295, %s2637_s15   ;;  %p2400_p0 = scmp.ge.s32.totalorder %s2637_s15, 1  ;;  %s2637_s15 = sphi %s2664_s15, %s14_s15  }
   0x2   : > { %p200_p1 = scmp.lt.s32.totalorder %s2637_s15, 3 }
   0x4   : > { %p201_p2 = pnand %p2400_p0, %p200_p1 }
   0x6   : > { %204 = sbr.rel (%p201_p2) target bundleno = 368 (0x170), region = 36 }
   0xb   : > { %s2401_s17 = sshll.u32 %s2396_s16, 2  ;;  %vm345_vm0 = vsmask.f32 3328  ;;  %vm346_vm1 = vsmask.f32 7440  ;;  %v5542_v30 = vmov 0 }
   0xc   : > { %p247_p3 = scmp.lt.s32.totalorder %s2401_s17, 7  ;;  %vm2717_vm2 = vmor %vm345_vm0, %vm346_vm1 }
   0xd   : > { %v5543_v30 = vsel %vm2717_vm2, 4294967295, %v5542_v30 }
   0xe   : > { %s6095_s17 = smov (!%p247_p3, %s2401_s17), 7  ;;  %5544 = vst [vmem:[#allocation2_spill] sm:$0xff] %v5543_v30 }
   0xf   : > { %s2675_s18 = smul.u32 72, %s6095_s17  ;;  %s2510_s5 = sshll.u32 %s6095_s17, 5 }
  0x10   : > { %s5308_s8 = scalar_lea.vmem %s5337_s4, %s2510_s5 }
  0x11   : > { %s2681_s21 = scalar_lea.vmem %s5333_s0, %s2675_s18  ;;  %s3888_s24 = scalar_lea.vmem %s5334_s1, %s2675_s18 }
  0x12   : > { %v2684_v0 = vld [vmem:[%s2681_s21] sm:$0xf]  ;;  %v2687_v1 = vld [vmem:[%s2681_s21 + $0x8] sm:$0xf]  ;;  %v313_v2 = vld [vmem:[%s2681_s21 + $0x4] sm:$0x1]  ;;  %s4343_s27 = scalar_lea.vmem %s5335_s2, %s2675_s18  ;;  %s4949_s30 = scalar_lea.vmem %s5336_s3, %s2675_s18 }
  0x13   : > { %v2691_v3 = vld [vmem:[%s2681_s21 + $0x10] sm:$0xf]  ;;  %v314_v4 = vld [vmem:[%s2681_s21 + $0xc] sm:$0x1]  ;;  %v2695_v5 = vld [vmem:[%s2681_s21 + $0x18] sm:$0xf] }
  0x14   : > { %v2698_v6 = vld [vmem:[%s2681_s21 + $0x20] sm:$0xf]  ;;  %v349_v7 = vshrl.u32 %v2684_v0, 16  ;;  %v352_v8 = vshll.u32 %v2684_v0, 16  ;;  %v358_v9 = vshll.u32 %v313_v2, 16  ;;  %v363_v10 = vshrl.u32 %v2687_v1, 16 }
  0x15   : > { %v315_v11 = vld [vmem:[%s2681_s21 + $0x14] sm:$0x1]  ;;  %v366_v12 = vshll.u32 %v2687_v1, 16  ;;  %v372_v13 = vshll.u32 %v314_v4, 16  ;;  %v377_v14 = vshrl.u32 %v2691_v3, 16  ;;  %v380_v15 = vshll.u32 %v2691_v3, 16 }
  0x16   : > { %v316_v16 = vld [vmem:[%s2681_s21 + $0x1c] sm:$0x1]  ;;  %v351_v17 = vrot.slane %v349_v7, 4  ;;  %v354_v18 = vrot.slane %v352_v8, 5  ;;  %v2708_v19 = vrot.slane %v358_v9, 5  ;;  %v365_v20 = vrot.slane %v363_v10, 4 }
  0x17   : > { %v368_v21 = vrot.slane %v366_v12, 5  ;;  %v2710_v22 = vrot.slane %v372_v13, 5  ;;  %v379_v23 = vrot.slane %v377_v14, 4  ;;  %v382_v24 = vrot.slane %v380_v15, 5  ;;  %v317_v29 = vld [vmem:[%s2681_s21 + $0x24] sm:$0x1] }
  0x18   : > { %v355_v25 = vor.u32 %v354_v18, %v351_v17  ;;  %v386_v26 = vshll.u32 %v315_v11, 16  ;;  %v391_v27 = vshrl.u32 %v2695_v5, 16  ;;  %v394_v28 = vshll.u32 %v2695_v5, 16  ;;  %v2723_v35 = vld [vmem:[%s2681_s21 + $0x28] sm:$0xf] }
  0x19   : > { %v369_v31 = vor.u32 %v368_v21, %v365_v20  ;;  %v383_v32 = vor.u32 %v382_v24, %v379_v23  ;;  %v400_v33 = vshll.u32 %v316_v16, 16  ;;  %v405_v34 = vshrl.u32 %v2698_v6, 16  ;;  %v318_v40 = vld [vmem:[%s2681_s21 + $0x2c] sm:$0x1]  ;;  %v2737_v45 = vld [vmem:[%s2681_s21 + $0x30] sm:$0xf] }
  0x1a   : > { %v2725_v36 = vrot.slane %v355_v25, 4  ;;  %v2727_v37 = vrot.slane %v386_v26, 5  ;;  %v393_v38 = vrot.slane %v391_v27, 4  ;;  %v396_v39 = vrot.slane %v394_v28, 5  ;;  %v319_v50 = vld [vmem:[%s2681_s21 + $0x34] sm:$0x1] }
  0x1b   : > { %v2730_v41 = vrot.slane %v369_v31, 4  ;;  %v2732_v42 = vrot.slane %v383_v32, 4  ;;  %v2734_v43 = vrot.slane %v400_v33, 5  ;;  %v407_v44 = vrot.slane %v405_v34, 4  ;;  %v2756_v55 = vld [vmem:[%s2681_s21 + $0x38] sm:$0xf] }
  0x1c   : > { %v397_v47 = vor.u32 %v396_v39, %v393_v38  ;;  %v408_v48 = vshll.u32 %v2698_v6, 16  ;;  %v414_v49 = vshll.u32 %v317_v29, 16  ;;  %v419_v53 = vshrl.u32 %v2723_v35, 16  ;;  %v320_v60 = vld [vmem:[%s2681_s21 + $0x3c] sm:$0x1] }
  0x1d   : > { %v422_v54 = vshll.u32 %v2723_v35, 16  ;;  %v428_v59 = vshll.u32 %v318_v40, 16  ;;  %v433_v63 = vshrl.u32 %v2737_v45, 16  ;;  %v436_v2 = vshll.u32 %v2737_v45, 16  ;;  %v2766_v4 = vld [vmem:[%s2681_s21 + $0x48] sm:$0xf] }
  0x1e   : > { %v2758_v56 = vrot.slane %v397_v47, 4  ;;  %v410_v57 = vrot.slane %v408_v48, 5  ;;  %v2760_v58 = vrot.slane %v414_v49, 5  ;;  %v421_v61 = vrot.slane %v419_v53, 4  ;;  %v2775_v11 = vld [vmem:[%s2681_s21 + $0x50] sm:$0xf] }
  0x1f   : > { %v424_v62 = vrot.slane %v422_v54, 5  ;;  %v2772_v9 = vrot.slane %v428_v59, 5  ;;  %v442_v10 = vshll.u32 %v319_v50, 16  ;;  %v435_v13 = vrot.slane %v433_v63, 4  ;;  %v321_v16 = vld [vmem:[%s2681_s21 + $0x4c] sm:$0x1] }
  0x20   : > { %v411_v8 = vor.u32 %v410_v57, %v407_v44  ;;  %v438_v14 = vrot.slane %v436_v2, 5  ;;  %v447_v15 = vshrl.u32 %v2756_v55, 16  ;;  %v450_v20 = vshll.u32 %v2756_v55, 16  ;;  %v2785_v23 = vld [vmem:[%s2681_s21 + $0x58] sm:$0xf] }
  0x21   : > { %v425_v12 = vor.u32 %v424_v62, %v421_v61  ;;  %v2781_v18 = vrot.slane %v442_v10, 5  ;;  %v456_v21 = vshll.u32 %v320_v60, 16  ;;  %v461_v27 = vshrl.u32 %v2766_v4, 16  ;;  %v322_v28 = vld [vmem:[%s2681_s21 + $0x54] sm:$0x1] }
  0x22   : > { %v2779_v17 = vrot.slane %v411_v8, 4  ;;  %v439_v25 = vor.u32 %v438_v14, %v435_v13  ;;  %v449_v26 = vrot.slane %v447_v15, 4  ;;  %v452_v31 = vrot.slane %v450_v20, 5  ;;  %v323_v44 = vld [vmem:[%s2681_s21 + $0x5c] sm:$0x1] }
  0x23   : > { %v2787_v24 = vrot.slane %v425_v12, 4  ;;  %v2795_v32 = vrot.slane %v456_v21, 5  ;;  %v464_v33 = vshll.u32 %v2766_v4, 16  ;;  %v463_v39 = vrot.slane %v461_v27, 4  ;;  %v2808_v53 = vld [vmem:[%s2681_s21 + $0x60] sm:$0xf] }
  0x24   : > { %v2802_v38 = vrot.slane %v439_v25, 4  ;;  %v470_v40 = vshll.u32 %v321_v16, 16  ;;  %v453_v47 = vor.u32 %v452_v31, %v449_v26  ;;  %v475_v49 = vshrl.u32 %v2775_v11, 16  ;;  %v324_v61 = vld [vmem:[%s2681_s21 + $0x64] sm:$0x1] }
  0x25   : > { %v466_v48 = vrot.slane %v464_v33, 5  ;;  %v478_v50 = vshll.u32 %v2775_v11, 16  ;;  %v484_v59 = vshll.u32 %v322_v28, 16  ;;  %v489_v60 = vshrl.u32 %v2785_v23, 16  ;;  %v2821_v10 = vld [vmem:[%s2681_s21 + $0x68] sm:$0xf] }
  0x26   : > { %v2814_v57 = vrot.slane %v470_v40, 5  ;;  %v2818_v62 = vrot.slane %v453_v47, 4  ;;  %v477_v2 = vrot.slane %v475_v49, 4  ;;  %5545 = vst [vmem:[#allocation3_spill] sm:$0xff] %v2821_v10  ;;  %v492_v14 = vshll.u32 %v2785_v23, 16 }
  0x27   : > { %v467_v63 = vor.u32 %v466_v48, %v463_v39  ;;  %v480_v8 = vrot.slane %v478_v50, 5  ;;  %v2823_v12 = vrot.slane %v484_v59, 5  ;;  %v491_v13 = vrot.slane %v489_v60, 4  ;;  %v2827_v16 = vld [vmem:[%s2681_s21 + $0x70] sm:$0xf] }
  0x28   : > { %v498_v15 = vshll.u32 %v323_v44, 16  ;;  %5546 = vst [vmem:[#allocation4_spill] sm:$0xff] %v2827_v16  ;;  %v503_v26 = vshrl.u32 %v2808_v53, 16  ;;  %v325_v27 = vld [vmem:[%s2681_s21 + $0x6c] sm:$0x1]  ;;  %v494_v28 = vrot.slane %v492_v14, 5 }
  0x29   : > { %v2833_v21 = vrot.slane %v467_v63, 4  ;;  %v481_v25 = vor.u32 %v480_v8, %v477_v2  ;;  %v506_v33 = vshll.u32 %v2808_v53, 16  ;;  %v512_v39 = vshll.u32 %v324_v61, 16  ;;  %v2841_v40 = vld [vmem:[%s2681_s21 + $0x78] sm:$0xf] }
  0x2a   : > { %v2837_v31 = vrot.slane %v498_v15, 5  ;;  %5547 = vst [vmem:[#allocation5_spill] sm:$0xff] %v2841_v40  ;;  %v505_v48 = vrot.slane %v503_v26, 4  ;;  %v517_v49 = vshrl.u32 %v2821_v10, 16  ;;  %v326_v50 = vld [vmem:[%s2681_s21 + $0x74] sm:$0x1]  ;;  %v495_v59 = vor.u32 %v494_v28, %v491_v13 }
  0x2b   : > { %v2847_v47 = vrot.slane %v481_v25, 4  ;;  %v508_v60 = vrot.slane %v506_v33, 5  ;;  %v2851_v63 = vrot.slane %v512_v39, 5  ;;  %v520_v61 = vshll.u32 %v2821_v10, 16  ;;  %v327_v25 = vld [vmem:[%s2681_s21 + $0x7c] sm:$0x1] }
  0x2c   : > { %v519_v8 = vrot.slane %v517_v49, 4  ;;  %v526_v14 = vshll.u32 %v325_v27, 16  ;;  %v531_v15 = vshrl.u32 %v2827_v16, 16  ;;  %v2860_v26 = vrot.slane %v495_v59, 4  ;;  %v2864_v39 = vld [vmem:[%s2681_s21 + $0x80] sm:$0xf] }
  0x2d   : > { %5548 = vst [vmem:[#allocation6_spill] sm:$0xff] %v2851_v63  ;;  %v509_v13 = vor.u32 %v508_v60, %v505_v48  ;;  %v522_v28 = vrot.slane %v520_v61, 5  ;;  %v534_v33 = vshll.u32 %v2827_v16, 16  ;;  %5549 = vst [vmem:[#allocation7_spill] sm:$0xff] %v2864_v39  ;;  %v540_v54 = vshll.u32 %v326_v50, 16 }
  0x2e   : > { %v2866_v44 = vrot.slane %v526_v14, 5  ;;  %v533_v20 = vrot.slane %v531_v15, 4  ;;  %v545_v49 = vshrl.u32 %v2841_v40, 16  ;;  %v328_v27 = vld [vmem:[%s2681_s21 + $0x84] sm:$0x1]  ;;  %v548_v50 = vshll.u32 %v2841_v40, 16 }
  0x2f   : > { %v2874_v48 = vrot.slane %v509_v13, 4  ;;  %v523_v60 = vor.u32 %v522_v28, %v519_v8  ;;  %v536_v61 = vrot.slane %v534_v33, 5  ;;  %v2877_v2 = vld [vmem:[%s2681_s21 + $0x90] sm:$0xf]  ;;  %v2879_v14 = vrot.slane %v540_v54, 5 }
  0x30   : > { %5550 = vst [vmem:[#allocation8_spill] sm:$0xff] %v2866_v44  ;;  %5552 = vst [vmem:[#allocation10_spill] sm:$0xff] %v2877_v2  ;;  %v547_v15 = vrot.slane %v545_v49, 4  ;;  %v554_v34 = vshll.u32 %v327_v25, 16  ;;  %v2883_v29 = vld [vmem:[%s2681_s21 + $0x98] sm:$0xf] }
  0x31   : > { %5551 = vst [vmem:[#allocation9_spill] sm:$0xff] %v2874_v48  ;;  %5553 = vst [vmem:[#allocation11_spill] sm:$0xff] %v2879_v14  ;;  %v2889_v59 = vrot.slane %v523_v60, 4  ;;  %v537_v8 = vor.u32 %v536_v61, %v533_v20  ;;  %v559_v28 = vshrl.u32 %v2864_v39, 16  ;;  %v329_v33 = vld [vmem:[%s2681_s21 + $0x94] sm:$0x1] }
  0x32   : > { %5554 = vst [vmem:[#allocation12_spill] sm:$0xff] %v2883_v29  ;;  %v550_v54 = vrot.slane %v548_v50, 5  ;;  %v2893_v7 = vrot.slane %v554_v34, 5  ;;  %v562_v49 = vshll.u32 %v2864_v39, 16  ;;  %v568_v25 = vshll.u32 %v328_v27, 16 }
  0x33   : > { %5555 = vst [vmem:[#allocation13_spill] sm:$0xff] %v2889_v59  ;;  %v2897_v52 = vld [vmem:[%s2681_s21 + $0xa0] sm:$0xf]  ;;  %v2903_v60 = vrot.slane %v537_v8, 4  ;;  %v561_v20 = vrot.slane %v559_v28, 4  ;;  %v573_v61 = vshrl.u32 %v2877_v2, 16 }
  0x34   : > { %5556 = vst [vmem:[#allocation14_spill] sm:$0xff] %v2893_v7  ;;  %5557 = vst [vmem:[#allocation15_spill] sm:$0xff] %v2897_v52  ;;  %v330_v50 = vld [vmem:[%s2681_s21 + $0x9c] sm:$0x1]  ;;  %v551_v34 = vor.u32 %v550_v54, %v547_v15  ;;  %v564_v51 = vrot.slane %v562_v49, 5  ;;  %v2907_v46 = vrot.slane %v568_v25, 5 }
  0x35   : > { %5558 = vst [vmem:[#allocation16_spill] sm:$0xff] %v2903_v60  ;;  %v576_v27 = vshll.u32 %v2877_v2, 16  ;;  %v575_v13 = vrot.slane %v573_v61, 4  ;;  %v582_v8 = vshll.u32 %v329_v33, 16  ;;  %v587_v28 = vshrl.u32 %v2883_v29, 16 }
  0x36   : > { %5559 = vst [vmem:[#allocation17_spill] sm:$0xff] %v2907_v46  ;;  %v331_v40 = vld [vmem:[%s2681_s21 + $0xa4] sm:$0x1]  ;;  %v2916_v16 = vrot.slane %v551_v34, 4  ;;  %v565_v15 = vor.u32 %v564_v51, %v561_v20  ;;  %v590_v49 = vshll.u32 %v2883_v29, 16  ;;  %v596_v59 = vshll.u32 %v330_v50, 16 }
  0x37   : > { %v578_v54 = vrot.slane %v576_v27, 5  ;;  %v2920_v25 = vld [vmem:[%s2681_s21 + $0xa8] sm:$0xf]  ;;  %v2922_v2 = vrot.slane %v582_v8, 5  ;;  %v589_v44 = vrot.slane %v587_v28, 4  ;;  %v601_v61 = vshrl.u32 %v2897_v52, 16 }
  0x38   : > { %5560 = vst [vmem:[#allocation18_spill] sm:$0xff] %v2916_v16  ;;  %5561 = vst [vmem:[#allocation19_spill] sm:$0xff] %v2920_v25  ;;  %v332_v33 = vld [vmem:[%s2681_s21 + $0xac] sm:$0x1]  ;;  %v2930_v51 = vrot.slane %v565_v15, 4  ;;  %v592_v27 = vrot.slane %v590_v49, 5 }
  0x39   : > { %5562 = vst [vmem:[#allocation20_spill] sm:$0xff] %v2922_v2  ;;  %v579_v20 = vor.u32 %v578_v54, %v575_v13  ;;  %v2933_v39 = vld [vmem:[%s2681_s21 + $0xb0] sm:$0xf]  ;;  %v2935_v8 = vrot.slane %v596_v59, 5  ;;  %v603_v28 = vrot.slane %v601_v61, 4  ;;  %v604_v50 = vshll.u32 %v2897_v52, 16 }
  0x3a   : > { %5563 = vst [vmem:[#allocation21_spill] sm:$0xff] %v2930_v51  ;;  %5564 = vst [vmem:[#allocation22_spill] sm:$0xff] %v2933_v39  ;;  %v610_v29 = vshll.u32 %v331_v40, 16  ;;  %v2939_v14 = vld [vmem:[%s2681_s21 + $0xb8] sm:$0xf]  ;;  %v593_v13 = vor.u32 %v592_v27, %v589_v44  ;;  %v615_v54 = vshrl.u32 %v2920_v25, 16 }
  0x3b   : > { %5565 = vst [vmem:[#allocation23_spill] sm:$0xff] %v2935_v8  ;;  %5566 = vst [vmem:[#allocation24_spill] sm:$0xff] %v2939_v14  ;;  %v2945_v34 = vrot.slane %v579_v20, 4  ;;  %v333_v49 = vld [vmem:[%s2681_s21 + $0xb4] sm:$0x1]  ;;  %v606_v59 = vrot.slane %v604_v50, 5 }
  0x3c   : > { %v2949_v7 = vrot.slane %v610_v29, 5  ;;  %v618_v61 = vshll.u32 %v2920_v25, 16  ;;  %v624_v40 = vshll.u32 %v332_v33, 16  ;;  %v2953_v52 = vld [vmem:[%s2681_s21 + $0xc0] sm:$0xf]  ;;  %v2959_v20 = vrot.slane %v593_v13, 4 }
  0x3d   : > { %5567 = vst [vmem:[#allocation25_spill] sm:$0xff] %v2945_v34  ;;  %5569 = vst [vmem:[#allocation27_spill] sm:$0xff] %v2953_v52  ;;  %v617_v44 = vrot.slane %v615_v54, 4  ;;  %v629_v27 = vshrl.u32 %v2933_v39, 16  ;;  %v334_v50 = vld [vmem:[%s2681_s21 + $0xbc] sm:$0x1]  ;;  %v607_v29 = vor.u32 %v606_v59, %v603_v28 }
  0x3e   : > { %5568 = vst [vmem:[#allocation26_spill] sm:$0xff] %v2949_v7  ;;  %5570 = vst [vmem:[#allocation28_spill] sm:$0xff] %v2959_v20  ;;  %v620_v46 = vrot.slane %v618_v61, 5  ;;  %v2963_v51 = vrot.slane %v624_v40, 5  ;;  %v632_v33 = vshll.u32 %v2933_v39, 16  ;;  %v638_v13 = vshll.u32 %v333_v49, 16 }
  0x3f   : > { %v631_v15 = vrot.slane %v629_v27, 4  ;;  %v643_v54 = vshrl.u32 %v2939_v14, 16  ;;  %v335_v2 = vld [vmem:[%s2681_s21 + $0xc4] sm:$0x1]  ;;  %v2972_v34 = vrot.slane %v607_v29, 4  ;;  %v646_v61 = vshll.u32 %v2939_v14, 16 }
  0x40   : > { %5571 = vst [vmem:[#allocation29_spill] sm:$0xff] %v2963_v51  ;;  %v621_v28 = vor.u32 %v620_v46, %v617_v44  ;;  %v634_v59 = vrot.slane %v632_v33, 5  ;;  %v2976_v40 = vld [vmem:[%s2681_s21 + $0xc8] sm:$0xf]  ;;  %v2978_v39 = vrot.slane %v638_v13, 5  ;;  %v652_v60 = vshll.u32 %v334_v50, 16 }
  0x41   : > { %5572 = vst [vmem:[#allocation30_spill] sm:$0xff] %v2972_v34  ;;  %5573 = vst [vmem:[#allocation31_spill] sm:$0xff] %v2976_v40  ;;  %v645_v16 = vrot.slane %v643_v54, 4  ;;  %v657_v27 = vshrl.u32 %v2953_v52, 16  ;;  %v336_v49 = vld [vmem:[%s2681_s21 + $0xcc] sm:$0x1] }
  0x42   : > { %5574 = vst [vmem:[#allocation32_spill] sm:$0xff] %v2978_v39  ;;  %v2986_v46 = vrot.slane %v621_v28, 4  ;;  %v635_v44 = vor.u32 %v634_v59, %v631_v15  ;;  %v648_v33 = vrot.slane %v646_v61, 5  ;;  %v2989_v25 = vld [vmem:[%s2681_s21 + $0xd8] sm:$0xf]  ;;  %v2991_v13 = vrot.slane %v652_v60, 5 }
  0x43   : > { %5576 = vst [vmem:[#allocation34_spill] sm:$0xff] %v2989_v25  ;;  %v659_v54 = vrot.slane %v657_v27, 4  ;;  %v660_v50 = vshll.u32 %v2953_v52, 16  ;;  %v666_v14 = vshll.u32 %v335_v2, 16  ;;  %v2995_v8 = vld [vmem:[%s2681_s21 + $0xe0] sm:$0xf] }
  0x44   : > { %5575 = vst [vmem:[#allocation33_spill] sm:$0xff] %v2986_v46  ;;  %5577 = vst [vmem:[#allocation35_spill] sm:$0xff] %v2991_v13  ;;  %v3001_v29 = vrot.slane %v635_v44, 4  ;;  %v649_v15 = vor.u32 %v648_v33, %v645_v16  ;;  %v671_v59 = vshrl.u32 %v2976_v40, 16  ;;  %v337_v61 = vld [vmem:[%s2681_s21 + $0xdc] sm:$0x1] }
  0x45   : > { %5578 = vst [vmem:[#allocation36_spill] sm:$0xff] %v2995_v8  ;;  %v662_v60 = vrot.slane %v660_v50, 5  ;;  %v3005_v7 = vrot.slane %v666_v14, 5  ;;  %v674_v27 = vshll.u32 %v2976_v40, 16  ;;  %v680_v2 = vshll.u32 %v336_v49, 16 }
  0x46   : > { %5579 = vst [vmem:[#allocation37_spill] sm:$0xff] %v3001_v29  ;;  %v3009_v52 = vld [vmem:[%s2681_s21 + $0xe8] sm:$0xf]  ;;  %v3015_v44 = vrot.slane %v649_v15, 4  ;;  %v673_v16 = vrot.slane %v671_v59, 4  ;;  %v685_v33 = vshrl.u32 %v2989_v25, 16 }
  0x47   : > { %5580 = vst [vmem:[#allocation38_spill] sm:$0xff] %v3005_v7  ;;  %5581 = vst [vmem:[#allocation39_spill] sm:$0xff] %v3009_v52  ;;  %v338_v50 = vld [vmem:[%s2681_s21 + $0xe4] sm:$0x1]  ;;  %v663_v14 = vor.u32 %v662_v60, %v659_v54  ;;  %v676_v51 = vrot.slane %v674_v27, 5  ;;  %v3019_v46 = vrot.slane %v680_v2, 5 }
  0x48   : > { %5582 = vst [vmem:[#allocation40_spill] sm:$0xff] %v3015_v44  ;;  %v688_v49 = vshll.u32 %v2989_v25, 16  ;;  %v687_v28 = vrot.slane %v685_v33, 4  ;;  %v694_v15 = vshll.u32 %v337_v61, 16  ;;  %v699_v59 = vshrl.u32 %v2995_v8, 16 }
  0x49   : > { %5583 = vst [vmem:[#allocation41_spill] sm:$0xff] %v3019_v46  ;;  %v339_v39 = vld [vmem:[%s2681_s21 + $0xec] sm:$0x1]  ;;  %v3028_v29 = vrot.slane %v663_v14, 4  ;;  %v677_v54 = vor.u32 %v676_v51, %v673_v16  ;;  %v702_v27 = vshll.u32 %v2995_v8, 16  ;;  %v708_v20 = vshll.u32 %v338_v50, 16 }
  0x4a   : > { %v690_v60 = vrot.slane %v688_v49, 5  ;;  %v3032_v2 = vld [vmem:[%s2681_s21 + $0xf0] sm:$0xf]  ;;  %v3034_v25 = vrot.slane %v694_v15, 5  ;;  %v701_v34 = vrot.slane %v699_v59, 4  ;;  %v713_v33 = vshrl.u32 %v3009_v52, 16 }
  0x4b   : > { %5584 = vst [vmem:[#allocation42_spill] sm:$0xff] %v3028_v29  ;;  %5585 = vst [vmem:[#allocation43_spill] sm:$0xff] %v3032_v2  ;;  %v340_v61 = vld [vmem:[%s2681_s21 + $0xf4] sm:$0x1]  ;;  %v3042_v51 = vrot.slane %v677_v54, 4  ;;  %v704_v49 = vrot.slane %v702_v27, 5 }
  0x4c   : > { %5586 = vst [vmem:[#allocation44_spill] sm:$0xff] %v3034_v25  ;;  %v691_v16 = vor.u32 %v690_v60, %v687_v28  ;;  %v3045_v40 = vld [vmem:[%s2681_s21 + $0xf8] sm:$0xf]  ;;  %v3047_v15 = vrot.slane %v708_v20, 5  ;;  %v715_v59 = vrot.slane %v713_v33, 4  ;;  %v716_v50 = vshll.u32 %v3009_v52, 16 }
  0x4d   : > { %5587 = vst [vmem:[#allocation45_spill] sm:$0xff] %v3042_v51  ;;  %5588 = vst [vmem:[#allocation46_spill] sm:$0xff] %v3045_v40  ;;  %v722_v8 = vshll.u32 %v339_v39, 16  ;;  %v3051_v13 = vld [vmem:[%s2681_s21 + $0x100] sm:$0xf]  ;;  %v705_v28 = vor.u32 %v704_v49, %v701_v34  ;;  %v727_v60 = vshrl.u32 %v3032_v2, 16 }
  0x4e   : > { %5589 = vst [vmem:[#allocation47_spill] sm:$0xff] %v3047_v15  ;;  %5590 = vst [vmem:[#allocation48_spill] sm:$0xff] %v3051_v13  ;;  %v3057_v14 = vrot.slane %v691_v16, 4  ;;  %v341_v27 = vld [vmem:[%s2681_s21 + $0xfc] sm:$0x1]  ;;  %v718_v20 = vrot.slane %v716_v50, 5 }
  0x4f   : > { %v3061_v7 = vrot.slane %v722_v8, 5  ;;  %v730_v33 = vshll.u32 %v3032_v2, 16  ;;  %v736_v39 = vshll.u32 %v340_v61, 16  ;;  %v3065_v52 = vld [vmem:[%s2681_s21 + $0x108] sm:$0xf]  ;;  %v3071_v16 = vrot.slane %v705_v28, 4 }
  0x50   : > { %5591 = vst [vmem:[#allocation49_spill] sm:$0xff] %v3057_v14  ;;  %v729_v34 = vrot.slane %v727_v60, 4  ;;  %v741_v49 = vshrl.u32 %v3045_v40, 16  ;;  %v342_v50 = vld [vmem:[%s2681_s21 + $0x104] sm:$0x1]  ;;  %v719_v8 = vor.u32 %v718_v20, %v715_v59  ;;  %v744_v61 = vshll.u32 %v3045_v40, 16 }
  0x51   : > { %5592 = vst [vmem:[#allocation50_spill] sm:$0xff] %v3071_v16  ;;  %v732_v46 = vrot.slane %v730_v33, 5  ;;  %v3075_v51 = vrot.slane %v736_v39, 5  ;;  %v750_v28 = vshll.u32 %v341_v27, 16  ;;  %v755_v60 = vshrl.u32 %v3051_v13, 16 }
  0x52   : > { %v743_v54 = vrot.slane %v741_v49, 4  ;;  %v343_v25 = vld [vmem:[%s2681_s21 + $0x10c] sm:$0x1]  ;;  %v3084_v14 = vrot.slane %v719_v8, 4  ;;  %v746_v59 = vrot.slane %v744_v61, 5  ;;  %v758_v20 = vshll.u32 %v3051_v13, 16 }
  0x53   : > { %v733_v29 = vor.u32 %v732_v46, %v729_v34  ;;  %v3088_v33 = vld [vmem:[%s2681_s21 + $0x110] sm:$0xf]  ;;  %v3090_v39 = vrot.slane %v750_v28, 5  ;;  %v757_v40 = vrot.slane %v755_v60, 4  ;;  %v764_v44 = vshll.u32 %v342_v50, 16 }
  0x54   : > { %v769_v10 = vshrl.u32 %v3065_v52, 16  ;;  %v344_v2 = vld [vmem:[%s2681_s21 + $0x114] sm:$0x1]  ;;  %v725_v27 = vsel %vm2717_vm2, %v3084_v14, %v3061_v7  ;;  %v747_v8 = vor.u32 %v746_v59, %v743_v54  ;;  %v760_v46 = vrot.slane %v758_v20, 5  ;;  %v5627_v20 = vld [vmem:[#allocation18_spill] sm:$0xff] }
  0x55   : > { %v734_v49 = vrot.slane %v733_v29, 4  ;;  %v766_v34 = vrot.slane %v764_v44, 5  ;;  %v772_v13 = vshll.u32 %v3065_v52, 16  ;;  %v778_v15 = vshll.u32 %v343_v25, 16 }
  0x56   : > { %v771_v61 = vrot.slane %v769_v10, 4  ;;  %v748_v28 = vrot.slane %v747_v8, 4  ;;  %v761_v60 = vor.u32 %v760_v46, %v757_v40  ;;  %v783_v16 = vshrl.u32 %v3088_v33, 16  ;;  %v5631_v46 = vld [vmem:[#allocation7_spill] sm:$0xff] }
  0x57   : > { %v739_v50 = vsel %vm2717_vm2, %v734_v49, %v3075_v51  ;;  %v774_v63 = vrot.slane %v772_v13, 5  ;;  %v780_v48 = vrot.slane %v778_v15, 5  ;;  %v786_v7 = vshll.u32 %v3088_v33, 16 }
  0x58   : > { %v792_v29 = vshll.u32 %v344_v2, 16  ;;  %v753_v10 = vsel %vm2717_vm2, %v748_v28, %v3090_v39  ;;  %v762_v44 = vrot.slane %v761_v60, 4  ;;  %v785_v14 = vrot.slane %v783_v16, 4  ;;  %v5628_v39 = vld [vmem:[#allocation14_spill] sm:$0xff] }
  0x59   : > { %v5593_v25 = vsel %vm2717_vm2, %v2725_v36, %v2708_v19  ;;  %v775_v51 = vor.u32 %v774_v63, %v771_v61  ;;  %v788_v13 = vrot.slane %v786_v7, 5  ;;  %v5594_v2 = vsel %vm2717_vm2, %v2730_v41, %v2710_v22  ;;  %v5633_v61 = vld [vmem:[#allocation17_spill] sm:$0xff]  ;;  %v5636_v7 = vld [vmem:[#allocation10_spill] sm:$0xff] }
  0x5a   : > { %v3113_v40 = vmax.bf16 %v5593_v25, %v2684_v0  ;;  %v794_v15 = vrot.slane %v792_v29, 5  ;;  %v3121_v54 = vmax.bf16 %v5594_v2, %v2687_v1  ;;  %v767_v16 = vsel %vm2717_vm2, %v762_v44, %v766_v34  ;;  %v5632_v34 = vld [vmem:[#allocation21_spill] sm:$0xff]  ;;  %v5638_v44 = vld [vmem:[#allocation20_spill] sm:$0xff] }
  0x5b   : > { %v5595_v0 = vsel %vm2717_vm2, %v2732_v42, %v2727_v37  ;;  %v5596_v36 = vsel %vm2717_vm2, %v2758_v56, %v2734_v43  ;;  %v5598_v1 = vsel %vm2717_vm2, %v2779_v17, %v2760_v58  ;;  %v776_v63 = vrot.slane %v775_v51, 4  ;;  %v5637_v29 = vld [vmem:[#allocation25_spill] sm:$0xff]  ;;  %v5642_v2 = vld [vmem:[#allocation28_spill] sm:$0xff] }
  0x5c   : > { %v3131_v19 = vmax.bf16 %v5595_v0, %v2691_v3  ;;  %v3139_v22 = vmax.bf16 %v5596_v36, %v2695_v5  ;;  %v3147_v41 = vmax.bf16 %v5598_v1, %v2698_v6  ;;  %v789_v37 = vor.u32 %v788_v13, %v785_v14  ;;  %v5641_v13 = vld [vmem:[#allocation12_spill] sm:$0xff]  ;;  %v5643_v0 = vld [vmem:[#allocation23_spill] sm:$0xff] }
  0x5d   : > { %v5600_v3 = vsel %vm2717_vm2, %v2787_v24, %v2772_v9  ;;  %v5602_v5 = vsel %vm2717_vm2, %v2802_v38, %v2781_v18  ;;  %v5604_v6 = vsel %vm2717_vm2, %v2818_v62, %v2795_v32  ;;  %v5612_v24 = vld [vmem:[#allocation9_spill] sm:$0xff]  ;;  %v5613_v32 = vld [vmem:[#allocation6_spill] sm:$0xff]  ;;  %v5629_v49 = vsel %vm2717_vm2, %v5627_v20, %v5628_v39 }
  0x5e   : > { %5597 = vst [vmem:[#allocation51_spill] sm:$0xff] %v3139_v22  ;;  %5599 = vst [vmem:[#allocation52_spill] sm:$0xff] %v3147_v41  ;;  %v3155_v42 = vmax.bf16 %v5600_v3, %v2723_v35  ;;  %v3163_v43 = vmax.bf16 %v5602_v5, %v2737_v45  ;;  %v3171_v56 = vmax.bf16 %v5604_v6, %v2756_v55  ;;  %v790_v18 = vrot.slane %v789_v37, 4  ;;  %v5617_v62 = vld [vmem:[#allocation13_spill] sm:$0xff]  ;;  %v5647_v37 = vld [vmem:[#allocation30_spill] sm:$0xff] }
  0x5f   : > { %v5606_v35 = vsel %vm2717_vm2, %v2833_v21, %v2814_v57  ;;  %v5608_v45 = vsel %vm2717_vm2, %v2847_v47, %v2823_v12  ;;  %v5610_v55 = vsel %vm2717_vm2, %v2860_v26, %v2837_v31  ;;  %v5616_v57 = vld [vmem:[#allocation3_spill] sm:$0xff]  ;;  %v5621_v31 = vld [vmem:[#allocation4_spill] sm:$0xff]  ;;  %v5634_v28 = vsel %vm2717_vm2, %v5632_v34, %v5633_v61  ;;  %v5648_v3 = vld [vmem:[#allocation26_spill] sm:$0xff] }
  0x60   : > { %5601 = vst [vmem:[#allocation53_spill] sm:$0xff] %v3155_v42  ;;  %5603 = vst [vmem:[#allocation54_spill] sm:$0xff] %v3163_v43  ;;  %v3179_v58 = vmax.bf16 %v5606_v35, %v2766_v4  ;;  %v3187_v9 = vmax.bf16 %v5608_v45, %v2775_v11  ;;  %v3195_v17 = vmax.bf16 %v5610_v55, %v2785_v23  ;;  %v5618_v23 = vld [vmem:[#allocation8_spill] sm:$0xff]  ;;  %v5623_v26 = vld [vmem:[#allocation11_spill] sm:$0xff] }
  0x61   : > { %5605 = vst [vmem:[#allocation55_spill] sm:$0xff] %v3171_v56  ;;  %v781_v4 = vsel %vm2717_vm2, %v776_v63, %v780_v48  ;;  %v5614_v11 = vsel %vm2717_vm2, %v5612_v24, %v5613_v32  ;;  %v5619_v12 = vsel %vm2717_vm2, %v5617_v62, %v5618_v23  ;;  %v5622_v47 = vld [vmem:[#allocation16_spill] sm:$0xff]  ;;  %v3237_v60 = vmax.bf16 %v5634_v28, %v5631_v46  ;;  %v5646_v63 = vld [vmem:[#allocation15_spill] sm:$0xff]  ;;  %v5653_v45 = vld [vmem:[#allocation29_spill] sm:$0xff] }
  0x62   : > { %5607 = vst [vmem:[#allocation56_spill] sm:$0xff] %v3179_v58  ;;  %5609 = vst [vmem:[#allocation57_spill] sm:$0xff] %v3187_v9  ;;  %v3205_v38 = vmax.bf16 %v5614_v11, %v2808_v53  ;;  %v3213_v21 = vmax.bf16 %v5619_v12, %v5616_v57  ;;  %v5624_v48 = vsel %vm2717_vm2, %v5622_v47, %v5623_v26  ;;  %v5626_v53 = vld [vmem:[#allocation5_spill] sm:$0xff]  ;;  %v5651_v35 = vld [vmem:[#allocation19_spill] sm:$0xff] }
  0x63   : > { %5611 = vst [vmem:[#allocation58_spill] sm:$0xff] %v3195_v17  ;;  %v3221_v59 = vmax.bf16 %v5624_v48, %v5621_v31  ;;  %v3229_v8 = vmax.bf16 %v5629_v49, %v5626_v53  ;;  %5635 = vst [vmem:[#allocation8_spill] sm:$0xff] %v3237_v60  ;;  %v5639_v14 = vsel %vm2717_vm2, %v5637_v29, %v5638_v44  ;;  %v5656_v24 = vld [vmem:[#allocation22_spill] sm:$0xff]  ;;  %v5657_v32 = vld [vmem:[#allocation37_spill] sm:$0xff] }
  0x64   : > { %5615 = vst [vmem:[#allocation9_spill] sm:$0xff] %v3205_v38  ;;  %5620 = vst [vmem:[#allocation6_spill] sm:$0xff] %v3213_v21  ;;  %v3245_v25 = vmax.bf16 %v5639_v14, %v5636_v7  ;;  %v795_v51 = vsel %vm2717_vm2, %v790_v18, %v794_v15  ;;  %v5644_v36 = vsel %vm2717_vm2, %v5642_v2, %v5643_v0  ;;  %v5652_v15 = vld [vmem:[#allocation33_spill] sm:$0xff]  ;;  %v5658_v11 = vld [vmem:[#allocation32_spill] sm:$0xff] }
  0x65   : > { %5625 = vst [vmem:[#allocation3_spill] sm:$0xff] %v3221_v59  ;;  %5630 = vst [vmem:[#allocation13_spill] sm:$0xff] %v3229_v8  ;;  %v3255_v1 = vmax.bf16 %v5644_v36, %v5641_v13  ;;  %v5649_v5 = vsel %vm2717_vm2, %v5647_v37, %v5648_v3  ;;  %v5654_v55 = vsel %vm2717_vm2, %v5652_v15, %v5653_v45  ;;  %v5661_v23 = vld [vmem:[#allocation24_spill] sm:$0xff]  ;;  %v5663_v31 = vld [vmem:[#allocation35_spill] sm:$0xff] }
  0x66   : > { %5640 = vst [vmem:[#allocation4_spill] sm:$0xff] %v3245_v25  ;;  %v3263_v6 = vmax.bf16 %v5649_v5, %v5646_v63  ;;  %v3271_v18 = vmax.bf16 %v5654_v55, %v5651_v35  ;;  %v5659_v57 = vsel %vm2717_vm2, %v5657_v32, %v5658_v11  ;;  %v5662_v12 = vld [vmem:[#allocation40_spill] sm:$0xff]  ;;  %v5666_v48 = vld [vmem:[#allocation27_spill] sm:$0xff]  ;;  %v5667_v53 = vld [vmem:[#allocation42_spill] sm:$0xff] }
  0x67   : > { %5645 = vst [vmem:[#allocation16_spill] sm:$0xff] %v3255_v1  ;;  %v3279_v62 = vmax.bf16 %v5659_v57, %v5656_v24  ;;  %v5664_v47 = vsel %vm2717_vm2, %v5662_v12, %v5663_v31  ;;  %v5668_v20 = vld [vmem:[#allocation38_spill] sm:$0xff]  ;;  %v5671_v46 = vld [vmem:[#allocation31_spill] sm:$0xff]  ;;  %v5672_v34 = vld [vmem:[#allocation45_spill] sm:$0xff] }
  0x68   : > { %5650 = vst [vmem:[#allocation11_spill] sm:$0xff] %v3263_v6  ;;  %5655 = vst [vmem:[#allocation5_spill] sm:$0xff] %v3271_v18  ;;  %v3287_v26 = vmax.bf16 %v5664_v47, %v5661_v23  ;;  %v5669_v39 = vsel %vm2717_vm2, %v5667_v53, %v5668_v20  ;;  %v5673_v61 = vld [vmem:[#allocation41_spill] sm:$0xff]  ;;  %v3306_v29 = vld [vmem:[%s2681_s21 + $0x8] sm:$0xf]  ;;  %v3361_v20 = vmax.bf16 %v795_v51, %v3088_v33 }
  0x69   : > { %5660 = vst [vmem:[#allocation18_spill] sm:$0xff] %v3279_v62  ;;  %v3295_v49 = vmax.bf16 %v5669_v39, %v5666_v48  ;;  %v5674_v28 = vsel %vm2717_vm2, %v5672_v34, %v5673_v61  ;;  %v3309_v44 = vld [vmem:[%s2681_s21 + $0x10] sm:$0xf]  ;;  %v3312_v14 = vld [vmem:[%s2681_s21 + $0x18] sm:$0xf]  ;;  %v5676_v2 = vld [vmem:[#allocation34_spill] sm:$0xff] }
  0x6a   : > { %5665 = vst [vmem:[#allocation14_spill] sm:$0xff] %v3287_v26  ;;  %v3303_v7 = vmax.bf16 %v5674_v28, %v5671_v46  ;;  %v3315_v13 = vld [vmem:[%s2681_s21 + $0x20] sm:$0xf]  ;;  %v5677_v0 = vld [vmem:[#allocation49_spill] sm:$0xff]  ;;  %v5678_v36 = vld [vmem:[#allocation44_spill] sm:$0xff] }
  0x6b   : > { %5670 = vst [vmem:[#allocation7_spill] sm:$0xff] %v3295_v49  ;;  %v5679_v63 = vsel %vm2717_vm2, %v5677_v0, %v5678_v36  ;;  %v5681_v3 = vld [vmem:[#allocation36_spill] sm:$0xff]  ;;  %v5682_v5 = vld [vmem:[#allocation50_spill] sm:$0xff]  ;;  %v5683_v35 = vld [vmem:[#allocation47_spill] sm:$0xff]  ;;  %v986_v49 = vshrl.u32 %v3312_v14, 16  ;;  %v1003_v9 = vshll.u32 %v3315_v13, 16 }
  0x6c   : > { %5675 = vst [vmem:[#allocation21_spill] sm:$0xff] %v3303_v7  ;;  %v3323_v37 = vmax.bf16 %v5679_v63, %v5676_v2  ;;  %v5684_v15 = vsel %vm2717_vm2, %v5682_v5, %v5683_v35  ;;  %v5686_v55 = vld [vmem:[#allocation39_spill] sm:$0xff]  ;;  %v3343_v23 = vld [vmem:[%s2681_s21 + $0x30] sm:$0xf]  ;;  %v3346_v12 = vld [vmem:[%s2681_s21 + $0x38] sm:$0xf] }
  0x6d   : > { %v3331_v45 = vmax.bf16 %v5684_v15, %v5681_v3  ;;  %v3334_v24 = vmax.bf16 %v725_v27, %v5686_v55  ;;  %v5688_v32 = vld [vmem:[#allocation43_spill] sm:$0xff]  ;;  %5691 = vst [vmem:[#allocation28_spill] sm:$0xff] %v3343_v23  ;;  %5692 = vst [vmem:[#allocation23_spill] sm:$0xff] %v3346_v12  ;;  %v3349_v31 = vld [vmem:[%s2681_s21 + $0x40] sm:$0xf]  ;;  %v972_v5 = vshrl.u32 %v3309_v44, 16 }
  0x6e   : > { %5680 = vst [vmem:[#allocation17_spill] sm:$0xff] %v3323_v37  ;;  %v3337_v11 = vmax.bf16 %v739_v50, %v5688_v32  ;;  %v3340_v57 = vld [vmem:[%s2681_s21 + $0x28] sm:$0xf]  ;;  %5693 = vst [vmem:[#allocation15_spill] sm:$0xff] %v3349_v31  ;;  %v5694_v47 = vld [vmem:[#allocation46_spill] sm:$0xff]  ;;  %v3358_v50 = vmax.bf16 %v781_v4, %v3065_v52  ;;  %v975_v37 = vshll.u32 %v3309_v44, 16 }
  0x6f   : > { %5685 = vst [vmem:[#allocation10_spill] sm:$0xff] %v3331_v45  ;;  %5687 = vst [vmem:[#allocation25_spill] sm:$0xff] %v3334_v24  ;;  %v3352_v48 = vmax.bf16 %v753_v10, %v5694_v47  ;;  %v5696_v53 = vld [vmem:[#allocation48_spill] sm:$0xff]  ;;  %v3367_v46 = vld [vmem:[%s2681_s21 + $0x58] sm:$0xf]  ;;  %v958_v45 = vshrl.u32 %v3306_v29, 16 }
  0x70   : > { %5689 = vst [vmem:[#allocation20_spill] sm:$0xff] %v3337_v11  ;;  %5690 = vst [vmem:[#allocation12_spill] sm:$0xff] %v3340_v57  ;;  %v3355_v27 = vmax.bf16 %v767_v16, %v5696_v53  ;;  %v3364_v39 = vld [vmem:[%s2681_s21 + $0x50] sm:$0xf]  ;;  %v3370_v34 = vld [vmem:[%s2681_s21 + $0x60] sm:$0xf] }
  0x71   : > { %5695 = vst [vmem:[#allocation30_spill] sm:$0xff] %v3352_v48  ;;  %5698 = vst [vmem:[#allocation19_spill] sm:$0xff] %v3358_v50  ;;  %v3373_v10 = vld [vmem:[%s2681_s21 + $0x68] sm:$0xf]  ;;  %v3376_v61 = vld [vmem:[%s2681_s21 + $0x70] sm:$0xf] }
  0x72   : > { %5697 = vst [vmem:[#allocation26_spill] sm:$0xff] %v3355_v27  ;;  %5699 = vst [vmem:[#allocation33_spill] sm:$0xff] %v3361_v20  ;;  %v3379_v16 = vld [vmem:[%s2681_s21 + $0x78] sm:$0xf]  ;;  %v3382_v52 = vld [vmem:[%s2681_s21 + $0x80] sm:$0xf] }
  0x73   : > { %5700 = vst [vmem:[#allocation29_spill] sm:$0xff] %v3364_v39  ;;  %5701 = vst [vmem:[#allocation22_spill] sm:$0xff] %v3367_v46  ;;  %v3385_v4 = vld [vmem:[%s2681_s21 + $0x88] sm:$0xf]  ;;  %v3396_v0 = vld [vmem:[%s2681_s21 + $0x98] sm:$0xf] }
  0x74   : > { %5702 = vst [vmem:[#allocation37_spill] sm:$0xff] %v3370_v34  ;;  %5703 = vst [vmem:[#allocation32_spill] sm:$0xff] %v3373_v10  ;;  %v3399_v36 = vld [vmem:[%s2681_s21 + $0xa0] sm:$0xf]  ;;  %v3402_v63 = vld [vmem:[%s2681_s21 + $0xa8] sm:$0xf] }
  0x75   : > { %5704 = vst [vmem:[#allocation24_spill] sm:$0xff] %v3376_v61  ;;  %5705 = vst [vmem:[#allocation40_spill] sm:$0xff] %v3379_v16  ;;  %v3413_v55 = vld [vmem:[%s2681_s21 + $0xb0] sm:$0xf]  ;;  %v3416_v32 = vld [vmem:[%s2681_s21 + $0xb8] sm:$0xf] }
  0x76   : > { %5706 = vst [vmem:[#allocation35_spill] sm:$0xff] %v3382_v52  ;;  %5707 = vst [vmem:[#allocation27_spill] sm:$0xff] %v3385_v4  ;;  %v3419_v47 = vld [vmem:[%s2681_s21 + $0xc0] sm:$0xf]  ;;  %v3430_v3 = vld [vmem:[%s2681_s21 + $0xc8] sm:$0xf] }
  0x77   : > { %5708 = vst [vmem:[#allocation42_spill] sm:$0xff] %v3396_v0  ;;  %5709 = vst [vmem:[#allocation38_spill] sm:$0xff] %v3399_v36  ;;  %v3433_v2 = vld [vmem:[%s2681_s21 + $0xd0] sm:$0xf]  ;;  %v3436_v28 = vld [vmem:[%s2681_s21 + $0xe0] sm:$0xf] }
  0x78   : > { %5710 = vst [vmem:[#allocation31_spill] sm:$0xff] %v3402_v63  ;;  %5711 = vst [vmem:[#allocation45_spill] sm:$0xff] %v3413_v55  ;;  %v3447_v51 = vld [vmem:[%s2681_s21 + $0xe8] sm:$0xf]  ;;  %v3450_v33 = vld [vmem:[%s2681_s21 + $0xf0] sm:$0xf] }
  0x79   : > { %5712 = vst [vmem:[#allocation41_spill] sm:$0xff] %v3416_v32  ;;  %5713 = vst [vmem:[#allocation34_spill] sm:$0xff] %v3419_v47  ;;  %v3453_v38 = vld [vmem:[%s2681_s21 + $0xf8] sm:$0xf]  ;;  %v3464_v60 = vld [vmem:[%s2681_s21 + $0x100] sm:$0xf] }
  0x7a   : > { %5714 = vst [vmem:[#allocation49_spill] sm:$0xff] %v3430_v3  ;;  %5715 = vst [vmem:[#allocation44_spill] sm:$0xff] %v3433_v2  ;;  %v3467_v8 = vld [vmem:[%s2681_s21 + $0x108] sm:$0xf]  ;;  %v2444_v35 = vld [vmem:[%s2681_s21 + $0xc] sm:$0x1] }
  0x7b   : > { %5716 = vst [vmem:[#allocation36_spill] sm:$0xff] %v3436_v28  ;;  %5717 = vst [vmem:[#allocation50_spill] sm:$0xff] %v3447_v51  ;;  %v3479_v6 = vld [vmem:[%s2681_s21 + $0x110] sm:$0xf]  ;;  %v3482_v15 = vld [vmem:[%s2681_s21 + $0x118] sm:$0xf] }
  0x7c   : > { %5718 = vst [vmem:[#allocation47_spill] sm:$0xff] %v3450_v33  ;;  %5719 = vst [vmem:[#allocation39_spill] sm:$0xff] %v3453_v38  ;;  %v2445_v1 = vld [vmem:[%s2681_s21 + $0x14] sm:$0x1]  ;;  %v961_v53 = vshll.u32 %v3306_v29, 16  ;;  %v967_v24 = vshll.u32 %v2444_v35, 16 }
  0x7d   : > { %5720 = vst [vmem:[#allocation43_spill] sm:$0xff] %v3464_v60  ;;  %5721 = vst [vmem:[#allocation46_spill] sm:$0xff] %v3467_v8  ;;  %v2446_v11 = vld [vmem:[%s2681_s21 + $0x1c] sm:$0x1]  ;;  %v981_v7 = vshll.u32 %v2445_v1, 16  ;;  %v989_v27 = vshll.u32 %v3312_v14, 16 }
  0x7e   : > { %v2447_v18 = vld [vmem:[%s2681_s21 + $0x24] sm:$0x1]  ;;  %v960_v50 = vrot.slane %v958_v45, 4  ;;  %v963_v48 = vrot.slane %v961_v53, 5  ;;  %v3509_v59 = vrot.slane %v967_v24, 5  ;;  %v974_v20 = vrot.slane %v972_v5, 4 }
  0x7f   : > { %v977_v26 = vrot.slane %v975_v37, 5  ;;  %v3511_v62 = vrot.slane %v981_v7, 5  ;;  %v988_v35 = vrot.slane %v986_v49, 4  ;;  %v991_v25 = vrot.slane %v989_v27, 5  ;;  %v2448_v58 = vld [vmem:[%s2681_s21 + $0x2c] sm:$0x1] }
  0x80   : > { %v964_v21 = vor.u32 %v963_v48, %v960_v50  ;;  %v995_v17 = vshll.u32 %v2446_v11, 16  ;;  %v1000_v1 = vshrl.u32 %v3315_v13, 16  ;;  %v1009_v45 = vshll.u32 %v2447_v18, 16  ;;  %v2449_v27 = vld [vmem:[%s2681_s21 + $0x34] sm:$0x1] }
  0x81   : > { %v978_v56 = vor.u32 %v977_v26, %v974_v20  ;;  %v992_v43 = vor.u32 %v991_v25, %v988_v35  ;;  %v1014_v24 = vshrl.u32 %v3340_v57, 16  ;;  %v1005_v49 = vrot.slane %v1003_v9, 5  ;;  %v2450_v20 = vld [vmem:[%s2681_s21 + $0x3c] sm:$0x1] }
  0x82   : > { %v3517_v5 = vrot.slane %v964_v21, 4  ;;  %v3519_v7 = vrot.slane %v995_v17, 5  ;;  %v1002_v37 = vrot.slane %v1000_v1, 4  ;;  %v3526_v50 = vrot.slane %v1009_v45, 5 }
  0x83   : > { %v3522_v48 = vrot.slane %v978_v56, 4  ;;  %v3524_v11 = vrot.slane %v992_v43, 4  ;;  %v1016_v26 = vrot.slane %v1014_v24, 4  ;;  %v1017_v17 = vshll.u32 %v3340_v57, 16  ;;  %v2451_v24 = vld [vmem:[%s2681_s21 + $0x44] sm:$0x1] }
  0x84   : > { %v1006_v21 = vor.u32 %v1005_v49, %v1002_v37  ;;  %v1023_v18 = vshll.u32 %v2448_v58, 16  ;;  %v1028_v9 = vshrl.u32 %v3343_v23, 16  ;;  %v1031_v53 = vshll.u32 %v3343_v23, 16 }
  0x85   : > { %v1019_v1 = vrot.slane %v1017_v17, 5  ;;  %v1037_v45 = vshll.u32 %v2449_v27, 16  ;;  %v1042_v43 = vshrl.u32 %v3346_v12, 16  ;;  %v1045_v25 = vshll.u32 %v3346_v12, 16 }
  0x86   : > { %v3544_v35 = vrot.slane %v1006_v21, 4  ;;  %v3546_v58 = vrot.slane %v1023_v18, 5  ;;  %v1030_v37 = vrot.slane %v1028_v9, 4  ;;  %v1033_v49 = vrot.slane %v1031_v53, 5  ;;  %v2452_v53 = vld [vmem:[%s2681_s21 + $0x54] sm:$0x1] }
  0x87   : > { %v1020_v42 = vor.u32 %v1019_v1, %v1016_v26  ;;  %v3555_v21 = vrot.slane %v1037_v45, 5  ;;  %v1051_v17 = vshll.u32 %v2450_v20, 16  ;;  %v1044_v23 = vrot.slane %v1042_v43, 4  ;;  %v2453_v45 = vld [vmem:[%s2681_s21 + $0x5c] sm:$0x1] }
  0x88   : > { %v1034_v18 = vor.u32 %v1033_v49, %v1030_v37  ;;  %v1047_v27 = vrot.slane %v1045_v25, 5  ;;  %v1056_v9 = vshrl.u32 %v3349_v31, 16  ;;  %v1059_v12 = vshll.u32 %v3349_v31, 16 }
  0x89   : > { %5722 = vst [vmem:[#allocation48_spill] sm:$0xff] %v3555_v21  ;;  %v3559_v41 = vrot.slane %v1020_v42, 4  ;;  %v3561_v57 = vrot.slane %v1051_v17, 5  ;;  %v1065_v22 = vshll.u32 %v2451_v24, 16  ;;  %v1070_v20 = vshrl.u32 %v3364_v39, 16 }
  0x8a   : > { %v3564_v56 = vrot.slane %v1034_v18, 4  ;;  %v1048_v26 = vor.u32 %v1047_v27, %v1044_v23  ;;  %v1058_v1 = vrot.slane %v1056_v9, 4  ;;  %v1061_v42 = vrot.slane %v1059_v12, 5  ;;  %v2454_v18 = vld [vmem:[%s2681_s21 + $0x64] sm:$0x1] }
  0x8b   : > { %v3572_v43 = vrot.slane %v1065_v22, 5  ;;  %v1073_v37 = vshll.u32 %v3364_v39, 16  ;;  %v1072_v49 = vrot.slane %v1070_v20, 4  ;;  %v1079_v17 = vshll.u32 %v2452_v53, 16  ;;  %v2455_v20 = vld [vmem:[%s2681_s21 + $0x6c] sm:$0x1] }
  0x8c   : > { %5723 = vst [vmem:[#allocation59_spill] sm:$0xff] %v3564_v56  ;;  %v3579_v24 = vrot.slane %v1048_v26, 4  ;;  %v1062_v27 = vor.u32 %v1061_v42, %v1058_v1  ;;  %v1084_v25 = vshrl.u32 %v3367_v46, 16  ;;  %v1087_v12 = vshll.u32 %v3367_v46, 16 }
  0x8d   : > { %5724 = vst [vmem:[#allocation60_spill] sm:$0xff] %v3572_v43  ;;  %v1075_v9 = vrot.slane %v1073_v37, 5  ;;  %v3588_v39 = vrot.slane %v1079_v17, 5  ;;  %v1093_v23 = vshll.u32 %v2453_v45, 16  ;;  %v1098_v26 = vshrl.u32 %v3370_v34, 16 }
  0x8e   : > { %v3592_v53 = vrot.slane %v1062_v27, 4  ;;  %v1086_v42 = vrot.slane %v1084_v25, 4  ;;  %v1089_v37 = vrot.slane %v1087_v12, 5  ;;  %v1101_v21 = vshll.u32 %v3370_v34, 16 }
  0x8f   : > { %5725 = vst [vmem:[#allocation61_spill] sm:$0xff] %v3588_v39  ;;  %v1076_v1 = vor.u32 %v1075_v9, %v1072_v49  ;;  %v3594_v31 = vrot.slane %v1093_v23, 5  ;;  %v1100_v46 = vrot.slane %v1098_v26, 4  ;;  %v1107_v56 = vshll.u32 %v2454_v18, 16  ;;  %v2456_v49 = vld [vmem:[%s2681_s21 + $0x74] sm:$0x1] }
  0x90   : > { %5726 = vst [vmem:[#allocation62_spill] sm:$0xff] %v3592_v53  ;;  %v1090_v22 = vor.u32 %v1089_v37, %v1086_v42  ;;  %v1112_v27 = vshrl.u32 %v3373_v10, 16  ;;  %v1103_v25 = vrot.slane %v1101_v21, 5  ;;  %v1115_v23 = vshll.u32 %v3373_v10, 16  ;;  %v2457_v37 = vld [vmem:[%s2681_s21 + $0x7c] sm:$0x1] }
  0x91   : > { %v3601_v17 = vrot.slane %v1076_v1, 4  ;;  %v3605_v9 = vrot.slane %v1107_v56, 5  ;;  %v1121_v12 = vshll.u32 %v2455_v20, 16  ;;  %v1126_v42 = vshrl.u32 %v3376_v61, 16  ;;  %v2459_v53 = vld [vmem:[%s2681_s21 + $0x8c] sm:$0x1] }
  0x92   : > { %v3612_v26 = vrot.slane %v1090_v22, 4  ;;  %v1114_v1 = vrot.slane %v1112_v27, 4  ;;  %v1104_v45 = vor.u32 %v1103_v25, %v1100_v46  ;;  %v1117_v34 = vrot.slane %v1115_v23, 5  ;;  %v2458_v27 = vld [vmem:[%s2681_s21 + $0x84] sm:$0x1] }
  0x93   : > { %5727 = vst [vmem:[#allocation63_spill] sm:$0xff] %v3601_v17  ;;  %v3616_v56 = vrot.slane %v1121_v12, 5  ;;  %v1129_v21 = vshll.u32 %v3376_v61, 16  ;;  %v1128_v10 = vrot.slane %v1126_v42, 4  ;;  %v1135_v18 = vshll.u32 %v2456_v49, 16 }
  0x94   : > { %v1140_v22 = vshrl.u32 %v3379_v16, 16  ;;  %v3625_v39 = vrot.slane %v1104_v45, 4  ;;  %v1118_v17 = vor.u32 %v1117_v34, %v1114_v1  ;;  %v1143_v25 = vshll.u32 %v3379_v16, 16  ;;  %v2460_v49 = vld [vmem:[%s2681_s21 + $0x9c] sm:$0x1] }
  0x95   : > { %5728 = vst [vmem:[#allocation64_spill] sm:$0xff] %v3616_v56  ;;  %v1131_v46 = vrot.slane %v1129_v21, 5  ;;  %v3628_v23 = vrot.slane %v1135_v18, 5  ;;  %v1149_v61 = vshll.u32 %v2457_v37, 16  ;;  %v1154_v43 = vshrl.u32 %v3382_v52, 16 }
  0x96   : > { %v1142_v12 = vrot.slane %v1140_v22, 4  ;;  %v3636_v42 = vrot.slane %v1118_v17, 4  ;;  %v1145_v34 = vrot.slane %v1143_v25, 5  ;;  %v1157_v18 = vshll.u32 %v3382_v52, 16 }
  0x97   : > { %5729 = vst [vmem:[#allocation65_spill] sm:$0xff] %v3628_v23  ;;  %v1132_v45 = vor.u32 %v1131_v46, %v1128_v10  ;;  %v3638_v1 = vrot.slane %v1149_v61, 5  ;;  %v1156_v21 = vrot.slane %v1154_v43, 4  ;;  %v1163_v22 = vshll.u32 %v2458_v27, 16 }
  0x98   : > { %5730 = vst [vmem:[#allocation66_spill] sm:$0xff] %v3636_v42  ;;  %v1146_v16 = vor.u32 %v1145_v34, %v1142_v12  ;;  %v1168_v17 = vshrl.u32 %v3385_v4, 16  ;;  %v1159_v10 = vrot.slane %v1157_v18, 5  ;;  %v1171_v61 = vshll.u32 %v3385_v4, 16  ;;  %v2461_v34 = vld [vmem:[%s2681_s21 + $0xa4] sm:$0x1] }
  0x99   : > { %v3645_v20 = vrot.slane %v1132_v45, 4  ;;  %v3649_v46 = vrot.slane %v1163_v22, 5  ;;  %v1177_v43 = vshll.u32 %v2459_v53, 16  ;;  %v1182_v12 = vshrl.u32 %v3396_v0, 16  ;;  %v2463_v42 = vld [vmem:[%s2681_s21 + $0xb4] sm:$0x1] }
  0x9a   : > { %v3656_v25 = vrot.slane %v1146_v16, 4  ;;  %v1170_v45 = vrot.slane %v1168_v17, 4  ;;  %v1160_v37 = vor.u32 %v1159_v10, %v1156_v21  ;;  %v1173_v52 = vrot.slane %v1171_v61, 5  ;;  %v2462_v17 = vld [vmem:[%s2681_s21 + $0xac] sm:$0x1] }
  0x9b   : > { %5731 = vst [vmem:[#allocation67_spill] sm:$0xff] %v3645_v20  ;;  %v3660_v18 = vrot.slane %v1177_v43, 5  ;;  %v1185_v22 = vshll.u32 %v3396_v0, 16  ;;  %v1184_v4 = vrot.slane %v1182_v12, 4  ;;  %v1191_v27 = vshll.u32 %v2460_v49, 16 }
  0x9c   : > { %v1196_v16 = vshrl.u32 %v3399_v36, 16  ;;  %v3669_v23 = vrot.slane %v1160_v37, 4  ;;  %v1174_v20 = vor.u32 %v1173_v52, %v1170_v45  ;;  %v1199_v10 = vshll.u32 %v3399_v36, 16  ;;  %v2464_v49 = vld [vmem:[%s2681_s21 + $0xbc] sm:$0x1] }
  0x9d   : > { %5732 = vst [vmem:[#allocation68_spill] sm:$0xff] %v3660_v18  ;;  %v1187_v21 = vrot.slane %v1185_v22, 5  ;;  %v3672_v61 = vrot.slane %v1191_v27, 5  ;;  %v1205_v0 = vshll.u32 %v2461_v34, 16  ;;  %v1210_v56 = vshrl.u32 %v3402_v63, 16 }
  0x9e   : > { %v1198_v43 = vrot.slane %v1196_v16, 4  ;;  %v3680_v12 = vrot.slane %v1174_v20, 4  ;;  %v1201_v52 = vrot.slane %v1199_v10, 5  ;;  %v1213_v27 = vshll.u32 %v3402_v63, 16 }
  0x9f   : > { %5733 = vst [vmem:[#allocation69_spill] sm:$0xff] %v3672_v61  ;;  %v1188_v37 = vor.u32 %v1187_v21, %v1184_v4  ;;  %v3682_v45 = vrot.slane %v1205_v0, 5  ;;  %v1212_v22 = vrot.slane %v1210_v56, 4  ;;  %v1219_v16 = vshll.u32 %v2462_v17, 16 }
  0xa0   : > { %5734 = vst [vmem:[#allocation70_spill] sm:$0xff] %v3680_v12  ;;  %v1202_v36 = vor.u32 %v1201_v52, %v1198_v43  ;;  %v1224_v20 = vshrl.u32 %v3413_v55, 16  ;;  %v1215_v4 = vrot.slane %v1213_v27, 5  ;;  %v1227_v0 = vshll.u32 %v3413_v55, 16  ;;  %v2465_v52 = vld [vmem:[%s2681_s21 + $0xc4] sm:$0x1] }
  0xa1   : > { %v3689_v53 = vrot.slane %v1188_v37, 4  ;;  %v3693_v21 = vrot.slane %v1219_v16, 5  ;;  %v1233_v56 = vshll.u32 %v2463_v42, 16  ;;  %v1238_v43 = vshrl.u32 %v3416_v32, 16  ;;  %v2467_v12 = vld [vmem:[%s2681_s21 + $0xd4] sm:$0x1] }
  0xa2   : > { %v3700_v10 = vrot.slane %v1202_v36, 4  ;;  %v1226_v37 = vrot.slane %v1224_v20, 4  ;;  %v1216_v34 = vor.u32 %v1215_v4, %v1212_v22  ;;  %v1229_v63 = vrot.slane %v1227_v0, 5  ;;  %v2466_v20 = vld [vmem:[%s2681_s21 + $0xcc] sm:$0x1] }
  0xa3   : > { %5735 = vst [vmem:[#allocation71_spill] sm:$0xff] %v3689_v53  ;;  %v3704_v27 = vrot.slane %v1233_v56, 5  ;;  %v1241_v16 = vshll.u32 %v3416_v32, 16  ;;  %v1240_v55 = vrot.slane %v1238_v43, 4  ;;  %v1247_v17 = vshll.u32 %v2464_v49, 16 }
  0xa4   : > { %v1252_v36 = vshrl.u32 %v3419_v47, 16  ;;  %v3713_v61 = vrot.slane %v1216_v34, 4  ;;  %v1230_v53 = vor.u32 %v1229_v63, %v1226_v37  ;;  %v1255_v4 = vshll.u32 %v3419_v47, 16  ;;  %v2468_v49 = vld [vmem:[%s2681_s21 + $0xe4] sm:$0x1] }
  0xa5   : > { %5736 = vst [vmem:[#allocation72_spill] sm:$0xff] %v3704_v27  ;;  %v1243_v22 = vrot.slane %v1241_v16, 5  ;;  %v3716_v0 = vrot.slane %v1247_v17, 5  ;;  %v1261_v32 = vshll.u32 %v2465_v52, 16  ;;  %v1266_v18 = vshrl.u32 %v3430_v3, 16 }
  0xa6   : > { %v1254_v56 = vrot.slane %v1252_v36, 4  ;;  %v3724_v43 = vrot.slane %v1230_v53, 4  ;;  %v1257_v63 = vrot.slane %v1255_v4, 5  ;;  %v1269_v17 = vshll.u32 %v3430_v3, 16 }
  0xa7   : > { %5737 = vst [vmem:[#allocation73_spill] sm:$0xff] %v3716_v0  ;;  %v1244_v34 = vor.u32 %v1243_v22, %v1240_v55  ;;  %v3726_v37 = vrot.slane %v1261_v32, 5  ;;  %v1268_v16 = vrot.slane %v1266_v18, 4  ;;  %v1275_v36 = vshll.u32 %v2466_v20, 16 }
  0xa8   : > { %5738 = vst [vmem:[#allocation74_spill] sm:$0xff] %v3724_v43  ;;  %v1258_v47 = vor.u32 %v1257_v63, %v1254_v56  ;;  %v1280_v53 = vshrl.u32 %v3433_v2, 16  ;;  %v1271_v55 = vrot.slane %v1269_v17, 5  ;;  %v1283_v32 = vshll.u32 %v3433_v2, 16  ;;  %v2469_v63 = vld [vmem:[%s2681_s21 + $0xec] sm:$0x1] }
  0xa9   : > { %v3733_v42 = vrot.slane %v1244_v34, 4  ;;  %v3737_v22 = vrot.slane %v1275_v36, 5  ;;  %v1289_v18 = vshll.u32 %v2467_v12, 16  ;;  %v1294_v56 = vshrl.u32 %v3436_v28, 16  ;;  %v2471_v43 = vld [vmem:[%s2681_s21 + $0xfc] sm:$0x1] }
  0xaa   : > { %v3744_v4 = vrot.slane %v1258_v47, 4  ;;  %v1282_v34 = vrot.slane %v1280_v53, 4  ;;  %v1272_v52 = vor.u32 %v1271_v55, %v1268_v16  ;;  %v1285_v3 = vrot.slane %v1283_v32, 5  ;;  %v2470_v53 = vld [vmem:[%s2681_s21 + $0xf4] sm:$0x1] }
  0xab   : > { %5739 = vst [vmem:[#allocation75_spill] sm:$0xff] %v3733_v42  ;;  %v3748_v17 = vrot.slane %v1289_v18, 5  ;;  %v1297_v36 = vshll.u32 %v3436_v28, 16  ;;  %v1296_v2 = vrot.slane %v1294_v56, 4  ;;  %v1303_v20 = vshll.u32 %v2468_v49, 16 }
  0xac   : > { %v1308_v47 = vshrl.u32 %v3447_v51, 16  ;;  %v3757_v0 = vrot.slane %v1272_v52, 4  ;;  %v1286_v42 = vor.u32 %v1285_v3, %v1282_v34  ;;  %v1311_v55 = vshll.u32 %v3447_v51, 16  ;;  %v2472_v49 = vld [vmem:[%s2681_s21 + $0x104] sm:$0x1] }
  0xad   : > { %5740 = vst [vmem:[#allocation76_spill] sm:$0xff] %v3748_v17  ;;  %v1299_v16 = vrot.slane %v1297_v36, 5  ;;  %v3760_v32 = vrot.slane %v1303_v20, 5  ;;  %v1317_v28 = vshll.u32 %v2469_v63, 16  ;;  %v1322_v27 = vshrl.u32 %v3450_v33, 16 }
  0xae   : > { %v1310_v18 = vrot.slane %v1308_v47, 4  ;;  %v3768_v56 = vrot.slane %v1286_v42, 4  ;;  %v1313_v3 = vrot.slane %v1311_v55, 5  ;;  %v1325_v20 = vshll.u32 %v3450_v33, 16 }
  0xaf   : > { %5741 = vst [vmem:[#allocation77_spill] sm:$0xff] %v3760_v32  ;;  %v1300_v52 = vor.u32 %v1299_v16, %v1296_v2  ;;  %v3770_v34 = vrot.slane %v1317_v28, 5  ;;  %v1324_v36 = vrot.slane %v1322_v27, 4  ;;  %v1331_v47 = vshll.u32 %v2470_v53, 16 }
  0xb0   : > { %5742 = vst [vmem:[#allocation78_spill] sm:$0xff] %v3768_v56  ;;  %v1314_v51 = vor.u32 %v1313_v3, %v1310_v18  ;;  %v1336_v42 = vshrl.u32 %v3453_v38, 16  ;;  %v1327_v2 = vrot.slane %v1325_v20, 5  ;;  %v1339_v28 = vshll.u32 %v3453_v38, 16  ;;  %v2473_v3 = vld [vmem:[%s2681_s21 + $0x10c] sm:$0x1] }
  0xb1   : > { %v3777_v12 = vrot.slane %v1300_v52, 4  ;;  %v3781_v16 = vrot.slane %v1331_v47, 5  ;;  %v1345_v27 = vshll.u32 %v2471_v43, 16  ;;  %v1350_v18 = vshrl.u32 %v3464_v60, 16  ;;  %v2475_v56 = vld [vmem:[%s2681_s21 + $0x11c] sm:$0x1] }
  0xb2   : > { %v3788_v55 = vrot.slane %v1314_v51, 4  ;;  %v1338_v52 = vrot.slane %v1336_v42, 4  ;;  %v1328_v63 = vor.u32 %v1327_v2, %v1324_v36  ;;  %v1341_v33 = vrot.slane %v1339_v28, 5  ;;  %v2474_v42 = vld [vmem:[%s2681_s21 + $0x114] sm:$0x1] }
  0xb3   : > { %5743 = vst [vmem:[#allocation79_spill] sm:$0xff] %v3777_v12  ;;  %v3792_v20 = vrot.slane %v1345_v27, 5  ;;  %v1353_v47 = vshll.u32 %v3464_v60, 16  ;;  %v1352_v38 = vrot.slane %v1350_v18, 4  ;;  %v1359_v53 = vshll.u32 %v2472_v49, 16 }
  0xb4   : > { %v1364_v51 = vshrl.u32 %v3467_v8, 16  ;;  %v3801_v32 = vrot.slane %v1328_v63, 4  ;;  %v1342_v12 = vor.u32 %v1341_v33, %v1338_v52  ;;  %v1367_v2 = vshll.u32 %v3467_v8, 16 }
  0xb5   : > { %v1355_v36 = vrot.slane %v1353_v47, 5  ;;  %v3804_v28 = vrot.slane %v1359_v53, 5  ;;  %v1373_v60 = vshll.u32 %v2473_v3, 16  ;;  %v1378_v17 = vshrl.u32 %v3479_v6, 16 }
  0xb6   : > { %v1366_v27 = vrot.slane %v1364_v51, 4  ;;  %v3812_v18 = vrot.slane %v1342_v12, 4  ;;  %v1369_v43 = vrot.slane %v1367_v2, 5  ;;  %v1381_v53 = vshll.u32 %v3479_v6, 16 }
  0xb7   : > { %v1356_v63 = vor.u32 %v1355_v36, %v1352_v38  ;;  %v3814_v33 = vrot.slane %v1373_v60, 5  ;;  %v1380_v52 = vrot.slane %v1378_v17, 4  ;;  %v1387_v47 = vshll.u32 %v2474_v42, 16 }
  0xb8   : > { %v1348_v3 = vsel %vm2717_vm2, %v3812_v18, %v3792_v20  ;;  %v1370_v8 = vor.u32 %v1369_v43, %v1366_v27  ;;  %v1392_v49 = vshrl.u32 %v3482_v15, 16  ;;  %v1383_v12 = vrot.slane %v1381_v53, 5 }
  0xb9   : > { %v3821_v51 = vrot.slane %v1356_v63, 4  ;;  %v3824_v38 = vrot.slane %v1387_v47, 5  ;;  %v1395_v60 = vshll.u32 %v3482_v15, 16  ;;  %v1401_v17 = vshll.u32 %v2475_v56, 16  ;;  %v5760_v47 = vld [vmem:[#allocation59_spill] sm:$0xff] }
  0xba   : > { %v1371_v36 = vrot.slane %v1370_v8, 4  ;;  %v1394_v2 = vrot.slane %v1392_v49, 4  ;;  %v5744_v20 = vmax.bf16 %v3306_v29, %v3113_v40  ;;  %v5745_v43 = vsel %vm2717_vm2, %v3517_v5, %v3509_v59  ;;  %v5753_v49 = vld [vmem:[#allocation12_spill] sm:$0xff] }
  0xbb   : > { %v1362_v42 = vsel %vm2717_vm2, %v3821_v51, %v3804_v28  ;;  %v1384_v18 = vor.u32 %v1383_v12, %v1380_v52  ;;  %v1397_v63 = vrot.slane %v1395_v60, 5  ;;  %v1403_v56 = vrot.slane %v1401_v17, 5  ;;  %v5761_v51 = vld [vmem:[#allocation48_spill] sm:$0xff]  ;;  %v5764_v60 = vld [vmem:[#allocation54_spill] sm:$0xff] }
  0xbc   : > { %v3839_v27 = vmax.bf16 %v5745_v43, %v5744_v20  ;;  %v5746_v53 = vmax.bf16 %v3309_v44, %v3121_v54  ;;  %v5747_v8 = vsel %vm2717_vm2, %v3522_v48, %v3511_v62  ;;  %v1376_v40 = vsel %vm2717_vm2, %v1371_v36, %v3814_v33  ;;  %v5750_v44 = vld [vmem:[#allocation51_spill] sm:$0xff]  ;;  %v5754_v33 = vld [vmem:[#allocation52_spill] sm:$0xff] }
  0xbd   : > { %v5748_v59 = vmax.bf16 %v3312_v14, %v3131_v19  ;;  %v5749_v29 = vsel %vm2717_vm2, %v3524_v11, %v3519_v7  ;;  %v5751_v5 = vmax.bf16 %v3315_v13, %v5750_v44  ;;  %v5752_v62 = vsel %vm2717_vm2, %v3544_v35, %v3526_v50  ;;  %v5757_v50 = vld [vmem:[#allocation28_spill] sm:$0xff]  ;;  %v5758_v35 = vld [vmem:[#allocation53_spill] sm:$0xff]  ;;  %v5767_v20 = vld [vmem:[#allocation15_spill] sm:$0xff] }
  0xbe   : > { %v3849_v28 = vmax.bf16 %v5747_v8, %v5746_v53  ;;  %v5755_v19 = vmax.bf16 %v5753_v49, %v5754_v33  ;;  %v5756_v14 = vsel %vm2717_vm2, %v3559_v41, %v3546_v58  ;;  %v1385_v13 = vrot.slane %v1384_v18, 4  ;;  %v5763_v58 = vld [vmem:[#allocation23_spill] sm:$0xff]  ;;  %v5771_v53 = vld [vmem:[#allocation60_spill] sm:$0xff]  ;;  %v5779_v33 = vld [vmem:[#allocation22_spill] sm:$0xff] }
  0xbf   : > { %v3862_v54 = vmax.bf16 %v5749_v29, %v5748_v59  ;;  %v3872_v48 = vmax.bf16 %v5752_v62, %v5751_v5  ;;  %v1398_v11 = vor.u32 %v1397_v63, %v1394_v2  ;;  %v5759_v52 = vmax.bf16 %v5757_v50, %v5758_v35  ;;  %v5768_v43 = vld [vmem:[#allocation55_spill] sm:$0xff]  ;;  %v5770_v63 = vld [vmem:[#allocation62_spill] sm:$0xff]  ;;  %v5773_v29 = vld [vmem:[#allocation29_spill] sm:$0xff] }
  0xc0   : > { %v3882_v7 = vmax.bf16 %v5756_v14, %v5755_v19  ;;  %v5762_v12 = vsel %vm2717_vm2, %v5760_v47, %v5761_v51  ;;  %v5765_v17 = vmax.bf16 %v5763_v58, %v5764_v60  ;;  %v5766_v36 = vsel %vm2717_vm2, %v3579_v24, %v3561_v57  ;;  %v5774_v44 = vld [vmem:[#allocation56_spill] sm:$0xff]  ;;  %v5776_v57 = vld [vmem:[#allocation63_spill] sm:$0xff]  ;;  %v5777_v24 = vld [vmem:[#allocation61_spill] sm:$0xff] }
  0xc1   : > { %v3898_v41 = vmax.bf16 %v5762_v12, %v5759_v52  ;;  %v5769_v18 = vmax.bf16 %v5767_v20, %v5768_v43  ;;  %v5772_v8 = vsel %vm2717_vm2, %v5770_v63, %v5771_v53  ;;  %v5775_v5 = vmax.bf16 %v5773_v29, %v5774_v44  ;;  %v5780_v19 = vld [vmem:[#allocation57_spill] sm:$0xff]  ;;  %v5784_v47 = vld [vmem:[#allocation58_spill] sm:$0xff]  ;;  %v5791_v43 = vld [vmem:[#allocation64_spill] sm:$0xff] }
  0xc2   : > { %v3908_v2 = vmax.bf16 %v5766_v36, %v5765_v17  ;;  %v5778_v62 = vsel %vm2717_vm2, %v5776_v57, %v5777_v24  ;;  %v5781_v14 = vmax.bf16 %v5779_v33, %v5780_v19  ;;  %v5782_v50 = vsel %vm2717_vm2, %v3612_v26, %v3594_v31  ;;  %v5783_v52 = vld [vmem:[#allocation37_spill] sm:$0xff]  ;;  %v5787_v36 = vld [vmem:[#allocation32_spill] sm:$0xff]  ;;  %v5790_v20 = vld [vmem:[#allocation66_spill] sm:$0xff] }
  0xc3   : > { %v3918_v59 = vmax.bf16 %v5772_v8, %v5769_v18  ;;  %v3928_v49 = vmax.bf16 %v5778_v62, %v5775_v5  ;;  %v5785_v51 = vmax.bf16 %v5783_v52, %v5784_v47  ;;  %v5786_v12 = vsel %vm2717_vm2, %v3625_v39, %v3605_v9  ;;  %v5788_v31 = vld [vmem:[#allocation9_spill] sm:$0xff]  ;;  %v5793_v39 = vld [vmem:[#allocation24_spill] sm:$0xff]  ;;  %v5794_v9 = vld [vmem:[#allocation6_spill] sm:$0xff] }
  0xc4   : > { %v3938_v35 = vmax.bf16 %v5782_v50, %v5781_v14  ;;  %v1390_v60 = vsel %vm2717_vm2, %v1385_v13, %v3824_v38  ;;  %v1399_v17 = vrot.slane %v1398_v11, 4  ;;  %v5789_v26 = vmax.bf16 %v5787_v36, %v5788_v31  ;;  %v5796_v8 = vld [vmem:[#allocation67_spill] sm:$0xff]  ;;  %v5797_v38 = vld [vmem:[#allocation65_spill] sm:$0xff]  ;;  %v5799_v29 = vld [vmem:[#allocation40_spill] sm:$0xff] }
  0xc5   : > { %v3948_v58 = vmax.bf16 %v5786_v12, %v5785_v51  ;;  %v5792_v18 = vsel %vm2717_vm2, %v5790_v20, %v5791_v43  ;;  %v5795_v53 = vmax.bf16 %v5793_v39, %v5794_v9  ;;  %v5798_v13 = vsel %vm2717_vm2, %v5796_v8, %v5797_v38  ;;  %v5800_v44 = vld [vmem:[#allocation3_spill] sm:$0xff]  ;;  %v5804_v33 = vld [vmem:[#allocation13_spill] sm:$0xff]  ;;  %v5808_v47 = vld [vmem:[#allocation8_spill] sm:$0xff] }
  0xc6   : > { %v3961_v63 = vmax.bf16 %v5792_v18, %v5789_v26  ;;  %v5801_v5 = vmax.bf16 %v5799_v29, %v5800_v44  ;;  %v5802_v57 = vsel %vm2717_vm2, %v3656_v25, %v3638_v1  ;;  %v5803_v62 = vld [vmem:[#allocation35_spill] sm:$0xff]  ;;  %v5806_v14 = vsel %vm2717_vm2, %v3669_v23, %v3649_v46  ;;  %v5810_v12 = vld [vmem:[#allocation70_spill] sm:$0xff]  ;;  %v5811_v1 = vld [vmem:[#allocation68_spill] sm:$0xff] }
  0xc7   : > { %v3971_v11 = vmax.bf16 %v5798_v13, %v5795_v53  ;;  %v5805_v19 = vmax.bf16 %v5803_v62, %v5804_v33  ;;  %v5807_v52 = vld [vmem:[#allocation27_spill] sm:$0xff]  ;;  %v5812_v25 = vsel %vm2717_vm2, %v5810_v12, %v5811_v1  ;;  %v5813_v31 = vld [vmem:[#allocation42_spill] sm:$0xff]  ;;  %v5814_v26 = vld [vmem:[#allocation4_spill] sm:$0xff]  ;;  %v1404_v38 = vsel %vm2717_vm2, %v1399_v17, %v1403_v56 }
  0xc8   : > { %v3981_v24 = vmax.bf16 %v5802_v57, %v5801_v5  ;;  %v5809_v51 = vmax.bf16 %v5807_v52, %v5808_v47  ;;  %v5815_v20 = vmax.bf16 %v5813_v31, %v5814_v26  ;;  %v5816_v43 = vld [vmem:[#allocation71_spill] sm:$0xff]  ;;  %v5817_v18 = vld [vmem:[#allocation69_spill] sm:$0xff]  ;;  %v4014_v39 = vld [vmem:[%s3888_s24] sm:$0xf]  ;;  %v5822_v5 = vsel %vm2717_vm2, %v3700_v10, %v3682_v45 }
  0xc9   : > { %v3991_v50 = vmax.bf16 %v5806_v14, %v5805_v19  ;;  %v5818_v23 = vsel %vm2717_vm2, %v5816_v43, %v5817_v18  ;;  %v4017_v9 = vld [vmem:[%s3888_s24 + $0x8] sm:$0xf]  ;;  %v4020_v53 = vld [vmem:[%s3888_s24 + $0x10] sm:$0xf]  ;;  %v4023_v8 = vld [vmem:[%s3888_s24 + $0x18] sm:$0xf]  ;;  %v5826_v14 = vsel %vm2717_vm2, %v3713_v61, %v3693_v21 }
  0xca   : > { %v4001_v36 = vmax.bf16 %v5812_v25, %v5809_v51  ;;  %v4011_v46 = vmax.bf16 %v5818_v23, %v5815_v20  ;;  %v5819_v13 = vld [vmem:[#allocation38_spill] sm:$0xff]  ;;  %v5820_v29 = vld [vmem:[#allocation16_spill] sm:$0xff]  ;;  %v5823_v62 = vld [vmem:[#allocation31_spill] sm:$0xff] }
  0xcb   : > { %v5821_v44 = vmax.bf16 %v5819_v13, %v5820_v29  ;;  %v5824_v33 = vld [vmem:[#allocation11_spill] sm:$0xff]  ;;  %v5827_v56 = vld [vmem:[#allocation45_spill] sm:$0xff]  ;;  %v5830_v51 = vld [vmem:[#allocation74_spill] sm:$0xff] }
  0xcc   : > { %v5825_v19 = vmax.bf16 %v5823_v62, %v5824_v33  ;;  %v5828_v17 = vld [vmem:[#allocation5_spill] sm:$0xff]  ;;  %v5831_v12 = vld [vmem:[#allocation72_spill] sm:$0xff]  ;;  %v4058_v1 = vld [vmem:[%s3888_s24 + $0x20] sm:$0xf]  ;;  %v5842_v62 = vsel %vm2717_vm2, %v3744_v4, %v3726_v37 }
  0xcd   : > { %v4035_v57 = vmax.bf16 %v5822_v5, %v5821_v44  ;;  %v5829_v47 = vmax.bf16 %v5827_v56, %v5828_v17  ;;  %v5832_v45 = vsel %vm2717_vm2, %v5830_v51, %v5831_v12  ;;  %v4061_v25 = vld [vmem:[%s3888_s24 + $0x28] sm:$0xf]  ;;  %v4064_v31 = vld [vmem:[%s3888_s24 + $0x30] sm:$0xf]  ;;  %v4067_v61 = vld [vmem:[%s3888_s24 + $0x38] sm:$0xf]  ;;  %v5846_v17 = vsel %vm2717_vm2, %v3757_v0, %v3737_v22 }
  0xce   : > { %v4045_v52 = vmax.bf16 %v5826_v14, %v5825_v19  ;;  %v5833_v21 = vld [vmem:[#allocation41_spill] sm:$0xff]  ;;  %v5834_v26 = vld [vmem:[#allocation18_spill] sm:$0xff]  ;;  %v5836_v43 = vld [vmem:[#allocation75_spill] sm:$0xff] }
  0xcf   : > { %v4055_v10 = vmax.bf16 %v5832_v45, %v5829_v47  ;;  %v5835_v20 = vmax.bf16 %v5833_v21, %v5834_v26  ;;  %v5837_v18 = vld [vmem:[#allocation73_spill] sm:$0xff]  ;;  %v5839_v29 = vld [vmem:[#allocation34_spill] sm:$0xff]  ;;  %v5844_v14 = vld [vmem:[#allocation7_spill] sm:$0xff] }
  0xd0   : > { %v5838_v23 = vsel %vm2717_vm2, %v5836_v43, %v5837_v18  ;;  %v5840_v44 = vld [vmem:[#allocation14_spill] sm:$0xff]  ;;  %v5843_v19 = vld [vmem:[#allocation49_spill] sm:$0xff]  ;;  %v5847_v51 = vld [vmem:[#allocation44_spill] sm:$0xff] }
  0xd1   : > { %v4077_v13 = vmax.bf16 %v5838_v23, %v5835_v20  ;;  %v5841_v5 = vmax.bf16 %v5839_v29, %v5840_v44  ;;  %v5845_v56 = vmax.bf16 %v5843_v19, %v5844_v14  ;;  %v5848_v12 = vld [vmem:[#allocation21_spill] sm:$0xff]  ;;  %v5850_v21 = vld [vmem:[#allocation78_spill] sm:$0xff]  ;;  %v5851_v26 = vld [vmem:[#allocation76_spill] sm:$0xff] }
  0xd2   : > { %v5849_v45 = vmax.bf16 %v5847_v51, %v5848_v12  ;;  %v5852_v37 = vsel %vm2717_vm2, %v5850_v21, %v5851_v26  ;;  %v4110_v20 = vld [vmem:[%s3888_s24 + $0x48] sm:$0xf]  ;;  %v4113_v43 = vld [vmem:[%s3888_s24 + $0x50] sm:$0xf]  ;;  %v4116_v18 = vld [vmem:[%s3888_s24 + $0x58] sm:$0xf]  ;;  %v5862_v51 = vsel %vm2717_vm2, %v3788_v55, %v3770_v34 }
  0xd3   : > { %v4087_v33 = vmax.bf16 %v5842_v62, %v5841_v5  ;;  %v4097_v47 = vmax.bf16 %v5846_v17, %v5845_v56  ;;  %v4119_v0 = vld [vmem:[%s3888_s24 + $0x60] sm:$0xf]  ;;  %v5853_v22 = vld [vmem:[#allocation36_spill] sm:$0xff]  ;;  %v5854_v23 = vld [vmem:[#allocation17_spill] sm:$0xff] }
  0xd4   : > { %v4107_v4 = vmax.bf16 %v5852_v37, %v5849_v45  ;;  %v5855_v29 = vmax.bf16 %v5853_v22, %v5854_v23  ;;  %v5856_v44 = vld [vmem:[#allocation79_spill] sm:$0xff]  ;;  %v5857_v5 = vld [vmem:[#allocation77_spill] sm:$0xff]  ;;  %v5859_v14 = vld [vmem:[#allocation50_spill] sm:$0xff]  ;;  %v5866_v37 = vsel %vm2717_vm2, %v3801_v32, %v3781_v16 }
  0xd5   : > { %v5858_v62 = vsel %vm2717_vm2, %v5856_v44, %v5857_v5  ;;  %v5860_v56 = vld [vmem:[#allocation10_spill] sm:$0xff]  ;;  %v5863_v45 = vld [vmem:[#allocation47_spill] sm:$0xff]  ;;  %v5864_v21 = vld [vmem:[#allocation25_spill] sm:$0xff] }
  0xd6   : > { %v4129_v19 = vmax.bf16 %v5858_v62, %v5855_v29  ;;  %v5861_v17 = vmax.bf16 %v5859_v14, %v5860_v56  ;;  %v5865_v26 = vmax.bf16 %v5863_v45, %v5864_v21  ;;  %v5867_v23 = vld [vmem:[#allocation39_spill] sm:$0xff]  ;;  %v5868_v29 = vld [vmem:[#allocation20_spill] sm:$0xff]  ;;  %v4163_v62 = vld [vmem:[%s3888_s24 + $0x78] sm:$0xf] }
  0xd7   : > { %v5869_v44 = vmax.bf16 %v5867_v23, %v5868_v29  ;;  %v4157_v34 = vld [vmem:[%s3888_s24 + $0x68] sm:$0xf]  ;;  %v4160_v55 = vld [vmem:[%s3888_s24 + $0x70] sm:$0xf]  ;;  %v4166_v14 = vld [vmem:[%s3888_s24 + $0x80] sm:$0xf] }
  0xd8   : > { %v4139_v12 = vmax.bf16 %v5862_v51, %v5861_v17  ;;  %v4149_v22 = vmax.bf16 %v5866_v37, %v5865_v26  ;;  %v5870_v56 = vld [vmem:[#allocation43_spill] sm:$0xff]  ;;  %v5871_v32 = vld [vmem:[#allocation30_spill] sm:$0xff]  ;;  %v5878_v29 = vld [vmem:[#allocation33_spill] sm:$0xff] }
  0xd9   : > { %v4154_v5 = vmax.bf16 %v1348_v3, %v5869_v44  ;;  %v5872_v16 = vmax.bf16 %v5870_v56, %v5871_v32  ;;  %v5873_v51 = vld [vmem:[#allocation46_spill] sm:$0xff]  ;;  %v5876_v26 = vld [vmem:[#allocation19_spill] sm:$0xff]  ;;  %v5879_v44 = vmax.bf16 %v3482_v15, %v5878_v29  ;;  %v4192_v56 = vld [vmem:[%s3888_s24 + $0x98] sm:$0xf] }
  0xda   : > { %v5874_v45 = vld [vmem:[#allocation26_spill] sm:$0xff]  ;;  %v5877_v37 = vmax.bf16 %v3479_v6, %v5876_v26  ;;  %v4204_v6 = vld [vmem:[%s3888_s24 + $0xb8] sm:$0xf]  ;;  %v4210_v15 = vld [vmem:[%s3888_s24 + $0xc8] sm:$0xf] }
  0xdb   : > { %v4171_v17 = vmax.bf16 %v1362_v42, %v5872_v16  ;;  %v5875_v21 = vmax.bf16 %v5873_v51, %v5874_v45  ;;  %v4186_v30 = vmax.bf16 %v1404_v38, %v5879_v44  ;;  %v4189_v42 = vld [vmem:[%s3888_s24 + $0x90] sm:$0xf]  ;;  %v4195_v32 = vld [vmem:[%s3888_s24 + $0xa0] sm:$0xf]  ;;  %v1501_v38 = vmax.bf16 %v4014_v39, %v3839_v27  ;;  %v4221_v26 = vld [vmem:[%s3888_s24 + $0xd8] sm:$0xf] }
  0xdc   : > { %v4181_v23 = vmax.bf16 %v1390_v60, %v5877_v37  ;;  %v4201_v16 = vld [vmem:[%s3888_s24 + $0xb0] sm:$0xf]  ;;  %v4207_v60 = vld [vmem:[%s3888_s24 + $0xc0] sm:$0xf]  ;;  %v1502_v51 = vmax.bf16 %v4017_v9, %v3849_v28  ;;  %v1503_v45 = vmax.bf16 %v4020_v53, %v3862_v54  ;;  %v4227_v29 = vld [vmem:[%s3888_s24 + $0xe8] sm:$0xf]  ;;  %v1505_v27 = vmax.bf16 %v4058_v1, %v3882_v7 }
  0xdd   : > { %v4176_v3 = vmax.bf16 %v1376_v40, %v5875_v21  ;;  %v4198_v40 = vld [vmem:[%s3888_s24 + $0xa8] sm:$0xf]  ;;  %v1504_v21 = vmax.bf16 %v4023_v8, %v3872_v48  ;;  %v4224_v37 = vld [vmem:[%s3888_s24 + $0xe0] sm:$0xf]  ;;  %v4230_v44 = vld [vmem:[%s3888_s24 + $0xf0] sm:$0xf]  ;;  %v1506_v28 = vmax.bf16 %v4061_v25, %v3898_v41  ;;  %v1507_v54 = vmax.bf16 %v4064_v31, %v3908_v2 }
  0xde   : > { %v1508_v48 = vmax.bf16 %v4067_v61, %v3918_v59  ;;  %v4241_v39 = vld [vmem:[%s3888_s24 + $0xf8] sm:$0xf]  ;;  %v4244_v9 = vld [vmem:[%s3888_s24 + $0x100] sm:$0xf]  ;;  %v4247_v53 = vld [vmem:[%s3888_s24 + $0x108] sm:$0xf]  ;;  %v1509_v41 = vmax.bf16 %v4110_v20, %v3928_v49  ;;  %v1510_v2 = vmax.bf16 %v4113_v43, %v3938_v35  ;;  %v1511_v59 = vmax.bf16 %v4116_v18, %v3948_v58 }
  0xdf   : > { %v4250_v7 = vld [vmem:[%s3888_s24 + $0x110] sm:$0xf]  ;;  %v1512_v8 = vmax.bf16 %v4119_v0, %v3961_v63  ;;  %v1513_v1 = vmax.bf16 %v4157_v34, %v3971_v11  ;;  %v1514_v25 = vmax.bf16 %v4160_v55, %v3981_v24  ;;  %v1515_v49 = vmax.bf16 %v4163_v62, %v3991_v50  ;;  %v2476_v31 = vld [vmem:[%s3888_s24 + $0x8] sm:$0xf]  ;;  %v2478_v61 = vld [vmem:[%s3888_s24 + $0x18] sm:$0xf] }
  0xe0   : > { %v1516_v35 = vmax.bf16 %v4166_v14, %v4001_v36  ;;  %v2477_v58 = vld [vmem:[%s3888_s24 + $0x10] sm:$0xf]  ;;  %v2479_v63 = vld [vmem:[%s3888_s24 + $0x20] sm:$0xf]  ;;  %v1517_v20 = vmax.bf16 %v4189_v42, %v4011_v46  ;;  %v1518_v11 = vmax.bf16 %v4192_v56, %v4035_v57  ;;  %v1519_v24 = vmax.bf16 %v4195_v32, %v4045_v52  ;;  %v2480_v36 = vld [vmem:[%s3888_s24 + $0x28] sm:$0xf] }
  0xe1   : > { %v1520_v50 = vmax.bf16 %v4198_v40, %v4055_v10  ;;  %v2481_v43 = vld [vmem:[%s3888_s24 + $0x30] sm:$0xf]  ;;  %v2482_v18 = vld [vmem:[%s3888_s24 + $0x38] sm:$0xf]  ;;  %v2483_v0 = vld [vmem:[%s3888_s24 + $0x40] sm:$0xf]  ;;  %v1521_v34 = vmax.bf16 %v4201_v16, %v4077_v13  ;;  %v1522_v46 = vmax.bf16 %v4204_v6, %v4087_v33  ;;  %v1523_v57 = vmax.bf16 %v4207_v60, %v4097_v47 }
  0xe2   : > { %v1524_v52 = vmax.bf16 %v4210_v15, %v4107_v4  ;;  %v2484_v10 = vld [vmem:[%s3888_s24 + $0x50] sm:$0xf]  ;;  %v2485_v55 = vld [vmem:[%s3888_s24 + $0x58] sm:$0xf]  ;;  %v2486_v62 = vld [vmem:[%s3888_s24 + $0x60] sm:$0xf]  ;;  %v1525_v13 = vmax.bf16 %v4221_v26, %v4129_v19  ;;  %v1526_v33 = vmax.bf16 %v4224_v37, %v4139_v12  ;;  %v1527_v47 = vmax.bf16 %v4227_v29, %v4149_v22 }
  0xe3   : > { %v1528_v4 = vmax.bf16 %v4230_v44, %v4154_v5  ;;  %v2487_v14 = vld [vmem:[%s3888_s24 + $0x68] sm:$0xf]  ;;  %v2488_v42 = vld [vmem:[%s3888_s24 + $0x70] sm:$0xf]  ;;  %v2489_v56 = vld [vmem:[%s3888_s24 + $0x78] sm:$0xf]  ;;  %v1529_v32 = vmax.bf16 %v4241_v39, %v4171_v17  ;;  %v1530_v19 = vmax.bf16 %v4244_v9, %v4176_v3  ;;  %v1531_v12 = vmax.bf16 %v4247_v53, %v4181_v23 }
  0xe4   : > { %v1532_v22 = vmax.bf16 %v4250_v7, %v4186_v30  ;;  %v2490_v40 = vld [vmem:[%s3888_s24 + $0x80] sm:$0xf]  ;;  %v2491_v5 = vld [vmem:[%s3888_s24 + $0x88] sm:$0xf]  ;;  %v2492_v16 = vld [vmem:[%s3888_s24 + $0x98] sm:$0xf]  ;;  %v4320_v15 = vmax.bf16 %v2476_v31, %v1501_v38  ;;  %v4322_v26 = vmax.bf16 %v2477_v58, %v1502_v51  ;;  %v4324_v3 = vmax.bf16 %v2478_v61, %v1503_v45 }
  0xe5   : > { %v2493_v6 = vld [vmem:[%s3888_s24 + $0xa0] sm:$0xf]  ;;  %v2494_v60 = vld [vmem:[%s3888_s24 + $0xa8] sm:$0xf]  ;;  %v2495_v17 = vld [vmem:[%s3888_s24 + $0xb0] sm:$0xf]  ;;  %v4326_v23 = vmax.bf16 %v2479_v63, %v1504_v21  ;;  %v4331_v44 = vmax.bf16 %v2480_v36, %v1505_v27  ;;  %v4333_v39 = vmax.bf16 %v2481_v43, %v1506_v28  ;;  %v4335_v9 = vmax.bf16 %v2482_v18, %v1507_v54 }
  0xe6   : > { %v2496_v30 = vld [vmem:[%s3888_s24 + $0xb8] sm:$0xf]  ;;  %v2497_v37 = vld [vmem:[%s3888_s24 + $0xc0] sm:$0xf]  ;;  %v2498_v29 = vld [vmem:[%s3888_s24 + $0xc8] sm:$0xf]  ;;  %v4337_v38 = vmax.bf16 %v2483_v0, %v1508_v48  ;;  %v4348_v53 = vmax.bf16 %v2484_v10, %v1509_v41  ;;  %v4350_v27 = vmax.bf16 %v2485_v55, %v1510_v2  ;;  %v4352_v28 = vmax.bf16 %v2486_v62, %v1511_v59 }
  0xe7   : > { %5880 = vst [vmem:[#allocation51_spill] sm:$0xff] %v4326_v23  ;;  %5881 = vst [vmem:[#allocation12_spill] sm:$0xff] %v4331_v44  ;;  %v2499_v51 = vld [vmem:[%s3888_s24 + $0xd0] sm:$0xf]  ;;  %v2500_v45 = vld [vmem:[%s3888_s24 + $0xe0] sm:$0xf]  ;;  %v4354_v54 = vmax.bf16 %v2487_v14, %v1512_v8  ;;  %v4359_v58 = vmax.bf16 %v2488_v42, %v1513_v1  ;;  %v4361_v61 = vmax.bf16 %v2489_v56, %v1514_v25 }
  0xe8   : > { %5882 = vst [vmem:[#allocation52_spill] sm:$0xff] %v4333_v39  ;;  %5883 = vst [vmem:[#allocation28_spill] sm:$0xff] %v4335_v9  ;;  %v2501_v21 = vld [vmem:[%s3888_s24 + $0xe8] sm:$0xf]  ;;  %v2502_v48 = vld [vmem:[%s3888_s24 + $0xf0] sm:$0xf]  ;;  %v4363_v63 = vmax.bf16 %v2490_v40, %v1515_v49  ;;  %v4365_v41 = vmax.bf16 %v2491_v5, %v1516_v35  ;;  %v4370_v8 = vmax.bf16 %v2492_v16, %v1517_v20 }
  0xe9   : > { %5884 = vst [vmem:[#allocation53_spill] sm:$0xff] %v4337_v38  ;;  %5885 = vst [vmem:[#allocation59_spill] sm:$0xff] %v4348_v53  ;;  %v2503_v7 = vld [vmem:[%s3888_s24 + $0xf8] sm:$0xf]  ;;  %v2504_v31 = vld [vmem:[%s3888_s24 + $0x100] sm:$0xf]  ;;  %v4372_v43 = vmax.bf16 %v2493_v6, %v1518_v11  ;;  %v4374_v1 = vmax.bf16 %v2494_v60, %v1519_v24  ;;  %v4376_v25 = vmax.bf16 %v2495_v17, %v1520_v50 }
  0xea   : > { %5886 = vst [vmem:[#allocation48_spill] sm:$0xff] %v4350_v27  ;;  %5887 = vst [vmem:[#allocation23_spill] sm:$0xff] %v4352_v28  ;;  %v2505_v2 = vld [vmem:[%s3888_s24 + $0x108] sm:$0xf]  ;;  %v2506_v59 = vld [vmem:[%s3888_s24 + $0x110] sm:$0xf]  ;;  %v4378_v49 = vmax.bf16 %v2496_v30, %v1521_v34  ;;  %v4380_v18 = vmax.bf16 %v2497_v37, %v1522_v46  ;;  %v4382_v35 = vmax.bf16 %v2498_v29, %v1523_v57 }
  0xeb   : > { %5888 = vst [vmem:[#allocation54_spill] sm:$0xff] %v4354_v54  ;;  %5889 = vst [vmem:[#allocation15_spill] sm:$0xff] %v4359_v58  ;;  %v2507_v36 = vld [vmem:[%s3888_s24 + $0x118] sm:$0xf]  ;;  %v4384_v0 = vmax.bf16 %v2499_v51, %v1524_v52  ;;  %v4387_v20 = vld [vmem:[%s4343_s27] sm:$0xf]  ;;  %v4398_v34 = vmax.bf16 %v2500_v45, %v1525_v13  ;;  %v4400_v46 = vmax.bf16 %v2501_v21, %v1526_v33 }
  0xec   : > { %5890 = vst [vmem:[#allocation55_spill] sm:$0xff] %v4361_v61  ;;  %5891 = vst [vmem:[#allocation62_spill] sm:$0xff] %v4363_v63  ;;  %v4390_v11 = vld [vmem:[%s4343_s27 + $0x8] sm:$0xf]  ;;  %v4393_v24 = vld [vmem:[%s4343_s27 + $0x10] sm:$0xf]  ;;  %v4402_v57 = vmax.bf16 %v2502_v48, %v1527_v47  ;;  %v4404_v52 = vmax.bf16 %v2503_v7, %v1528_v4  ;;  %v4418_v13 = vmax.bf16 %v2504_v31, %v1529_v32 }
  0xed   : > { %5892 = vst [vmem:[#allocation60_spill] sm:$0xff] %v4365_v41  ;;  %5893 = vst [vmem:[#allocation29_spill] sm:$0xff] %v4370_v8  ;;  %v4396_v50 = vld [vmem:[%s4343_s27 + $0x18] sm:$0xf]  ;;  %v4407_v10 = vld [vmem:[%s4343_s27 + $0x20] sm:$0xf]  ;;  %v4420_v33 = vmax.bf16 %v2505_v2, %v1530_v19  ;;  %v4422_v47 = vmax.bf16 %v2506_v59, %v1531_v12  ;;  %v4424_v4 = vmax.bf16 %v2507_v36, %v1532_v22 }
  0xee   : > { %5894 = vst [vmem:[#allocation56_spill] sm:$0xff] %v4372_v43  ;;  %5895 = vst [vmem:[#allocation63_spill] sm:$0xff] %v4374_v1  ;;  %v4410_v55 = vld [vmem:[%s4343_s27 + $0x28] sm:$0xf]  ;;  %v4413_v62 = vld [vmem:[%s4343_s27 + $0x30] sm:$0xf] }
  0xef   : > { %5896 = vst [vmem:[#allocation61_spill] sm:$0xff] %v4376_v25  ;;  %5897 = vst [vmem:[#allocation22_spill] sm:$0xff] %v4378_v49  ;;  %v4416_v14 = vld [vmem:[%s4343_s27 + $0x38] sm:$0xf]  ;;  %v4427_v42 = vld [vmem:[%s4343_s27 + $0x48] sm:$0xf] }
  0xf0   : > { %5898 = vst [vmem:[#allocation57_spill] sm:$0xff] %v4380_v18  ;;  %5899 = vst [vmem:[#allocation37_spill] sm:$0xff] %v4382_v35  ;;  %v4430_v56 = vld [vmem:[%s4343_s27 + $0x50] sm:$0xf]  ;;  %v4433_v40 = vld [vmem:[%s4343_s27 + $0x58] sm:$0xf] }
  0xf1   : > { %5900 = vst [vmem:[#allocation58_spill] sm:$0xff] %v4384_v0  ;;  %5901 = vst [vmem:[#allocation32_spill] sm:$0xff] %v4398_v34  ;;  %v4436_v5 = vld [vmem:[%s4343_s27 + $0x60] sm:$0xf]  ;;  %v4439_v32 = vld [vmem:[%s4343_s27 + $0x68] sm:$0xf] }
  0xf2   : > { %5902 = vst [vmem:[#allocation9_spill] sm:$0xff] %v4400_v46  ;;  %5903 = vst [vmem:[#allocation66_spill] sm:$0xff] %v4402_v57  ;;  %v4442_v19 = vld [vmem:[%s4343_s27 + $0x70] sm:$0xf]  ;;  %v4445_v12 = vld [vmem:[%s4343_s27 + $0x78] sm:$0xf] }
  0xf3   : > { %5904 = vst [vmem:[#allocation64_spill] sm:$0xff] %v4404_v52  ;;  %5905 = vst [vmem:[#allocation24_spill] sm:$0xff] %v4407_v10  ;;  %v4448_v16 = vld [vmem:[%s4343_s27 + $0x80] sm:$0xf]  ;;  %v4459_v30 = vld [vmem:[%s4343_s27 + $0x90] sm:$0xf] }
  0xf4   : > { %5906 = vst [vmem:[#allocation6_spill] sm:$0xff] %v4410_v55  ;;  %5907 = vst [vmem:[#allocation67_spill] sm:$0xff] %v4413_v62  ;;  %v4462_v37 = vld [vmem:[%s4343_s27 + $0x98] sm:$0xf]  ;;  %v4465_v29 = vld [vmem:[%s4343_s27 + $0xa0] sm:$0xf] }
  0xf5   : > { %5908 = vst [vmem:[#allocation65_spill] sm:$0xff] %v4416_v14  ;;  %5909 = vst [vmem:[#allocation40_spill] sm:$0xff] %v4418_v13  ;;  %v4476_v7 = vld [vmem:[%s4343_s27 + $0xa8] sm:$0xf]  ;;  %v4479_v31 = vld [vmem:[%s4343_s27 + $0xb0] sm:$0xf] }
  0xf6   : > { %5910 = vst [vmem:[#allocation3_spill] sm:$0xff] %v4420_v33  ;;  %5911 = vst [vmem:[#allocation35_spill] sm:$0xff] %v4422_v47  ;;  %v4482_v2 = vld [vmem:[%s4343_s27 + $0xb8] sm:$0xf]  ;;  %v4493_v45 = vld [vmem:[%s4343_s27 + $0xc0] sm:$0xf] }
  0xf7   : > { %5912 = vst [vmem:[#allocation13_spill] sm:$0xff] %v4424_v4  ;;  %5913 = vst [vmem:[#allocation27_spill] sm:$0xff] %v4427_v42  ;;  %v4496_v51 = vld [vmem:[%s4343_s27 + $0xc8] sm:$0xf]  ;;  %v4499_v17 = vld [vmem:[%s4343_s27 + $0xd8] sm:$0xf] }
  0xf8   : > { %5914 = vst [vmem:[#allocation8_spill] sm:$0xff] %v4430_v56  ;;  %5915 = vst [vmem:[#allocation70_spill] sm:$0xff] %v4433_v40  ;;  %v4510_v60 = vld [vmem:[%s4343_s27 + $0xe0] sm:$0xf]  ;;  %v4513_v6 = vld [vmem:[%s4343_s27 + $0xe8] sm:$0xf] }
  0xf9   : > { %5916 = vst [vmem:[#allocation68_spill] sm:$0xff] %v4436_v5  ;;  %5917 = vst [vmem:[#allocation42_spill] sm:$0xff] %v4439_v32  ;;  %v4516_v22 = vld [vmem:[%s4343_s27 + $0xf0] sm:$0xf]  ;;  %v4527_v41 = vld [vmem:[%s4343_s27 + $0xf8] sm:$0xf] }
  0xfa   : > { %5918 = vst [vmem:[#allocation4_spill] sm:$0xff] %v4442_v19  ;;  %5919 = vst [vmem:[#allocation71_spill] sm:$0xff] %v4445_v12  ;;  %v4530_v63 = vld [vmem:[%s4343_s27 + $0x100] sm:$0xf]  ;;  %v1662_v21 = vld [vmem:[%s4343_s27 + $0x4] sm:$0x1] }
  0xfb   : > { %5920 = vst [vmem:[#allocation69_spill] sm:$0xff] %v4448_v16  ;;  %5921 = vst [vmem:[#allocation38_spill] sm:$0xff] %v4459_v30  ;;  %v4542_v1 = vld [vmem:[%s4343_s27 + $0x108] sm:$0xf]  ;;  %v4545_v48 = vld [vmem:[%s4343_s27 + $0x110] sm:$0xf] }
  0xfc   : > { %5922 = vst [vmem:[#allocation16_spill] sm:$0xff] %v4462_v37  ;;  %5923 = vst [vmem:[#allocation31_spill] sm:$0xff] %v4465_v29  ;;  %v1663_v43 = vld [vmem:[%s4343_s27 + $0xc] sm:$0x1]  ;;  %v1695_v46 = vshrl.u32 %v4387_v20, 16  ;;  %v1698_v59 = vshll.u32 %v4387_v20, 16 }
  0xfd   : > { %5924 = vst [vmem:[#allocation11_spill] sm:$0xff] %v4476_v7  ;;  %5925 = vst [vmem:[#allocation45_spill] sm:$0xff] %v4479_v31  ;;  %v1704_v57 = vshll.u32 %v1662_v21, 16  ;;  %v1709_v36 = vshrl.u32 %v4390_v11, 16  ;;  %v1664_v52 = vld [vmem:[%s4343_s27 + $0x14] sm:$0x1] }
  0xfe   : > { %5926 = vst [vmem:[#allocation5_spill] sm:$0xff] %v4482_v2  ;;  %5927 = vst [vmem:[#allocation74_spill] sm:$0xff] %v4493_v45  ;;  %v1712_v34 = vshll.u32 %v4390_v11, 16  ;;  %v1718_v0 = vshll.u32 %v1663_v43, 16  ;;  %v1723_v35 = vshrl.u32 %v4393_v24, 16  ;;  %v1726_v33 = vshll.u32 %v4393_v24, 16 }
  0xff   : > { %5928 = vst [vmem:[#allocation72_spill] sm:$0xff] %v4496_v51  ;;  %5929 = vst [vmem:[#allocation41_spill] sm:$0xff] %v4499_v17  ;;  %v1665_v25 = vld [vmem:[%s4343_s27 + $0x1c] sm:$0x1]  ;;  %v1697_v47 = vrot.slane %v1695_v46, 4  ;;  %v1700_v13 = vrot.slane %v1698_v59, 5 }
 0x100   : > { %5930 = vst [vmem:[#allocation18_spill] sm:$0xff] %v4510_v60  ;;  %5931 = vst [vmem:[#allocation75_spill] sm:$0xff] %v4513_v6  ;;  %v4572_v61 = vrot.slane %v1704_v57, 5  ;;  %v1711_v4 = vrot.slane %v1709_v36, 4  ;;  %v1714_v18 = vrot.slane %v1712_v34, 5  ;;  %v4574_v49 = vrot.slane %v1718_v0, 5 }
 0x101   : > { %5932 = vst [vmem:[#allocation73_spill] sm:$0xff] %v4516_v22  ;;  %5933 = vst [vmem:[#allocation34_spill] sm:$0xff] %v4527_v41  ;;  %v1725_v21 = vrot.slane %v1723_v35, 4  ;;  %v1728_v8 = vrot.slane %v1726_v33, 5  ;;  %v1701_v58 = vor.u32 %v1700_v13, %v1697_v47  ;;  %v1732_v54 = vshll.u32 %v1664_v52, 16 }
 0x102   : > { %5934 = vst [vmem:[#allocation14_spill] sm:$0xff] %v4530_v63  ;;  %v1737_v43 = vshrl.u32 %v4396_v50, 16  ;;  %v1740_v28 = vshll.u32 %v4396_v50, 16  ;;  %v1666_v27 = vld [vmem:[%s4343_s27 + $0x24] sm:$0x1]  ;;  %v1715_v53 = vor.u32 %v1714_v18, %v1711_v4  ;;  %v1746_v46 = vshll.u32 %v1665_v25, 16 }
 0x103   : > { %v1729_v38 = vor.u32 %v1728_v8, %v1725_v21  ;;  %v1751_v57 = vshrl.u32 %v4407_v10, 16  ;;  %v4580_v59 = vrot.slane %v1701_v58, 4  ;;  %v4582_v0 = vrot.slane %v1732_v54, 5  ;;  %v1667_v33 = vld [vmem:[%s4343_s27 + $0x2c] sm:$0x1] }
 0x104   : > { %v1739_v34 = vrot.slane %v1737_v43, 4  ;;  %v1742_v35 = vrot.slane %v1740_v28, 5  ;;  %v4585_v13 = vrot.slane %v1715_v53, 4  ;;  %v4589_v47 = vrot.slane %v1746_v46, 5  ;;  %v1668_v36 = vld [vmem:[%s4343_s27 + $0x34] sm:$0x1] }
 0x105   : > { %v4587_v52 = vrot.slane %v1729_v38, 4  ;;  %v1753_v18 = vrot.slane %v1751_v57, 4  ;;  %v1754_v54 = vshll.u32 %v4407_v10, 16  ;;  %v1760_v4 = vshll.u32 %v1666_v27, 16 }
 0x106   : > { %v1743_v58 = vor.u32 %v1742_v35, %v1739_v34  ;;  %v1765_v28 = vshrl.u32 %v4410_v55, 16  ;;  %v1768_v21 = vshll.u32 %v4410_v55, 16  ;;  %v1774_v57 = vshll.u32 %v1667_v33, 16  ;;  %v1669_v34 = vld [vmem:[%s4343_s27 + $0x3c] sm:$0x1] }
 0x107   : > { %v1756_v46 = vrot.slane %v1754_v54, 5  ;;  %v4609_v27 = vrot.slane %v1760_v4, 5  ;;  %v1779_v38 = vshrl.u32 %v4413_v62, 16  ;;  %v1782_v9 = vshll.u32 %v4413_v62, 16 }
 0x108   : > { %v4607_v43 = vrot.slane %v1743_v58, 4  ;;  %v1767_v35 = vrot.slane %v1765_v28, 4  ;;  %v1770_v25 = vrot.slane %v1768_v21, 5  ;;  %v4618_v58 = vrot.slane %v1774_v57, 5  ;;  %v1670_v21 = vld [vmem:[%s4343_s27 + $0x4c] sm:$0x1] }
 0x109   : > { %v1757_v39 = vor.u32 %v1756_v46, %v1753_v18  ;;  %v1788_v54 = vshll.u32 %v1668_v36, 16  ;;  %v1781_v55 = vrot.slane %v1779_v38, 4  ;;  %v1784_v33 = vrot.slane %v1782_v9, 5 }
 0x10a   : > { %5936 = vst [vmem:[#allocation49_spill] sm:$0xff] %v4618_v58  ;;  %v1771_v4 = vor.u32 %v1770_v25, %v1767_v35  ;;  %v1793_v28 = vshrl.u32 %v4416_v14, 16  ;;  %v1796_v62 = vshll.u32 %v4416_v14, 16  ;;  %v1802_v23 = vshll.u32 %v1669_v34, 16  ;;  %v1671_v25 = vld [vmem:[%s4343_s27 + $0x54] sm:$0x1] }
 0x10b   : > { %v4622_v44 = vrot.slane %v1757_v39, 4  ;;  %v4624_v10 = vrot.slane %v1788_v54, 5  ;;  %v1785_v18 = vor.u32 %v1784_v33, %v1781_v55  ;;  %v1807_v36 = vshrl.u32 %v4427_v42, 16 }
 0x10c   : > { %v4627_v53 = vrot.slane %v1771_v4, 4  ;;  %v1795_v46 = vrot.slane %v1793_v28, 4  ;;  %v1798_v39 = vrot.slane %v1796_v62, 5  ;;  %v4635_v38 = vrot.slane %v1802_v23, 5  ;;  %v1672_v4 = vld [vmem:[%s4343_s27 + $0x5c] sm:$0x1] }
 0x10d   : > { %v1810_v57 = vshll.u32 %v4427_v42, 16  ;;  %v4642_v34 = vrot.slane %v1785_v18, 4  ;;  %v1809_v35 = vrot.slane %v1807_v36, 4  ;;  %v1816_v54 = vshll.u32 %v1670_v21, 16  ;;  %v1673_v36 = vld [vmem:[%s4343_s27 + $0x64] sm:$0x1] }
 0x10e   : > { %5937 = vst [vmem:[#allocation7_spill] sm:$0xff] %v4627_v53  ;;  %5938 = vst [vmem:[#allocation44_spill] sm:$0xff] %v4635_v38  ;;  %v1799_v33 = vor.u32 %v1798_v39, %v1795_v46  ;;  %v1821_v9 = vshrl.u32 %v4430_v56, 16  ;;  %v1824_v62 = vshll.u32 %v4430_v56, 16  ;;  %v1830_v55 = vshll.u32 %v1671_v25, 16 }
 0x10f   : > { %v1812_v28 = vrot.slane %v1810_v57, 5  ;;  %v4651_v42 = vrot.slane %v1816_v54, 5  ;;  %v1835_v18 = vshrl.u32 %v4433_v40, 16  ;;  %v1838_v58 = vshll.u32 %v4433_v40, 16 }
 0x110   : > { %v4655_v21 = vrot.slane %v1799_v33, 4  ;;  %v1823_v39 = vrot.slane %v1821_v9, 4  ;;  %v1826_v57 = vrot.slane %v1824_v62, 5  ;;  %v4657_v14 = vrot.slane %v1830_v55, 5 }
 0x111   : > { %5939 = vst [vmem:[#allocation21_spill] sm:$0xff] %v4651_v42  ;;  %v1813_v46 = vor.u32 %v1812_v28, %v1809_v35  ;;  %v1837_v56 = vrot.slane %v1835_v18, 4  ;;  %v1844_v53 = vshll.u32 %v1672_v4, 16  ;;  %v1849_v33 = vshrl.u32 %v4436_v5, 16  ;;  %v1674_v35 = vld [vmem:[%s4343_s27 + $0x6c] sm:$0x1] }
 0x112   : > { %5940 = vst [vmem:[#allocation78_spill] sm:$0xff] %v4655_v21  ;;  %v1827_v23 = vor.u32 %v1826_v57, %v1823_v39  ;;  %v1840_v9 = vrot.slane %v1838_v58, 5  ;;  %v1852_v55 = vshll.u32 %v4436_v5, 16  ;;  %v1858_v62 = vshll.u32 %v1673_v36, 16  ;;  %v1675_v57 = vld [vmem:[%s4343_s27 + $0x74] sm:$0x1] }
 0x113   : > { %v4664_v54 = vrot.slane %v1813_v46, 4  ;;  %v4668_v28 = vrot.slane %v1844_v53, 5  ;;  %v1851_v46 = vrot.slane %v1849_v33, 4  ;;  %v1863_v39 = vshrl.u32 %v4439_v32, 16  ;;  %v1676_v33 = vld [vmem:[%s4343_s27 + $0x7c] sm:$0x1] }
 0x114   : > { %v4675_v18 = vrot.slane %v1827_v23, 4  ;;  %v1841_v25 = vor.u32 %v1840_v9, %v1837_v56  ;;  %v1854_v40 = vrot.slane %v1852_v55, 5  ;;  %v4679_v53 = vrot.slane %v1858_v62, 5  ;;  %v1677_v21 = vld [vmem:[%s4343_s27 + $0x84] sm:$0x1] }
 0x115   : > { %5941 = vst [vmem:[#allocation76_spill] sm:$0xff] %v4664_v54  ;;  %v1866_v58 = vshll.u32 %v4439_v32, 16  ;;  %v1865_v5 = vrot.slane %v1863_v39, 4  ;;  %v1872_v4 = vshll.u32 %v1674_v35, 16  ;;  %v1877_v23 = vshrl.u32 %v4442_v19, 16 }
 0x116   : > { %5942 = vst [vmem:[#allocation36_spill] sm:$0xff] %v4679_v53  ;;  %v4688_v42 = vrot.slane %v1841_v25, 4  ;;  %v1855_v54 = vor.u32 %v1854_v40, %v1851_v46  ;;  %v1880_v9 = vshll.u32 %v4442_v19, 16  ;;  %v1886_v32 = vshll.u32 %v1675_v57, 16  ;;  %v1678_v35 = vld [vmem:[%s4343_s27 + $0x94] sm:$0x1] }
 0x117   : > { %v1868_v56 = vrot.slane %v1866_v58, 5  ;;  %v4691_v55 = vrot.slane %v1872_v4, 5  ;;  %v1879_v62 = vrot.slane %v1877_v23, 4  ;;  %v1891_v38 = vshrl.u32 %v4445_v12, 16 }
 0x118   : > { %v4699_v39 = vrot.slane %v1855_v54, 4  ;;  %v1882_v40 = vrot.slane %v1880_v9, 5  ;;  %v4701_v46 = vrot.slane %v1886_v32, 5  ;;  %v1894_v4 = vshll.u32 %v4445_v12, 16 }
 0x119   : > { %5943 = vst [vmem:[#allocation17_spill] sm:$0xff] %v4691_v55  ;;  %v1869_v25 = vor.u32 %v1868_v56, %v1865_v5  ;;  %v1893_v58 = vrot.slane %v1891_v38, 4  ;;  %v1900_v23 = vshll.u32 %v1676_v33, 16  ;;  %v1905_v54 = vshrl.u32 %v4448_v16, 16 }
 0x11a   : > { %5944 = vst [vmem:[#allocation79_spill] sm:$0xff] %v4699_v39  ;;  %v1883_v19 = vor.u32 %v1882_v40, %v1879_v62  ;;  %v1896_v5 = vrot.slane %v1894_v4, 5  ;;  %v1908_v32 = vshll.u32 %v4448_v16, 16  ;;  %v1914_v38 = vshll.u32 %v1677_v21, 16  ;;  %v1679_v40 = vld [vmem:[%s4343_s27 + $0x9c] sm:$0x1] }
 0x11b   : > { %v4708_v36 = vrot.slane %v1869_v25, 4  ;;  %v4712_v56 = vrot.slane %v1900_v23, 5  ;;  %v1907_v25 = vrot.slane %v1905_v54, 4  ;;  %v1919_v62 = vshrl.u32 %v4459_v30, 16  ;;  %v1680_v54 = vld [vmem:[%s4343_s27 + $0xa4] sm:$0x1] }
 0x11c   : > { %v4719_v9 = vrot.slane %v1883_v19, 4  ;;  %v1897_v57 = vor.u32 %v1896_v5, %v1893_v58  ;;  %v1910_v12 = vrot.slane %v1908_v32, 5  ;;  %v4723_v4 = vrot.slane %v1914_v38, 5  ;;  %v1681_v39 = vld [vmem:[%s4343_s27 + $0xac] sm:$0x1] }
 0x11d   : > { %5945 = vst [vmem:[#allocation77_spill] sm:$0xff] %v4708_v36  ;;  %v1922_v23 = vshll.u32 %v4459_v30, 16  ;;  %v1921_v16 = vrot.slane %v1919_v62, 4  ;;  %v1928_v33 = vshll.u32 %v1678_v35, 16  ;;  %v1933_v19 = vshrl.u32 %v4462_v37, 16 }
 0x11e   : > { %5946 = vst [vmem:[#allocation50_spill] sm:$0xff] %v4723_v4  ;;  %v4732_v55 = vrot.slane %v1897_v57, 4  ;;  %v1911_v36 = vor.u32 %v1910_v12, %v1907_v25  ;;  %v1936_v5 = vshll.u32 %v4462_v37, 16  ;;  %v1942_v30 = vshll.u32 %v1679_v40, 16  ;;  %v1682_v35 = vld [vmem:[%s4343_s27 + $0xb4] sm:$0x1] }
 0x11f   : > { %v1924_v58 = vrot.slane %v1922_v23, 5  ;;  %v4735_v32 = vrot.slane %v1928_v33, 5  ;;  %v1935_v38 = vrot.slane %v1933_v19, 4  ;;  %v1947_v53 = vshrl.u32 %v4465_v29, 16 }
 0x120   : > { %v4743_v62 = vrot.slane %v1911_v36, 4  ;;  %v1938_v12 = vrot.slane %v1936_v5, 5  ;;  %v4745_v25 = vrot.slane %v1942_v30, 5  ;;  %v1950_v33 = vshll.u32 %v4465_v29, 16 }
 0x121   : > { %5947 = vst [vmem:[#allocation10_spill] sm:$0xff] %v4735_v32  ;;  %v1925_v57 = vor.u32 %v1924_v58, %v1921_v16  ;;  %v1949_v23 = vrot.slane %v1947_v53, 4  ;;  %v1956_v19 = vshll.u32 %v1680_v54, 16  ;;  %v1961_v36 = vshrl.u32 %v4476_v7, 16 }
 0x122   : > { %5948 = vst [vmem:[#allocation47_spill] sm:$0xff] %v4743_v62  ;;  %v1939_v37 = vor.u32 %v1938_v12, %v1935_v38  ;;  %v1952_v16 = vrot.slane %v1950_v33, 5  ;;  %v1964_v30 = vshll.u32 %v4476_v7, 16  ;;  %v1970_v53 = vshll.u32 %v1681_v39, 16  ;;  %v1683_v12 = vld [vmem:[%s4343_s27 + $0xbc] sm:$0x1] }
 0x123   : > { %v4752_v21 = vrot.slane %v1925_v57, 4  ;;  %v4756_v58 = vrot.slane %v1956_v19, 5  ;;  %v1963_v57 = vrot.slane %v1961_v36, 4  ;;  %v1975_v38 = vshrl.u32 %v4479_v31, 16  ;;  %v1684_v36 = vld [vmem:[%s4343_s27 + $0xc4] sm:$0x1] }
 0x124   : > { %v4763_v5 = vrot.slane %v1939_v37, 4  ;;  %v1953_v40 = vor.u32 %v1952_v16, %v1949_v23  ;;  %v1966_v29 = vrot.slane %v1964_v30, 5  ;;  %v4767_v33 = vrot.slane %v1970_v53, 5  ;;  %v1685_v62 = vld [vmem:[%s4343_s27 + $0xcc] sm:$0x1] }
 0x125   : > { %5949 = vst [vmem:[#allocation25_spill] sm:$0xff] %v4752_v21  ;;  %v1978_v19 = vshll.u32 %v4479_v31, 16  ;;  %v1977_v7 = vrot.slane %v1975_v38, 4  ;;  %v1984_v54 = vshll.u32 %v1682_v35, 16  ;;  %v1989_v37 = vshrl.u32 %v4482_v2, 16 }
 0x126   : > { %5950 = vst [vmem:[#allocation39_spill] sm:$0xff] %v4767_v33  ;;  %v4776_v32 = vrot.slane %v1953_v40, 4  ;;  %v1967_v21 = vor.u32 %v1966_v29, %v1963_v57  ;;  %v1992_v16 = vshll.u32 %v4482_v2, 16  ;;  %v1998_v31 = vshll.u32 %v1683_v12, 16  ;;  %v1686_v35 = vld [vmem:[%s4343_s27 + $0xdc] sm:$0x1] }
 0x127   : > { %v1980_v23 = vrot.slane %v1978_v19, 5  ;;  %v4779_v30 = vrot.slane %v1984_v54, 5  ;;  %v1991_v53 = vrot.slane %v1989_v37, 4  ;;  %v2003_v4 = vshrl.u32 %v4493_v45, 16 }
 0x128   : > { %v4787_v38 = vrot.slane %v1967_v21, 4  ;;  %v1994_v29 = vrot.slane %v1992_v16, 5  ;;  %v4789_v57 = vrot.slane %v1998_v31, 5  ;;  %v2006_v54 = vshll.u32 %v4493_v45, 16 }
 0x129   : > { %5951 = vst [vmem:[#allocation20_spill] sm:$0xff] %v4779_v30  ;;  %v1981_v40 = vor.u32 %v1980_v23, %v1977_v7  ;;  %v2005_v19 = vrot.slane %v2003_v4, 4  ;;  %v2012_v37 = vshll.u32 %v1684_v36, 16  ;;  %v2017_v21 = vshrl.u32 %v4496_v51, 16 }
 0x12a   : > { %5952 = vst [vmem:[#allocation43_spill] sm:$0xff] %v4787_v38  ;;  %v1995_v2 = vor.u32 %v1994_v29, %v1991_v53  ;;  %v2008_v7 = vrot.slane %v2006_v54, 5  ;;  %v2020_v31 = vshll.u32 %v4496_v51, 16  ;;  %v2026_v4 = vshll.u32 %v1685_v62, 16  ;;  %v1687_v29 = vld [vmem:[%s4343_s27 + $0xe4] sm:$0x1] }
 0x12b   : > { %v4796_v39 = vrot.slane %v1981_v40, 4  ;;  %v4800_v23 = vrot.slane %v2012_v37, 5  ;;  %v2019_v40 = vrot.slane %v2017_v21, 4  ;;  %v2031_v53 = vshrl.u32 %v4499_v17, 16  ;;  %v1688_v21 = vld [vmem:[%s4343_s27 + $0xec] sm:$0x1] }
 0x12c   : > { %v4807_v16 = vrot.slane %v1995_v2, 4  ;;  %v2009_v12 = vor.u32 %v2008_v7, %v2005_v19  ;;  %v2022_v45 = vrot.slane %v2020_v31, 5  ;;  %v4811_v54 = vrot.slane %v2026_v4, 5  ;;  %v1689_v38 = vld [vmem:[%s4343_s27 + $0xf4] sm:$0x1] }
 0x12d   : > { %5953 = vst [vmem:[#allocation30_spill] sm:$0xff] %v4796_v39  ;;  %v2034_v37 = vshll.u32 %v4499_v17, 16  ;;  %v2033_v51 = vrot.slane %v2031_v53, 4  ;;  %v2040_v36 = vshll.u32 %v1686_v35, 16  ;;  %v2045_v2 = vshrl.u32 %v4510_v60, 16 }
 0x12e   : > { %5954 = vst [vmem:[#allocation46_spill] sm:$0xff] %v4811_v54  ;;  %v4820_v30 = vrot.slane %v2009_v12, 4  ;;  %v2023_v39 = vor.u32 %v2022_v45, %v2019_v40  ;;  %v2048_v7 = vshll.u32 %v4510_v60, 16  ;;  %v2054_v17 = vshll.u32 %v1687_v29, 16  ;;  %v1690_v35 = vld [vmem:[%s4343_s27 + $0xfc] sm:$0x1] }
 0x12f   : > { %v2036_v19 = vrot.slane %v2034_v37, 5  ;;  %v4823_v31 = vrot.slane %v2040_v36, 5  ;;  %v2047_v4 = vrot.slane %v2045_v2, 4  ;;  %v2059_v33 = vshrl.u32 %v4513_v6, 16 }
 0x130   : > { %v4831_v53 = vrot.slane %v2023_v39, 4  ;;  %v2050_v45 = vrot.slane %v2048_v7, 5  ;;  %v4833_v40 = vrot.slane %v2054_v17, 5  ;;  %v2062_v36 = vshll.u32 %v4513_v6, 16 }
 0x131   : > { %5955 = vst [vmem:[#allocation26_spill] sm:$0xff] %v4823_v31  ;;  %v2037_v12 = vor.u32 %v2036_v19, %v2033_v51  ;;  %v2061_v37 = vrot.slane %v2059_v33, 4  ;;  %v2068_v2 = vshll.u32 %v1688_v21, 16  ;;  %v2073_v39 = vshrl.u32 %v4516_v22, 16 }
 0x132   : > { %5956 = vst [vmem:[#allocation19_spill] sm:$0xff] %v4831_v53  ;;  %v2051_v60 = vor.u32 %v2050_v45, %v2047_v4  ;;  %v2064_v51 = vrot.slane %v2062_v36, 5  ;;  %v2076_v17 = vshll.u32 %v4516_v22, 16  ;;  %v2082_v33 = vshll.u32 %v1689_v38, 16  ;;  %v1691_v45 = vld [vmem:[%s4343_s27 + $0x104] sm:$0x1] }
 0x133   : > { %v4840_v62 = vrot.slane %v2037_v12, 4  ;;  %v4844_v19 = vrot.slane %v2068_v2, 5  ;;  %v2075_v12 = vrot.slane %v2073_v39, 4  ;;  %v2087_v4 = vshrl.u32 %v4527_v41, 16  ;;  %v1692_v39 = vld [vmem:[%s4343_s27 + $0x10c] sm:$0x1] }
 0x134   : > { %v4851_v7 = vrot.slane %v2051_v60, 4  ;;  %v2065_v29 = vor.u32 %v2064_v51, %v2061_v37  ;;  %v2078_v6 = vrot.slane %v2076_v17, 5  ;;  %v4855_v36 = vrot.slane %v2082_v33, 5  ;;  %v1693_v53 = vld [vmem:[%s4343_s27 + $0x114] sm:$0x1] }
 0x135   : > { %5957 = vst [vmem:[#allocation33_spill] sm:$0xff] %v4840_v62  ;;  %v2090_v2 = vshll.u32 %v4527_v41, 16  ;;  %v2089_v22 = vrot.slane %v2087_v4, 4  ;;  %v2096_v21 = vshll.u32 %v1690_v35, 16  ;;  %v2101_v60 = vshrl.u32 %v4530_v63, 16 }
 0x136   : > { %v4864_v31 = vrot.slane %v2065_v29, 4  ;;  %v2079_v62 = vor.u32 %v2078_v6, %v2075_v12  ;;  %v2104_v51 = vshll.u32 %v4530_v63, 16  ;;  %v2110_v41 = vshll.u32 %v1691_v45, 16 }
 0x137   : > { %v2092_v37 = vrot.slane %v2090_v2, 5  ;;  %v4867_v17 = vrot.slane %v2096_v21, 5  ;;  %v2103_v33 = vrot.slane %v2101_v60, 4  ;;  %v2115_v54 = vshrl.u32 %v4542_v1, 16 }
 0x138   : > { %v4875_v4 = vrot.slane %v2079_v62, 4  ;;  %v2106_v38 = vrot.slane %v2104_v51, 5  ;;  %v4877_v6 = vrot.slane %v2110_v41, 5  ;;  %v2118_v21 = vshll.u32 %v4542_v1, 16 }
 0x139   : > { %v2093_v29 = vor.u32 %v2092_v37, %v2089_v22  ;;  %v2117_v12 = vrot.slane %v2115_v54, 4  ;;  %v2124_v2 = vshll.u32 %v1692_v39, 16  ;;  %v2129_v35 = vshrl.u32 %v4545_v48, 16 }
 0x13a   : > { %v2085_v45 = vsel %vm2717_vm2, %v4875_v4, %v4855_v36  ;;  %v2107_v63 = vor.u32 %v2106_v38, %v2103_v33  ;;  %v2120_v62 = vrot.slane %v2118_v21, 5  ;;  %v2132_v41 = vshll.u32 %v4545_v48, 16 }
 0x13b   : > { %v4884_v60 = vrot.slane %v2093_v29, 4  ;;  %v2126_v22 = vrot.slane %v2124_v2, 5  ;;  %v2138_v37 = vshll.u32 %v1693_v53, 16  ;;  %v2131_v51 = vrot.slane %v2129_v35, 4  ;;  %v5967_v35 = vld [vmem:[#allocation24_spill] sm:$0xff]  ;;  %v5974_v2 = vld [vmem:[#allocation7_spill] sm:$0xff] }
 0x13c   : > { %v2108_v39 = vrot.slane %v2107_v63, 4  ;;  %v5958_v36 = vmax.bf16 %v4387_v20, %v4320_v15  ;;  %v5959_v38 = vsel %vm2717_vm2, %v4580_v59, %v4572_v61  ;;  %v2121_v4 = vor.u32 %v2120_v62, %v2117_v12 }
 0x13d   : > { %v2099_v54 = vsel %vm2717_vm2, %v4884_v60, %v4867_v17  ;;  %v2134_v29 = vrot.slane %v2132_v41, 5  ;;  %v2140_v53 = vrot.slane %v2138_v37, 5  ;;  %v5960_v21 = vmax.bf16 %v4390_v11, %v4322_v26  ;;  %v5964_v11 = vld [vmem:[#allocation51_spill] sm:$0xff]  ;;  %v5975_v60 = vld [vmem:[#allocation49_spill] sm:$0xff] }
 0x13e   : > { %v4900_v33 = vmax.bf16 %v5959_v38, %v5958_v36  ;;  %v5961_v63 = vsel %vm2717_vm2, %v4585_v13, %v4574_v49  ;;  %v2113_v61 = vsel %vm2717_vm2, %v2108_v39, %v4877_v6  ;;  %v5962_v20 = vmax.bf16 %v4393_v24, %v4324_v3  ;;  %v5968_v6 = vld [vmem:[#allocation12_spill] sm:$0xff]  ;;  %v5981_v36 = vld [vmem:[#allocation65_spill] sm:$0xff] }
 0x13f   : > { %v4910_v15 = vmax.bf16 %v5961_v63, %v5960_v21  ;;  %v5963_v59 = vsel %vm2717_vm2, %v4587_v52, %v4582_v0  ;;  %v5965_v17 = vmax.bf16 %v4396_v50, %v5964_v11  ;;  %v5966_v49 = vsel %vm2717_vm2, %v4607_v43, %v4589_v47  ;;  %v5971_v47 = vld [vmem:[#allocation6_spill] sm:$0xff]  ;;  %v5972_v43 = vld [vmem:[#allocation52_spill] sm:$0xff]  ;;  %v5982_v38 = vld [vmem:[#allocation53_spill] sm:$0xff] }
 0x140   : > { %v4923_v26 = vmax.bf16 %v5963_v59, %v5962_v20  ;;  %v5969_v3 = vmax.bf16 %v5967_v35, %v5968_v6  ;;  %v5970_v24 = vsel %vm2717_vm2, %v4622_v44, %v4609_v27  ;;  %v2122_v50 = vrot.slane %v2121_v4, 4  ;;  %v5977_v44 = vld [vmem:[#allocation67_spill] sm:$0xff]  ;;  %v5978_v27 = vld [vmem:[#allocation28_spill] sm:$0xff] }
 0x141   : > { %v4933_v13 = vmax.bf16 %v5966_v49, %v5965_v17  ;;  %v2135_v52 = vor.u32 %v2134_v29, %v2131_v51  ;;  %v5973_v12 = vmax.bf16 %v5971_v47, %v5972_v43  ;;  %v5976_v62 = vsel %vm2717_vm2, %v5974_v2, %v5975_v60  ;;  %v5984_v29 = vld [vmem:[#allocation78_spill] sm:$0xff]  ;;  %v5985_v21 = vld [vmem:[#allocation44_spill] sm:$0xff]  ;;  %v5987_v59 = vld [vmem:[#allocation27_spill] sm:$0xff] }
 0x142   : > { %v4943_v0 = vmax.bf16 %v5970_v24, %v5969_v3  ;;  %v5979_v37 = vmax.bf16 %v5977_v44, %v5978_v27  ;;  %v5980_v39 = vsel %vm2717_vm2, %v4642_v34, %v4624_v10  ;;  %v5983_v4 = vmax.bf16 %v5981_v36, %v5982_v38  ;;  %v5988_v11 = vld [vmem:[#allocation59_spill] sm:$0xff]  ;;  %v5990_v10 = vld [vmem:[#allocation76_spill] sm:$0xff]  ;;  %v5991_v34 = vld [vmem:[#allocation21_spill] sm:$0xff] }
 0x143   : > { %v4959_v41 = vmax.bf16 %v5976_v62, %v5973_v12  ;;  %v5986_v63 = vsel %vm2717_vm2, %v5984_v29, %v5985_v21  ;;  %v5989_v17 = vmax.bf16 %v5987_v59, %v5988_v11  ;;  %v5992_v49 = vsel %vm2717_vm2, %v5990_v10, %v5991_v34  ;;  %v5993_v6 = vld [vmem:[#allocation8_spill] sm:$0xff]  ;;  %v5997_v12 = vld [vmem:[#allocation70_spill] sm:$0xff]  ;;  %v5998_v2 = vld [vmem:[#allocation23_spill] sm:$0xff] }
 0x144   : > { %v4969_v51 = vmax.bf16 %v5980_v39, %v5979_v37  ;;  %v4979_v20 = vmax.bf16 %v5986_v63, %v5983_v4  ;;  %v5994_v3 = vld [vmem:[#allocation48_spill] sm:$0xff]  ;;  %v5996_v47 = vsel %vm2717_vm2, %v4675_v18, %v4657_v14  ;;  %v5999_v60 = vmax.bf16 %v5997_v12, %v5998_v2  ;;  %v6002_v14 = vld [vmem:[#allocation54_spill] sm:$0xff]  ;;  %v6004_v36 = vld [vmem:[#allocation79_spill] sm:$0xff] }
 0x145   : > { %v4989_v35 = vmax.bf16 %v5992_v49, %v5989_v17  ;;  %v5995_v24 = vmax.bf16 %v5993_v6, %v5994_v3  ;;  %v6000_v62 = vsel %vm2717_vm2, %v4688_v42, %v4668_v28  ;;  %v2127_v27 = vsel %vm2717_vm2, %v2122_v50, %v2126_v22  ;;  %v6001_v39 = vld [vmem:[#allocation68_spill] sm:$0xff]  ;;  %v6007_v42 = vld [vmem:[#allocation42_spill] sm:$0xff]  ;;  %v6008_v28 = vld [vmem:[#allocation15_spill] sm:$0xff] }
 0x146   : > { %v5009_v44 = vmax.bf16 %v6000_v62, %v5999_v60  ;;  %v2136_v37 = vrot.slane %v2135_v52, 4  ;;  %v6003_v18 = vmax.bf16 %v6001_v39, %v6002_v14  ;;  %v6005_v38 = vld [vmem:[#allocation36_spill] sm:$0xff]  ;;  %v6009_v21 = vmax.bf16 %v6007_v42, %v6008_v28  ;;  %v6010_v63 = vld [vmem:[#allocation77_spill] sm:$0xff]  ;;  %v6014_v11 = vld [vmem:[#allocation55_spill] sm:$0xff] }
 0x147   : > { %v4999_v43 = vmax.bf16 %v5996_v47, %v5995_v24  ;;  %v6006_v4 = vsel %vm2717_vm2, %v6004_v36, %v6005_v38  ;;  %v6011_v22 = vld [vmem:[#allocation17_spill] sm:$0xff]  ;;  %v6013_v59 = vld [vmem:[#allocation4_spill] sm:$0xff]  ;;  %v6016_v10 = vsel %vm2717_vm2, %v4719_v9, %v4701_v46  ;;  %v6017_v49 = vld [vmem:[#allocation71_spill] sm:$0xff]  ;;  %v6020_v24 = vsel %vm2717_vm2, %v4732_v55, %v4712_v56 }
 0x148   : > { %v5022_v29 = vmax.bf16 %v6006_v4, %v6003_v18  ;;  %v6012_v50 = vsel %vm2717_vm2, %v6010_v63, %v6011_v22  ;;  %v6015_v17 = vmax.bf16 %v6013_v59, %v6014_v11  ;;  %v6018_v6 = vld [vmem:[#allocation62_spill] sm:$0xff]  ;;  %v6021_v12 = vld [vmem:[#allocation69_spill] sm:$0xff]  ;;  %v6022_v2 = vld [vmem:[#allocation60_spill] sm:$0xff]  ;;  %v2141_v22 = vsel %vm2717_vm2, %v2136_v37, %v2140_v53 }
 0x149   : > { %v5032_v52 = vmax.bf16 %v6012_v50, %v6009_v21  ;;  %v6019_v3 = vmax.bf16 %v6017_v49, %v6018_v6  ;;  %v6023_v60 = vmax.bf16 %v6021_v12, %v6022_v2  ;;  %v6024_v62 = vld [vmem:[#allocation47_spill] sm:$0xff]  ;;  %v6025_v46 = vld [vmem:[#allocation50_spill] sm:$0xff]  ;;  %v6028_v18 = vld [vmem:[#allocation29_spill] sm:$0xff] }
 0x14a   : > { %v5042_v34 = vmax.bf16 %v6016_v10, %v6015_v17  ;;  %v6026_v9 = vsel %vm2717_vm2, %v6024_v62, %v6025_v46  ;;  %v6027_v14 = vld [vmem:[#allocation38_spill] sm:$0xff]  ;;  %v6030_v38 = vld [vmem:[#allocation25_spill] sm:$0xff]  ;;  %v5078_v28 = vld [vmem:[%s4949_s30 + $0x8] sm:$0xf]  ;;  %v6036_v17 = vsel %vm2717_vm2, %v4763_v5, %v4745_v25 }
 0x14b   : > { %v5052_v47 = vmax.bf16 %v6020_v24, %v6019_v3  ;;  %v5062_v39 = vmax.bf16 %v6026_v9, %v6023_v60  ;;  %v6029_v36 = vmax.bf16 %v6027_v14, %v6028_v18  ;;  %v6031_v4 = vld [vmem:[#allocation10_spill] sm:$0xff]  ;;  %v5081_v21 = vld [vmem:[%s4949_s30 + $0x10] sm:$0xf]  ;;  %v5084_v63 = vld [vmem:[%s4949_s30 + $0x18] sm:$0xf]  ;;  %v6040_v24 = vsel %vm2717_vm2, %v4776_v32, %v4756_v58 }
 0x14c   : > { %v6032_v55 = vsel %vm2717_vm2, %v6030_v38, %v6031_v4  ;;  %v5075_v42 = vld [vmem:[%s4949_s30] sm:$0xf]  ;;  %v6033_v50 = vld [vmem:[#allocation16_spill] sm:$0xff]  ;;  %v6037_v49 = vld [vmem:[#allocation31_spill] sm:$0xff] }
 0x14d   : > { %v5072_v56 = vmax.bf16 %v6032_v55, %v6029_v36  ;;  %v6034_v59 = vld [vmem:[#allocation56_spill] sm:$0xff]  ;;  %v6038_v6 = vld [vmem:[#allocation63_spill] sm:$0xff]  ;;  %v6042_v37 = vld [vmem:[#allocation61_spill] sm:$0xff] }
 0x14e   : > { %v6035_v11 = vmax.bf16 %v6033_v50, %v6034_v59  ;;  %v6039_v3 = vmax.bf16 %v6037_v49, %v6038_v6  ;;  %v6041_v53 = vld [vmem:[#allocation11_spill] sm:$0xff]  ;;  %v5119_v46 = vld [vmem:[%s4949_s30 + $0x20] sm:$0xf]  ;;  %v5125_v32 = vld [vmem:[%s4949_s30 + $0x30] sm:$0xf]  ;;  %v6056_v49 = vsel %vm2717_vm2, %v4807_v16, %v4789_v57 }
 0x14f   : > { %v6043_v2 = vmax.bf16 %v6041_v53, %v6042_v37  ;;  %v6044_v60 = vld [vmem:[#allocation43_spill] sm:$0xff]  ;;  %v5128_v58 = vld [vmem:[%s4949_s30 + $0x38] sm:$0xf]  ;;  %v6048_v18 = vld [vmem:[#allocation22_spill] sm:$0xff]  ;;  %v6060_v37 = vsel %vm2717_vm2, %v4820_v30, %v4800_v23 }
 0x150   : > { %v5096_v10 = vmax.bf16 %v6036_v17, %v6035_v11  ;;  %v5106_v12 = vmax.bf16 %v6040_v24, %v6039_v3  ;;  %v6045_v62 = vld [vmem:[#allocation39_spill] sm:$0xff]  ;;  %v6047_v14 = vld [vmem:[#allocation45_spill] sm:$0xff]  ;;  %v6050_v38 = vld [vmem:[#allocation30_spill] sm:$0xff] }
 0x151   : > { %v6046_v25 = vsel %vm2717_vm2, %v6044_v60, %v6045_v62  ;;  %v5122_v9 = vld [vmem:[%s4949_s30 + $0x28] sm:$0xf]  ;;  %v6049_v36 = vmax.bf16 %v6047_v14, %v6048_v18  ;;  %v6051_v4 = vld [vmem:[#allocation20_spill] sm:$0xff]  ;;  %v6053_v59 = vld [vmem:[#allocation5_spill] sm:$0xff] }
 0x152   : > { %v5116_v5 = vmax.bf16 %v6046_v25, %v6043_v2  ;;  %v6052_v55 = vsel %vm2717_vm2, %v6050_v38, %v6051_v4  ;;  %v6054_v11 = vld [vmem:[#allocation57_spill] sm:$0xff]  ;;  %v6057_v3 = vld [vmem:[#allocation74_spill] sm:$0xff]  ;;  %v6061_v60 = vld [vmem:[#allocation72_spill] sm:$0xff] }
 0x153   : > { %v5138_v50 = vmax.bf16 %v6052_v55, %v6049_v36  ;;  %v6055_v17 = vmax.bf16 %v6053_v59, %v6054_v11  ;;  %v6058_v24 = vld [vmem:[#allocation37_spill] sm:$0xff]  ;;  %v6062_v62 = vld [vmem:[#allocation58_spill] sm:$0xff]  ;;  %v6064_v14 = vld [vmem:[#allocation19_spill] sm:$0xff] }
 0x154   : > { %v6059_v53 = vmax.bf16 %v6057_v3, %v6058_v24  ;;  %v6063_v25 = vmax.bf16 %v6061_v60, %v6062_v62  ;;  %v6065_v18 = vld [vmem:[#allocation46_spill] sm:$0xff]  ;;  %v5171_v36 = vld [vmem:[%s4949_s30 + $0x48] sm:$0xf]  ;;  %v5174_v38 = vld [vmem:[%s4949_s30 + $0x50] sm:$0xf] }
 0x155   : > { %v5148_v6 = vmax.bf16 %v6056_v49, %v6055_v17  ;;  %v6066_v57 = vsel %vm2717_vm2, %v6064_v14, %v6065_v18  ;;  %v5177_v30 = vld [vmem:[%s4949_s30 + $0x58] sm:$0xf]  ;;  %v6068_v4 = vld [vmem:[#allocation32_spill] sm:$0xff]  ;;  %v6071_v11 = vld [vmem:[#allocation26_spill] sm:$0xff]  ;;  %v6080_v18 = vsel %vm2717_vm2, %v4864_v31, %v4844_v19 }
 0x156   : > { %v5158_v2 = vmax.bf16 %v6060_v37, %v6059_v53  ;;  %v5168_v16 = vmax.bf16 %v6066_v57, %v6063_v25  ;;  %v6067_v23 = vld [vmem:[#allocation41_spill] sm:$0xff]  ;;  %v6073_v3 = vld [vmem:[#allocation18_spill] sm:$0xff]  ;;  %v6076_v37 = vsel %vm2717_vm2, %v4851_v7, %v4833_v40  ;;  %v6077_v62 = vld [vmem:[#allocation75_spill] sm:$0xff] }
 0x157   : > { %v6069_v55 = vmax.bf16 %v6067_v23, %v6068_v4  ;;  %v6070_v59 = vld [vmem:[#allocation33_spill] sm:$0xff]  ;;  %v6078_v25 = vld [vmem:[#allocation66_spill] sm:$0xff]  ;;  %v6082_v4 = vld [vmem:[#allocation64_spill] sm:$0xff] }
 0x158   : > { %v6072_v17 = vsel %vm2717_vm2, %v6070_v59, %v6071_v11  ;;  %v6074_v24 = vld [vmem:[#allocation9_spill] sm:$0xff]  ;;  %v6079_v14 = vmax.bf16 %v6077_v62, %v6078_v25  ;;  %v5215_v11 = vld [vmem:[%s4949_s30 + $0x60] sm:$0xf]  ;;  %v5218_v40 = vld [vmem:[%s4949_s30 + $0x68] sm:$0xf] }
 0x159   : > { %v5187_v49 = vmax.bf16 %v6072_v17, %v6069_v55  ;;  %v6075_v53 = vmax.bf16 %v6073_v3, %v6074_v24  ;;  %v6081_v23 = vld [vmem:[#allocation73_spill] sm:$0xff]  ;;  %v5221_v7 = vld [vmem:[%s4949_s30 + $0x70] sm:$0xf]  ;;  %v6084_v17 = vld [vmem:[#allocation34_spill] sm:$0xff] }
 0x15a   : > { %v5207_v57 = vmax.bf16 %v6080_v18, %v6079_v14  ;;  %v6083_v55 = vmax.bf16 %v6081_v23, %v6082_v4  ;;  %v6085_v3 = vld [vmem:[#allocation40_spill] sm:$0xff]  ;;  %v6087_v31 = vld [vmem:[#allocation14_spill] sm:$0xff]  ;;  %v6088_v19 = vld [vmem:[#allocation3_spill] sm:$0xff] }
 0x15b   : > { %v5197_v60 = vmax.bf16 %v6076_v37, %v6075_v53  ;;  %v6086_v8 = vmax.bf16 %v6084_v17, %v6085_v3  ;;  %v6089_v53 = vmax.bf16 %v6087_v31, %v6088_v19  ;;  %v6092_v14 = vld [vmem:[#allocation13_spill] sm:$0xff]  ;;  %v2224_v3 = vld [vmem:[%s4949_s30 + $0xa0] sm:$0xf] }
 0x15c   : > { %v5212_v59 = vmax.bf16 %v2085_v45, %v6083_v55  ;;  %v6090_v45 = vld [vmem:[#allocation35_spill] sm:$0xff]  ;;  %v6093_v18 = vmax.bf16 %v4545_v48, %v6092_v14  ;;  %v2220_v4 = vld [vmem:[%s4949_s30 + $0x78] sm:$0xf]  ;;  %v2221_v55 = vld [vmem:[%s4949_s30 + $0x80] sm:$0xf]  ;;  %v2240_v48 = vmax.bf16 %v5081_v21, %v4923_v26  ;;  %v2245_v26 = vmax.bf16 %v5128_v58, %v4979_v20 }
 0x15d   : > { %v5226_v24 = vmax.bf16 %v2099_v54, %v6086_v8  ;;  %v5231_v37 = vmax.bf16 %v2113_v61, %v6089_v53  ;;  %v6091_v62 = vmax.bf16 %v4542_v1, %v6090_v45  ;;  %v2222_v54 = vld [vmem:[%s4949_s30 + $0x90] sm:$0xf]  ;;  %v2223_v17 = vld [vmem:[%s4949_s30 + $0x98] sm:$0xf]  ;;  %v2225_v61 = vld [vmem:[%s4949_s30 + $0xa8] sm:$0xf]  ;;  %v2238_v8 = vmax.bf16 %v5075_v42, %v4900_v33 }
 0x15e   : > { %v5241_v23 = vmax.bf16 %v2141_v22, %v6093_v18  ;;  %v2239_v1 = vmax.bf16 %v5078_v28, %v4910_v15  ;;  %v2226_v22 = vld [vmem:[%s4949_s30 + $0xb0] sm:$0xf]  ;;  %v2227_v31 = vld [vmem:[%s4949_s30 + $0xb8] sm:$0xf]  ;;  %v2228_v19 = vld [vmem:[%s4949_s30 + $0xc0] sm:$0xf]  ;;  %v2242_v53 = vmax.bf16 %v5119_v46, %v4943_v0  ;;  %v2243_v33 = vmax.bf16 %v5122_v9, %v4959_v41 }
 0x15f   : > { %v5236_v25 = vmax.bf16 %v2127_v27, %v6091_v62  ;;  %v2241_v27 = vmax.bf16 %v5084_v63, %v4933_v13  ;;  %v2244_v15 = vmax.bf16 %v5125_v32, %v4969_v51  ;;  %v2229_v13 = vld [vmem:[%s4949_s30 + $0xc8] sm:$0xf]  ;;  %v2230_v42 = vld [vmem:[%s4949_s30 + $0xd8] sm:$0xf]  ;;  %v2231_v28 = vld [vmem:[%s4949_s30 + $0xe0] sm:$0xf]  ;;  %v2246_v21 = vmax.bf16 %v5171_v36, %v4989_v35 }
 0x160   : > { %v2247_v0 = vmax.bf16 %v5174_v38, %v4999_v43  ;;  %v2248_v41 = vmax.bf16 %v5177_v30, %v5009_v44  ;;  %v2249_v51 = vmax.bf16 %v5215_v11, %v5022_v29  ;;  %v2232_v63 = vld [vmem:[%s4949_s30 + $0xe8] sm:$0xf]  ;;  %v2233_v46 = vld [vmem:[%s4949_s30 + $0xf0] sm:$0xf]  ;;  %v2234_v20 = vld [vmem:[%s4949_s30 + $0xf8] sm:$0xf]  ;;  %v2250_v9 = vmax.bf16 %v5218_v40, %v5032_v52 }
 0x161   : > { %v2251_v32 = vmax.bf16 %v5221_v7, %v5042_v34  ;;  %v2252_v35 = vmax.bf16 %v2220_v4, %v5052_v47  ;;  %v2253_v58 = vmax.bf16 %v2221_v55, %v5062_v39  ;;  %v2235_v43 = vld [vmem:[%s4949_s30 + $0x100] sm:$0xf]  ;;  %v2236_v36 = vld [vmem:[%s4949_s30 + $0x108] sm:$0xf]  ;;  %v2237_v44 = vld [vmem:[%s4949_s30 + $0x110] sm:$0xf]  ;;  %v2254_v38 = vmax.bf16 %v2222_v54, %v5072_v56 }
 0x162   : > { %v2255_v29 = vmax.bf16 %v2223_v17, %v5096_v10  ;;  %v2256_v30 = vmax.bf16 %v2224_v3, %v5106_v12  ;;  %v2257_v11 = vmax.bf16 %v2225_v61, %v5116_v5  ;;  %v2258_v52 = vmax.bf16 %v2226_v22, %v5138_v50 }
 0x163   : > { %v2259_v34 = vmax.bf16 %v2227_v31, %v5148_v6  ;;  %v2260_v47 = vmax.bf16 %v2228_v19, %v5158_v2  ;;  %v2261_v39 = vmax.bf16 %v2229_v13, %v5168_v16  ;;  %v2262_v40 = vmax.bf16 %v2230_v42, %v5187_v49 }
 0x164   : > { %v2263_v7 = vmax.bf16 %v2231_v28, %v5197_v60  ;;  %v2264_v56 = vmax.bf16 %v2232_v63, %v5207_v57  ;;  %v2265_v10 = vmax.bf16 %v2233_v46, %v5212_v59  ;;  %v2266_v12 = vmax.bf16 %v2234_v20, %v5226_v24 }
 0x165   : > { %v2267_v5 = vmax.bf16 %v2235_v43, %v5231_v37  ;;  %v2268_v50 = vmax.bf16 %v2236_v36, %v5236_v25  ;;  %v2269_v6 = vmax.bf16 %v2237_v44, %v5241_v23  ;;  %v2591_v2 = vcombine.low %v2238_v8, %v2239_v1 }
 0x166   : > { %v2592_v16 = vcombine.low %v2240_v48, %v2241_v27  ;;  %v2594_v49 = vcombine.low %v2242_v53, %v2243_v33  ;;  %v2596_v60 = vcombine.low %v2244_v15, %v2245_v26  ;;  %v2598_v57 = vcombine.low %v2246_v21, %v2247_v0 }
 0x167   : > { %v2600_v59 = vcombine.low %v2248_v41, %v2249_v51  ;;  %v2602_v45 = vcombine.low %v2250_v9, %v2251_v32  ;;  %v2604_v62 = vcombine.low %v2252_v35, %v2253_v58  ;;  %2515 = vst [vmem:[%s5308_s8] sm:$0xff] %v2591_v2   ;;  %v2606_v24 = vcombine.low %v2254_v38, %v2255_v29 }
 0x168   : > { %2593 = vst [vmem:[%s5308_s8 + $0x8] sm:$0xff] %v2592_v16   ;;  %2595 = vst [vmem:[%s5308_s8 + $0x10] sm:$0xff] %v2594_v49   ;;  %v2608_v37 = vcombine.low %v2256_v30, %v2257_v11  ;;  %v2610_v25 = vcombine.low %v2258_v52, %v2259_v34  ;;  %v2612_v14 = vcombine.low %v2260_v47, %v2261_v39 }
 0x169   : > { %2597 = vst [vmem:[%s5308_s8 + $0x18] sm:$0xff] %v2596_v60   ;;  %2599 = vst [vmem:[%s5308_s8 + $0x20] sm:$0xff] %v2598_v57   ;;  %v2614_v18 = vcombine.low %v2262_v40, %v2263_v7  ;;  %v2616_v23 = vcombine.low %v2264_v56, %v2265_v10  ;;  %v2618_v4 = vcombine.low %v2266_v12, %v2267_v5 }
 0x16a   : > { %2601 = vst [vmem:[%s5308_s8 + $0x28] sm:$0xff] %v2600_v59   ;;  %2603 = vst [vmem:[%s5308_s8 + $0x30] sm:$0xff] %v2602_v45   ;;  %v2620_v55 = vcombine.low %v2268_v50, %v2269_v6 }
 0x16b   : > { %2605 = vst [vmem:[%s5308_s8 + $0x38] sm:$0xff] %v2604_v62   ;;  %2607 = vst [vmem:[%s5308_s8 + $0x40] sm:$0xff] %v2606_v24  }
 0x16c   : > { %2609 = vst [vmem:[%s5308_s8 + $0x48] sm:$0xff] %v2608_v37   ;;  %2611 = vst [vmem:[%s5308_s8 + $0x50] sm:$0xff] %v2610_v25  }
 0x16d   : > { %2613 = vst [vmem:[%s5308_s8 + $0x58] sm:$0xff] %v2612_v14   ;;  %2615 = vst [vmem:[%s5308_s8 + $0x60] sm:$0xff] %v2614_v18  }
 0x16e   : > { %2617 = vst [vmem:[%s5308_s8 + $0x68] sm:$0xff] %v2616_v23   ;;  %2619 = vst [vmem:[%s5308_s8 + $0x70] sm:$0xff] %v2618_v4  }
 0x16f   : > { %2621 = vst [vmem:[%s5308_s8 + $0x78] sm:$0xff] %v2620_v55  }
 0x170 PF: > { %s14_s15 = sadd.s32 1, %s2637_s15  }
 0x171   : > { %p11_p4 = scmp.ge.s32.totalorder %s14_s15, 4  }
 0x173   :  { %13 = sbr.rel (!%p11_p4) target bundleno = 1 (0x1), region = 77 }

// kernel: resnetlif50_forward.59
= control target key start
LH: loop header
LB: loop body
LE: loop exit
PB: predicated region body
PF: predicated region fallthrough
CT: control target
= control target key end

     0   :  { %s1094_s12 = smov 0   ;;  %s1215_s0 = inlined_call_operand.vmem [shape: bf16[512,128], index: 0, kind: input, shape index: {}]   ;;  %s1216_s1 = inlined_call_operand.vmem [shape: bf16[128,128], index: 1, kind: input, shape index: {}]   ;;  %s1217_s2 = inlined_call_operand.vmem [shape: f32[1,128], index: 2, kind: input, shape index: {}]   ;;  %s1218_s3 = inlined_call_operand.vmem [shape: bf16[512,128], index: 3, kind: output, shape index: {}]  }
   0x1 LB: > { %s751_s13 = sadd.s32 4294967295, %s1072_s12   ;;  %p755_p0 = scmp.ge.s32.totalorder %s1072_s12, 1  ;;  %s1072_s12 = sphi %s1094_s12, %s13_s12  }
   0x2   : > { %p138_p1 = scmp.lt.s32.totalorder %s1072_s12, 3 }
   0x4   : > { %p139_p2 = pnand %p755_p0, %p138_p1 }
   0x5   : > { %s756_s16 = sshll.u32 (!%p139_p2), %s751_s13, 5 }
   0x6   : > { %142 = sbr.rel (%p139_p2) target bundleno = 272 (0x110), region = 32  ;;  %p163_p3 = scmp.lt.s32.totalorder (!%p139_p2), %s756_s16, 63 }
   0xb   : > { %v1042_v0 = vld [vmem:[%s1216_s1 + $0x38] sm:$0xff]   ;;  %v1043_v1 = vld [vmem:[%s1216_s1 + $0x30] sm:$0xff]   ;;  %s1220_s16 = smov (!%p163_p3, %s756_s16), 63  ;;  %v1044_v2 = vld [vmem:[%s1216_s1 + $0x28] sm:$0xff]  }
   0xc   : > { %970 = vmatprep.subr.bf16.mxu0 %v1042_v0  ;;  %1018 = vmatprep.subr.bf16.mxu1 %v1042_v0  ;;  %s757_s21 = sshll.u32 %s1220_s16, 2  ;;  %v1045_v3 = vld [vmem:[%s1216_s1 + $0x20] sm:$0xff]   ;;  %v1046_v6 = vld [vmem:[%s1216_s1 + $0x18] sm:$0xff]   ;;  %v1047_v7 = vld [vmem:[%s1216_s1 + $0x10] sm:$0xff]  }
   0xd   : > { %971 = vmatpush3.bf16.msra.mxu0 %v1042_v0  ;;  %1026 = vmatpush3.bf16.msra.mxu1 %v1042_v0  ;;  %s1119_s24 = scalar_lea.vmem %s1215_s0, %s757_s21  ;;  %v1048_v8 = vld [vmem:[%s1216_s1 + $0x8] sm:$0xff]   ;;  %v1049_v9 = vld [vmem:[%s1216_s1] sm:$0xff]   ;;  %s1168_s13 = scalar_lea.vmem %s1218_s3, %s757_s21 }
   0xe   : > { %972 = vmatprep.subr.bf16.mxu0 %v1043_v1  ;;  %1019 = vmatprep.subr.bf16.mxu1 %v1043_v1  ;;  %v1050_v4 = vld [vmem:[%s1119_s24] sm:$0xff]   ;;  %v1052_v10 = vld [vmem:[%s1119_s24 + $0x8] sm:$0xff]   ;;  %v1054_v12 = vld [vmem:[%s1119_s24 + $0x10] sm:$0xff]  }
   0xf   : > { %v1051_v5 = vld [vmem:[%s1119_s24 + $0x40] sm:$0xff]   ;;  %986 = vmatprep.mubr.bf16.mxu0 %v1050_v4  ;;  %v1053_v11 = vld [vmem:[%s1119_s24 + $0x48] sm:$0xff]   ;;  %v1055_v13 = vld [vmem:[%s1119_s24 + $0x50] sm:$0xff]  }
  0x10   : > { %1002 = vmatprep.mubr.bf16.mxu1 %v1051_v5  ;;  %v1056_v14 = vld [vmem:[%s1119_s24 + $0x18] sm:$0xff]   ;;  %v1058_v16 = vld [vmem:[%s1119_s24 + $0x20] sm:$0xff]   ;;  %v1060_v18 = vld [vmem:[%s1119_s24 + $0x28] sm:$0xff]  }
  0x11   : > { %973 = vmatpush3.bf16.msra.mxu0 %v1043_v1  ;;  %1027 = vmatpush3.bf16.msra.mxu1 %v1043_v1  ;;  %v1057_v15 = vld [vmem:[%s1119_s24 + $0x58] sm:$0xff]   ;;  %v1059_v17 = vld [vmem:[%s1119_s24 + $0x60] sm:$0xff]   ;;  %v1061_v19 = vld [vmem:[%s1119_s24 + $0x68] sm:$0xff]  }
  0x12   : > { %974 = vmatprep.subr.bf16.mxu0 %v1044_v2  ;;  %1020 = vmatprep.subr.bf16.mxu1 %v1044_v2  ;;  %v1062_v20 = vld [vmem:[%s1119_s24 + $0x30] sm:$0xff]   ;;  %v1064_v22 = vld [vmem:[%s1119_s24 + $0x38] sm:$0xff]   ;;  %v1155_v26 = vld [vmem:[%s1217_s2] ss:$0 sm:$0xff] }
  0x13   : > { %v1063_v21 = vld [vmem:[%s1119_s24 + $0x70] sm:$0xff]   ;;  %v1065_v23 = vld [vmem:[%s1119_s24 + $0x78] sm:$0xff]  }
  0x15   : > { %975 = vmatpush3.bf16.msra.mxu0 %v1044_v2  ;;  %1028 = vmatpush3.bf16.msra.mxu1 %v1044_v2 }
  0x16   : > { %976 = vmatprep.subr.bf16.mxu0 %v1045_v3  ;;  %1021 = vmatprep.subr.bf16.mxu1 %v1045_v3 }
  0x19   : > { %977 = vmatpush3.bf16.msra.mxu0 %v1045_v3  ;;  %1029 = vmatpush3.bf16.msra.mxu1 %v1045_v3 }
  0x1a   : > { %978 = vmatprep.subr.bf16.mxu0 %v1046_v6  ;;  %1022 = vmatprep.subr.bf16.mxu1 %v1046_v6 }
  0x1d   : > { %979 = vmatpush3.bf16.msra.mxu0 %v1046_v6  ;;  %1030 = vmatpush3.bf16.msra.mxu1 %v1046_v6 }
  0x1e   : > { %980 = vmatprep.subr.bf16.mxu0 %v1047_v7  ;;  %1023 = vmatprep.subr.bf16.mxu1 %v1047_v7 }
  0x21   : > { %981 = vmatpush3.bf16.msra.mxu0 %v1047_v7  ;;  %1031 = vmatpush3.bf16.msra.mxu1 %v1047_v7 }
  0x22   : > { %982 = vmatprep.subr.bf16.mxu0 %v1048_v8  ;;  %1024 = vmatprep.subr.bf16.mxu1 %v1048_v8 }
  0x25   : > { %983 = vmatpush3.bf16.msra.mxu0 %v1048_v8  ;;  %1032 = vmatpush3.bf16.msra.mxu1 %v1048_v8 }
  0x26   : > { %984 = vmatprep.subr.bf16.mxu0 %v1049_v9  ;;  %1025 = vmatprep.subr.bf16.mxu1 %v1049_v9 }
  0x29   : > { %985 = vmatpush3.bf16.msra.mxu0 %v1049_v9  ;;  %1033 = vmatpush3.bf16.msra.mxu1 %v1049_v9 }
  0x2c   : > { %987 = vmatmul.mubr.bf16.vlgmr.msra.gmra.mxu0 %v1052_v10  ;;  %1003 = vmatmul.mubr.bf16.vlgmr.msra.gmra.mxu1 %v1053_v11 }
  0x2d   : > { %990 = vmatprep.mubr.bf16.mxu0 %v1054_v12  ;;  %1006 = vmatprep.mubr.bf16.mxu1 %v1055_v13 }
  0x34   : > { %991 = vmatmul.mubr.bf16.gmra.mxu0 %v1056_v14  ;;  %1007 = vmatmul.mubr.bf16.gmra.mxu1 %v1057_v15 }
  0x35   : > { %994 = vmatprep.mubr.bf16.mxu0 %v1058_v16  ;;  %1010 = vmatprep.mubr.bf16.mxu1 %v1059_v17 }
  0x3c   : > { %995 = vmatmul.mubr.bf16.gmra.mxu0 %v1060_v18  ;;  %1011 = vmatmul.mubr.bf16.gmra.mxu1 %v1061_v19 }
  0x3d   : > { %998 = vmatprep.mubr.bf16.mxu0 %v1062_v20  ;;  %1014 = vmatprep.mubr.bf16.mxu1 %v1063_v21 }
  0x44   : > { %999 = vmatmul.mubr.bf16.gmra.mxu0 %v1064_v22  ;;  %1015 = vmatmul.mubr.bf16.gmra.mxu1 %v1065_v23 }
  0xec   : > { %v988_v24 = vpop.f32.mrf.mxu0  ;;  %v1004_v25 = vpop.f32.mrf.mxu1 }
  0xed   : > { %v417_v31 = vadd.f32 %v988_v24, %v1155_v26  ;;  %v481_v32 = vadd.f32 %v1004_v25, %v1155_v26 }
  0xee   : > { %v408_v27 = vpop.f32.mrf.mxu0  ;;  %v472_v28 = vpop.f32.mrf.mxu1 }
  0xef   : > { %v409_v35 = vadd.f32 %v1155_v26, %v408_v27  ;;  %v473_v36 = vadd.f32 %v1155_v26, %v472_v28 }
  0xf0   : > { %v989_v29 = vpop.f32.mrf.mxu0  ;;  %v1005_v30 = vpop.f32.mrf.mxu1 }
  0xf1   : > { %v420_v33 = vadd.f32 %v989_v29, %v1155_v26  ;;  %v484_v34 = vadd.f32 %v1005_v30, %v1155_v26 }
  0xf2   : > { %v411_v37 = vpop.f32.mrf.mxu0  ;;  %v475_v38 = vpop.f32.mrf.mxu1 }
  0xf3   : > { %v859_v39 = vpack.c.bf16 %v420_v33, %v417_v31  ;;  %v899_v40 = vpack.c.bf16 %v484_v34, %v481_v32  ;;  %v412_v41 = vadd.f32 %v1155_v26, %v411_v37  ;;  %v476_v42 = vadd.f32 %v1155_v26, %v475_v38 }
  0xf4   : > { %v992_v43 = vpop.f32.mrf.mxu0  ;;  %v1008_v44 = vpop.f32.mrf.mxu1 }
  0xf5   : > { %931 = vst [vmem:[%s1168_s13 + $0x8] sm:$0xff] %v859_v39   ;;  %939 = vst [vmem:[%s1168_s13 + $0x48] sm:$0xff] %v899_v40   ;;  %v854_v45 = vpack.c.bf16 %v412_v41, %v409_v35  ;;  %v894_v46 = vpack.c.bf16 %v476_v42, %v473_v36  ;;  %v433_v51 = vadd.f32 %v992_v43, %v1155_v26 }
  0xf6   : > { %v424_v47 = vpop.f32.mrf.mxu0  ;;  %v488_v48 = vpop.f32.mrf.mxu1  ;;  %v497_v52 = vadd.f32 %v1008_v44, %v1155_v26 }
  0xf7   : > { %855 = vst [vmem:[%s1168_s13] sm:$0xff] %v854_v45   ;;  %938 = vst [vmem:[%s1168_s13 + $0x40] sm:$0xff] %v894_v46   ;;  %v425_v55 = vadd.f32 %v1155_v26, %v424_v47  ;;  %v489_v56 = vadd.f32 %v1155_v26, %v488_v48 }
  0xf8   : > { %v993_v49 = vpop.f32.mrf.mxu0  ;;  %v1009_v50 = vpop.f32.mrf.mxu1 }
  0xf9   : > { %v436_v53 = vadd.f32 %v993_v49, %v1155_v26  ;;  %v500_v54 = vadd.f32 %v1009_v50, %v1155_v26 }
  0xfa   : > { %v427_v57 = vpop.f32.mrf.mxu0  ;;  %v491_v58 = vpop.f32.mrf.mxu1 }
  0xfb   : > { %v869_v59 = vpack.c.bf16 %v436_v53, %v433_v51  ;;  %v909_v60 = vpack.c.bf16 %v500_v54, %v497_v52  ;;  %v428_v61 = vadd.f32 %v1155_v26, %v427_v57  ;;  %v492_v62 = vadd.f32 %v1155_v26, %v491_v58 }
  0xfc   : > { %v996_v63 = vpop.f32.mrf.mxu0  ;;  %v1012_v0 = vpop.f32.mrf.mxu1 }
  0xfd   : > { %933 = vst [vmem:[%s1168_s13 + $0x18] sm:$0xff] %v869_v59   ;;  %941 = vst [vmem:[%s1168_s13 + $0x58] sm:$0xff] %v909_v60   ;;  %v864_v1 = vpack.c.bf16 %v428_v61, %v425_v55  ;;  %v904_v2 = vpack.c.bf16 %v492_v62, %v489_v56  ;;  %v449_v7 = vadd.f32 %v996_v63, %v1155_v26 }
  0xfe   : > { %v440_v3 = vpop.f32.mrf.mxu0  ;;  %v504_v4 = vpop.f32.mrf.mxu1  ;;  %v513_v8 = vadd.f32 %v1012_v0, %v1155_v26 }
  0xff   : > { %932 = vst [vmem:[%s1168_s13 + $0x10] sm:$0xff] %v864_v1   ;;  %940 = vst [vmem:[%s1168_s13 + $0x50] sm:$0xff] %v904_v2   ;;  %v441_v11 = vadd.f32 %v1155_v26, %v440_v3  ;;  %v505_v12 = vadd.f32 %v1155_v26, %v504_v4 }
 0x100   : > { %v997_v5 = vpop.f32.mrf.mxu0  ;;  %v1013_v6 = vpop.f32.mrf.mxu1 }
 0x101   : > { %v452_v9 = vadd.f32 %v997_v5, %v1155_v26  ;;  %v516_v10 = vadd.f32 %v1013_v6, %v1155_v26 }
 0x102   : > { %v443_v13 = vpop.f32.mrf.mxu0  ;;  %v507_v14 = vpop.f32.mrf.mxu1 }
 0x103   : > { %v879_v15 = vpack.c.bf16 %v452_v9, %v449_v7  ;;  %v919_v16 = vpack.c.bf16 %v516_v10, %v513_v8  ;;  %v444_v17 = vadd.f32 %v1155_v26, %v443_v13  ;;  %v508_v18 = vadd.f32 %v1155_v26, %v507_v14 }
 0x104   : > { %v1000_v19 = vpop.f32.mrf.mxu0  ;;  %v1016_v20 = vpop.f32.mrf.mxu1 }
 0x105   : > { %935 = vst [vmem:[%s1168_s13 + $0x28] sm:$0xff] %v879_v15   ;;  %943 = vst [vmem:[%s1168_s13 + $0x68] sm:$0xff] %v919_v16   ;;  %v874_v21 = vpack.c.bf16 %v444_v17, %v441_v11  ;;  %v914_v22 = vpack.c.bf16 %v508_v18, %v505_v12  ;;  %v465_v28 = vadd.f32 %v1000_v19, %v1155_v26 }
 0x106   : > { %v456_v23 = vpop.f32.mrf.mxu0  ;;  %v520_v24 = vpop.f32.mrf.mxu1  ;;  %v529_v29 = vadd.f32 %v1016_v20, %v1155_v26 }
 0x107   : > { %934 = vst [vmem:[%s1168_s13 + $0x20] sm:$0xff] %v874_v21   ;;  %942 = vst [vmem:[%s1168_s13 + $0x60] sm:$0xff] %v914_v22   ;;  %v457_v32 = vadd.f32 %v1155_v26, %v456_v23  ;;  %v521_v33 = vadd.f32 %v1155_v26, %v520_v24 }
 0x108   : > { %v1001_v25 = vpop.f32.mrf.mxu0  ;;  %v1017_v27 = vpop.f32.mrf.mxu1 }
 0x109   : > { %v468_v30 = vadd.f32 %v1001_v25, %v1155_v26  ;;  %v532_v31 = vadd.f32 %v1017_v27, %v1155_v26 }
 0x10a   : > { %v459_v34 = vpop.f32.mrf.mxu0  ;;  %v523_v35 = vpop.f32.mrf.mxu1 }
 0x10b   : > { %v889_v36 = vpack.c.bf16 %v468_v30, %v465_v28  ;;  %v929_v37 = vpack.c.bf16 %v532_v31, %v529_v29  ;;  %v460_v38 = vadd.f32 %v1155_v26, %v459_v34  ;;  %v524_v39 = vadd.f32 %v1155_v26, %v523_v35 }
 0x10d   : > { %937 = vst [vmem:[%s1168_s13 + $0x38] sm:$0xff] %v889_v36   ;;  %945 = vst [vmem:[%s1168_s13 + $0x78] sm:$0xff] %v929_v37   ;;  %v884_v40 = vpack.c.bf16 %v460_v38, %v457_v32  ;;  %v924_v41 = vpack.c.bf16 %v524_v39, %v521_v33 }
 0x10f   : > { %936 = vst [vmem:[%s1168_s13 + $0x30] sm:$0xff] %v884_v40   ;;  %944 = vst [vmem:[%s1168_s13 + $0x70] sm:$0xff] %v924_v41  }
 0x110 PF: > { %s13_s12 = sadd.s32 1, %s1072_s12  }
 0x111   : > { %p10_p4 = scmp.ge.s32.totalorder %s13_s12, 4  }
 0x113   :  { %12 = sbr.rel (!%p10_p4) target bundleno = 1 (0x1), region = 62 }

// kernel: resnetlif50_forward.60
= control target key start
LH: loop header
LB: loop body
LE: loop exit
PB: predicated region body
PF: predicated region fallthrough
CT: control target
= control target key end

     0   :  { %s1196_s15 = smov 0   ;;  %s1198_s16 = smov 0   ;;  %s1414_s0 = inlined_call_operand.vmem [shape: bf16[4,128,128], index: 0, kind: input, shape index: {}]   ;;  %s1415_s1 = inlined_call_operand.vmem [shape: bf16[128,128], index: 1, kind: input, shape index: {}]   ;;  %s1416_s2 = inlined_call_operand.vmem [shape: f32[1,128], index: 2, kind: input, shape index: {}]   ;;  %s1417_s3 = inlined_call_operand.vmem [shape: bf16[4,128,128], index: 3, kind: input, shape index: {}]   ;;  %s1418_s4 = inlined_call_operand.vmem [shape: bf16[4,128,128], index: 4, kind: output, shape index: {}]  }
   0x1   :  { %s1200_s17 = smov 0  }
   0x2 LB: > { %s23_s18 = sadd.s32 1, %s1163_s16  ;;  %p891_p0 = scmp.ge.s32.totalorder %s1167_s17, 1  ;;  %s1167_s17 = sphi %s1200_s17, %s14_s17   ;;  %s1163_s16 = sphi %s1198_s16, %s1420_s16   ;;  %s1159_s15 = sphi %s1196_s15, %s1419_s15  }
   0x3   : > { %p24_p1 = scmp.ge.s32.totalorder %s23_s18, 4  ;;  %p200_p2 = scmp.lt.s32.totalorder %s1167_s17, 5 }
   0x5   : > { %s1422_s18 = smov (%p24_p1, %s23_s18), 0  ;;  %p201_p3 = pnand %p891_p0, %p200_p2 }
   0x6   : > { %p244_p4 = scmp.lt.s32.totalorder (!%p201_p3), %s1159_s15, 3  ;;  %p898_p5 = scmp.ne.s32.totalorder (!%p201_p3), %s1159_s15, 0 }
   0x7   : > { %204 = sbr.rel (%p201_p3) target bundleno = 287 (0x11f), region = 36 }
   0xc   : > { %s245_s19 = scalar_select %p244_p4, %s1159_s15, 3 }
   0xd   : > { %277 = sbr.rel (%p898_p5) target bundleno = 27 (0x1b), region = 40 }
   0xe   : > { %s950_s20 = sshll.u32 %s245_s19, 6 }
   0xf   : > { %s1217_s23 = scalar_lea.vmem %s1414_s0, %s950_s20  ;;  %s1222_s26 = scalar_lea.vmem %s1417_s3, %s950_s20 }
  0x10   : > { %s1227_s29 = scalar_lea.vmem %s1418_s4, %s950_s20 }
  0x12   : > { %v1169_v0 = vmov 0.0  }
  0x13   : > { %278 = vst [vmem:[#allocation2 + $0x30] sm:$0xff] %v1169_v0  ;;  %279 = vst [vmem:[#allocation2] sm:$0xff] %v1169_v0 }
  0x14   : > { %280 = vst [vmem:[#allocation2 + $0x58] sm:$0xff] %v1169_v0  ;;  %281 = vst [vmem:[#allocation2 + $0x18] sm:$0xff] %v1169_v0 }
  0x15   : > { %282 = vst [vmem:[#allocation2 + $0x50] sm:$0xff] %v1169_v0  ;;  %283 = vst [vmem:[#allocation2 + $0x68] sm:$0xff] %v1169_v0 }
  0x16   : > { %284 = vst [vmem:[#allocation2 + $0x8] sm:$0xff] %v1169_v0  ;;  %285 = vst [vmem:[#allocation2 + $0x48] sm:$0xff] %v1169_v0 }
  0x17   : > { %286 = vst [vmem:[#allocation2 + $0x40] sm:$0xff] %v1169_v0  ;;  %287 = vst [vmem:[#allocation2 + $0x20] sm:$0xff] %v1169_v0 }
  0x18   : > { %288 = vst [vmem:[#allocation2 + $0x10] sm:$0xff] %v1169_v0  ;;  %289 = vst [vmem:[#allocation2 + $0x38] sm:$0xff] %v1169_v0 }
  0x19   : > { %290 = vst [vmem:[#allocation2 + $0x60] sm:$0xff] %v1169_v0  ;;  %291 = vst [vmem:[#allocation2 + $0x70] sm:$0xff] %v1169_v0 }
  0x1a   : > { %292 = vst [vmem:[#allocation2 + $0x78] sm:$0xff] %v1169_v0  ;;  %293 = vst [vmem:[#allocation2 + $0x28] sm:$0xff] %v1169_v0 }
  0x1b PF: > { %v1129_v1 = vld [vmem:[%s1415_s1 + $0x38] sm:$0xff]   ;;  %v1130_v2 = vld [vmem:[%s1415_s1 + $0x30] sm:$0xff]   ;;  %v1131_v3 = vld [vmem:[%s1415_s1 + $0x28] sm:$0xff]  }
  0x1c   : > { %1055 = vmatprep.subr.bf16.mxu0 %v1129_v1  ;;  %1087 = vmatprep.subr.bf16.mxu1 %v1129_v1  ;;  %v1132_v4 = vld [vmem:[%s1415_s1 + $0x20] sm:$0xff]   ;;  %v1133_v7 = vld [vmem:[%s1415_s1 + $0x18] sm:$0xff]   ;;  %v1134_v8 = vld [vmem:[%s1415_s1 + $0x10] sm:$0xff]  }
  0x1d   : > { %1056 = vmatpush3.bf16.msra.mxu0 %v1129_v1  ;;  %1095 = vmatpush3.bf16.msra.mxu1 %v1129_v1  ;;  %v1137_v5 = vld [vmem:[%s1217_s23] sm:$0xff]   ;;  %v1135_v9 = vld [vmem:[%s1415_s1 + $0x8] sm:$0xff]   ;;  %v1141_v13 = vld [vmem:[%s1217_s23 + $0x10] sm:$0xff]  }
  0x1e   : > { %1057 = vmatprep.subr.bf16.mxu0 %v1130_v2  ;;  %1088 = vmatprep.subr.bf16.mxu1 %v1130_v2  ;;  %v1138_v6 = vld [vmem:[%s1217_s23 + $0x20] sm:$0xff]   ;;  %v1139_v11 = vld [vmem:[%s1217_s23 + $0x8] sm:$0xff]   ;;  %v1142_v14 = vld [vmem:[%s1217_s23 + $0x30] sm:$0xff]  }
  0x1f   : > { %1071 = vmatprep.mubr.bf16.mxu0 %v1137_v5  ;;  %1079 = vmatprep.mubr.bf16.mxu1 %v1138_v6  ;;  %v1136_v10 = vld [vmem:[%s1415_s1] sm:$0xff]   ;;  %v1140_v12 = vld [vmem:[%s1217_s23 + $0x28] sm:$0xff]   ;;  %v1143_v15 = vld [vmem:[%s1217_s23 + $0x18] sm:$0xff]  }
  0x20   : > { %v1144_v16 = vld [vmem:[%s1217_s23 + $0x38] sm:$0xff]   ;;  %v1262_v18 = vld [vmem:[%s1222_s26 + $0x8] sm:$0xff]   ;;  %v584_v19 = vld [vmem:[#allocation2 + $0x10] sm:$0xff] }
  0x21   : > { %1058 = vmatpush3.bf16.msra.mxu0 %v1130_v2  ;;  %1096 = vmatpush3.bf16.msra.mxu1 %v1130_v2  ;;  %v576_v17 = vld [vmem:[#allocation2 + $0x58] sm:$0xff]  ;;  %v574_v20 = vld [vmem:[#allocation2 + $0x30] sm:$0xff]  ;;  %v1265_v21 = vld [vmem:[%s1222_s26 + $0x28] sm:$0xff]   ;;  %v600_v28 = vmul.f32 0.3, %v584_v19  ;;  %v975_v32 = vunpack.c.l.bf16 %v1262_v18  ;;  %v976_v40 = vunpack.c.h.bf16 %v1262_v18 }
  0x22   : > { %1059 = vmatprep.subr.bf16.mxu0 %v1131_v3  ;;  %1089 = vmatprep.subr.bf16.mxu1 %v1131_v3  ;;  %v1268_v22 = vld [vmem:[%s1222_s26] sm:$0xff]   ;;  %v592_v24 = vmul.f32 0.3, %v576_v17  ;;  %v577_v26 = vld [vmem:[#allocation2 + $0x18] sm:$0xff]  ;;  %v1278_v29 = vmul.f32 0.3, %v574_v20  ;;  %v991_v33 = vunpack.c.l.bf16 %v1265_v21  ;;  %v992_v45 = vunpack.c.h.bf16 %v1265_v21 }
  0x23   : > { %v582_v23 = vld [vmem:[#allocation2 + $0x40] sm:$0xff]  ;;  %v585_v30 = vld [vmem:[#allocation2 + $0x38] sm:$0xff]  ;;  %v971_v34 = vunpack.c.l.bf16 %v1268_v22  ;;  %v1291_v41 = vmul.f32 0.3, %v577_v26  ;;  %v580_v42 = vld [vmem:[#allocation2 + $0x8] sm:$0xff]  ;;  %v972_v47 = vunpack.c.h.bf16 %v1268_v22 }
  0x24   : > { %v1271_v25 = vld [vmem:[%s1222_s26 + $0x20] sm:$0xff]   ;;  %v598_v35 = vmul.f32 0.3, %v582_v23  ;;  %v1284_v37 = vld [vmem:[%s1222_s26 + $0x18] sm:$0xff]   ;;  %v1294_v44 = vld [vmem:[%s1222_s26 + $0x10] sm:$0xff]  }
  0x25   : > { %1060 = vmatpush3.bf16.msra.mxu0 %v1131_v3  ;;  %1097 = vmatpush3.bf16.msra.mxu1 %v1131_v3  ;;  %v1276_v27 = vld [vmem:[%s1416_s2] ss:$0 sm:$0xff]  ;;  %v1287_v38 = vld [vmem:[%s1222_s26 + $0x38] sm:$0xff]   ;;  %v987_v39 = vunpack.c.l.bf16 %v1271_v25  ;;  %v1297_v46 = vmul.f32 0.3, %v585_v30  ;;  %v988_v48 = vunpack.c.h.bf16 %v1271_v25  ;;  %v578_v49 = vld [vmem:[#allocation2 + $0x50] sm:$0xff]  ;;  %v983_v56 = vunpack.c.l.bf16 %v1284_v37 }
  0x26   : > { %1061 = vmatprep.subr.bf16.mxu0 %v1132_v4  ;;  %1090 = vmatprep.subr.bf16.mxu1 %v1132_v4  ;;  %v575_v31 = vld [vmem:[#allocation2] sm:$0xff]  ;;  %v588_v43 = vld [vmem:[#allocation2 + $0x78] sm:$0xff]  ;;  %v1302_v50 = vld [vmem:[%s1222_s26 + $0x30] sm:$0xff]   ;;  %v999_v57 = vunpack.c.l.bf16 %v1287_v38  ;;  %v1312_v60 = vmul.f32 0.3, %v580_v42  ;;  %v979_v2 = vunpack.c.l.bf16 %v1294_v44 }
  0x27   : > { %v583_v36 = vld [vmem:[#allocation2 + $0x20] sm:$0xff]  ;;  %v1304_v54 = vmul.f32 0.3, %v575_v31  ;;  %v1314_v61 = vmul.f32 0.3, %v588_v43  ;;  %v581_v62 = vld [vmem:[#allocation2 + $0x48] sm:$0xff]  ;;  %v980_v31 = vunpack.c.h.bf16 %v1294_v44 }
  0x28   : > { %v586_v51 = vld [vmem:[#allocation2 + $0x60] sm:$0xff]  ;;  %v1306_v55 = vmul.f32 0.3, %v583_v36  ;;  %v589_v63 = vld [vmem:[#allocation2 + $0x28] sm:$0xff]  ;;  %v1317_v3 = vmul.f32 0.3, %v578_v49 }
  0x29   : > { %1062 = vmatpush3.bf16.msra.mxu0 %v1132_v4  ;;  %1098 = vmatpush3.bf16.msra.mxu1 %v1132_v4  ;;  %v995_v4 = vunpack.c.l.bf16 %v1302_v50  ;;  %v1320_v5 = vmul.f32 0.3, %v586_v51 }
  0x2a   : > { %1063 = vmatprep.subr.bf16.mxu0 %v1133_v7  ;;  %1091 = vmatprep.subr.bf16.mxu1 %v1133_v7 }
  0x2d   : > { %1064 = vmatpush3.bf16.msra.mxu0 %v1133_v7  ;;  %1099 = vmatpush3.bf16.msra.mxu1 %v1133_v7 }
  0x2e   : > { %1065 = vmatprep.subr.bf16.mxu0 %v1134_v8  ;;  %1092 = vmatprep.subr.bf16.mxu1 %v1134_v8 }
  0x31   : > { %1066 = vmatpush3.bf16.msra.mxu0 %v1134_v8  ;;  %1100 = vmatpush3.bf16.msra.mxu1 %v1134_v8 }
  0x32   : > { %1067 = vmatprep.subr.bf16.mxu0 %v1135_v9  ;;  %1093 = vmatprep.subr.bf16.mxu1 %v1135_v9 }
  0x35   : > { %1068 = vmatpush3.bf16.msra.mxu0 %v1135_v9  ;;  %1101 = vmatpush3.bf16.msra.mxu1 %v1135_v9 }
  0x36   : > { %1069 = vmatprep.subr.bf16.mxu0 %v1136_v10  ;;  %1094 = vmatprep.subr.bf16.mxu1 %v1136_v10 }
  0x39   : > { %1070 = vmatpush3.bf16.msra.mxu0 %v1136_v10  ;;  %1102 = vmatpush3.bf16.msra.mxu1 %v1136_v10 }
  0x3c   : > { %1072 = vmatmul.mubr.bf16.vlgmr.msra.gmra.mxu0 %v1139_v11  ;;  %1080 = vmatmul.mubr.bf16.vlgmr.msra.gmra.mxu1 %v1140_v12  ;;  %v984_v12 = vunpack.c.h.bf16 %v1284_v37 }
  0x3d   : > { %1075 = vmatprep.mubr.bf16.mxu0 %v1141_v13  ;;  %1083 = vmatprep.mubr.bf16.mxu1 %v1142_v14  ;;  %v1325_v13 = vmul.f32 0.3, %v581_v62  ;;  %v1000_v14 = vunpack.c.h.bf16 %v1287_v38 }
  0x44   : > { %1076 = vmatmul.mubr.bf16.gmra.mxu0 %v1143_v15  ;;  %1084 = vmatmul.mubr.bf16.gmra.mxu1 %v1144_v16  ;;  %v1328_v15 = vmul.f32 0.3, %v589_v63 }
  0xfc   : > { %v1073_v52 = vpop.f32.mrf.mxu0  ;;  %v1081_v53 = vpop.f32.mrf.mxu1 }
  0xfd   : > { %v472_v58 = vadd.f32 %v1073_v52, %v1276_v27  ;;  %v504_v59 = vadd.f32 %v1081_v53, %v1276_v27 }
  0xfe   : > { %v463_v0 = vpop.f32.mrf.mxu0  ;;  %v495_v1 = vpop.f32.mrf.mxu1 }
  0xff   : > { %v560_v6 = vadd.f32 %v975_v32, %v472_v58  ;;  %v568_v7 = vadd.f32 %v991_v33, %v504_v59  ;;  %v464_v8 = vadd.f32 %v1276_v27, %v463_v0  ;;  %v496_v9 = vadd.f32 %v1276_v27, %v495_v1 }
 0x100   : > { %v1074_v10 = vpop.f32.mrf.mxu0  ;;  %v1082_v11 = vpop.f32.mrf.mxu1  ;;  %v996_v32 = vunpack.c.h.bf16 %v1302_v50 }
 0x101   : > { %v608_v16 = vadd.f32 %v592_v24, %v560_v6  ;;  %v616_v17 = vadd.f32 %v600_v28, %v568_v7  ;;  %v558_v19 = vadd.f32 %v971_v34, %v464_v8  ;;  %v566_v20 = vadd.f32 %v987_v39, %v496_v9 }
 0x102   : > { %v475_v21 = vadd.f32 %v1074_v10, %v1276_v27  ;;  %v507_v23 = vadd.f32 %v1082_v11, %v1276_v27  ;;  %v466_v26 = vpop.f32.mrf.mxu0  ;;  %v498_v30 = vpop.f32.mrf.mxu1  ;;  %v1170_v24 = vmov 0.0  }
 0x103   : > { %vm624_vm0 = vcmp.ge.f32.partialorder %v608_v16, 0.5  ;;  %vm632_vm1 = vcmp.ge.f32.partialorder %v616_v17, 0.5  ;;  %v606_v33 = vadd.f32 %v1278_v29, %v558_v19  ;;  %v614_v36 = vadd.f32 %v598_v35, %v566_v20 }
 0x104   : > { %v640_v42 = vsel %vm624_vm0, 0.0, %v608_v16  ;;  %v918_v28 = vsel %vm624_vm0, 1.0, %v1170_v24  ;;  %v648_v34 = vsel %vm632_vm1, 0.0, %v616_v17  ;;  %v926_v39 = vsel %vm632_vm1, 1.0, %v1170_v24  ;;  %v1077_v43 = vpop.f32.mrf.mxu0  ;;  %v1085_v49 = vpop.f32.mrf.mxu1 }
 0x105   : > { %656 = vst [vmem:[#allocation2 + $0x58] sm:$0xff] %v640_v42  ;;  %664 = vst [vmem:[#allocation2 + $0x10] sm:$0xff] %v648_v34  ;;  %vm622_vm2 = vcmp.ge.f32.partialorder %v606_v33, 0.5  ;;  %vm630_vm3 = vcmp.ge.f32.partialorder %v614_v36, 0.5  ;;  %v561_v51 = vadd.f32 %v976_v40, %v475_v21  ;;  %v569_v52 = vadd.f32 %v992_v45, %v507_v23  ;;  %v579_v34 = vld [vmem:[#allocation2 + $0x68] sm:$0xff] }
 0x106   : > { %v638_v53 = vsel %vm622_vm2, 0.0, %v606_v33  ;;  %v916_v29 = vsel %vm622_vm2, 1.0, %v1170_v24  ;;  %v646_v35 = vsel %vm630_vm3, 0.0, %v614_v36  ;;  %v924_v58 = vsel %vm630_vm3, 1.0, %v1170_v24  ;;  %v479_v59 = vpop.f32.mrf.mxu0  ;;  %v511_v62 = vpop.f32.mrf.mxu1 }
 0x107   : > { %654 = vst [vmem:[#allocation2 + $0x30] sm:$0xff] %v638_v53  ;;  %662 = vst [vmem:[#allocation2 + $0x40] sm:$0xff] %v646_v35  ;;  %v609_v63 = vadd.f32 %v1291_v41, %v561_v51  ;;  %v617_v0 = vadd.f32 %v1297_v46, %v569_v52  ;;  %v467_v1 = vadd.f32 %v1276_v27, %v466_v26  ;;  %v595_v35 = vmul.f32 0.3, %v579_v34 }
 0x108   : > { %v499_v18 = vadd.f32 %v1276_v27, %v498_v30  ;;  %v488_v40 = vadd.f32 %v1077_v43, %v1276_v27  ;;  %v520_v45 = vadd.f32 %v1085_v49, %v1276_v27  ;;  %v480_v6 = vadd.f32 %v1276_v27, %v479_v59  ;;  %v1078_v16 = vpop.f32.mrf.mxu0  ;;  %v1086_v17 = vpop.f32.mrf.mxu1 }
 0x109   : > { %v512_v7 = vadd.f32 %v1276_v27, %v511_v62  ;;  %vm625_vm4 = vcmp.ge.f32.partialorder %v609_v63, 0.5  ;;  %vm633_vm5 = vcmp.ge.f32.partialorder %v617_v0, 0.5  ;;  %v559_v8 = vadd.f32 %v972_v47, %v467_v1 }
 0x10a   : > { %v567_v41 = vadd.f32 %v988_v48, %v499_v18  ;;  %v641_v46 = vsel %vm625_vm4, 0.0, %v609_v63  ;;  %v919_v9 = vsel %vm625_vm4, 1.0, %v1170_v24  ;;  %v649_v10 = vsel %vm633_vm5, 0.0, %v617_v0  ;;  %v514_v33 = vpop.f32.mrf.mxu1 }
 0x10b   : > { %v927_v11 = vsel %vm633_vm5, 1.0, %v1170_v24  ;;  %657 = vst [vmem:[#allocation2 + $0x18] sm:$0xff] %v641_v46  ;;  %v1005_v19 = vpack.c.bf16 %v919_v9, %v918_v28  ;;  %665 = vst [vmem:[#allocation2 + $0x38] sm:$0xff] %v649_v10  ;;  %v607_v22 = vadd.f32 %v1304_v54, %v559_v8  ;;  %v564_v25 = vadd.f32 %v983_v56, %v488_v40 }
 0x10c   : > { %v1017_v20 = vpack.c.bf16 %v927_v11, %v926_v39  ;;  %v615_v47 = vadd.f32 %v1306_v55, %v567_v41  ;;  %v572_v48 = vadd.f32 %v999_v57, %v520_v45  ;;  %v562_v21 = vadd.f32 %v979_v2, %v480_v6  ;;  %v482_v2 = vpop.f32.mrf.mxu0  ;;  %v587_v39 = vld [vmem:[#allocation2 + $0x70] sm:$0xff] }
 0x10d   : > { %v570_v23 = vadd.f32 %v995_v4, %v512_v7  ;;  %1032 = vst [vmem:[%s1227_s29 + $0x8] sm:$0xff] %v1005_v19   ;;  %vm623_vm6 = vcmp.ge.f32.partialorder %v607_v22, 0.5  ;;  %v491_v54 = vadd.f32 %v1078_v16, %v1276_v27  ;;  %v523_v55 = vadd.f32 %v1086_v17, %v1276_v27 }
 0x10e   : > { %1036 = vst [vmem:[%s1227_s29 + $0x28] sm:$0xff] %v1017_v20   ;;  %vm631_vm7 = vcmp.ge.f32.partialorder %v615_v47, 0.5  ;;  %v639_v26 = vsel %vm623_vm6, 0.0, %v607_v22  ;;  %v917_v56 = vsel %vm623_vm6, 1.0, %v1170_v24  ;;  %v612_v42 = vadd.f32 %v1312_v60, %v564_v25 }
 0x10f   : > { %v647_v30 = vsel %vm631_vm7, 0.0, %v615_v47  ;;  %v925_v57 = vsel %vm631_vm7, 1.0, %v1170_v24  ;;  %655 = vst [vmem:[#allocation2] sm:$0xff] %v639_v26  ;;  %v1002_v4 = vpack.c.bf16 %v917_v56, %v916_v29  ;;  %v620_v28 = vadd.f32 %v1314_v61, %v572_v48 }
 0x110   : > { %663 = vst [vmem:[#allocation2 + $0x20] sm:$0xff] %v647_v30  ;;  %v1014_v36 = vpack.c.bf16 %v925_v57, %v924_v58  ;;  %v610_v43 = vadd.f32 %v1317_v3, %v562_v21  ;;  %v618_v49 = vadd.f32 %v1320_v5, %v570_v23  ;;  %v565_v51 = vadd.f32 %v984_v12, %v491_v54 }
 0x111   : > { %v573_v52 = vadd.f32 %v1000_v14, %v523_v55  ;;  %1003 = vst [vmem:[%s1227_s29] sm:$0xff] %v1002_v4   ;;  %vm628_vm8 = vcmp.ge.f32.partialorder %v612_v42, 0.5  ;;  %vm636_vm9 = vcmp.ge.f32.partialorder %v620_v28, 0.5  ;;  %v483_v60 = vadd.f32 %v1276_v27, %v482_v2 }
 0x112   : > { %1035 = vst [vmem:[%s1227_s29 + $0x20] sm:$0xff] %v1014_v36   ;;  %v515_v61 = vadd.f32 %v1276_v27, %v514_v33  ;;  %v644_v53 = vsel %vm628_vm8, 0.0, %v612_v42  ;;  %v652_v29 = vsel %vm636_vm9, 0.0, %v620_v28  ;;  %v603_v3 = vmul.f32 0.3, %v587_v39 }
 0x113   : > { %660 = vst [vmem:[#allocation2 + $0x8] sm:$0xff] %v644_v53  ;;  %668 = vst [vmem:[#allocation2 + $0x78] sm:$0xff] %v652_v29  ;;  %vm626_vm10 = vcmp.ge.f32.partialorder %v610_v43, 0.5  ;;  %vm634_vm11 = vcmp.ge.f32.partialorder %v618_v49, 0.5  ;;  %v613_v37 = vadd.f32 %v1325_v13, %v565_v51  ;;  %v621_v38 = vadd.f32 %v1328_v15, %v573_v52 }
 0x114   : > { %v922_v5 = vsel %vm628_vm8, 1.0, %v1170_v24  ;;  %v930_v12 = vsel %vm636_vm9, 1.0, %v1170_v24  ;;  %v642_v14 = vsel %vm626_vm10, 0.0, %v610_v43  ;;  %v650_v27 = vsel %vm634_vm11, 0.0, %v618_v49 }
 0x115   : > { %658 = vst [vmem:[#allocation2 + $0x50] sm:$0xff] %v642_v14  ;;  %666 = vst [vmem:[#allocation2 + $0x60] sm:$0xff] %v650_v27  ;;  %vm629_vm12 = vcmp.ge.f32.partialorder %v613_v37, 0.5  ;;  %vm637_vm13 = vcmp.ge.f32.partialorder %v621_v38, 0.5  ;;  %v563_v58 = vadd.f32 %v980_v31, %v483_v60  ;;  %v571_v13 = vadd.f32 %v996_v32, %v515_v61 }
 0x116   : > { %v645_v15 = vsel %vm629_vm12, 0.0, %v613_v37  ;;  %v923_v59 = vsel %vm629_vm12, 1.0, %v1170_v24  ;;  %v653_v62 = vsel %vm637_vm13, 0.0, %v621_v38  ;;  %v931_v63 = vsel %vm637_vm13, 1.0, %v1170_v24 }
 0x117   : > { %661 = vst [vmem:[#allocation2 + $0x48] sm:$0xff] %v645_v15  ;;  %v1011_v0 = vpack.c.bf16 %v923_v59, %v922_v5  ;;  %669 = vst [vmem:[#allocation2 + $0x28] sm:$0xff] %v653_v62  ;;  %v1023_v1 = vpack.c.bf16 %v931_v63, %v930_v12  ;;  %v611_v18 = vadd.f32 %v595_v35, %v563_v58  ;;  %v920_v44 = vsel %vm626_vm10, 1.0, %v1170_v24 }
 0x118   : > { %v619_v40 = vadd.f32 %v603_v3, %v571_v13  ;;  %v928_v50 = vsel %vm634_vm11, 1.0, %v1170_v24 }
 0x119   : > { %1034 = vst [vmem:[%s1227_s29 + $0x18] sm:$0xff] %v1011_v0   ;;  %1038 = vst [vmem:[%s1227_s29 + $0x38] sm:$0xff] %v1023_v1   ;;  %vm627_vm14 = vcmp.ge.f32.partialorder %v611_v18, 0.5 }
 0x11a   : > { %vm635_vm15 = vcmp.ge.f32.partialorder %v619_v40, 0.5  ;;  %v643_v31 = vsel %vm627_vm14, 0.0, %v611_v18  ;;  %v921_v32 = vsel %vm627_vm14, 1.0, %v1170_v24 }
 0x11b   : > { %v651_v45 = vsel %vm635_vm15, 0.0, %v619_v40  ;;  %v929_v6 = vsel %vm635_vm15, 1.0, %v1170_v24  ;;  %659 = vst [vmem:[#allocation2 + $0x68] sm:$0xff] %v643_v31  ;;  %v1008_v7 = vpack.c.bf16 %v921_v32, %v920_v44 }
 0x11c   : > { %667 = vst [vmem:[#allocation2 + $0x70] sm:$0xff] %v651_v45  ;;  %v1020_v8 = vpack.c.bf16 %v929_v6, %v928_v50 }
 0x11d   : > { %1033 = vst [vmem:[%s1227_s29 + $0x10] sm:$0xff] %v1008_v7  }
 0x11e   : > { %1037 = vst [vmem:[%s1227_s29 + $0x30] sm:$0xff] %v1020_v8  }
 0x11f PF: > { %s14_s17 = sadd.s32 1, %s1167_s17   ;;  %s1419_s15 = smov %s1163_s16 }
 0x120   : > { %p11_p6 = scmp.ge.s32.totalorder %s14_s17, 6   ;;  %s1420_s16 = smov %s1422_s18 }
 0x122   :  { %13 = sbr.rel (!%p11_p6) target bundleno = 2 (0x2), region = 73 }

// kernel: resnetlif50_forward.58
= control target key start
LH: loop header
LB: loop body
LE: loop exit
PB: predicated region body
PF: predicated region fallthrough
CT: control target
= control target key end

     0   :  { %s2853_s12 = smov 0   ;;  %s2855_s13 = smov 0   ;;  %s3484_s0 = inlined_call_operand.vmem [shape: bf16[4,128,1152], index: 0, kind: input, shape index: {}]   ;;  %s3485_s1 = inlined_call_operand.vmem [shape: bf16[1152,128], index: 1, kind: input, shape index: {}]   ;;  %s3486_s2 = inlined_call_operand.vmem [shape: f32[1,128], index: 2, kind: input, shape index: {}]   ;;  %s3487_s3 = inlined_call_operand.vmem [shape: bf16[4,128,128], index: 3, kind: output, shape index: {}]  }
   0x1   :  { %s2857_s14 = smov 0  }
   0x2 LB: > { %s22_s15 = sadd.s32 1, %s2825_s13  ;;  %p2052_p0 = scmp.ge.s32.totalorder %s2829_s14, 1  ;;  %s2829_s14 = sphi %s2857_s14, %s13_s14   ;;  %s2825_s13 = sphi %s2855_s13, %s3541_s13   ;;  %s2821_s12 = sphi %s2853_s12, %s3540_s12  }
   0x3   : > { %p23_p1 = scmp.ge.s32.totalorder %s22_s15, 4  ;;  %p159_p2 = scmp.lt.s32.totalorder %s2829_s14, 5 }
   0x5   : > { %s3543_s15 = smov (%p23_p1, %s22_s15), 0  ;;  %p160_p3 = pnand %p2052_p0, %p159_p2 }
   0x7   : > { %163 = sbr.rel (%p160_p3) target bundleno = 412 (0x19c), region = 32 }
   0xc   : > { %p193_p4 = scmp.lt.s32.totalorder %s2821_s12, 3  ;;  %p2056_p5 = scmp.ne.s32.totalorder %s2821_s12, 0 }
   0xe   : > { %s194_s16 = scalar_select %p193_p4, %s2821_s12, 3 }
   0xf   : > { %217 = sbr.rel (%p2056_p5) target bundleno = 29 (0x1d), region = 36 }
  0x10   : > { %s2604_s17 = smul.u32 576, %s194_s16  ;;  %s2236_s18 = sshll.u32 %s194_s16, 6 }
  0x11   : > { %s2874_s21 = scalar_lea.vmem %s3487_s3, %s2236_s18 }
  0x12   : > { %s2879_s24 = scalar_lea.vmem %s3484_s0, %s2604_s17 }
  0x14   : > { %v2831_v0 = vmov 0.0  }
  0x15   : > { %218 = vst [vmem:[#allocation2 + $0x30] sm:$0xff] %v2831_v0  ;;  %219 = vst [vmem:[#allocation2] sm:$0xff] %v2831_v0 }
  0x16   : > { %220 = vst [vmem:[#allocation2 + $0x58] sm:$0xff] %v2831_v0  ;;  %221 = vst [vmem:[#allocation2 + $0x18] sm:$0xff] %v2831_v0 }
  0x17   : > { %222 = vst [vmem:[#allocation2 + $0x50] sm:$0xff] %v2831_v0  ;;  %223 = vst [vmem:[#allocation2 + $0x68] sm:$0xff] %v2831_v0 }
  0x18   : > { %224 = vst [vmem:[#allocation2 + $0x8] sm:$0xff] %v2831_v0  ;;  %225 = vst [vmem:[#allocation2 + $0x48] sm:$0xff] %v2831_v0 }
  0x19   : > { %226 = vst [vmem:[#allocation2 + $0x40] sm:$0xff] %v2831_v0  ;;  %227 = vst [vmem:[#allocation2 + $0x20] sm:$0xff] %v2831_v0 }
  0x1a   : > { %228 = vst [vmem:[#allocation2 + $0x10] sm:$0xff] %v2831_v0  ;;  %229 = vst [vmem:[#allocation2 + $0x38] sm:$0xff] %v2831_v0 }
  0x1b   : > { %230 = vst [vmem:[#allocation2 + $0x60] sm:$0xff] %v2831_v0  ;;  %231 = vst [vmem:[#allocation2 + $0x70] sm:$0xff] %v2831_v0 }
  0x1c   : > { %232 = vst [vmem:[#allocation2 + $0x78] sm:$0xff] %v2831_v0  ;;  %233 = vst [vmem:[#allocation2 + $0x28] sm:$0xff] %v2831_v0 }
  0x1d PF: > { %v2631_v1 = vld [vmem:[%s3485_s1 + $0x78] sm:$0xff]   ;;  %v2635_v5 = vld [vmem:[%s3485_s1 + $0x70] sm:$0xff]   ;;  %v2639_v9 = vld [vmem:[%s3485_s1 + $0x68] sm:$0xff]  }
  0x1e   : > { %v2632_v2 = vld [vmem:[%s3485_s1 + $0xf8] sm:$0xff]   ;;  %2284 = vmatprep.subr.bf16.mxu0 %v2631_v1  ;;  %v2636_v6 = vld [vmem:[%s3485_s1 + $0xf0] sm:$0xff]   ;;  %v2640_v10 = vld [vmem:[%s3485_s1 + $0xe8] sm:$0xff]  }
  0x1f   : > { %v2633_v3 = vld [vmem:[%s3485_s1 + $0x38] sm:$0xff]   ;;  %2348 = vmatprep.subr.bf16.mxu1 %v2632_v2  ;;  %v2637_v7 = vld [vmem:[%s3485_s1 + $0x30] sm:$0xff]   ;;  %v2641_v11 = vld [vmem:[%s3485_s1 + $0x28] sm:$0xff]  }
  0x20   : > { %v2634_v4 = vld [vmem:[%s3485_s1 + $0xb8] sm:$0xff]   ;;  %2285 = vmatpush3.bf16.msra.mxu0 %v2633_v3  ;;  %v2638_v8 = vld [vmem:[%s3485_s1 + $0xb0] sm:$0xff]   ;;  %v2642_v12 = vld [vmem:[%s3485_s1 + $0xa8] sm:$0xff]  }
  0x21   : > { %2349 = vmatpush3.bf16.msra.mxu1 %v2634_v4  ;;  %2286 = vmatprep.subr.bf16.mxu0 %v2635_v5  ;;  %v2643_v13 = vld [vmem:[%s3485_s1 + $0x60] sm:$0xff]   ;;  %v2647_v17 = vld [vmem:[%s3485_s1 + $0x58] sm:$0xff]   ;;  %v2651_v21 = vld [vmem:[%s3485_s1 + $0x50] sm:$0xff]  }
  0x22   : > { %2350 = vmatprep.subr.bf16.mxu1 %v2636_v6  ;;  %v2644_v14 = vld [vmem:[%s3485_s1 + $0xe0] sm:$0xff]   ;;  %v2648_v18 = vld [vmem:[%s3485_s1 + $0xd8] sm:$0xff]   ;;  %v2652_v22 = vld [vmem:[%s3485_s1 + $0xd0] sm:$0xff]  }
  0x23   : > { %v2645_v15 = vld [vmem:[%s3485_s1 + $0x20] sm:$0xff]   ;;  %v2649_v19 = vld [vmem:[%s3485_s1 + $0x18] sm:$0xff]   ;;  %v2653_v23 = vld [vmem:[%s3485_s1 + $0x10] sm:$0xff]  }
  0x24   : > { %2287 = vmatpush3.bf16.msra.mxu0 %v2637_v7  ;;  %v2646_v16 = vld [vmem:[%s3485_s1 + $0xa0] sm:$0xff]   ;;  %v2650_v20 = vld [vmem:[%s3485_s1 + $0x98] sm:$0xff]   ;;  %v2654_v24 = vld [vmem:[%s3485_s1 + $0x90] sm:$0xff]  }
  0x25   : > { %2351 = vmatpush3.bf16.msra.mxu1 %v2638_v8  ;;  %2288 = vmatprep.subr.bf16.mxu0 %v2639_v9  ;;  %v2655_v25 = vld [vmem:[%s3485_s1 + $0x48] sm:$0xff]   ;;  %v2659_v29 = vld [vmem:[%s3485_s1 + $0x40] sm:$0xff]   ;;  %v2669_v37 = vld [vmem:[%s3485_s1 + $0x178] sm:$0xff]  }
  0x26   : > { %2352 = vmatprep.subr.bf16.mxu1 %v2640_v10  ;;  %v2656_v26 = vld [vmem:[%s3485_s1 + $0xc8] sm:$0xff]   ;;  %v2660_v30 = vld [vmem:[%s3485_s1 + $0xc0] sm:$0xff]   ;;  %v2670_v38 = vld [vmem:[%s3485_s1 + $0x1f8] sm:$0xff]  }
  0x27   : > { %v2657_v27 = vld [vmem:[%s3485_s1 + $0x8] sm:$0xff]   ;;  %v2661_v31 = vld [vmem:[%s3485_s1] sm:$0xff]   ;;  %v2671_v39 = vld [vmem:[%s3485_s1 + $0x138] sm:$0xff]  }
  0x28   : > { %2289 = vmatpush3.bf16.msra.mxu0 %v2641_v11  ;;  %v2658_v28 = vld [vmem:[%s3485_s1 + $0x88] sm:$0xff]   ;;  %v2662_v32 = vld [vmem:[%s3485_s1 + $0x80] sm:$0xff]   ;;  %v2672_v40 = vld [vmem:[%s3485_s1 + $0x1b8] sm:$0xff]  }
  0x29   : > { %2353 = vmatpush3.bf16.msra.mxu1 %v2642_v12  ;;  %2290 = vmatprep.subr.bf16.mxu0 %v2643_v13  ;;  %v2663_v33 = vld [vmem:[%s2879_s24] ss:$36 sps:$4 sm:$0xff]   ;;  %v2666_v35 = vld [vmem:[%s2879_s24 + $0x8] ss:$36 sps:$4 sm:$0xff]   ;;  %v2675_v42 = vld [vmem:[%s2879_s24 + $0x54] ss:$36 sps:$4 sm:$0xff]  }
  0x2a   : > { %2354 = vmatprep.subr.bf16.mxu1 %v2644_v14  ;;  %v2665_v34 = vld [vmem:[%s2879_s24 + $0x4] ss:$36 sps:$4 sm:$0xff]   ;;  %v2668_v36 = vld [vmem:[%s2879_s24 + $0xc] ss:$36 sps:$4 sm:$0xff]   ;;  %v2683_v49 = vld [vmem:[%s2879_s24 + $0x94] ss:$36 sps:$4 sm:$0xff]  }
  0x2b   : > { %1297 = vmatprep.mubr.bf16.mxu0 %v2665_v34  ;;  %1394 = vmatprep.mubr.bf16.mxu1 %v2668_v36  ;;  %v2673_v41 = vld [vmem:[%s2879_s24 + $0x4c] ss:$36 sps:$4 sm:$0xff]   ;;  %v2685_v50 = vld [vmem:[%s2879_s24 + $0x9c] ss:$36 sps:$4 sm:$0xff]   ;;  %v2695_v58 = vld [vmem:[%s2879_s24 + $0xe4] ss:$36 sps:$4 sm:$0xff]  }
  0x2c   : > { %2291 = vmatpush3.bf16.msra.mxu0 %v2645_v15  ;;  %v2677_v43 = vld [vmem:[%s2879_s24 + $0x48] ss:$36 sps:$4 sm:$0xff]   ;;  %v2678_v44 = vld [vmem:[%s2879_s24 + $0x50] ss:$36 sps:$4 sm:$0xff]   ;;  %v2688_v52 = vld [vmem:[%s2879_s24 + $0x98] ss:$36 sps:$4 sm:$0xff]  }
  0x2d   : > { %2355 = vmatpush3.bf16.msra.mxu1 %v2646_v16  ;;  %2292 = vmatprep.subr.bf16.mxu0 %v2647_v17  ;;  %v2679_v45 = vld [vmem:[%s3485_s1 + $0x170] sm:$0xff]   ;;  %v2689_v53 = vld [vmem:[%s3485_s1 + $0x168] sm:$0xff]   ;;  %v2693_v57 = vld [vmem:[%s2879_s24 + $0xdc] ss:$36 sps:$4 sm:$0xff]  }
  0x2e   : > { %2356 = vmatprep.subr.bf16.mxu1 %v2648_v18  ;;  %v2680_v46 = vld [vmem:[%s3485_s1 + $0x1f0] sm:$0xff]   ;;  %v2690_v54 = vld [vmem:[%s3485_s1 + $0x1e8] sm:$0xff]   ;;  %v2697_v59 = vld [vmem:[%s2879_s24 + $0xd8] ss:$36 sps:$4 sm:$0xff]  }
  0x2f   : > { %v2681_v47 = vld [vmem:[%s3485_s1 + $0x130] sm:$0xff]   ;;  %v2691_v55 = vld [vmem:[%s3485_s1 + $0x128] sm:$0xff]   ;;  %v2698_v60 = vld [vmem:[%s2879_s24 + $0xe0] ss:$36 sps:$4 sm:$0xff]  }
  0x30   : > { %2293 = vmatpush3.bf16.msra.mxu0 %v2649_v19  ;;  %v2682_v48 = vld [vmem:[%s3485_s1 + $0x1b0] sm:$0xff]   ;;  %v2692_v56 = vld [vmem:[%s3485_s1 + $0x1a8] sm:$0xff]   ;;  %v2699_v61 = vld [vmem:[%s3485_s1 + $0x160] sm:$0xff]  }
  0x31   : > { %2357 = vmatpush3.bf16.msra.mxu1 %v2650_v20  ;;  %2294 = vmatprep.subr.bf16.mxu0 %v2651_v21  ;;  %v2687_v51 = vld [vmem:[%s2879_s24 + $0x90] ss:$36 sps:$4 sm:$0xff]   ;;  %v2700_v62 = vld [vmem:[%s3485_s1 + $0x1e0] sm:$0xff]   ;;  %v2709_v4 = vld [vmem:[%s3485_s1 + $0x158] sm:$0xff]  }
  0x32   : > { %2358 = vmatprep.subr.bf16.mxu1 %v2652_v22  ;;  %v2701_v63 = vld [vmem:[%s3485_s1 + $0x120] sm:$0xff]   ;;  %v2705_v2 = vld [vmem:[%s2879_s24 + $0x12c] ss:$36 sps:$4 sm:$0xff]   ;;  %v2710_v6 = vld [vmem:[%s3485_s1 + $0x1d8] sm:$0xff]  }
  0x33   : > { %v2702_v0 = vld [vmem:[%s3485_s1 + $0x1a0] sm:$0xff]   ;;  %v2708_v5 = vld [vmem:[%s2879_s24 + $0x128] ss:$36 sps:$4 sm:$0xff]   ;;  %v2711_v7 = vld [vmem:[%s3485_s1 + $0x118] sm:$0xff]  }
  0x34   : > { %2295 = vmatpush3.bf16.msra.mxu0 %v2653_v23  ;;  %v2703_v1 = vld [vmem:[%s2879_s24 + $0x124] ss:$36 sps:$4 sm:$0xff]   ;;  %v2712_v8 = vld [vmem:[%s3485_s1 + $0x198] sm:$0xff]   ;;  %v2713_v9 = vld [vmem:[%s2879_s24 + $0x16c] ss:$36 sps:$4 sm:$0xff]  }
  0x35   : > { %2359 = vmatpush3.bf16.msra.mxu1 %v2654_v24  ;;  %2296 = vmatprep.subr.bf16.mxu0 %v2655_v25  ;;  %v2707_v3 = vld [vmem:[%s2879_s24 + $0x120] ss:$36 sps:$4 sm:$0xff]   ;;  %v2715_v10 = vld [vmem:[%s2879_s24 + $0x174] ss:$36 sps:$4 sm:$0xff]   ;;  %v2717_v13 = vld [vmem:[%s2879_s24 + $0x168] ss:$36 sps:$4 sm:$0xff]  }
  0x36   : > { %2360 = vmatprep.subr.bf16.mxu1 %v2656_v26  ;;  %v2719_v11 = vld [vmem:[%s3485_s1 + $0x150] sm:$0xff]   ;;  %v2725_v18 = vld [vmem:[%s2879_s24 + $0x1bc] ss:$36 sps:$4 sm:$0xff]   ;;  %v2729_v19 = vld [vmem:[%s3485_s1 + $0x148] sm:$0xff]  }
  0x37   : > { %v2720_v12 = vld [vmem:[%s3485_s1 + $0x1d0] sm:$0xff]   ;;  %v2730_v20 = vld [vmem:[%s3485_s1 + $0x1c8] sm:$0xff]   ;;  %v2728_v24 = vld [vmem:[%s2879_s24 + $0x1b8] ss:$36 sps:$4 sm:$0xff]  }
  0x38   : > { %2297 = vmatpush3.bf16.msra.mxu0 %v2657_v27  ;;  %v2721_v14 = vld [vmem:[%s3485_s1 + $0x110] sm:$0xff]   ;;  %v2731_v21 = vld [vmem:[%s3485_s1 + $0x108] sm:$0xff]   ;;  %v2733_v25 = vld [vmem:[%s2879_s24 + $0x1fc] ss:$36 sps:$4 sm:$0xff]  }
  0x39   : > { %2361 = vmatpush3.bf16.msra.mxu1 %v2658_v28  ;;  %2298 = vmatprep.subr.bf16.mxu0 %v2659_v29  ;;  %v2722_v15 = vld [vmem:[%s3485_s1 + $0x190] sm:$0xff]   ;;  %v2732_v22 = vld [vmem:[%s3485_s1 + $0x188] sm:$0xff]   ;;  %v2739_v27 = vld [vmem:[%s3485_s1 + $0x140] sm:$0xff]  }
  0x3a   : > { %2362 = vmatprep.subr.bf16.mxu1 %v2660_v30  ;;  %v2718_v16 = vld [vmem:[%s2879_s24 + $0x170] ss:$36 sps:$4 sm:$0xff]   ;;  %v2735_v26 = vld [vmem:[%s2879_s24 + $0x204] ss:$36 sps:$4 sm:$0xff]  }
  0x3b   : > { %v2723_v17 = vld [vmem:[%s2879_s24 + $0x1b4] ss:$36 sps:$4 sm:$0xff]   ;;  %v2740_v28 = vld [vmem:[%s3485_s1 + $0x1c0] sm:$0xff]  }
  0x3c   : > { %2299 = vmatpush3.bf16.msra.mxu0 %v2661_v31  ;;  %v2727_v23 = vld [vmem:[%s2879_s24 + $0x1b0] ss:$36 sps:$4 sm:$0xff]   ;;  %v2741_v29 = vld [vmem:[%s3485_s1 + $0x100] sm:$0xff]   ;;  %v2737_v31 = vld [vmem:[%s2879_s24 + $0x1f8] ss:$36 sps:$4 sm:$0xff]  }
  0x3d   : > { %2363 = vmatpush3.bf16.msra.mxu1 %v2662_v32  ;;  %2412 = vmatprep.subr.bf16.mxu0 %v2669_v37  ;;  %v2742_v30 = vld [vmem:[%s3485_s1 + $0x180] sm:$0xff]   ;;  %v2745_v34 = vld [vmem:[%s2879_s24 + $0x14] ss:$36 sps:$4 sm:$0xff]  }
  0x3e   : > { %2476 = vmatprep.subr.bf16.mxu1 %v2670_v38  ;;  %v2738_v32 = vld [vmem:[%s2879_s24 + $0x200] ss:$36 sps:$4 sm:$0xff]   ;;  %v2743_v36 = vld [vmem:[%s2879_s24 + $0x10] ss:$36 sps:$4 sm:$0xff]   ;;  %v2746_v37 = vld [vmem:[%s2879_s24 + $0x18] ss:$36 sps:$4 sm:$0xff]  }
  0x3f   : > { %1298 = vmatmul.mubr.bf16.vlgmr.msra.gmra.mxu0 %v2663_v33  ;;  %v2749_v33 = vld [vmem:[%s3485_s1 + $0x238] sm:$0xff]  }
  0x40   : > { %1395 = vmatmul.mubr.bf16.vlgmr.msra.gmra.mxu1 %v2666_v35  ;;  %2413 = vmatpush3.bf16.msra.mxu0 %v2671_v39  ;;  %v2748_v35 = vld [vmem:[%s2879_s24 + $0x1c] ss:$36 sps:$4 sm:$0xff]   ;;  %v2752_v39 = vld [vmem:[%s2879_s24 + $0x64] ss:$36 sps:$4 sm:$0xff]  }
  0x41   : > { %2477 = vmatpush3.bf16.msra.mxu1 %v2672_v40  ;;  %1305 = vmatprep.mubr.bf16.mxu0 %v2673_v41  ;;  %v2750_v38 = vld [vmem:[%s2879_s24 + $0x5c] ss:$36 sps:$4 sm:$0xff]   ;;  %v2756_v40 = vld [vmem:[%s3485_s1 + $0x230] sm:$0xff]   ;;  %v2763_v41 = vld [vmem:[%s3485_s1 + $0x228] sm:$0xff]  }
  0x42   : > { %1402 = vmatprep.mubr.bf16.mxu1 %v2675_v42  ;;  %2414 = vmatprep.subr.bf16.mxu0 %v2679_v45  ;;  %v2754_v42 = vld [vmem:[%s2879_s24 + $0x58] ss:$36 sps:$4 sm:$0xff]   ;;  %v2759_v45 = vld [vmem:[%s2879_s24 + $0xac] ss:$36 sps:$4 sm:$0xff]  }
  0x43   : > { %2478 = vmatprep.subr.bf16.mxu1 %v2680_v46  ;;  %v2770_v46 = vld [vmem:[%s3485_s1 + $0x220] sm:$0xff]  }
  0x44   : > { %2415 = vmatpush3.bf16.msra.mxu0 %v2681_v47  ;;  %v2777_v47 = vld [vmem:[%s3485_s1 + $0x218] sm:$0xff]  }
  0x45   : > { %2479 = vmatpush3.bf16.msra.mxu1 %v2682_v48  ;;  %2416 = vmatprep.subr.bf16.mxu0 %v2689_v53  ;;  %v2761_v48 = vld [vmem:[%s2879_s24 + $0xa0] ss:$36 sps:$4 sm:$0xff]   ;;  %v2768_v53 = vld [vmem:[%s2879_s24 + $0xe8] ss:$36 sps:$4 sm:$0xff]  }
  0x46   : > { %2480 = vmatprep.subr.bf16.mxu1 %v2690_v54  ;;  %v2791_v54 = vld [vmem:[%s3485_s1 + $0x208] sm:$0xff]  }
  0x47   : > { %1306 = vmatmul.mubr.bf16.gmra.mxu0 %v2677_v43  ;;  %v2755_v43 = vld [vmem:[%s2879_s24 + $0x60] ss:$36 sps:$4 sm:$0xff]  }
  0x48   : > { %1403 = vmatmul.mubr.bf16.gmra.mxu1 %v2678_v44  ;;  %1313 = vmatprep.mubr.bf16.mxu0 %v2683_v49  ;;  %v2757_v44 = vld [vmem:[%s2879_s24 + $0xa4] ss:$36 sps:$4 sm:$0xff]  }
  0x49   : > { %1410 = vmatprep.mubr.bf16.mxu1 %v2685_v50  ;;  %2417 = vmatpush3.bf16.msra.mxu0 %v2691_v55  ;;  %v2762_v49 = vld [vmem:[%s2879_s24 + $0xa8] ss:$36 sps:$4 sm:$0xff]   ;;  %v2769_v55 = vld [vmem:[%s2879_s24 + $0xf0] ss:$36 sps:$4 sm:$0xff]  }
  0x4a   : > { %2481 = vmatpush3.bf16.msra.mxu1 %v2692_v56  ;;  %2418 = vmatprep.subr.bf16.mxu0 %v2699_v61  ;;  %v2764_v50 = vld [vmem:[%s2879_s24 + $0xec] ss:$36 sps:$4 sm:$0xff]   ;;  %v2771_v56 = vld [vmem:[%s2879_s24 + $0x134] ss:$36 sps:$4 sm:$0xff]   ;;  %v2778_v61 = vld [vmem:[%s2879_s24 + $0x17c] ss:$36 sps:$4 sm:$0xff]  }
  0x4b   : > { %2482 = vmatprep.subr.bf16.mxu1 %v2700_v62  ;;  %v2780_v62 = vld [vmem:[%s2879_s24 + $0x184] ss:$36 sps:$4 sm:$0xff]  }
  0x4d   : > { %2419 = vmatpush3.bf16.msra.mxu0 %v2701_v63  ;;  %v2782_v63 = vld [vmem:[%s2879_s24 + $0x178] ss:$36 sps:$4 sm:$0xff]  }
  0x4e   : > { %2483 = vmatpush3.bf16.msra.mxu1 %v2702_v0  ;;  %2420 = vmatprep.subr.bf16.mxu0 %v2709_v4  ;;  %v2783_v0 = vld [vmem:[%s2879_s24 + $0x180] ss:$36 sps:$4 sm:$0xff]   ;;  %v2790_v4 = vld [vmem:[%s2879_s24 + $0x1c8] ss:$36 sps:$4 sm:$0xff]  }
  0x4f   : > { %1314 = vmatmul.mubr.bf16.gmra.mxu0 %v2687_v51  ;;  %2484 = vmatprep.subr.bf16.mxu1 %v2710_v6  ;;  %v2766_v51 = vld [vmem:[%s2879_s24 + $0xf4] ss:$36 sps:$4 sm:$0xff]  }
  0x50   : > { %1411 = vmatmul.mubr.bf16.gmra.mxu1 %v2688_v52  ;;  %1321 = vmatprep.mubr.bf16.mxu0 %v2693_v57  ;;  %v2784_v52 = vld [vmem:[%s3485_s1 + $0x210] sm:$0xff]   ;;  %v2773_v57 = vld [vmem:[%s2879_s24 + $0x13c] ss:$36 sps:$4 sm:$0xff]  }
  0x51   : > { %1418 = vmatprep.mubr.bf16.mxu1 %v2695_v58  ;;  %2421 = vmatpush3.bf16.msra.mxu0 %v2711_v7  ;;  %v2798_v58 = vld [vmem:[%s3485_s1 + $0x200] sm:$0xff]   ;;  %v2794_v6 = vld [vmem:[%s2879_s24 + $0x214] ss:$36 sps:$4 sm:$0xff]   ;;  %v2796_v7 = vld [vmem:[%s2879_s24 + $0x208] ss:$36 sps:$4 sm:$0xff]  }
  0x52   : > { %2485 = vmatpush3.bf16.msra.mxu1 %v2712_v8  ;;  %2422 = vmatprep.subr.bf16.mxu0 %v2719_v11  ;;  %v2797_v8 = vld [vmem:[%s2879_s24 + $0x210] ss:$36 sps:$4 sm:$0xff]   ;;  %v2801_v11 = vld [vmem:[%s2879_s24 + $0x68] ss:$36 sps:$4 sm:$0xff]  }
  0x53   : > { %2486 = vmatprep.subr.bf16.mxu1 %v2720_v12  ;;  %v2802_v12 = vld [vmem:[%s2879_s24 + $0x188] ss:$36 sps:$4 sm:$0xff]  }
  0x55   : > { %2423 = vmatpush3.bf16.msra.mxu0 %v2721_v14  ;;  %v2804_v14 = vld [vmem:[%s2879_s24 + $0x1d0] ss:$36 sps:$4 sm:$0xff]  }
  0x56   : > { %2487 = vmatpush3.bf16.msra.mxu1 %v2722_v15  ;;  %2424 = vmatprep.subr.bf16.mxu0 %v2729_v19  ;;  %v2805_v15 = vld [vmem:[%s2879_s24 + $0xf8] ss:$36 sps:$4 sm:$0xff]   ;;  %v3172_v19 = vld [vmem:[%s3486_s2] ss:$0 sm:$0xff] }
  0x57   : > { %1322 = vmatmul.mubr.bf16.gmra.mxu0 %v2697_v59  ;;  %2488 = vmatprep.subr.bf16.mxu1 %v2730_v20  ;;  %v2775_v59 = vld [vmem:[%s2879_s24 + $0x130] ss:$36 sps:$4 sm:$0xff]  }
  0x58   : > { %1419 = vmatmul.mubr.bf16.gmra.mxu1 %v2698_v60  ;;  %1329 = vmatprep.mubr.bf16.mxu0 %v2703_v1  ;;  %v2776_v60 = vld [vmem:[%s2879_s24 + $0x138] ss:$36 sps:$4 sm:$0xff]   ;;  %v2785_v1 = vld [vmem:[%s2879_s24 + $0x1c4] ss:$36 sps:$4 sm:$0xff]  }
  0x59   : > { %1426 = vmatprep.mubr.bf16.mxu1 %v2705_v2  ;;  %2425 = vmatpush3.bf16.msra.mxu0 %v2731_v21  ;;  %v2787_v2 = vld [vmem:[%s2879_s24 + $0x1cc] ss:$36 sps:$4 sm:$0xff]  }
  0x5a   : > { %2489 = vmatpush3.bf16.msra.mxu1 %v2732_v22  ;;  %2426 = vmatprep.subr.bf16.mxu0 %v2739_v27 }
  0x5b   : > { %2490 = vmatprep.subr.bf16.mxu1 %v2740_v28 }
  0x5d   : > { %2427 = vmatpush3.bf16.msra.mxu0 %v2741_v29 }
  0x5e   : > { %2491 = vmatpush3.bf16.msra.mxu1 %v2742_v30  ;;  %2556 = vmatprep.subr.bf16.mxu0 %v2749_v33 }
  0x5f   : > { %1330 = vmatmul.mubr.bf16.gmra.mxu0 %v2707_v3  ;;  %2588 = vmatprep.subr.bf16.mxu1 %v2749_v33  ;;  %v2789_v3 = vld [vmem:[%s2879_s24 + $0x1c0] ss:$36 sps:$4 sm:$0xff]  }
  0x60   : > { %1427 = vmatmul.mubr.bf16.gmra.mxu1 %v2708_v5  ;;  %1337 = vmatprep.mubr.bf16.mxu0 %v2713_v9  ;;  %v2792_v5 = vld [vmem:[%s2879_s24 + $0x20c] ss:$36 sps:$4 sm:$0xff]   ;;  %v2799_v9 = vld [vmem:[%s2879_s24 + $0x20] ss:$36 sps:$4 sm:$0xff]  }
  0x61   : > { %1434 = vmatprep.mubr.bf16.mxu1 %v2715_v10  ;;  %v2800_v10 = vld [vmem:[%s2879_s24 + $0x140] ss:$36 sps:$4 sm:$0xff]  }
  0x67   : > { %1338 = vmatmul.mubr.bf16.gmra.mxu0 %v2717_v13  ;;  %v2803_v13 = vld [vmem:[%s2879_s24 + $0xb0] ss:$36 sps:$4 sm:$0xff]  }
  0x68   : > { %1435 = vmatmul.mubr.bf16.gmra.mxu1 %v2718_v16  ;;  %1345 = vmatprep.mubr.bf16.mxu0 %v2723_v17  ;;  %v2806_v16 = vld [vmem:[%s2879_s24 + $0x218] ss:$36 sps:$4 sm:$0xff]  }
  0x69   : > { %1442 = vmatprep.mubr.bf16.mxu1 %v2725_v18 }
  0x6f   : > { %1346 = vmatmul.mubr.bf16.gmra.mxu0 %v2727_v23 }
  0x70   : > { %1443 = vmatmul.mubr.bf16.gmra.mxu1 %v2728_v24  ;;  %1353 = vmatprep.mubr.bf16.mxu0 %v2733_v25 }
  0x71   : > { %1450 = vmatprep.mubr.bf16.mxu1 %v2735_v26 }
  0x77   : > { %1354 = vmatmul.mubr.bf16.gmra.mxu0 %v2737_v31 }
  0x78   : > { %1451 = vmatmul.mubr.bf16.gmra.mxu1 %v2738_v32  ;;  %1491 = vmatprep.mubr.bf16.mxu0 %v2745_v34 }
  0x79   : > { %1588 = vmatprep.mubr.bf16.mxu1 %v2748_v35 }
  0x7f   : > { %1492 = vmatmul.mubr.bf16.vlgmr.msra.gmra.mxu0 %v2743_v36 }
  0x80   : > { %1589 = vmatmul.mubr.bf16.vlgmr.msra.gmra.mxu1 %v2746_v37  ;;  %2557 = vmatpush3.bf16.msra.mxu0 %v2749_v33 }
  0x81   : > { %2596 = vmatpush3.bf16.msra.mxu1 %v2749_v33  ;;  %1499 = vmatprep.mubr.bf16.mxu0 %v2750_v38 }
  0x82   : > { %1596 = vmatprep.mubr.bf16.mxu1 %v2752_v39  ;;  %2558 = vmatprep.subr.bf16.mxu0 %v2756_v40 }
  0x83   : > { %2589 = vmatprep.subr.bf16.mxu1 %v2756_v40 }
  0x84   : > { %2559 = vmatpush3.bf16.msra.mxu0 %v2756_v40 }
  0x85   : > { %2597 = vmatpush3.bf16.msra.mxu1 %v2756_v40  ;;  %2560 = vmatprep.subr.bf16.mxu0 %v2763_v41 }
  0x86   : > { %2590 = vmatprep.subr.bf16.mxu1 %v2763_v41 }
  0x87   : > { %1500 = vmatmul.mubr.bf16.gmra.mxu0 %v2754_v42 }
  0x88   : > { %1597 = vmatmul.mubr.bf16.gmra.mxu1 %v2755_v43  ;;  %1507 = vmatprep.mubr.bf16.mxu0 %v2757_v44 }
  0x89   : > { %1604 = vmatprep.mubr.bf16.mxu1 %v2759_v45  ;;  %2561 = vmatpush3.bf16.msra.mxu0 %v2763_v41 }
  0x8a   : > { %2598 = vmatpush3.bf16.msra.mxu1 %v2763_v41  ;;  %2562 = vmatprep.subr.bf16.mxu0 %v2770_v46 }
  0x8b   : > { %2591 = vmatprep.subr.bf16.mxu1 %v2770_v46 }
  0x8d   : > { %2563 = vmatpush3.bf16.msra.mxu0 %v2770_v46 }
  0x8e   : > { %2599 = vmatpush3.bf16.msra.mxu1 %v2770_v46  ;;  %2564 = vmatprep.subr.bf16.mxu0 %v2777_v47 }
  0x8f   : > { %1508 = vmatmul.mubr.bf16.gmra.mxu0 %v2761_v48  ;;  %2592 = vmatprep.subr.bf16.mxu1 %v2777_v47 }
  0x90   : > { %1605 = vmatmul.mubr.bf16.gmra.mxu1 %v2762_v49  ;;  %1515 = vmatprep.mubr.bf16.mxu0 %v2764_v50 }
  0x91   : > { %1612 = vmatprep.mubr.bf16.mxu1 %v2766_v51  ;;  %2565 = vmatpush3.bf16.msra.mxu0 %v2777_v47 }
  0x92   : > { %2600 = vmatpush3.bf16.msra.mxu1 %v2777_v47  ;;  %2566 = vmatprep.subr.bf16.mxu0 %v2784_v52 }
  0x93   : > { %2593 = vmatprep.subr.bf16.mxu1 %v2784_v52 }
  0x95   : > { %2567 = vmatpush3.bf16.msra.mxu0 %v2784_v52 }
  0x96   : > { %2601 = vmatpush3.bf16.msra.mxu1 %v2784_v52  ;;  %2568 = vmatprep.subr.bf16.mxu0 %v2791_v54 }
  0x97   : > { %1516 = vmatmul.mubr.bf16.gmra.mxu0 %v2768_v53  ;;  %2594 = vmatprep.subr.bf16.mxu1 %v2791_v54 }
  0x98   : > { %1613 = vmatmul.mubr.bf16.gmra.mxu1 %v2769_v55  ;;  %1523 = vmatprep.mubr.bf16.mxu0 %v2771_v56 }
  0x99   : > { %1620 = vmatprep.mubr.bf16.mxu1 %v2773_v57  ;;  %2569 = vmatpush3.bf16.msra.mxu0 %v2791_v54 }
  0x9a   : > { %2602 = vmatpush3.bf16.msra.mxu1 %v2791_v54  ;;  %2570 = vmatprep.subr.bf16.mxu0 %v2798_v58 }
  0x9b   : > { %2595 = vmatprep.subr.bf16.mxu1 %v2798_v58 }
  0x9d   : > { %2571 = vmatpush3.bf16.msra.mxu0 %v2798_v58 }
  0x9e   : > { %2603 = vmatpush3.bf16.msra.mxu1 %v2798_v58 }
  0x9f   : > { %1524 = vmatmul.mubr.bf16.gmra.mxu0 %v2775_v59 }
  0xa0   : > { %1621 = vmatmul.mubr.bf16.gmra.mxu1 %v2776_v60  ;;  %1531 = vmatprep.mubr.bf16.mxu0 %v2778_v61 }
  0xa1   : > { %1628 = vmatprep.mubr.bf16.mxu1 %v2780_v62 }
  0xa7   : > { %1532 = vmatmul.mubr.bf16.gmra.mxu0 %v2782_v63 }
  0xa8   : > { %1629 = vmatmul.mubr.bf16.gmra.mxu1 %v2783_v0  ;;  %1539 = vmatprep.mubr.bf16.mxu0 %v2785_v1 }
  0xa9   : > { %1636 = vmatprep.mubr.bf16.mxu1 %v2787_v2 }
  0xaf   : > { %1540 = vmatmul.mubr.bf16.gmra.mxu0 %v2789_v3 }
  0xb0   : > { %1637 = vmatmul.mubr.bf16.gmra.mxu1 %v2790_v4  ;;  %1547 = vmatprep.mubr.bf16.mxu0 %v2792_v5 }
  0xb1   : > { %1644 = vmatprep.mubr.bf16.mxu1 %v2794_v6 }
  0xb7   : > { %1548 = vmatmul.mubr.bf16.gmra.mxu0 %v2796_v7 }
  0xb8   : > { %1645 = vmatmul.mubr.bf16.gmra.mxu1 %v2797_v8  ;;  %2572 = vmatprep.mubr.bf16.mxu0 %v2799_v9 }
  0xb9   : > { %2580 = vmatprep.mubr.bf16.mxu1 %v2800_v10 }
  0xbf   : > { %2573 = vmatmul.mubr.bf16.vlgmr.msra.gmra.mxu0 %v2801_v11 }
  0xc0   : > { %2581 = vmatmul.mubr.bf16.vlgmr.msra.gmra.mxu1 %v2802_v12  ;;  %2576 = vmatprep.mubr.bf16.mxu0 %v2803_v13 }
  0xc1   : > { %2584 = vmatprep.mubr.bf16.mxu1 %v2804_v14 }
  0xc7   : > { %2577 = vmatmul.mubr.bf16.gmra.mxu0 %v2805_v15 }
  0xc8   : > { %2585 = vmatmul.mubr.bf16.gmra.mxu1 %v2806_v16 }
  0xff   : > { %v2300_v17 = vpop.f32.mrf.mxu0 }
 0x100   : > { %v2364_v18 = vpop.f32.mrf.mxu1 }
 0x101   : > { %v2301_v20 = vpop.f32.mrf.mxu0 }
 0x102   : > { %v2302_v21 = vadd.f32 %v2301_v20, %v2300_v17  ;;  %v2365_v22 = vpop.f32.mrf.mxu1 }
 0x103   : > { %v2366_v23 = vadd.f32 %v2365_v22, %v2364_v18  ;;  %v2303_v24 = vpop.f32.mrf.mxu0 }
 0x104   : > { %v1300_v25 = vadd.f32 %v2302_v21, %v3172_v19  ;;  %v2367_v26 = vpop.f32.mrf.mxu1 }
 0x105   : > { %v2304_v27 = vpop.f32.mrf.mxu0 }
 0x106   : > { %v3175_v28 = vadd.f32 %v2366_v23, %v1300_v25  ;;  %v2305_v29 = vadd.f32 %v2304_v27, %v2303_v24  ;;  %v2368_v30 = vpop.f32.mrf.mxu1 }
 0x107   : > { %v2369_v31 = vadd.f32 %v2368_v30, %v2367_v26  ;;  %v2306_v32 = vpop.f32.mrf.mxu0 }
 0x108   : > { %v1303_v33 = vadd.f32 %v2305_v29, %v3172_v19  ;;  %v2370_v34 = vpop.f32.mrf.mxu1 }
 0x109   : > { %v2307_v35 = vpop.f32.mrf.mxu0 }
 0x10a   : > { %v3178_v36 = vadd.f32 %v2369_v31, %v1303_v33  ;;  %v2308_v37 = vadd.f32 %v2307_v35, %v2306_v32  ;;  %v2371_v38 = vpop.f32.mrf.mxu1 }
 0x10b   : > { %v2372_v39 = vadd.f32 %v2371_v38, %v2370_v34  ;;  %v2309_v40 = vpop.f32.mrf.mxu0 }
 0x10c   : > { %v1308_v41 = vadd.f32 %v2308_v37, %v3172_v19  ;;  %v2373_v42 = vpop.f32.mrf.mxu1 }
 0x10d   : > { %v2310_v43 = vpop.f32.mrf.mxu0 }
 0x10e   : > { %v3181_v44 = vadd.f32 %v2372_v39, %v1308_v41  ;;  %v2311_v45 = vadd.f32 %v2310_v43, %v2309_v40  ;;  %v2374_v46 = vpop.f32.mrf.mxu1 }
 0x10f   : > { %v2375_v47 = vadd.f32 %v2374_v46, %v2373_v42  ;;  %v2312_v48 = vpop.f32.mrf.mxu0 }
 0x110   : > { %v1311_v49 = vadd.f32 %v2311_v45, %v3172_v19  ;;  %v2376_v50 = vpop.f32.mrf.mxu1 }
 0x111   : > { %v2313_v51 = vpop.f32.mrf.mxu0 }
 0x112   : > { %v3184_v52 = vadd.f32 %v2375_v47, %v1311_v49  ;;  %v2314_v53 = vadd.f32 %v2313_v51, %v2312_v48  ;;  %v2377_v54 = vpop.f32.mrf.mxu1 }
 0x113   : > { %v2378_v55 = vadd.f32 %v2377_v54, %v2376_v50  ;;  %v2315_v56 = vpop.f32.mrf.mxu0 }
 0x114   : > { %v1316_v57 = vadd.f32 %v2314_v53, %v3172_v19  ;;  %v2379_v58 = vpop.f32.mrf.mxu1 }
 0x115   : > { %v2316_v59 = vpop.f32.mrf.mxu0 }
 0x116   : > { %v3187_v60 = vadd.f32 %v2378_v55, %v1316_v57  ;;  %v2317_v61 = vadd.f32 %v2316_v59, %v2315_v56  ;;  %v2380_v62 = vpop.f32.mrf.mxu1 }
 0x117   : > { %v2381_v63 = vadd.f32 %v2380_v62, %v2379_v58  ;;  %v2318_v0 = vpop.f32.mrf.mxu0 }
 0x118   : > { %v1319_v1 = vadd.f32 %v2317_v61, %v3172_v19  ;;  %v2382_v2 = vpop.f32.mrf.mxu1 }
 0x119   : > { %v2319_v3 = vpop.f32.mrf.mxu0 }
 0x11a   : > { %v3190_v4 = vadd.f32 %v2381_v63, %v1319_v1  ;;  %v2320_v5 = vadd.f32 %v2319_v3, %v2318_v0  ;;  %v2383_v6 = vpop.f32.mrf.mxu1 }
 0x11b   : > { %v2384_v7 = vadd.f32 %v2383_v6, %v2382_v2  ;;  %v2321_v8 = vpop.f32.mrf.mxu0 }
 0x11c   : > { %v1324_v9 = vadd.f32 %v2320_v5, %v3172_v19  ;;  %v2385_v10 = vpop.f32.mrf.mxu1 }
 0x11d   : > { %v2322_v11 = vpop.f32.mrf.mxu0 }
 0x11e   : > { %v3193_v12 = vadd.f32 %v2384_v7, %v1324_v9  ;;  %v2323_v13 = vadd.f32 %v2322_v11, %v2321_v8  ;;  %v2386_v14 = vpop.f32.mrf.mxu1 }
 0x11f   : > { %v2387_v15 = vadd.f32 %v2386_v14, %v2385_v10  ;;  %v2324_v16 = vpop.f32.mrf.mxu0 }
 0x120   : > { %v1327_v17 = vadd.f32 %v2323_v13, %v3172_v19  ;;  %v2388_v18 = vpop.f32.mrf.mxu1 }
 0x121   : > { %v2325_v20 = vpop.f32.mrf.mxu0 }
 0x122   : > { %v3196_v21 = vadd.f32 %v2387_v15, %v1327_v17  ;;  %v2326_v22 = vadd.f32 %v2325_v20, %v2324_v16  ;;  %v2389_v23 = vpop.f32.mrf.mxu1 }
 0x123   : > { %v2390_v24 = vadd.f32 %v2389_v23, %v2388_v18  ;;  %v2327_v25 = vpop.f32.mrf.mxu0 }
 0x124   : > { %v1332_v26 = vadd.f32 %v2326_v22, %v3172_v19  ;;  %v2391_v27 = vpop.f32.mrf.mxu1 }
 0x125   : > { %v2328_v29 = vpop.f32.mrf.mxu0 }
 0x126   : > { %v3199_v30 = vadd.f32 %v2390_v24, %v1332_v26  ;;  %v2329_v31 = vadd.f32 %v2328_v29, %v2327_v25  ;;  %v2392_v32 = vpop.f32.mrf.mxu1 }
 0x127   : > { %v2393_v33 = vadd.f32 %v2392_v32, %v2391_v27  ;;  %v2330_v34 = vpop.f32.mrf.mxu0 }
 0x128   : > { %3488 = vst [vmem:[#allocation3_spill] sm:$0xff] %v3199_v30  ;;  %v1335_v35 = vadd.f32 %v2329_v31, %v3172_v19  ;;  %v2394_v37 = vpop.f32.mrf.mxu1 }
 0x129   : > { %v2331_v38 = vpop.f32.mrf.mxu0 }
 0x12a   : > { %v3202_v39 = vadd.f32 %v2393_v33, %v1335_v35  ;;  %v2332_v40 = vadd.f32 %v2331_v38, %v2330_v34  ;;  %v2395_v41 = vpop.f32.mrf.mxu1 }
 0x12b   : > { %v2396_v42 = vadd.f32 %v2395_v41, %v2394_v37  ;;  %v2333_v43 = vpop.f32.mrf.mxu0 }
 0x12c   : > { %3489 = vst [vmem:[#allocation4_spill] sm:$0xff] %v3202_v39  ;;  %v1340_v45 = vadd.f32 %v2332_v40, %v3172_v19  ;;  %v2397_v46 = vpop.f32.mrf.mxu1 }
 0x12d   : > { %v2334_v47 = vpop.f32.mrf.mxu0 }
 0x12e   : > { %v3205_v48 = vadd.f32 %v2396_v42, %v1340_v45  ;;  %v2335_v49 = vadd.f32 %v2334_v47, %v2333_v43  ;;  %v2398_v50 = vpop.f32.mrf.mxu1 }
 0x12f   : > { %v2399_v51 = vadd.f32 %v2398_v50, %v2397_v46  ;;  %v2336_v53 = vpop.f32.mrf.mxu0 }
 0x130   : > { %3490 = vst [vmem:[#allocation5_spill] sm:$0xff] %v3205_v48  ;;  %v1343_v54 = vadd.f32 %v2335_v49, %v3172_v19  ;;  %v2400_v55 = vpop.f32.mrf.mxu1 }
 0x131   : > { %v2337_v56 = vpop.f32.mrf.mxu0 }
 0x132   : > { %v3208_v57 = vadd.f32 %v2399_v51, %v1343_v54  ;;  %v2338_v58 = vadd.f32 %v2337_v56, %v2336_v53  ;;  %v2401_v59 = vpop.f32.mrf.mxu1 }
 0x133   : > { %v2402_v61 = vadd.f32 %v2401_v59, %v2400_v55  ;;  %v2339_v62 = vpop.f32.mrf.mxu0 }
 0x134   : > { %3491 = vst [vmem:[#allocation6_spill] sm:$0xff] %v3208_v57  ;;  %v1348_v63 = vadd.f32 %v2338_v58, %v3172_v19  ;;  %v2403_v0 = vpop.f32.mrf.mxu1  ;;  %v1759_v57 = vld [vmem:[#allocation2 + $0x20] sm:$0xff] }
 0x135   : > { %v2340_v1 = vpop.f32.mrf.mxu0 }
 0x136   : > { %v3211_v2 = vadd.f32 %v2402_v61, %v1348_v63  ;;  %v2341_v3 = vadd.f32 %v2340_v1, %v2339_v62  ;;  %v2404_v5 = vpop.f32.mrf.mxu1 }
 0x137   : > { %v2405_v6 = vadd.f32 %v2404_v5, %v2403_v0  ;;  %v2342_v7 = vpop.f32.mrf.mxu0 }
 0x138   : > { %3492 = vst [vmem:[#allocation7_spill] sm:$0xff] %v3211_v2  ;;  %v1351_v8 = vadd.f32 %v2341_v3, %v3172_v19  ;;  %v2406_v9 = vpop.f32.mrf.mxu1  ;;  %v1751_v2 = vld [vmem:[#allocation2] sm:$0xff] }
 0x139   : > { %v2343_v10 = vpop.f32.mrf.mxu0 }
 0x13a   : > { %v3214_v11 = vadd.f32 %v2405_v6, %v1351_v8  ;;  %v2344_v13 = vadd.f32 %v2343_v10, %v2342_v7  ;;  %v2407_v14 = vpop.f32.mrf.mxu1 }
 0x13b   : > { %v2408_v15 = vadd.f32 %v2407_v14, %v2406_v9  ;;  %v2345_v16 = vpop.f32.mrf.mxu0 }
 0x13c   : > { %3493 = vst [vmem:[#allocation8_spill] sm:$0xff] %v3214_v11  ;;  %v1356_v17 = vadd.f32 %v2344_v13, %v3172_v19  ;;  %v2409_v18 = vpop.f32.mrf.mxu1  ;;  %v1758_v11 = vld [vmem:[#allocation2 + $0x40] sm:$0xff] }
 0x13d   : > { %v2346_v20 = vpop.f32.mrf.mxu0  ;;  %v3312_v30 = vmul.f32 0.3, %v1758_v11 }
 0x13e   : > { %v3217_v22 = vadd.f32 %v2408_v15, %v1356_v17  ;;  %v2347_v23 = vadd.f32 %v2346_v20, %v2345_v16  ;;  %v2410_v24 = vpop.f32.mrf.mxu1 }
 0x13f   : > { %v2411_v25 = vadd.f32 %v2410_v24, %v2409_v18  ;;  %v2428_v26 = vpop.f32.mrf.mxu0  ;;  %v1760_v24 = vld [vmem:[#allocation2 + $0x10] sm:$0xff]  ;;  %3509 = vst [vmem:[#allocation24_spill] sm:$0xff] %v3312_v30 }
 0x140   : > { %3494 = vst [vmem:[#allocation9_spill] sm:$0xff] %v3217_v22  ;;  %v1359_v27 = vadd.f32 %v2347_v23, %v3172_v19  ;;  %v3220_v29 = vpop.f32.mrf.mxu1  ;;  %v1752_v23 = vld [vmem:[#allocation2 + $0x58] sm:$0xff] }
 0x141   : > { %v2429_v31 = vpop.f32.mrf.mxu0  ;;  %v1753_v22 = vld [vmem:[#allocation2 + $0x18] sm:$0xff] }
 0x142   : > { %v3222_v32 = vadd.f32 %v2411_v25, %v1359_v27  ;;  %v3224_v33 = vpop.f32.mrf.mxu1  ;;  %v1750_v27 = vld [vmem:[#allocation2 + $0x30] sm:$0xff] }
 0x143   : > { %v2431_v34 = vpop.f32.mrf.mxu0  ;;  %v3310_v39 = vmul.f32 0.3, %v1750_v27  ;;  %v1757_v27 = vld [vmem:[#allocation2 + $0x48] sm:$0xff] }
 0x144   : > { %3495 = vst [vmem:[#allocation10_spill] sm:$0xff] %v3222_v32  ;;  %v3226_v35 = vpop.f32.mrf.mxu1 }
 0x145   : > { %v2432_v37 = vpop.f32.mrf.mxu0  ;;  %3508 = vst [vmem:[#allocation23_spill] sm:$0xff] %v3310_v39 }
 0x146   : > { %v3228_v38 = vpop.f32.mrf.mxu1 }
 0x147   : > { %v3230_v40 = vpop.f32.mrf.mxu0 }
 0x148   : > { %v3232_v41 = vpop.f32.mrf.mxu1 }
 0x149   : > { %v3234_v42 = vpop.f32.mrf.mxu0 }
 0x14a   : > { %v3236_v19 = vpop.f32.mrf.mxu1 }
 0x14b   : > { %v3238_v43 = vpop.f32.mrf.mxu0 }
 0x14c   : > { %v3240_v45 = vpop.f32.mrf.mxu1 }
 0x14d   : > { %v3242_v46 = vpop.f32.mrf.mxu0 }
 0x14e   : > { %v3244_v47 = vpop.f32.mrf.mxu1 }
 0x14f   : > { %v3246_v49 = vpop.f32.mrf.mxu0 }
 0x150   : > { %v3248_v50 = vpop.f32.mrf.mxu1 }
 0x151   : > { %v3250_v51 = vpop.f32.mrf.mxu0 }
 0x152   : > { %v3252_v53 = vpop.f32.mrf.mxu1 }
 0x153   : > { %v3254_v54 = vpop.f32.mrf.mxu0 }
 0x154   : > { %v3256_v55 = vpop.f32.mrf.mxu1 }
 0x155   : > { %v3258_v56 = vpop.f32.mrf.mxu0 }
 0x156   : > { %v3260_v58 = vpop.f32.mrf.mxu1 }
 0x157   : > { %v3262_v59 = vpop.f32.mrf.mxu0 }
 0x158   : > { %v3264_v61 = vpop.f32.mrf.mxu1 }
 0x159   : > { %3496 = vst [vmem:[#allocation11_spill] sm:$0xff] %v3264_v61  ;;  %v3266_v62 = vpop.f32.mrf.mxu0  ;;  %v3314_v61 = vmul.f32 0.3, %v1753_v22 }
 0x15a   : > { %v3268_v63 = vpop.f32.mrf.mxu1 }
 0x15b   : > { %3497 = vst [vmem:[#allocation12_spill] sm:$0xff] %v3268_v63  ;;  %v3270_v0 = vpop.f32.mrf.mxu0 }
 0x15c   : > { %v3272_v1 = vpop.f32.mrf.mxu1 }
 0x15d   : > { %3498 = vst [vmem:[#allocation13_spill] sm:$0xff] %v3272_v1  ;;  %v3274_v3 = vpop.f32.mrf.mxu0  ;;  %v1764_v1 = vld [vmem:[#allocation2 + $0x78] sm:$0xff] }
 0x15e   : > { %v3276_v5 = vpop.f32.mrf.mxu1  ;;  %v3326_v30 = vmul.f32 0.3, %v1764_v1  ;;  %v2442_v1 = vadd.f32 %v3250_v51, %v3246_v49  ;;  %v2451_v49 = vadd.f32 %v3274_v3, %v3270_v0  ;;  %v2506_v0 = vadd.f32 %v3252_v53, %v3248_v50 }
 0x15f   : > { %3499 = vst [vmem:[#allocation14_spill] sm:$0xff] %v3276_v5  ;;  %v3278_v6 = vpop.f32.mrf.mxu0  ;;  %v1756_v5 = vld [vmem:[#allocation2 + $0x8] sm:$0xff]  ;;  %v2509_v50 = vadd.f32 %v3260_v58, %v3256_v55 }
 0x160   : > { %v3280_v7 = vpop.f32.mrf.mxu1  ;;  %v3324_v11 = vmul.f32 0.3, %v1756_v5  ;;  %3513 = vst [vmem:[#allocation28_spill] sm:$0xff] %v3326_v30 }
 0x161   : > { %3500 = vst [vmem:[#allocation15_spill] sm:$0xff] %v3280_v7  ;;  %v3282_v8 = vpop.f32.mrf.mxu0  ;;  %v3304_v7 = vmul.f32 0.3, %v1752_v23  ;;  %v1754_v23 = vld [vmem:[#allocation2 + $0x50] sm:$0xff] }
 0x162   : > { %v3284_v9 = vpop.f32.mrf.mxu1  ;;  %3512 = vst [vmem:[#allocation27_spill] sm:$0xff] %v3324_v11 }
 0x163   : > { %3501 = vst [vmem:[#allocation16_spill] sm:$0xff] %v3284_v9  ;;  %v3286_v10 = vpop.f32.mrf.mxu0 }
 0x164   : > { %v3288_v13 = vpop.f32.mrf.mxu1 }
 0x165   : > { %3502 = vst [vmem:[#allocation17_spill] sm:$0xff] %v3288_v13  ;;  %v3290_v14 = vpop.f32.mrf.mxu0  ;;  %v1761_v13 = vld [vmem:[#allocation2 + $0x38] sm:$0xff] }
 0x166   : > { %v3292_v15 = vpop.f32.mrf.mxu1  ;;  %v3316_v48 = vmul.f32 0.3, %v1761_v13  ;;  %v2436_v13 = vadd.f32 %v3234_v42, %v3230_v40  ;;  %v2494_v40 = vadd.f32 %v3224_v33, %v3220_v29  ;;  %v2445_v42 = vadd.f32 %v3258_v56, %v3254_v54 }
 0x167   : > { %3503 = vst [vmem:[#allocation18_spill] sm:$0xff] %v3292_v15  ;;  %v2458_v16 = vpop.f32.mrf.mxu0  ;;  %v3306_v15 = vmul.f32 0.3, %v1760_v24  ;;  %v2457_v3 = vadd.f32 %v3290_v14, %v3286_v10  ;;  %v3516_v10 = vld [vmem:[#allocation12_spill] sm:$0xff] }
 0x168   : > { %v3294_v17 = vpop.f32.mrf.mxu1  ;;  %v1502_v33 = vadd.f32 %v2436_v13, %v3181_v44  ;;  %v1513_v44 = vadd.f32 %v2445_v42, %v3190_v4  ;;  %v3514_v4 = vld [vmem:[#allocation5_spill] sm:$0xff] }
 0x169   : > { %3504 = vst [vmem:[#allocation19_spill] sm:$0xff] %v3294_v17  ;;  %v2459_v18 = vpop.f32.mrf.mxu0  ;;  %3507 = vst [vmem:[#allocation22_spill] sm:$0xff] %v3306_v15  ;;  %v2430_v17 = vadd.f32 %v2429_v31, %v2428_v26  ;;  %v3320_v15 = vmul.f32 0.3, %v1751_v2  ;;  %v3322_v26 = vmul.f32 0.3, %v1759_v57  ;;  %v2439_v2 = vadd.f32 %v3242_v46, %v3238_v43 }
 0x16a   : > { %v3296_v20 = vpop.f32.mrf.mxu1  ;;  %v1762_v31 = vld [vmem:[#allocation2 + $0x60] sm:$0xff]  ;;  %v3335_v57 = vmul.f32 0.3, %v1754_v23  ;;  %v2460_v56 = vadd.f32 %v2459_v18, %v2458_v16 }
 0x16b   : > { %3505 = vst [vmem:[#allocation20_spill] sm:$0xff] %v3296_v20  ;;  %v3298_v25 = vpop.f32.mrf.mxu0  ;;  %3510 = vst [vmem:[#allocation25_spill] sm:$0xff] %v3320_v15  ;;  %v1494_v22 = vadd.f32 %v2430_v17, %v3175_v28  ;;  %v3340_v11 = vmul.f32 0.3, %v1762_v31  ;;  %v3342_v28 = vmul.f32 0.3, %v1757_v27  ;;  %v1505_v54 = vadd.f32 %v2439_v2, %v3184_v52 }
 0x16c   : > { %v3300_v32 = vpop.f32.mrf.mxu1  ;;  %3511 = vst [vmem:[#allocation26_spill] sm:$0xff] %v3322_v26  ;;  %v1763_v26 = vld [vmem:[#allocation2 + $0x70] sm:$0xff]  ;;  %v2500_v27 = vadd.f32 %v3236_v19, %v3232_v41  ;;  %v2454_v52 = vadd.f32 %v3282_v8, %v3278_v6  ;;  %v1534_v53 = vadd.f32 %v2460_v56, %v3514_v4  ;;  %v3525_v56 = vld [vmem:[#allocation15_spill] sm:$0xff] }
 0x16d   : > { %3506 = vst [vmem:[#allocation21_spill] sm:$0xff] %v3300_v32  ;;  %v3302_v9 = vpop.f32.mrf.mxu0  ;;  %v2433_v32 = vadd.f32 %v2432_v37, %v2431_v34  ;;  %v1765_v34 = vld [vmem:[#allocation2 + $0x28] sm:$0xff]  ;;  %v3360_v29 = vmul.f32 0.3, %v1763_v26  ;;  %v1591_v31 = vadd.f32 %v2494_v40, %v1494_v22  ;;  %v3515_v26 = vld [vmem:[#allocation11_spill] sm:$0xff]  ;;  %v3523_v40 = vld [vmem:[#allocation6_spill] sm:$0xff] }
 0x16e   : > { %v3308_v20 = vpop.f32.mrf.mxu1  ;;  %v1755_v37 = vld [vmem:[#allocation2 + $0x68] sm:$0xff]  ;;  %v3350_v46 = vmul.f32 0.3, %v1765_v34  ;;  %v1599_v6 = vadd.f32 %v2500_v27, %v1502_v33  ;;  %v2512_v14 = vadd.f32 %v3516_v10, %v3515_v26  ;;  %v3517_v34 = vld [vmem:[#allocation13_spill] sm:$0xff]  ;;  %v3531_v26 = vld [vmem:[#allocation10_spill] sm:$0xff] }
 0x16f   : > { %v2464_v63 = vpop.f32.mrf.mxu0  ;;  %v1497_v5 = vadd.f32 %v2433_v32, %v3178_v36  ;;  %v3352_v17 = vmul.f32 0.3, %v1755_v37  ;;  %v2497_v36 = vadd.f32 %v3228_v38, %v3226_v35  ;;  %v2448_v32 = vadd.f32 %v3266_v62, %v3262_v59  ;;  %v3526_v27 = vld [vmem:[#allocation16_spill] sm:$0xff] }
 0x170   : > { %v3318_v24 = vpop.f32.mrf.mxu1  ;;  %v2503_v35 = vadd.f32 %v3244_v47, %v3240_v45  ;;  %v1510_v38 = vadd.f32 %v2442_v1, %v3187_v60  ;;  %v1521_v45 = vadd.f32 %v2451_v49, %v3196_v21  ;;  %v2463_v60 = vadd.f32 %v3302_v9, %v3298_v25  ;;  %v3520_v9 = vld [vmem:[#allocation4_spill] sm:$0xff]  ;;  %v3521_v55 = vld [vmem:[#allocation19_spill] sm:$0xff] }
 0x171   : > { %v2465_v39 = vpop.f32.mrf.mxu0  ;;  %v3369_v62 = vadd.f32 %v2497_v36, %v1497_v5  ;;  %v1518_v19 = vadd.f32 %v2448_v32, %v3193_v12  ;;  %v3518_v12 = vld [vmem:[#allocation14_spill] sm:$0xff]  ;;  %v1529_v25 = vadd.f32 %v2457_v3, %v3520_v9  ;;  %v3395_v1 = vadd.f32 %v2509_v50, %v1513_v44  ;;  %v3524_v36 = vld [vmem:[#allocation7_spill] sm:$0xff] }
 0x172   : > { %v3333_v15 = vpop.f32.mrf.mxu1  ;;  %v2466_v47 = vadd.f32 %v2465_v39, %v2464_v63  ;;  %v1602_v8 = vadd.f32 %v2503_v35, %v1505_v54  ;;  %v2515_v37 = vadd.f32 %v3518_v12, %v3517_v34  ;;  %v3389_v13 = vadd.f32 %v2506_v0, %v1510_v38  ;;  %v3519_v39 = vld [vmem:[#allocation3_spill] sm:$0xff]  ;;  %v3522_v58 = vld [vmem:[#allocation20_spill] sm:$0xff]  ;;  %v3527_v38 = vld [vmem:[#allocation17_spill] sm:$0xff] }
 0x173   : > { %v2467_v30 = vpop.f32.mrf.mxu0  ;;  %v1526_v63 = vadd.f32 %v2454_v52, %v3519_v39  ;;  %v2524_v2 = vadd.f32 %v3522_v58, %v3521_v55  ;;  %v1537_v42 = vadd.f32 %v2463_v60, %v3523_v40  ;;  %v3399_v33 = vadd.f32 %v2512_v14, %v1518_v19  ;;  %v3530_v19 = vld [vmem:[#allocation9_spill] sm:$0xff] }
 0x174   : > { %v3348_v43 = vpop.f32.mrf.mxu1  ;;  %v1542_v32 = vadd.f32 %v2466_v47, %v3524_v36  ;;  %v3401_v54 = vadd.f32 %v2515_v37, %v1521_v45  ;;  %v2518_v35 = vadd.f32 %v3526_v27, %v3525_v56  ;;  %v3529_v44 = vld [vmem:[#allocation21_spill] sm:$0xff]  ;;  %v2530_v60 = vadd.f32 %v3333_v15, %v3318_v24 }
 0x175   : > { %v2468_v51 = vpop.f32.mrf.mxu0  ;;  %v2527_v50 = vadd.f32 %v3308_v20, %v3529_v44 }
 0x176   : > { %v2532_v23 = vpop.f32.mrf.mxu1  ;;  %v2469_v47 = vadd.f32 %v2468_v51, %v2467_v30  ;;  %v1623_v12 = vadd.f32 %v2518_v35, %v1526_v63  ;;  %v1639_v55 = vadd.f32 %v2530_v60, %v1542_v32  ;;  %v3532_v51 = vld [vmem:[#allocation8_spill] sm:$0xff] }
 0x177   : > { %v2470_v59 = vpop.f32.mrf.mxu0  ;;  %v3414_v20 = vadd.f32 %v2532_v23, %v3348_v43 }
 0x178   : > { %v2534_v41 = vpop.f32.mrf.mxu1 }
 0x179   : > { %v2471_v16 = vpop.f32.mrf.mxu0 }
 0x17a   : > { %v2535_v18 = vpop.f32.mrf.mxu1  ;;  %v2472_v21 = vadd.f32 %v2471_v16, %v2470_v59  ;;  %v3528_v59 = vld [vmem:[#allocation18_spill] sm:$0xff]  ;;  %v1631_v16 = vadd.f32 %v2524_v2, %v1534_v53  ;;  %v1634_v53 = vadd.f32 %v2527_v50, %v1537_v42 }
 0x17b   : > { %v2473_v22 = vpop.f32.mrf.mxu0  ;;  %v2521_v0 = vadd.f32 %v3528_v59, %v3527_v38  ;;  %v2536_v39 = vadd.f32 %v2535_v18, %v2534_v41  ;;  %v3534_v18 = vld [vmem:[#allocation23_spill] sm:$0xff] }
 0x17c   : > { %v2537_v5 = vpop.f32.mrf.mxu1  ;;  %v1550_v4 = vadd.f32 %v2472_v21, %v3530_v19  ;;  %v3418_v21 = vadd.f32 %v2469_v47, %v3532_v51 }
 0x17d   : > { %v2474_v49 = vpop.f32.mrf.mxu0  ;;  %v1626_v37 = vadd.f32 %v2521_v0, %v1529_v25 }
 0x17e   : > { %v2475_v52 = vadd.f32 %v2474_v49, %v2473_v22  ;;  %v2538_v3 = vpop.f32.mrf.mxu1  ;;  %v1647_v41 = vadd.f32 %v2536_v39, %v1550_v4 }
 0x17f   : > { %v2574_v45 = vpop.f32.mrf.mxu0  ;;  %v2539_v58 = vadd.f32 %v2538_v3, %v2537_v5  ;;  %v2832_v5 = vmov 0.0  }
 0x180   : > { %v1553_v10 = vadd.f32 %v2475_v52, %v3531_v26  ;;  %v1696_v14 = vadd.f32 %v2574_v45, %v1599_v6  ;;  %v2582_v34 = vpop.f32.mrf.mxu1  ;;  %v3533_v6 = vld [vmem:[#allocation22_spill] sm:$0xff]  ;;  %v3536_v26 = vld [vmem:[#allocation25_spill] sm:$0xff] }
 0x181   : > { %v1728_v22 = vadd.f32 %v2582_v34, %v1631_v16  ;;  %v1687_v9 = vpop.f32.mrf.mxu0 }
 0x182   : > { %v1784_v30 = vadd.f32 %v3304_v7, %v1696_v14  ;;  %v1688_v15 = vadd.f32 %v1687_v9, %v1591_v31  ;;  %v1719_v24 = vpop.f32.mrf.mxu1  ;;  %v3422_v43 = vadd.f32 %v2539_v58, %v1553_v10  ;;  %v3535_v31 = vld [vmem:[#allocation24_spill] sm:$0xff] }
 0x183   : > { %v1792_v2 = vadd.f32 %v3533_v6, %v1728_v22  ;;  %v1720_v63 = vadd.f32 %v1719_v24, %v1623_v12  ;;  %v2575_v25 = vpop.f32.mrf.mxu0 }
 0x184   : > { %vm1800_vm0 = vcmp.ge.f32.partialorder %v1784_v30, 0.5  ;;  %v1782_v40 = vadd.f32 %v3534_v18, %v1688_v15  ;;  %v1699_v42 = vadd.f32 %v2575_v25, %v1602_v8  ;;  %v2583_v36 = vpop.f32.mrf.mxu1  ;;  %v3539_v18 = vld [vmem:[#allocation28_spill] sm:$0xff] }
 0x185   : > { %v1816_v23 = vsel %vm1800_vm0, 0.0, %v1784_v30  ;;  %v2204_v7 = vsel %vm1800_vm0, 1.0, %v2832_v5  ;;  %vm1808_vm1 = vcmp.ge.f32.partialorder %v1792_v2, 0.5  ;;  %v1790_v32 = vadd.f32 %v3535_v31, %v1720_v63  ;;  %v1690_v49 = vpop.f32.mrf.mxu0 }
 0x186   : > { %1832 = vst [vmem:[#allocation2 + $0x58] sm:$0xff] %v1816_v23  ;;  %v1824_v56 = vsel %vm1808_vm1, 0.0, %v1792_v2  ;;  %v2212_v27 = vsel %vm1808_vm1, 1.0, %v2832_v5  ;;  %vm1798_vm2 = vcmp.ge.f32.partialorder %v1782_v40, 0.5  ;;  %v1785_v35 = vadd.f32 %v3314_v61, %v1699_v42  ;;  %v1722_v38 = vpop.f32.mrf.mxu1 }
 0x187   : > { %1840 = vst [vmem:[#allocation2 + $0x10] sm:$0xff] %v1824_v56  ;;  %v1814_v8 = vsel %vm1798_vm2, 0.0, %v1782_v40  ;;  %v2202_v59 = vsel %vm1798_vm2, 1.0, %v2832_v5  ;;  %vm1806_vm3 = vcmp.ge.f32.partialorder %v1790_v32, 0.5  ;;  %v1731_v0 = vadd.f32 %v2583_v36, %v1634_v53  ;;  %v2578_v52 = vpop.f32.mrf.mxu0 }
 0x188   : > { %1830 = vst [vmem:[#allocation2 + $0x30] sm:$0xff] %v1814_v8  ;;  %v1822_v3 = vsel %vm1806_vm3, 0.0, %v1790_v32  ;;  %v2210_v16 = vsel %vm1806_vm3, 1.0, %v2832_v5  ;;  %vm1801_vm4 = vcmp.ge.f32.partialorder %v1785_v35, 0.5  ;;  %v1691_v44 = vadd.f32 %v1690_v49, %v3369_v62  ;;  %v2586_v50 = vpop.f32.mrf.mxu1  ;;  %v3537_v62 = vld [vmem:[#allocation26_spill] sm:$0xff] }
 0x189   : > { %1838 = vst [vmem:[#allocation2 + $0x40] sm:$0xff] %v1822_v3  ;;  %v1817_v60 = vsel %vm1801_vm4, 0.0, %v1785_v35  ;;  %v2205_v61 = vsel %vm1801_vm4, 1.0, %v2832_v5  ;;  %v1793_v47 = vadd.f32 %v3316_v48, %v1731_v0  ;;  %v1723_v19 = vadd.f32 %v1722_v38, %v1626_v37  ;;  %v1703_v4 = vpop.f32.mrf.mxu0  ;;  %v3538_v37 = vld [vmem:[#allocation27_spill] sm:$0xff] }
 0x18a   : > { %1833 = vst [vmem:[#allocation2 + $0x18] sm:$0xff] %v1817_v60  ;;  %v2257_v45 = vpack.c.bf16 %v2205_v61, %v2204_v7  ;;  %v1783_v10 = vadd.f32 %v3536_v26, %v1691_v44  ;;  %v1712_v14 = vadd.f32 %v2578_v52, %v3399_v33  ;;  %v1744_v34 = vadd.f32 %v2586_v50, %v1647_v41  ;;  %v1735_v12 = vpop.f32.mrf.mxu1 }
 0x18b   : > { %vm1809_vm5 = vcmp.ge.f32.partialorder %v1793_v47, 0.5  ;;  %v1791_v39 = vadd.f32 %v3537_v62, %v1723_v19  ;;  %v1704_v22 = vadd.f32 %v1703_v4, %v3389_v13  ;;  %v1736_v9 = vadd.f32 %v1735_v12, %v1639_v55  ;;  %v2579_v53 = vpop.f32.mrf.mxu0 }
 0x18c   : > { %2277 = vst [vmem:[%s2874_s21 + $0x8] sm:$0xff] %v2257_v45   ;;  %v1825_v58 = vsel %vm1809_vm5, 0.0, %v1793_v47  ;;  %v2213_v48 = vsel %vm1809_vm5, 1.0, %v2832_v5  ;;  %vm1799_vm6 = vcmp.ge.f32.partialorder %v1783_v10, 0.5  ;;  %v1788_v30 = vadd.f32 %v3538_v37, %v1712_v14  ;;  %v2587_v15 = vpop.f32.mrf.mxu1 }
 0x18d   : > { %1841 = vst [vmem:[#allocation2 + $0x38] sm:$0xff] %v1825_v58  ;;  %v2269_v33 = vpack.c.bf16 %v2213_v48, %v2212_v27  ;;  %v1815_v24 = vsel %vm1799_vm6, 0.0, %v1783_v10  ;;  %v2203_v51 = vsel %vm1799_vm6, 1.0, %v2832_v5  ;;  %vm1807_vm7 = vcmp.ge.f32.partialorder %v1791_v39, 0.5  ;;  %v1706_v2 = vpop.f32.mrf.mxu0 }
 0x18e   : > { %1831 = vst [vmem:[#allocation2] sm:$0xff] %v1815_v24  ;;  %v2254_v13 = vpack.c.bf16 %v2203_v51, %v2202_v59  ;;  %v1823_v55 = vsel %vm1807_vm7, 0.0, %v1791_v39  ;;  %v2211_v6 = vsel %vm1807_vm7, 1.0, %v2832_v5  ;;  %vm1804_vm8 = vcmp.ge.f32.partialorder %v1788_v30, 0.5  ;;  %v1738_v63 = vpop.f32.mrf.mxu1 }
 0x18f   : > { %2281 = vst [vmem:[%s2874_s21 + $0x28] sm:$0xff] %v2269_v33   ;;  %1839 = vst [vmem:[#allocation2 + $0x20] sm:$0xff] %v1823_v55  ;;  %v2266_v25 = vpack.c.bf16 %v2211_v6, %v2210_v16  ;;  %v1820_v41 = vsel %vm1804_vm8, 0.0, %v1788_v30  ;;  %v1796_v40 = vadd.f32 %v3539_v18, %v1744_v34  ;;  %v1642_v42 = vadd.f32 %v3414_v20, %v3418_v21 }
 0x190   : > { %2255 = vst [vmem:[%s2874_s21] sm:$0xff] %v2254_v13   ;;  %1836 = vst [vmem:[#allocation2 + $0x8] sm:$0xff] %v1820_v41  ;;  %v1786_v36 = vadd.f32 %v3335_v57, %v1704_v22  ;;  %v1794_v23 = vadd.f32 %v3340_v11, %v1736_v9  ;;  %v1715_v7 = vadd.f32 %v2579_v53, %v3401_v54 }
 0x191   : > { %v1747_v31 = vadd.f32 %v2587_v15, %v3422_v43  ;;  %2280 = vst [vmem:[%s2874_s21 + $0x20] sm:$0xff] %v2266_v25   ;;  %vm1812_vm9 = vcmp.ge.f32.partialorder %v1796_v40, 0.5  ;;  %v1707_v32 = vadd.f32 %v1706_v2, %v3395_v1  ;;  %v1739_v49 = vadd.f32 %v1738_v63, %v1642_v42 }
 0x192   : > { %v1828_v56 = vsel %vm1812_vm9, 0.0, %v1796_v40  ;;  %vm1802_vm10 = vcmp.ge.f32.partialorder %v1786_v36, 0.5  ;;  %vm1810_vm11 = vcmp.ge.f32.partialorder %v1794_v23, 0.5  ;;  %v1789_v11 = vadd.f32 %v3342_v28, %v1715_v7 }
 0x193   : > { %1844 = vst [vmem:[#allocation2 + $0x78] sm:$0xff] %v1828_v56  ;;  %v1818_v20 = vsel %vm1802_vm10, 0.0, %v1786_v36  ;;  %v1826_v21 = vsel %vm1810_vm11, 0.0, %v1794_v23  ;;  %v1797_v57 = vadd.f32 %v3350_v46, %v1747_v31  ;;  %v1787_v54 = vadd.f32 %v3352_v17, %v1707_v32 }
 0x194   : > { %1834 = vst [vmem:[#allocation2 + $0x50] sm:$0xff] %v1818_v20  ;;  %1842 = vst [vmem:[#allocation2 + $0x60] sm:$0xff] %v1826_v21  ;;  %v1795_v43 = vadd.f32 %v3360_v29, %v1739_v49  ;;  %v2208_v1 = vsel %vm1804_vm8, 1.0, %v2832_v5  ;;  %v2216_v27 = vsel %vm1812_vm9, 1.0, %v2832_v5  ;;  %v2206_v35 = vsel %vm1802_vm10, 1.0, %v2832_v5 }
 0x195   : > { %vm1805_vm12 = vcmp.ge.f32.partialorder %v1789_v11, 0.5  ;;  %vm1813_vm13 = vcmp.ge.f32.partialorder %v1797_v57, 0.5  ;;  %vm1803_vm14 = vcmp.ge.f32.partialorder %v1787_v54, 0.5  ;;  %v2214_v52 = vsel %vm1810_vm11, 1.0, %v2832_v5 }
 0x196   : > { %vm1811_vm15 = vcmp.ge.f32.partialorder %v1795_v43, 0.5  ;;  %v1821_v28 = vsel %vm1805_vm12, 0.0, %v1789_v11  ;;  %v2209_v46 = vsel %vm1805_vm12, 1.0, %v2832_v5  ;;  %v1829_v17 = vsel %vm1813_vm13, 0.0, %v1797_v57 }
 0x197   : > { %v2217_v29 = vsel %vm1813_vm13, 1.0, %v2832_v5  ;;  %1837 = vst [vmem:[#allocation2 + $0x48] sm:$0xff] %v1821_v28  ;;  %v2263_v38 = vpack.c.bf16 %v2209_v46, %v2208_v1  ;;  %1845 = vst [vmem:[#allocation2 + $0x28] sm:$0xff] %v1829_v17  ;;  %v1819_v59 = vsel %vm1803_vm14, 0.0, %v1787_v54  ;;  %v2207_v0 = vsel %vm1803_vm14, 1.0, %v2832_v5 }
 0x198   : > { %v2275_v8 = vpack.c.bf16 %v2217_v29, %v2216_v27  ;;  %1835 = vst [vmem:[#allocation2 + $0x68] sm:$0xff] %v1819_v59  ;;  %v2260_v3 = vpack.c.bf16 %v2207_v0, %v2206_v35  ;;  %v1827_v16 = vsel %vm1811_vm15, 0.0, %v1795_v43  ;;  %v2215_v44 = vsel %vm1811_vm15, 1.0, %v2832_v5 }
 0x199   : > { %2279 = vst [vmem:[%s2874_s21 + $0x18] sm:$0xff] %v2263_v38   ;;  %1843 = vst [vmem:[#allocation2 + $0x70] sm:$0xff] %v1827_v16  ;;  %v2272_v50 = vpack.c.bf16 %v2215_v44, %v2214_v52 }
 0x19a   : > { %2283 = vst [vmem:[%s2874_s21 + $0x38] sm:$0xff] %v2275_v8   ;;  %2278 = vst [vmem:[%s2874_s21 + $0x10] sm:$0xff] %v2260_v3  }
 0x19b   : > { %2282 = vst [vmem:[%s2874_s21 + $0x30] sm:$0xff] %v2272_v50  }
 0x19c PF: > { %s13_s14 = sadd.s32 1, %s2829_s14   ;;  %s3540_s12 = smov %s2825_s13 }
 0x19d   : > { %p10_p6 = scmp.ge.s32.totalorder %s13_s14, 6   ;;  %s3541_s13 = smov %s3543_s15 }
 0x19f   :  { %12 = sbr.rel (!%p10_p6) target bundleno = 2 (0x2), region = 66 }

// kernel: resnetlif50_forward.69
= control target key start
LH: loop header
LB: loop body
LE: loop exit
PB: predicated region body
PF: predicated region fallthrough
CT: control target
= control target key end

     0   :  { %s602_s1 = inlined_call_operand.vmem [shape: bf16[128,128], index: 1, kind: input, shape index: {}]   ;;  %s603_s0 = inlined_call_operand.vmem [shape: bf16[128,128], index: 0, kind: input, shape index: {}]   ;;  %s604_s2 = inlined_call_operand.vmem [shape: f32[1,128], index: 2, kind: input, shape index: {}]   ;;  %s605_s3 = inlined_call_operand.vmem [shape: bf16[128,128], index: 3, kind: output, shape index: {}]  }
   0x1   :  { %v491_v0 = vld [vmem:[%s602_s1 + $0x38] sm:$0xff]   ;;  %v492_v1 = vld [vmem:[%s602_s1 + $0x30] sm:$0xff]   ;;  %v493_v2 = vld [vmem:[%s602_s1 + $0x28] sm:$0xff]  }
   0x2   :  { %443 = vmatprep.subr.bf16.mxu0 %v491_v0  ;;  %475 = vmatprep.subr.bf16.mxu1 %v491_v0  ;;  %v494_v3 = vld [vmem:[%s602_s1 + $0x20] sm:$0xff]   ;;  %v495_v6 = vld [vmem:[%s602_s1 + $0x18] sm:$0xff]   ;;  %v496_v7 = vld [vmem:[%s602_s1 + $0x10] sm:$0xff]  }
   0x3   :  { %444 = vmatpush3.bf16.msra.mxu0 %v491_v0  ;;  %483 = vmatpush3.bf16.msra.mxu1 %v491_v0  ;;  %v499_v4 = vld [vmem:[%s603_s0] sm:$0xff]   ;;  %v497_v8 = vld [vmem:[%s602_s1 + $0x8] sm:$0xff]   ;;  %v503_v12 = vld [vmem:[%s603_s0 + $0x10] sm:$0xff]  }
   0x4   :  { %445 = vmatprep.subr.bf16.mxu0 %v492_v1  ;;  %476 = vmatprep.subr.bf16.mxu1 %v492_v1  ;;  %v500_v5 = vld [vmem:[%s603_s0 + $0x20] sm:$0xff]   ;;  %v501_v10 = vld [vmem:[%s603_s0 + $0x8] sm:$0xff]   ;;  %v504_v13 = vld [vmem:[%s603_s0 + $0x30] sm:$0xff]  }
   0x5   :  { %459 = vmatprep.mubr.bf16.mxu0 %v499_v4  ;;  %467 = vmatprep.mubr.bf16.mxu1 %v500_v5  ;;  %v498_v9 = vld [vmem:[%s602_s1] sm:$0xff]   ;;  %v502_v11 = vld [vmem:[%s603_s0 + $0x28] sm:$0xff]   ;;  %v505_v14 = vld [vmem:[%s603_s0 + $0x18] sm:$0xff]  }
   0x6   :  { %v506_v15 = vld [vmem:[%s603_s0 + $0x38] sm:$0xff]   ;;  %v331_v18 = vld [vmem:[%s604_s2] ss:$0 sm:$0xff] }
   0x7   :  { %446 = vmatpush3.bf16.msra.mxu0 %v492_v1  ;;  %484 = vmatpush3.bf16.msra.mxu1 %v492_v1 }
   0x8   :  { %447 = vmatprep.subr.bf16.mxu0 %v493_v2  ;;  %477 = vmatprep.subr.bf16.mxu1 %v493_v2 }
   0xb   :  { %448 = vmatpush3.bf16.msra.mxu0 %v493_v2  ;;  %485 = vmatpush3.bf16.msra.mxu1 %v493_v2 }
   0xc   :  { %449 = vmatprep.subr.bf16.mxu0 %v494_v3  ;;  %478 = vmatprep.subr.bf16.mxu1 %v494_v3 }
   0xf   :  { %450 = vmatpush3.bf16.msra.mxu0 %v494_v3  ;;  %486 = vmatpush3.bf16.msra.mxu1 %v494_v3 }
  0x10   :  { %451 = vmatprep.subr.bf16.mxu0 %v495_v6  ;;  %479 = vmatprep.subr.bf16.mxu1 %v495_v6 }
  0x13   :  { %452 = vmatpush3.bf16.msra.mxu0 %v495_v6  ;;  %487 = vmatpush3.bf16.msra.mxu1 %v495_v6 }
  0x14   :  { %453 = vmatprep.subr.bf16.mxu0 %v496_v7  ;;  %480 = vmatprep.subr.bf16.mxu1 %v496_v7 }
  0x17   :  { %454 = vmatpush3.bf16.msra.mxu0 %v496_v7  ;;  %488 = vmatpush3.bf16.msra.mxu1 %v496_v7 }
  0x18   :  { %455 = vmatprep.subr.bf16.mxu0 %v497_v8  ;;  %481 = vmatprep.subr.bf16.mxu1 %v497_v8 }
  0x1b   :  { %456 = vmatpush3.bf16.msra.mxu0 %v497_v8  ;;  %489 = vmatpush3.bf16.msra.mxu1 %v497_v8 }
  0x1c   :  { %457 = vmatprep.subr.bf16.mxu0 %v498_v9  ;;  %482 = vmatprep.subr.bf16.mxu1 %v498_v9 }
  0x1f   :  { %458 = vmatpush3.bf16.msra.mxu0 %v498_v9  ;;  %490 = vmatpush3.bf16.msra.mxu1 %v498_v9 }
  0x22   :  { %460 = vmatmul.mubr.bf16.vlgmr.msra.gmra.mxu0 %v501_v10  ;;  %468 = vmatmul.mubr.bf16.vlgmr.msra.gmra.mxu1 %v502_v11 }
  0x23   :  { %463 = vmatprep.mubr.bf16.mxu0 %v503_v12  ;;  %471 = vmatprep.mubr.bf16.mxu1 %v504_v13 }
  0x2a   :  { %464 = vmatmul.mubr.bf16.gmra.mxu0 %v505_v14  ;;  %472 = vmatmul.mubr.bf16.gmra.mxu1 %v506_v15 }
  0xe2   :  { %v461_v16 = vpop.f32.mrf.mxu0  ;;  %v469_v17 = vpop.f32.mrf.mxu1 }
  0xe3   :  { %v193_v23 = vadd.f32 %v461_v16, %v331_v18  ;;  %v225_v24 = vadd.f32 %v469_v17, %v331_v18 }
  0xe4   :  { %v184_v19 = vpop.f32.mrf.mxu0  ;;  %v216_v20 = vpop.f32.mrf.mxu1 }
  0xe5   :  { %v185_v27 = vadd.f32 %v331_v18, %v184_v19  ;;  %v217_v28 = vadd.f32 %v331_v18, %v216_v20 }
  0xe6   :  { %v462_v21 = vpop.f32.mrf.mxu0  ;;  %v470_v22 = vpop.f32.mrf.mxu1 }
  0xe7   :  { %v196_v25 = vadd.f32 %v462_v21, %v331_v18  ;;  %v228_v26 = vadd.f32 %v470_v22, %v331_v18 }
  0xe8   :  { %v187_v29 = vpop.f32.mrf.mxu0  ;;  %v219_v30 = vpop.f32.mrf.mxu1 }
  0xe9   :  { %v388_v31 = vpack.c.bf16 %v196_v25, %v193_v23  ;;  %v408_v32 = vpack.c.bf16 %v228_v26, %v225_v24  ;;  %v188_v33 = vadd.f32 %v331_v18, %v187_v29  ;;  %v220_v34 = vadd.f32 %v331_v18, %v219_v30 }
  0xea   :  { %v465_v35 = vpop.f32.mrf.mxu0  ;;  %v473_v36 = vpop.f32.mrf.mxu1 }
  0xeb   :  { %420 = vst [vmem:[%s605_s3 + $0x8] sm:$0xff] %v388_v31   ;;  %424 = vst [vmem:[%s605_s3 + $0x28] sm:$0xff] %v408_v32   ;;  %v383_v37 = vpack.c.bf16 %v188_v33, %v185_v27  ;;  %v403_v38 = vpack.c.bf16 %v220_v34, %v217_v28  ;;  %v209_v43 = vadd.f32 %v465_v35, %v331_v18 }
  0xec   :  { %v200_v39 = vpop.f32.mrf.mxu0  ;;  %v232_v40 = vpop.f32.mrf.mxu1  ;;  %v241_v44 = vadd.f32 %v473_v36, %v331_v18 }
  0xed   :  { %384 = vst [vmem:[%s605_s3] sm:$0xff] %v383_v37   ;;  %423 = vst [vmem:[%s605_s3 + $0x20] sm:$0xff] %v403_v38   ;;  %v201_v47 = vadd.f32 %v331_v18, %v200_v39  ;;  %v233_v48 = vadd.f32 %v331_v18, %v232_v40 }
  0xee   :  { %v466_v41 = vpop.f32.mrf.mxu0  ;;  %v474_v42 = vpop.f32.mrf.mxu1 }
  0xef   :  { %v212_v45 = vadd.f32 %v466_v41, %v331_v18  ;;  %v244_v46 = vadd.f32 %v474_v42, %v331_v18 }
  0xf0   :  { %v203_v49 = vpop.f32.mrf.mxu0  ;;  %v235_v50 = vpop.f32.mrf.mxu1 }
  0xf1   :  { %v398_v51 = vpack.c.bf16 %v212_v45, %v209_v43  ;;  %v418_v52 = vpack.c.bf16 %v244_v46, %v241_v44  ;;  %v204_v53 = vadd.f32 %v331_v18, %v203_v49  ;;  %v236_v54 = vadd.f32 %v331_v18, %v235_v50 }
  0xf3   :  { %422 = vst [vmem:[%s605_s3 + $0x18] sm:$0xff] %v398_v51   ;;  %426 = vst [vmem:[%s605_s3 + $0x38] sm:$0xff] %v418_v52   ;;  %v393_v55 = vpack.c.bf16 %v204_v53, %v201_v47  ;;  %v413_v56 = vpack.c.bf16 %v236_v54, %v233_v48 }
  0xf5   :  { %421 = vst [vmem:[%s605_s3 + $0x10] sm:$0xff] %v393_v55   ;;  %425 = vst [vmem:[%s605_s3 + $0x30] sm:$0xff] %v413_v56  }

// kernel: resnetlif50_forward.70
= control target key start
LH: loop header
LB: loop body
LE: loop exit
PB: predicated region body
PF: predicated region fallthrough
CT: control target
= control target key end

     0   :  { %s760_s15 = smov 0   ;;  %s762_s16 = smov 0   ;;  %s835_s0 = inlined_call_operand.vmem [shape: bf16[4,32,128], index: 0, kind: input, shape index: {}]   ;;  %s836_s1 = inlined_call_operand.vmem [shape: bf16[128,128], index: 1, kind: input, shape index: {}]   ;;  %s837_s2 = inlined_call_operand.vmem [shape: f32[1,128], index: 2, kind: input, shape index: {}]   ;;  %s838_s3 = inlined_call_operand.vmem [shape: bf16[4,32,128], index: 3, kind: input, shape index: {}]   ;;  %s839_s4 = inlined_call_operand.vmem [shape: bf16[4,32,128], index: 4, kind: output, shape index: {}]  }
   0x1   :  { %s764_s17 = smov 0  }
   0x2 LB: > { %s23_s18 = sadd.s32 1, %s727_s16  ;;  %p591_p0 = scmp.ge.s32.totalorder %s731_s17, 1  ;;  %s731_s17 = sphi %s764_s17, %s14_s17   ;;  %s727_s16 = sphi %s762_s16, %s841_s16   ;;  %s723_s15 = sphi %s760_s15, %s840_s15  }
   0x3   : > { %p24_p1 = scmp.ge.s32.totalorder %s23_s18, 4  ;;  %p200_p2 = scmp.lt.s32.totalorder %s731_s17, 5 }
   0x5   : > { %s843_s18 = smov (%p24_p1, %s23_s18), 0  ;;  %p201_p3 = pnand %p591_p0, %p200_p2 }
   0x6   : > { %p244_p4 = scmp.lt.s32.totalorder (!%p201_p3), %s723_s15, 3  ;;  %p598_p5 = scmp.ne.s32.totalorder (!%p201_p3), %s723_s15, 0 }
   0x7   : > { %204 = sbr.rel (%p201_p3) target bundleno = 264 (0x108), region = 36 }
   0xc   : > { %s245_s19 = scalar_select %p244_p4, %s723_s15, 3 }
   0xd   : > { %277 = sbr.rel (%p598_p5) target bundleno = 21 (0x15), region = 40 }
   0xe   : > { %s620_s20 = sshll.u32 %s245_s19, 4 }
   0xf   : > { %s781_s23 = scalar_lea.vmem %s835_s0, %s620_s20  ;;  %s786_s26 = scalar_lea.vmem %s838_s3, %s620_s20 }
  0x10   : > { %s791_s29 = scalar_lea.vmem %s839_s4, %s620_s20 }
  0x12   : > { %v733_v0 = vmov 0.0  }
  0x13   : > { %278 = vst [vmem:[#allocation2 + $0x10] sm:$0xff] %v733_v0  ;;  %279 = vst [vmem:[#allocation2] sm:$0xff] %v733_v0 }
  0x14   : > { %280 = vst [vmem:[#allocation2 + $0x18] sm:$0xff] %v733_v0  ;;  %281 = vst [vmem:[#allocation2 + $0x8] sm:$0xff] %v733_v0 }
  0x15 PF: > { %v699_v1 = vld [vmem:[%s836_s1 + $0x38] sm:$0xff]   ;;  %v700_v2 = vld [vmem:[%s836_s1 + $0x30] sm:$0xff]   ;;  %v701_v3 = vld [vmem:[%s836_s1 + $0x28] sm:$0xff]   ;;  %v734_v44 = vmov 0.0  }
  0x16   : > { %653 = vmatprep.subr.bf16.mxu0 %v699_v1  ;;  %v702_v4 = vld [vmem:[%s836_s1 + $0x20] sm:$0xff]   ;;  %v703_v6 = vld [vmem:[%s836_s1 + $0x18] sm:$0xff]   ;;  %v704_v7 = vld [vmem:[%s836_s1 + $0x10] sm:$0xff]  }
  0x17   : > { %654 = vmatpush3.bf16.msra.mxu0 %v699_v1  ;;  %v707_v5 = vld [vmem:[%s781_s23] sm:$0xff]   ;;  %v705_v8 = vld [vmem:[%s836_s1 + $0x8] sm:$0xff]  }
  0x18   : > { %655 = vmatprep.subr.bf16.mxu0 %v700_v2  ;;  %669 = vmatprep.mubr.bf16.mxu0 %v707_v5  ;;  %v706_v9 = vld [vmem:[%s836_s1] sm:$0xff]   ;;  %v708_v10 = vld [vmem:[%s781_s23 + $0x8] sm:$0xff]  }
  0x19   : > { %v641_v11 = vld [vmem:[%s786_s26 + $0x8] sm:$0xff]   ;;  %v599_v12 = vld [vmem:[%s837_s2] ss:$0 sm:$0xff] }
  0x1a   : > { %v628_v14 = vld [vmem:[%s786_s26] sm:$0xff]   ;;  %v633_v15 = vunpack.c.l.bf16 %v641_v11  ;;  %v430_v17 = vld [vmem:[#allocation2 + $0x10] sm:$0xff]  ;;  %v634_v26 = vunpack.c.h.bf16 %v641_v11 }
  0x1b   : > { %656 = vmatpush3.bf16.msra.mxu0 %v700_v2  ;;  %v432_v13 = vld [vmem:[#allocation2 + $0x18] sm:$0xff]  ;;  %v629_v20 = vunpack.c.l.bf16 %v628_v14  ;;  %v433_v21 = vld [vmem:[#allocation2 + $0x8] sm:$0xff]  ;;  %v434_v25 = vmul.f32 0.3, %v430_v17  ;;  %v431_v27 = vld [vmem:[#allocation2] sm:$0xff]  ;;  %v630_v33 = vunpack.c.h.bf16 %v628_v14 }
  0x1c   : > { %657 = vmatprep.subr.bf16.mxu0 %v701_v3  ;;  %v436_v19 = vmul.f32 0.3, %v432_v13  ;;  %v437_v29 = vmul.f32 0.3, %v433_v21  ;;  %v435_v35 = vmul.f32 0.3, %v431_v27 }
  0x1f   : > { %658 = vmatpush3.bf16.msra.mxu0 %v701_v3 }
  0x20   : > { %659 = vmatprep.subr.bf16.mxu0 %v702_v4 }
  0x23   : > { %660 = vmatpush3.bf16.msra.mxu0 %v702_v4 }
  0x24   : > { %661 = vmatprep.subr.bf16.mxu0 %v703_v6 }
  0x27   : > { %662 = vmatpush3.bf16.msra.mxu0 %v703_v6 }
  0x28   : > { %663 = vmatprep.subr.bf16.mxu0 %v704_v7 }
  0x2b   : > { %664 = vmatpush3.bf16.msra.mxu0 %v704_v7 }
  0x2c   : > { %665 = vmatprep.subr.bf16.mxu0 %v705_v8 }
  0x2f   : > { %666 = vmatpush3.bf16.msra.mxu0 %v705_v8 }
  0x30   : > { %667 = vmatprep.subr.bf16.mxu0 %v706_v9 }
  0x33   : > { %668 = vmatpush3.bf16.msra.mxu0 %v706_v9 }
  0x36   : > { %670 = vmatmul.mubr.bf16.vlgmr.msra.gmra.mxu0 %v708_v10 }
  0xf6   : > { %v671_v16 = vpop.f32.mrf.mxu0 }
  0xf7   : > { %v412_v18 = vadd.f32 %v671_v16, %v599_v12 }
  0xf8   : > { %v403_v22 = vpop.f32.mrf.mxu0 }
  0xf9   : > { %v428_v23 = vadd.f32 %v633_v15, %v412_v18  ;;  %v404_v24 = vadd.f32 %v599_v12, %v403_v22 }
  0xfa   : > { %v672_v28 = vpop.f32.mrf.mxu0 }
  0xfb   : > { %v440_v30 = vadd.f32 %v436_v19, %v428_v23  ;;  %v426_v31 = vadd.f32 %v629_v20, %v404_v24  ;;  %v415_v32 = vadd.f32 %v672_v28, %v599_v12 }
  0xfc   : > { %v406_v34 = vpop.f32.mrf.mxu0 }
  0xfd   : > { %vm444_vm0 = vcmp.ge.f32.partialorder %v440_v30, 0.5  ;;  %v438_v36 = vadd.f32 %v434_v25, %v426_v31  ;;  %v429_v37 = vadd.f32 %v634_v26, %v415_v32  ;;  %v407_v38 = vadd.f32 %v599_v12, %v406_v34 }
  0xfe   : > { %v448_v39 = vsel %vm444_vm0, 0.0, %v440_v30  ;;  %v612_v45 = vsel %vm444_vm0, 1.0, %v734_v44 }
  0xff   : > { %452 = vst [vmem:[#allocation2 + $0x18] sm:$0xff] %v448_v39  ;;  %vm442_vm1 = vcmp.ge.f32.partialorder %v438_v36, 0.5  ;;  %v441_v40 = vadd.f32 %v437_v29, %v429_v37  ;;  %v427_v41 = vadd.f32 %v630_v33, %v407_v38 }
 0x100   : > { %v446_v42 = vsel %vm442_vm1, 0.0, %v438_v36  ;;  %v610_v49 = vsel %vm442_vm1, 1.0, %v734_v44 }
 0x101   : > { %450 = vst [vmem:[#allocation2 + $0x10] sm:$0xff] %v446_v42  ;;  %vm445_vm2 = vcmp.ge.f32.partialorder %v441_v40, 0.5  ;;  %v439_v43 = vadd.f32 %v435_v35, %v427_v41 }
 0x102   : > { %v449_v46 = vsel %vm445_vm2, 0.0, %v441_v40  ;;  %v613_v47 = vsel %vm445_vm2, 1.0, %v734_v44 }
 0x103   : > { %453 = vst [vmem:[#allocation2 + $0x8] sm:$0xff] %v449_v46  ;;  %v639_v48 = vpack.c.bf16 %v613_v47, %v612_v45  ;;  %vm443_vm3 = vcmp.ge.f32.partialorder %v439_v43, 0.5 }
 0x104   : > { %v447_v50 = vsel %vm443_vm3, 0.0, %v439_v43  ;;  %v611_v51 = vsel %vm443_vm3, 1.0, %v734_v44 }
 0x105   : > { %642 = vst [vmem:[%s791_s29 + $0x8] sm:$0xff] %v639_v48   ;;  %451 = vst [vmem:[#allocation2] sm:$0xff] %v447_v50  ;;  %v636_v52 = vpack.c.bf16 %v611_v51, %v610_v49 }
 0x107   : > { %637 = vst [vmem:[%s791_s29] sm:$0xff] %v636_v52  }
 0x108 PF: > { %s14_s17 = sadd.s32 1, %s731_s17   ;;  %s840_s15 = smov %s727_s16 }
 0x109   : > { %p11_p6 = scmp.ge.s32.totalorder %s14_s17, 6   ;;  %s841_s16 = smov %s843_s18 }
 0x10b   :  { %13 = sbr.rel (!%p11_p6) target bundleno = 2 (0x2), region = 73 }

// kernel: resnetlif50_forward.71
= control target key start
LH: loop header
LB: loop body
LE: loop exit
PB: predicated region body
PF: predicated region fallthrough
CT: control target
= control target key end

     0   :  { %s650_s12 = smov 0   ;;  %s652_s13 = smov 0   ;;  %s718_s0 = inlined_call_operand.vmem [shape: bf16[4,32,128], index: 0, kind: input, shape index: {}]   ;;  %s719_s1 = inlined_call_operand.vmem [shape: bf16[128,128], index: 1, kind: input, shape index: {}]   ;;  %s720_s2 = inlined_call_operand.vmem [shape: f32[1,128], index: 2, kind: input, shape index: {}]   ;;  %s721_s3 = inlined_call_operand.vmem [shape: bf16[4,32,128], index: 3, kind: output, shape index: {}]  }
   0x1   :  { %s654_s14 = smov 0  }
   0x2 LB: > { %s22_s15 = sadd.s32 1, %s622_s13  ;;  %p498_p0 = scmp.ge.s32.totalorder %s626_s14, 1  ;;  %s626_s14 = sphi %s654_s14, %s13_s14   ;;  %s622_s13 = sphi %s652_s13, %s723_s13   ;;  %s618_s12 = sphi %s650_s12, %s722_s12  }
   0x3   : > { %p23_p1 = scmp.ge.s32.totalorder %s22_s15, 4  ;;  %p158_p2 = scmp.lt.s32.totalorder %s626_s14, 5 }
   0x5   : > { %s725_s15 = smov (%p23_p1, %s22_s15), 0  ;;  %p159_p3 = pnand %p498_p0, %p158_p2 }
   0x6   : > { %p191_p4 = scmp.lt.s32.totalorder (!%p159_p3), %s618_s12, 3  ;;  %p503_p5 = scmp.ne.s32.totalorder (!%p159_p3), %s618_s12, 0 }
   0x7   : > { %162 = sbr.rel (%p159_p3) target bundleno = 262 (0x106), region = 32 }
   0xc   : > { %s192_s16 = scalar_select %p191_p4, %s618_s12, 3 }
   0xd   : > { %214 = sbr.rel (%p503_p5) target bundleno = 21 (0x15), region = 36 }
   0xe   : > { %s525_s17 = sshll.u32 %s192_s16, 4 }
   0xf   : > { %s671_s20 = scalar_lea.vmem %s718_s0, %s525_s17  ;;  %s676_s23 = scalar_lea.vmem %s721_s3, %s525_s17 }
  0x12   : > { %v628_v0 = vmov 0.0  }
  0x13   : > { %215 = vst [vmem:[#allocation2 + $0x10] sm:$0xff] %v628_v0  ;;  %216 = vst [vmem:[#allocation2] sm:$0xff] %v628_v0 }
  0x14   : > { %217 = vst [vmem:[#allocation2 + $0x18] sm:$0xff] %v628_v0  ;;  %218 = vst [vmem:[#allocation2 + $0x8] sm:$0xff] %v628_v0 }
  0x15 PF: > { %v594_v1 = vld [vmem:[%s719_s1 + $0x38] sm:$0xff]   ;;  %v595_v2 = vld [vmem:[%s719_s1 + $0x30] sm:$0xff]   ;;  %v596_v3 = vld [vmem:[%s719_s1 + $0x28] sm:$0xff]   ;;  %v629_v34 = vmov 0.0  }
  0x16   : > { %548 = vmatprep.subr.bf16.mxu0 %v594_v1  ;;  %v597_v4 = vld [vmem:[%s719_s1 + $0x20] sm:$0xff]   ;;  %v598_v6 = vld [vmem:[%s719_s1 + $0x18] sm:$0xff]   ;;  %v599_v7 = vld [vmem:[%s719_s1 + $0x10] sm:$0xff]  }
  0x17   : > { %549 = vmatpush3.bf16.msra.mxu0 %v594_v1  ;;  %v602_v5 = vld [vmem:[%s671_s20] sm:$0xff]   ;;  %v600_v8 = vld [vmem:[%s719_s1 + $0x8] sm:$0xff]  }
  0x18   : > { %550 = vmatprep.subr.bf16.mxu0 %v595_v2  ;;  %564 = vmatprep.mubr.bf16.mxu0 %v602_v5  ;;  %v601_v9 = vld [vmem:[%s719_s1] sm:$0xff]   ;;  %v603_v10 = vld [vmem:[%s671_s20 + $0x8] sm:$0xff]  }
  0x19   : > { %v504_v12 = vld [vmem:[%s720_s2] ss:$0 sm:$0xff] }
  0x1a   : > { %v355_v13 = vld [vmem:[#allocation2 + $0x10] sm:$0xff]  ;;  %v356_v20 = vld [vmem:[#allocation2] sm:$0xff] }
  0x1b   : > { %551 = vmatpush3.bf16.msra.mxu0 %v595_v2  ;;  %v357_v11 = vld [vmem:[#allocation2 + $0x18] sm:$0xff]  ;;  %v358_v16 = vld [vmem:[#allocation2 + $0x8] sm:$0xff]  ;;  %v359_v18 = vmul.f32 0.3, %v355_v13  ;;  %v360_v27 = vmul.f32 0.3, %v356_v20 }
  0x1c   : > { %552 = vmatprep.subr.bf16.mxu0 %v596_v3  ;;  %v361_v14 = vmul.f32 0.3, %v357_v11  ;;  %v362_v23 = vmul.f32 0.3, %v358_v16 }
  0x1f   : > { %553 = vmatpush3.bf16.msra.mxu0 %v596_v3 }
  0x20   : > { %554 = vmatprep.subr.bf16.mxu0 %v597_v4 }
  0x23   : > { %555 = vmatpush3.bf16.msra.mxu0 %v597_v4 }
  0x24   : > { %556 = vmatprep.subr.bf16.mxu0 %v598_v6 }
  0x27   : > { %557 = vmatpush3.bf16.msra.mxu0 %v598_v6 }
  0x28   : > { %558 = vmatprep.subr.bf16.mxu0 %v599_v7 }
  0x2b   : > { %559 = vmatpush3.bf16.msra.mxu0 %v599_v7 }
  0x2c   : > { %560 = vmatprep.subr.bf16.mxu0 %v600_v8 }
  0x2f   : > { %561 = vmatpush3.bf16.msra.mxu0 %v600_v8 }
  0x30   : > { %562 = vmatprep.subr.bf16.mxu0 %v601_v9 }
  0x33   : > { %563 = vmatpush3.bf16.msra.mxu0 %v601_v9 }
  0x36   : > { %565 = vmatmul.mubr.bf16.vlgmr.msra.gmra.mxu0 %v603_v10 }
  0xf6   : > { %v566_v15 = vpop.f32.mrf.mxu0 }
  0xf7   : > { %v349_v17 = vadd.f32 %v566_v15, %v504_v12 }
  0xf8   : > { %v340_v19 = vpop.f32.mrf.mxu0 }
  0xf9   : > { %v365_v21 = vadd.f32 %v361_v14, %v349_v17  ;;  %v341_v22 = vadd.f32 %v504_v12, %v340_v19 }
  0xfa   : > { %v567_v24 = vpop.f32.mrf.mxu0 }
  0xfb   : > { %vm369_vm0 = vcmp.ge.f32.partialorder %v365_v21, 0.5  ;;  %v363_v25 = vadd.f32 %v359_v18, %v341_v22  ;;  %v352_v26 = vadd.f32 %v567_v24, %v504_v12 }
  0xfc   : > { %v373_v28 = vsel %vm369_vm0, 0.0, %v365_v21  ;;  %v343_v29 = vpop.f32.mrf.mxu0  ;;  %v517_v35 = vsel %vm369_vm0, 1.0, %v629_v34 }
  0xfd   : > { %377 = vst [vmem:[#allocation2 + $0x18] sm:$0xff] %v373_v28  ;;  %vm367_vm1 = vcmp.ge.f32.partialorder %v363_v25, 0.5  ;;  %v366_v30 = vadd.f32 %v362_v23, %v352_v26  ;;  %v344_v31 = vadd.f32 %v504_v12, %v343_v29 }
  0xfe   : > { %v371_v32 = vsel %vm367_vm1, 0.0, %v363_v25  ;;  %v515_v39 = vsel %vm367_vm1, 1.0, %v629_v34 }
  0xff   : > { %375 = vst [vmem:[#allocation2 + $0x10] sm:$0xff] %v371_v32  ;;  %vm370_vm2 = vcmp.ge.f32.partialorder %v366_v30, 0.5  ;;  %v364_v33 = vadd.f32 %v360_v27, %v344_v31 }
 0x100   : > { %v374_v36 = vsel %vm370_vm2, 0.0, %v366_v30  ;;  %v518_v37 = vsel %vm370_vm2, 1.0, %v629_v34 }
 0x101   : > { %378 = vst [vmem:[#allocation2 + $0x8] sm:$0xff] %v374_v36  ;;  %v535_v38 = vpack.c.bf16 %v518_v37, %v517_v35  ;;  %vm368_vm3 = vcmp.ge.f32.partialorder %v364_v33, 0.5 }
 0x102   : > { %v372_v40 = vsel %vm368_vm3, 0.0, %v364_v33  ;;  %v516_v41 = vsel %vm368_vm3, 1.0, %v629_v34 }
 0x103   : > { %537 = vst [vmem:[%s676_s23 + $0x8] sm:$0xff] %v535_v38   ;;  %376 = vst [vmem:[#allocation2] sm:$0xff] %v372_v40  ;;  %v532_v42 = vpack.c.bf16 %v516_v41, %v515_v39 }
 0x105   : > { %533 = vst [vmem:[%s676_s23] sm:$0xff] %v532_v42  }
 0x106 PF: > { %s13_s14 = sadd.s32 1, %s626_s14   ;;  %s722_s12 = smov %s622_s13 }
 0x107   : > { %p10_p6 = scmp.ge.s32.totalorder %s13_s14, 6   ;;  %s723_s13 = smov %s725_s15 }
 0x109   :  { %12 = sbr.rel (!%p10_p6) target bundleno = 2 (0x2), region = 66 }

// kernel: resnetlif50_forward.68
= control target key start
LH: loop header
LB: loop body
LE: loop exit
PB: predicated region body
PF: predicated region fallthrough
CT: control target
= control target key end

     0   :  { %s1739_s12 = smov 0   ;;  %s1741_s13 = smov 0   ;;  %s2015_s0 = inlined_call_operand.vmem [shape: bf16[4,32,1152], index: 0, kind: input, shape index: {}]   ;;  %s2016_s1 = inlined_call_operand.vmem [shape: bf16[1152,128], index: 1, kind: input, shape index: {}]   ;;  %s2017_s2 = inlined_call_operand.vmem [shape: f32[1,128], index: 2, kind: input, shape index: {}]   ;;  %s2018_s3 = inlined_call_operand.vmem [shape: bf16[4,32,128], index: 3, kind: output, shape index: {}]  }
   0x1   :  { %s1743_s14 = smov 0  }
   0x2 LB: > { %s22_s15 = sadd.s32 1, %s1711_s13  ;;  %p1308_p0 = scmp.ge.s32.totalorder %s1715_s14, 1  ;;  %s1715_s14 = sphi %s1743_s14, %s13_s14   ;;  %s1711_s13 = sphi %s1741_s13, %s2020_s13   ;;  %s1707_s12 = sphi %s1739_s12, %s2019_s12  }
   0x3   : > { %p23_p1 = scmp.ge.s32.totalorder %s22_s15, 4  ;;  %p159_p2 = scmp.lt.s32.totalorder %s1715_s14, 5 }
   0x5   : > { %s2022_s15 = smov (%p23_p1, %s22_s15), 0  ;;  %p160_p3 = pnand %p1308_p0, %p159_p2 }
   0x6   : > { %p193_p4 = scmp.lt.s32.totalorder (!%p160_p3), %s1707_s12, 3  ;;  %p1312_p5 = scmp.ne.s32.totalorder (!%p160_p3), %s1707_s12, 0 }
   0x7   : > { %163 = sbr.rel (%p160_p3) target bundleno = 326 (0x146), region = 32 }
   0xc   : > { %s194_s16 = scalar_select %p193_p4, %s1707_s12, 3 }
   0xd   : > { %217 = sbr.rel (%p1312_p5) target bundleno = 21 (0x15), region = 36 }
   0xe   : > { %s1568_s17 = smul.u32 144, %s194_s16  ;;  %s1414_s18 = sshll.u32 %s194_s16, 4 }
   0xf   : > { %s1760_s21 = scalar_lea.vmem %s2018_s3, %s1414_s18 }
  0x10   : > { %s1765_s24 = scalar_lea.vmem %s2015_s0, %s1568_s17 }
  0x12   : > { %v1717_v0 = vmov 0.0  }
  0x13   : > { %218 = vst [vmem:[#allocation2 + $0x10] sm:$0xff] %v1717_v0  ;;  %219 = vst [vmem:[#allocation2] sm:$0xff] %v1717_v0 }
  0x14   : > { %220 = vst [vmem:[#allocation2 + $0x18] sm:$0xff] %v1717_v0  ;;  %221 = vst [vmem:[#allocation2 + $0x8] sm:$0xff] %v1717_v0 }
  0x15 PF: > { %v1595_v1 = vld [vmem:[%s2016_s1 + $0x78] sm:$0xff]   ;;  %v1599_v5 = vld [vmem:[%s2016_s1 + $0x70] sm:$0xff]   ;;  %v1603_v9 = vld [vmem:[%s2016_s1 + $0x68] sm:$0xff]  }
  0x16   : > { %v1596_v2 = vld [vmem:[%s2016_s1 + $0x38] sm:$0xff]   ;;  %1426 = vmatprep.subr.bf16.mxu0 %v1595_v1  ;;  %v1600_v6 = vld [vmem:[%s2016_s1 + $0x30] sm:$0xff]   ;;  %v1604_v10 = vld [vmem:[%s2016_s1 + $0x28] sm:$0xff]  }
  0x17   : > { %v1597_v3 = vld [vmem:[%s2016_s1 + $0xf8] sm:$0xff]   ;;  %1427 = vmatpush3.bf16.msra.mxu0 %v1596_v2  ;;  %v1601_v7 = vld [vmem:[%s2016_s1 + $0xf0] sm:$0xff]   ;;  %v1605_v11 = vld [vmem:[%s2016_s1 + $0xe8] sm:$0xff]  }
  0x18   : > { %v1598_v4 = vld [vmem:[%s2016_s1 + $0xb8] sm:$0xff]   ;;  %1454 = vmatprep.subr.bf16.mxu1 %v1597_v3  ;;  %1428 = vmatprep.subr.bf16.mxu0 %v1599_v5  ;;  %v1602_v8 = vld [vmem:[%s2016_s1 + $0xb0] sm:$0xff]   ;;  %v1606_v12 = vld [vmem:[%s2016_s1 + $0xa8] sm:$0xff]  }
  0x19   : > { %1455 = vmatpush3.bf16.msra.mxu1 %v1598_v4  ;;  %v1607_v13 = vld [vmem:[%s2016_s1 + $0x60] sm:$0xff]   ;;  %v1611_v17 = vld [vmem:[%s2016_s1 + $0x58] sm:$0xff]   ;;  %v1615_v21 = vld [vmem:[%s2016_s1 + $0x50] sm:$0xff]  }
  0x1a   : > { %1456 = vmatprep.subr.bf16.mxu1 %v1601_v7  ;;  %v1608_v14 = vld [vmem:[%s2016_s1 + $0x20] sm:$0xff]   ;;  %v1612_v18 = vld [vmem:[%s2016_s1 + $0x18] sm:$0xff]   ;;  %v1616_v22 = vld [vmem:[%s2016_s1 + $0x10] sm:$0xff]  }
  0x1b   : > { %1429 = vmatpush3.bf16.msra.mxu0 %v1600_v6  ;;  %v1609_v15 = vld [vmem:[%s2016_s1 + $0xe0] sm:$0xff]   ;;  %v1613_v19 = vld [vmem:[%s2016_s1 + $0xd8] sm:$0xff]   ;;  %v1617_v23 = vld [vmem:[%s2016_s1 + $0xd0] sm:$0xff]  }
  0x1c   : > { %1430 = vmatprep.subr.bf16.mxu0 %v1603_v9  ;;  %v1610_v16 = vld [vmem:[%s2016_s1 + $0xa0] sm:$0xff]   ;;  %v1614_v20 = vld [vmem:[%s2016_s1 + $0x98] sm:$0xff]   ;;  %v1618_v24 = vld [vmem:[%s2016_s1 + $0x90] sm:$0xff]  }
  0x1d   : > { %1457 = vmatpush3.bf16.msra.mxu1 %v1602_v8  ;;  %v1619_v25 = vld [vmem:[%s2016_s1 + $0x48] sm:$0xff]   ;;  %v1623_v29 = vld [vmem:[%s2016_s1 + $0x40] sm:$0xff]   ;;  %v1630_v35 = vld [vmem:[%s2016_s1 + $0x178] sm:$0xff]  }
  0x1e   : > { %1458 = vmatprep.subr.bf16.mxu1 %v1605_v11  ;;  %v1620_v26 = vld [vmem:[%s2016_s1 + $0x8] sm:$0xff]   ;;  %v1624_v30 = vld [vmem:[%s2016_s1] sm:$0xff]   ;;  %v1634_v38 = vld [vmem:[%s2016_s1 + $0x138] sm:$0xff]  }
  0x1f   : > { %1431 = vmatpush3.bf16.msra.mxu0 %v1604_v10  ;;  %v1621_v27 = vld [vmem:[%s2016_s1 + $0xc8] sm:$0xff]   ;;  %v1625_v31 = vld [vmem:[%s2016_s1 + $0xc0] sm:$0xff]   ;;  %v1635_v39 = vld [vmem:[%s2016_s1 + $0x1f8] sm:$0xff]  }
  0x20   : > { %1432 = vmatprep.subr.bf16.mxu0 %v1607_v13  ;;  %v1622_v28 = vld [vmem:[%s2016_s1 + $0x88] sm:$0xff]   ;;  %v1626_v32 = vld [vmem:[%s1765_s24] ss:$36 sps:$4 sm:$0xff]   ;;  %v1636_v40 = vld [vmem:[%s2016_s1 + $0x1b8] sm:$0xff]  }
  0x21   : > { %1459 = vmatpush3.bf16.msra.mxu1 %v1606_v12  ;;  %v1628_v33 = vld [vmem:[%s1765_s24 + $0x4] ss:$36 sps:$4 sm:$0xff]   ;;  %v1633_v37 = vld [vmem:[%s1765_s24 + $0xc] ss:$36 sps:$4 sm:$0xff]   ;;  %v1649_v53 = vld [vmem:[%s2016_s1 + $0x158] sm:$0xff]  }
  0x22   : > { %1460 = vmatprep.subr.bf16.mxu1 %v1609_v15  ;;  %v1629_v34 = vld [vmem:[%s2016_s1 + $0x80] sm:$0xff]   ;;  %949 = vmatprep.mubr.bf16.mxu0 %v1628_v33  ;;  %v1631_v36 = vld [vmem:[%s1765_s24 + $0x8] ss:$36 sps:$4 sm:$0xff]   ;;  %v1637_v41 = vld [vmem:[%s2016_s1 + $0x170] sm:$0xff]  }
  0x23   : > { %1433 = vmatpush3.bf16.msra.mxu0 %v1608_v14  ;;  %998 = vmatprep.mubr.bf16.mxu1 %v1633_v37  ;;  %v1638_v42 = vld [vmem:[%s2016_s1 + $0x130] sm:$0xff]   ;;  %v1641_v45 = vld [vmem:[%s2016_s1 + $0x168] sm:$0xff]   ;;  %v1645_v49 = vld [vmem:[%s2016_s1 + $0x160] sm:$0xff]  }
  0x24   : > { %1434 = vmatprep.subr.bf16.mxu0 %v1611_v17  ;;  %v1639_v43 = vld [vmem:[%s2016_s1 + $0x1f0] sm:$0xff]   ;;  %v1642_v46 = vld [vmem:[%s2016_s1 + $0x128] sm:$0xff]   ;;  %v1646_v50 = vld [vmem:[%s2016_s1 + $0x120] sm:$0xff]  }
  0x25   : > { %1461 = vmatpush3.bf16.msra.mxu1 %v1610_v16  ;;  %v1640_v44 = vld [vmem:[%s2016_s1 + $0x1b0] sm:$0xff]   ;;  %v1643_v47 = vld [vmem:[%s2016_s1 + $0x1e8] sm:$0xff]   ;;  %v1647_v51 = vld [vmem:[%s2016_s1 + $0x1e0] sm:$0xff]  }
  0x26   : > { %1462 = vmatprep.subr.bf16.mxu1 %v1613_v19  ;;  %v1644_v48 = vld [vmem:[%s2016_s1 + $0x1a8] sm:$0xff]   ;;  %v1648_v52 = vld [vmem:[%s2016_s1 + $0x1a0] sm:$0xff]   ;;  %v1650_v54 = vld [vmem:[%s2016_s1 + $0x118] sm:$0xff]  }
  0x27   : > { %1435 = vmatpush3.bf16.msra.mxu0 %v1612_v18  ;;  %v1651_v55 = vld [vmem:[%s1765_s24 + $0x4c] ss:$36 sps:$4 sm:$0xff]   ;;  %v1653_v56 = vld [vmem:[%s2016_s1 + $0x1d8] sm:$0xff]   ;;  %v1667_v5 = vld [vmem:[%s2016_s1 + $0x140] sm:$0xff]  }
  0x28   : > { %1436 = vmatprep.subr.bf16.mxu0 %v1615_v21  ;;  %v1654_v57 = vld [vmem:[%s1765_s24 + $0x48] ss:$36 sps:$4 sm:$0xff]   ;;  %v1655_v58 = vld [vmem:[%s2016_s1 + $0x198] sm:$0xff]   ;;  %v1658_v60 = vld [vmem:[%s2016_s1 + $0x150] sm:$0xff]  }
  0x29   : > { %1463 = vmatpush3.bf16.msra.mxu1 %v1614_v20  ;;  %v1656_v59 = vld [vmem:[%s1765_s24 + $0x54] ss:$36 sps:$4 sm:$0xff]   ;;  %v1663_v1 = vld [vmem:[%s2016_s1 + $0x148] sm:$0xff]   ;;  %v1668_v6 = vld [vmem:[%s2016_s1 + $0x100] sm:$0xff]  }
  0x2a   : > { %1464 = vmatprep.subr.bf16.mxu1 %v1617_v23  ;;  %v1659_v61 = vld [vmem:[%s1765_s24 + $0x50] ss:$36 sps:$4 sm:$0xff]   ;;  %v1664_v2 = vld [vmem:[%s2016_s1 + $0x108] sm:$0xff]   ;;  %v1669_v7 = vld [vmem:[%s2016_s1 + $0x1c0] sm:$0xff]  }
  0x2b   : > { %1437 = vmatpush3.bf16.msra.mxu0 %v1616_v22  ;;  %v1660_v62 = vld [vmem:[%s2016_s1 + $0x110] sm:$0xff]   ;;  %v1665_v3 = vld [vmem:[%s2016_s1 + $0x1c8] sm:$0xff]   ;;  %v1673_v10 = vld [vmem:[%s2016_s1 + $0x180] sm:$0xff]  }
  0x2c   : > { %1438 = vmatprep.subr.bf16.mxu0 %v1619_v25  ;;  %v1661_v63 = vld [vmem:[%s2016_s1 + $0x1d0] sm:$0xff]   ;;  %v1666_v4 = vld [vmem:[%s2016_s1 + $0x188] sm:$0xff]   ;;  %v1674_v11 = vld [vmem:[%s2016_s1 + $0x238] sm:$0xff]  }
  0x2d   : > { %1465 = vmatpush3.bf16.msra.mxu1 %v1618_v24  ;;  %v1662_v0 = vld [vmem:[%s2016_s1 + $0x190] sm:$0xff]   ;;  %v1675_v12 = vld [vmem:[%s1765_s24 + $0x18] ss:$36 sps:$4 sm:$0xff]   ;;  %v1682_v17 = vld [vmem:[%s2016_s1 + $0x228] sm:$0xff]  }
  0x2e   : > { %1466 = vmatprep.subr.bf16.mxu1 %v1621_v27  ;;  %v1670_v8 = vld [vmem:[%s1765_s24 + $0x10] ss:$36 sps:$4 sm:$0xff]   ;;  %v1677_v13 = vld [vmem:[%s1765_s24 + $0x1c] ss:$36 sps:$4 sm:$0xff]   ;;  %v1683_v18 = vld [vmem:[%s1765_s24 + $0x64] ss:$36 sps:$4 sm:$0xff]  }
  0x2f   : > { %1439 = vmatpush3.bf16.msra.mxu0 %v1620_v26  ;;  %v1672_v9 = vld [vmem:[%s1765_s24 + $0x14] ss:$36 sps:$4 sm:$0xff]   ;;  %v1679_v15 = vld [vmem:[%s1765_s24 + $0x5c] ss:$36 sps:$4 sm:$0xff]   ;;  %v1689_v24 = vld [vmem:[%s2016_s1 + $0x208] sm:$0xff]  }
  0x30   : > { %1440 = vmatprep.subr.bf16.mxu0 %v1623_v29  ;;  %v1678_v14 = vld [vmem:[%s2016_s1 + $0x230] sm:$0xff]   ;;  %v1681_v16 = vld [vmem:[%s1765_s24 + $0x58] ss:$36 sps:$4 sm:$0xff]   ;;  %v1685_v19 = vld [vmem:[%s1765_s24 + $0x60] ss:$36 sps:$4 sm:$0xff]  }
  0x31   : > { %1467 = vmatpush3.bf16.msra.mxu1 %v1622_v28  ;;  %v1686_v20 = vld [vmem:[%s2016_s1 + $0x220] sm:$0xff]   ;;  %v1687_v21 = vld [vmem:[%s2016_s1 + $0x218] sm:$0xff]   ;;  %v1688_v23 = vld [vmem:[%s2016_s1 + $0x210] sm:$0xff]  }
  0x32   : > { %1468 = vmatprep.subr.bf16.mxu1 %v1625_v31  ;;  %v1691_v22 = vld [vmem:[%s1765_s24 + $0x20] ss:$36 sps:$4 sm:$0xff]   ;;  %v1692_v26 = vld [vmem:[%s1765_s24 + $0x68] ss:$36 sps:$4 sm:$0xff]  }
  0x33   : > { %1441 = vmatpush3.bf16.msra.mxu0 %v1624_v30  ;;  %v1690_v25 = vld [vmem:[%s2016_s1 + $0x200] sm:$0xff]  }
  0x34   : > { %1482 = vmatprep.subr.bf16.mxu0 %v1630_v35 }
  0x35   : > { %1469 = vmatpush3.bf16.msra.mxu1 %v1629_v34 }
  0x36   : > { %950 = vmatmul.mubr.bf16.vlgmr.msra.gmra.mxu0 %v1626_v32  ;;  %1510 = vmatprep.subr.bf16.mxu1 %v1635_v39 }
  0x37   : > { %1483 = vmatpush3.bf16.msra.mxu0 %v1634_v38  ;;  %957 = vmatprep.mubr.bf16.mxu0 %v1651_v55 }
  0x38   : > { %999 = vmatmul.mubr.bf16.vlgmr.msra.gmra.mxu1 %v1631_v36  ;;  %1484 = vmatprep.subr.bf16.mxu0 %v1637_v41 }
  0x39   : > { %1511 = vmatpush3.bf16.msra.mxu1 %v1636_v40  ;;  %1006 = vmatprep.mubr.bf16.mxu1 %v1656_v59 }
  0x3a   : > { %1512 = vmatprep.subr.bf16.mxu1 %v1639_v43 }
  0x3b   : > { %1485 = vmatpush3.bf16.msra.mxu0 %v1638_v42 }
  0x3c   : > { %1486 = vmatprep.subr.bf16.mxu0 %v1641_v45 }
  0x3d   : > { %1513 = vmatpush3.bf16.msra.mxu1 %v1640_v44 }
  0x3e   : > { %1514 = vmatprep.subr.bf16.mxu1 %v1643_v47  ;;  %958 = vmatmul.mubr.bf16.gmra.mxu0 %v1654_v57 }
  0x3f   : > { %1487 = vmatpush3.bf16.msra.mxu0 %v1642_v46  ;;  %1047 = vmatprep.mubr.bf16.mxu0 %v1672_v9 }
  0x40   : > { %1488 = vmatprep.subr.bf16.mxu0 %v1645_v49  ;;  %1007 = vmatmul.mubr.bf16.gmra.mxu1 %v1659_v61 }
  0x41   : > { %1515 = vmatpush3.bf16.msra.mxu1 %v1644_v48  ;;  %1096 = vmatprep.mubr.bf16.mxu1 %v1677_v13 }
  0x42   : > { %1516 = vmatprep.subr.bf16.mxu1 %v1647_v51 }
  0x43   : > { %1489 = vmatpush3.bf16.msra.mxu0 %v1646_v50 }
  0x44   : > { %1490 = vmatprep.subr.bf16.mxu0 %v1649_v53 }
  0x45   : > { %1517 = vmatpush3.bf16.msra.mxu1 %v1648_v52 }
  0x46   : > { %1518 = vmatprep.subr.bf16.mxu1 %v1653_v56  ;;  %v1313_v56 = vld [vmem:[%s2017_s2] ss:$0 sm:$0xff] }
  0x47   : > { %1491 = vmatpush3.bf16.msra.mxu0 %v1650_v54 }
  0x48   : > { %1492 = vmatprep.subr.bf16.mxu0 %v1658_v60 }
  0x49   : > { %1519 = vmatpush3.bf16.msra.mxu1 %v1655_v58 }
  0x4a   : > { %1520 = vmatprep.subr.bf16.mxu1 %v1661_v63 }
  0x4b   : > { %1493 = vmatpush3.bf16.msra.mxu0 %v1660_v62 }
  0x4c   : > { %1494 = vmatprep.subr.bf16.mxu0 %v1663_v1 }
  0x4d   : > { %1521 = vmatpush3.bf16.msra.mxu1 %v1662_v0 }
  0x4e   : > { %1522 = vmatprep.subr.bf16.mxu1 %v1665_v3 }
  0x4f   : > { %1495 = vmatpush3.bf16.msra.mxu0 %v1664_v2 }
  0x50   : > { %1496 = vmatprep.subr.bf16.mxu0 %v1667_v5 }
  0x51   : > { %1523 = vmatpush3.bf16.msra.mxu1 %v1666_v4 }
  0x52   : > { %1524 = vmatprep.subr.bf16.mxu1 %v1669_v7 }
  0x53   : > { %1497 = vmatpush3.bf16.msra.mxu0 %v1668_v6 }
  0x54   : > { %1548 = vmatprep.subr.bf16.mxu0 %v1674_v11 }
  0x55   : > { %1525 = vmatpush3.bf16.msra.mxu1 %v1673_v10 }
  0x56   : > { %1048 = vmatmul.mubr.bf16.vlgmr.msra.gmra.mxu0 %v1670_v8 }
  0x57   : > { %1549 = vmatpush3.bf16.msra.mxu0 %v1674_v11  ;;  %1055 = vmatprep.mubr.bf16.mxu0 %v1679_v15 }
  0x58   : > { %1097 = vmatmul.mubr.bf16.vlgmr.msra.gmra.mxu1 %v1675_v12  ;;  %1550 = vmatprep.subr.bf16.mxu0 %v1678_v14 }
  0x59   : > { %1104 = vmatprep.mubr.bf16.mxu1 %v1683_v18 }
  0x5b   : > { %1551 = vmatpush3.bf16.msra.mxu0 %v1678_v14  ;;  %v1164_v14 = vld [vmem:[#allocation2 + $0x18] sm:$0xff] }
  0x5c   : > { %1552 = vmatprep.subr.bf16.mxu0 %v1682_v17 }
  0x5e   : > { %1056 = vmatmul.mubr.bf16.gmra.mxu0 %v1681_v16 }
  0x5f   : > { %1553 = vmatpush3.bf16.msra.mxu0 %v1682_v17  ;;  %1564 = vmatprep.mubr.bf16.mxu0 %v1691_v22 }
  0x60   : > { %1105 = vmatmul.mubr.bf16.gmra.mxu1 %v1685_v19  ;;  %1554 = vmatprep.subr.bf16.mxu0 %v1686_v20 }
  0x63   : > { %1555 = vmatpush3.bf16.msra.mxu0 %v1686_v20  ;;  %v1162_v20 = vld [vmem:[#allocation2 + $0x10] sm:$0xff] }
  0x64   : > { %1556 = vmatprep.subr.bf16.mxu0 %v1687_v21 }
  0x67   : > { %1557 = vmatpush3.bf16.msra.mxu0 %v1687_v21  ;;  %v1168_v21 = vmul.f32 0.3, %v1164_v14 }
  0x68   : > { %1558 = vmatprep.subr.bf16.mxu0 %v1688_v23 }
  0x6b   : > { %1559 = vmatpush3.bf16.msra.mxu0 %v1688_v23 }
  0x6c   : > { %1560 = vmatprep.subr.bf16.mxu0 %v1689_v24 }
  0x6f   : > { %1561 = vmatpush3.bf16.msra.mxu0 %v1689_v24 }
  0x70   : > { %1562 = vmatprep.subr.bf16.mxu0 %v1690_v25 }
  0x73   : > { %1563 = vmatpush3.bf16.msra.mxu0 %v1690_v25 }
  0x76   : > { %1565 = vmatmul.mubr.bf16.vlgmr.msra.gmra.mxu0 %v1692_v26 }
  0xf6   : > { %v1442_v27 = vpop.f32.mrf.mxu0 }
  0xf8   : > { %v1470_v28 = vpop.f32.mrf.mxu1  ;;  %v1443_v29 = vpop.f32.mrf.mxu0 }
  0xf9   : > { %v1444_v55 = vadd.f32 %v1443_v29, %v1442_v27  ;;  %v1166_v27 = vmul.f32 0.3, %v1162_v20 }
  0xfa   : > { %v1471_v30 = vpop.f32.mrf.mxu1  ;;  %v1445_v31 = vpop.f32.mrf.mxu0 }
  0xfb   : > { %v952_v62 = vadd.f32 %v1444_v55, %v1313_v56  ;;  %v1472_v63 = vadd.f32 %v1471_v30, %v1470_v28  ;;  %v1165_v28 = vld [vmem:[#allocation2 + $0x8] sm:$0xff] }
  0xfc   : > { %v1473_v32 = vpop.f32.mrf.mxu1  ;;  %v1446_v33 = vpop.f32.mrf.mxu0 }
  0xfd   : > { %v1447_v0 = vadd.f32 %v1446_v33, %v1445_v31  ;;  %v1001_v8 = vadd.f32 %v1472_v63, %v952_v62  ;;  %v1163_v33 = vld [vmem:[#allocation2] sm:$0xff] }
  0xfe   : > { %v1448_v34 = vpop.f32.mrf.mxu0  ;;  %v1474_v35 = vpop.f32.mrf.mxu1 }
  0xff   : > { %v955_v9 = vadd.f32 %v1447_v0, %v1313_v56  ;;  %v1475_v10 = vadd.f32 %v1474_v35, %v1473_v32 }
 0x100   : > { %v1476_v36 = vpop.f32.mrf.mxu1  ;;  %v1449_v37 = vpop.f32.mrf.mxu0 }
 0x101   : > { %v1450_v54 = vadd.f32 %v1449_v37, %v1448_v34  ;;  %v1004_v22 = vadd.f32 %v1475_v10, %v955_v9 }
 0x102   : > { %v1477_v38 = vpop.f32.mrf.mxu1  ;;  %v1451_v39 = vpop.f32.mrf.mxu0 }
 0x103   : > { %v960_v59 = vadd.f32 %v1450_v54, %v1313_v56  ;;  %v1478_v60 = vadd.f32 %v1477_v38, %v1476_v36  ;;  %v1169_v38 = vmul.f32 0.3, %v1165_v28 }
 0x104   : > { %v1479_v40 = vpop.f32.mrf.mxu1  ;;  %v1452_v41 = vpop.f32.mrf.mxu0 }
 0x105   : > { %v1453_v61 = vadd.f32 %v1452_v41, %v1451_v39  ;;  %v1009_v4 = vadd.f32 %v1478_v60, %v960_v59 }
 0x106   : > { %v1480_v43 = vpop.f32.mrf.mxu1 }
 0x107   : > { %v963_v5 = vadd.f32 %v1453_v61, %v1313_v56  ;;  %v1481_v6 = vadd.f32 %v1480_v43, %v1479_v40  ;;  %v1167_v40 = vmul.f32 0.3, %v1163_v33 }
 0x109   : > { %v1012_v16 = vadd.f32 %v1481_v6, %v963_v5 }
 0x116   : > { %v1498_v42 = vpop.f32.mrf.mxu0 }
 0x118   : > { %v1499_v44 = vpop.f32.mrf.mxu0  ;;  %v1526_v45 = vpop.f32.mrf.mxu1 }
 0x119   : > { %v1500_v7 = vadd.f32 %v1499_v44, %v1498_v42 }
 0x11a   : > { %v1501_v46 = vpop.f32.mrf.mxu0  ;;  %v1527_v47 = vpop.f32.mrf.mxu1 }
 0x11b   : > { %v1050_v17 = vadd.f32 %v1500_v7, %v1001_v8  ;;  %v1528_v18 = vadd.f32 %v1527_v47, %v1526_v45 }
 0x11c   : > { %v1502_v48 = vpop.f32.mrf.mxu0  ;;  %v1529_v49 = vpop.f32.mrf.mxu1 }
 0x11d   : > { %v1503_v19 = vadd.f32 %v1502_v48, %v1501_v46  ;;  %v1099_v32 = vadd.f32 %v1528_v18, %v1050_v17 }
 0x11e   : > { %v1504_v50 = vpop.f32.mrf.mxu0  ;;  %v1530_v51 = vpop.f32.mrf.mxu1 }
 0x11f   : > { %v1053_v29 = vadd.f32 %v1503_v19, %v1004_v22  ;;  %v1531_v30 = vadd.f32 %v1530_v51, %v1529_v49 }
 0x120   : > { %v1505_v52 = vpop.f32.mrf.mxu0  ;;  %v1532_v53 = vpop.f32.mrf.mxu1 }
 0x121   : > { %v1506_v1 = vadd.f32 %v1505_v52, %v1504_v50  ;;  %v1102_v43 = vadd.f32 %v1531_v30, %v1053_v29  ;;  %v1718_v50 = vmov 0.0  }
 0x122   : > { %v1507_v57 = vpop.f32.mrf.mxu0  ;;  %v1533_v58 = vpop.f32.mrf.mxu1 }
 0x123   : > { %v1058_v11 = vadd.f32 %v1506_v1, %v1009_v4  ;;  %v1534_v12 = vadd.f32 %v1533_v58, %v1532_v53 }
 0x124   : > { %v1508_v2 = vpop.f32.mrf.mxu0  ;;  %v1535_v3 = vpop.f32.mrf.mxu1 }
 0x125   : > { %v1509_v13 = vadd.f32 %v1508_v2, %v1507_v57  ;;  %v1107_v25 = vadd.f32 %v1534_v12, %v1058_v11 }
 0x126   : > { %v1536_v15 = vpop.f32.mrf.mxu1 }
 0x127   : > { %v1061_v23 = vadd.f32 %v1509_v13, %v1012_v16  ;;  %v1537_v24 = vadd.f32 %v1536_v15, %v1535_v3 }
 0x129   : > { %v1110_v37 = vadd.f32 %v1537_v24, %v1061_v23 }
 0x136   : > { %v1566_v26 = vpop.f32.mrf.mxu0 }
 0x137   : > { %v1156_v31 = vadd.f32 %v1566_v26, %v1107_v25 }
 0x138   : > { %v1147_v34 = vpop.f32.mrf.mxu0 }
 0x139   : > { %v1172_v35 = vadd.f32 %v1168_v21, %v1156_v31  ;;  %v1148_v36 = vadd.f32 %v1147_v34, %v1099_v32 }
 0x13a   : > { %v1567_v39 = vpop.f32.mrf.mxu0 }
 0x13b   : > { %vm1176_vm0 = vcmp.ge.f32.partialorder %v1172_v35, 0.5  ;;  %v1170_v41 = vadd.f32 %v1166_v27, %v1148_v36  ;;  %v1159_v42 = vadd.f32 %v1567_v39, %v1110_v37 }
 0x13c   : > { %v1180_v44 = vsel %vm1176_vm0, 0.0, %v1172_v35  ;;  %v1150_v45 = vpop.f32.mrf.mxu0  ;;  %v1406_v51 = vsel %vm1176_vm0, 1.0, %v1718_v50 }
 0x13d   : > { %1184 = vst [vmem:[#allocation2 + $0x18] sm:$0xff] %v1180_v44  ;;  %vm1174_vm1 = vcmp.ge.f32.partialorder %v1170_v41, 0.5  ;;  %v1173_v46 = vadd.f32 %v1169_v38, %v1159_v42  ;;  %v1151_v47 = vadd.f32 %v1150_v45, %v1102_v43 }
 0x13e   : > { %v1178_v48 = vsel %vm1174_vm1, 0.0, %v1170_v41  ;;  %v1404_v55 = vsel %vm1174_vm1, 1.0, %v1718_v50 }
 0x13f   : > { %1182 = vst [vmem:[#allocation2 + $0x10] sm:$0xff] %v1178_v48  ;;  %vm1177_vm2 = vcmp.ge.f32.partialorder %v1173_v46, 0.5  ;;  %v1171_v49 = vadd.f32 %v1167_v40, %v1151_v47 }
 0x140   : > { %v1181_v52 = vsel %vm1177_vm2, 0.0, %v1173_v46  ;;  %v1407_v53 = vsel %vm1177_vm2, 1.0, %v1718_v50 }
 0x141   : > { %1185 = vst [vmem:[#allocation2 + $0x8] sm:$0xff] %v1181_v52  ;;  %v1423_v54 = vpack.c.bf16 %v1407_v53, %v1406_v51  ;;  %vm1175_vm3 = vcmp.ge.f32.partialorder %v1171_v49, 0.5 }
 0x142   : > { %v1179_v56 = vsel %vm1175_vm3, 0.0, %v1171_v49  ;;  %v1405_v57 = vsel %vm1175_vm3, 1.0, %v1718_v50 }
 0x143   : > { %1425 = vst [vmem:[%s1760_s21 + $0x8] sm:$0xff] %v1423_v54   ;;  %1183 = vst [vmem:[#allocation2] sm:$0xff] %v1179_v56  ;;  %v1420_v58 = vpack.c.bf16 %v1405_v57, %v1404_v55 }
 0x145   : > { %1421 = vst [vmem:[%s1760_s21] sm:$0xff] %v1420_v58  }
 0x146 PF: > { %s13_s14 = sadd.s32 1, %s1715_s14   ;;  %s2019_s12 = smov %s1711_s13 }
 0x147   : > { %p10_p6 = scmp.ge.s32.totalorder %s13_s14, 6   ;;  %s2020_s13 = smov %s2022_s15 }
 0x149   :  { %12 = sbr.rel (!%p10_p6) target bundleno = 2 (0x2), region = 66 }

// kernel: resnetlif50_forward.82
= control target key start
LH: loop header
LB: loop body
LE: loop exit
PB: predicated region body
PF: predicated region fallthrough
CT: control target
= control target key end

     0   :  { %s304_s1 = inlined_call_operand.vmem [shape: bf16[128,128], index: 1, kind: input, shape index: {}]   ;;  %s305_s0 = inlined_call_operand.vmem [shape: bf16[32,128], index: 0, kind: input, shape index: {}]   ;;  %s306_s2 = inlined_call_operand.vmem [shape: f32[1,128], index: 2, kind: input, shape index: {}]   ;;  %s307_s3 = inlined_call_operand.vmem [shape: bf16[32,128], index: 3, kind: output, shape index: {}]  }
   0x1   :  { %v235_v0 = vld [vmem:[%s304_s1 + $0x38] sm:$0xff]   ;;  %v236_v1 = vld [vmem:[%s304_s1 + $0x30] sm:$0xff]   ;;  %v237_v2 = vld [vmem:[%s304_s1 + $0x28] sm:$0xff]  }
   0x2   :  { %215 = vmatprep.subr.bf16.mxu0 %v235_v0  ;;  %v238_v3 = vld [vmem:[%s304_s1 + $0x20] sm:$0xff]   ;;  %v239_v5 = vld [vmem:[%s304_s1 + $0x18] sm:$0xff]   ;;  %v240_v6 = vld [vmem:[%s304_s1 + $0x10] sm:$0xff]  }
   0x3   :  { %216 = vmatpush3.bf16.msra.mxu0 %v235_v0  ;;  %v243_v4 = vld [vmem:[%s305_s0] sm:$0xff]   ;;  %v241_v7 = vld [vmem:[%s304_s1 + $0x8] sm:$0xff]  }
   0x4   :  { %217 = vmatprep.subr.bf16.mxu0 %v236_v1  ;;  %231 = vmatprep.mubr.bf16.mxu0 %v243_v4  ;;  %v242_v8 = vld [vmem:[%s304_s1] sm:$0xff]   ;;  %v244_v9 = vld [vmem:[%s305_s0 + $0x8] sm:$0xff]  }
   0x5   :  { %v175_v11 = vld [vmem:[%s306_s2] ss:$0 sm:$0xff] }
   0x7   :  { %218 = vmatpush3.bf16.msra.mxu0 %v236_v1 }
   0x8   :  { %219 = vmatprep.subr.bf16.mxu0 %v237_v2 }
   0xb   :  { %220 = vmatpush3.bf16.msra.mxu0 %v237_v2 }
   0xc   :  { %221 = vmatprep.subr.bf16.mxu0 %v238_v3 }
   0xf   :  { %222 = vmatpush3.bf16.msra.mxu0 %v238_v3 }
  0x10   :  { %223 = vmatprep.subr.bf16.mxu0 %v239_v5 }
  0x13   :  { %224 = vmatpush3.bf16.msra.mxu0 %v239_v5 }
  0x14   :  { %225 = vmatprep.subr.bf16.mxu0 %v240_v6 }
  0x17   :  { %226 = vmatpush3.bf16.msra.mxu0 %v240_v6 }
  0x18   :  { %227 = vmatprep.subr.bf16.mxu0 %v241_v7 }
  0x1b   :  { %228 = vmatpush3.bf16.msra.mxu0 %v241_v7 }
  0x1c   :  { %229 = vmatprep.subr.bf16.mxu0 %v242_v8 }
  0x1f   :  { %230 = vmatpush3.bf16.msra.mxu0 %v242_v8 }
  0x22   :  { %232 = vmatmul.mubr.bf16.vlgmr.msra.gmra.mxu0 %v244_v9 }
  0xe2   :  { %v233_v10 = vpop.f32.mrf.mxu0 }
  0xe3   :  { %v145_v14 = vadd.f32 %v233_v10, %v175_v11 }
  0xe4   :  { %v136_v12 = vpop.f32.mrf.mxu0 }
  0xe5   :  { %v137_v17 = vadd.f32 %v175_v11, %v136_v12 }
  0xe6   :  { %v234_v13 = vpop.f32.mrf.mxu0 }
  0xe7   :  { %v148_v15 = vadd.f32 %v234_v13, %v175_v11 }
  0xe8   :  { %v139_v16 = vpop.f32.mrf.mxu0 }
  0xe9   :  { %v202_v18 = vpack.c.bf16 %v148_v15, %v145_v14  ;;  %v140_v19 = vadd.f32 %v175_v11, %v139_v16 }
  0xeb   :  { %204 = vst [vmem:[%s307_s3 + $0x8] sm:$0xff] %v202_v18   ;;  %v197_v20 = vpack.c.bf16 %v140_v19, %v137_v17 }
  0xed   :  { %198 = vst [vmem:[%s307_s3] sm:$0xff] %v197_v20  }

// kernel: resnetlif50_forward.84
= control target key start
LH: loop header
LB: loop body
LE: loop exit
PB: predicated region body
PF: predicated region fallthrough
CT: control target
= control target key end

     0   :  { %s530_s12 = smov 0   ;;  %s532_s13 = smov 0   ;;  %s596_s0 = inlined_call_operand.vmem [shape: bf16[4,8,128], index: 0, kind: input, shape index: {}]   ;;  %s597_s1 = inlined_call_operand.vmem [shape: bf16[128,128], index: 1, kind: input, shape index: {}]   ;;  %s598_s2 = inlined_call_operand.vmem [shape: f32[1,128], index: 2, kind: input, shape index: {}]   ;;  %s599_s3 = inlined_call_operand.vmem [shape: bf16[4,8,128], index: 3, kind: output, shape index: {}]  }
   0x1   :  { %s534_s14 = smov 0  }
   0x2 LB: > { %s22_s15 = sadd.s32 1, %s501_s13  ;;  %p403_p0 = scmp.ge.s32.totalorder %s505_s14, 1  ;;  %s505_s14 = sphi %s534_s14, %s13_s14   ;;  %s501_s13 = sphi %s532_s13, %s601_s13   ;;  %s497_s12 = sphi %s530_s12, %s600_s12  }
   0x3   : > { %p23_p1 = scmp.ge.s32.totalorder %s22_s15, 4  ;;  %p155_p2 = scmp.lt.s32.totalorder %s505_s14, 5 }
   0x5   : > { %s603_s15 = smov (%p23_p1, %s22_s15), 0  ;;  %p156_p3 = pnand %p403_p0, %p155_p2 }
   0x6   : > { %p183_p4 = scmp.lt.s32.totalorder (!%p156_p3), %s497_s12, 3  ;;  %p406_p5 = scmp.ne.s32.totalorder (!%p156_p3), %s497_s12, 0 }
   0x7   : > { %159 = sbr.rel (%p156_p3) target bundleno = 255 (0xff), region = 32 }
   0xc   : > { %s184_s16 = scalar_select %p183_p4, %s497_s12, 3 }
   0xd   : > { %201 = sbr.rel (%p406_p5) target bundleno = 20 (0x14), region = 36 }
   0xe   : > { %s404_s17 = sshll.u32 %s184_s16, 2 }
   0xf   : > { %s551_s20 = scalar_lea.vmem %s596_s0, %s404_s17  ;;  %s556_s23 = scalar_lea.vmem %s599_s3, %s404_s17 }
  0x12   : > { %v507_v0 = vmov 0.0  }
  0x13   : > { %202 = vst [vmem:[#allocation2] sm:$0xff] %v507_v0 }
  0x14 PF: > { %v475_v1 = vld [vmem:[%s597_s1 + $0x38] sm:$0xff]   ;;  %v508_v2 = vmov 0.0   ;;  %v476_v3 = vld [vmem:[%s597_s1 + $0x30] sm:$0xff]   ;;  %vm509_vm0 = vmmov 0   ;;  %v477_v4 = vld [vmem:[%s597_s1 + $0x28] sm:$0xff]  }
  0x15   : > { %428 = vmatprep.subr.bf16.mxu0 %v508_v2  ;;  %444 = vmatprep.mubr.msk.bf16.mxu0 %vm509_vm0, %v508_v2  ;;  %v478_v5 = vld [vmem:[%s597_s1 + $0x20] sm:$0xff]   ;;  %v479_v6 = vld [vmem:[%s597_s1 + $0x18] sm:$0xff]   ;;  %v480_v7 = vld [vmem:[%s597_s1 + $0x10] sm:$0xff]  }
  0x16   : > { %429 = vmatpush3.bf16.msra.mxu0 %v475_v1  ;;  %v481_v8 = vld [vmem:[%s597_s1 + $0x8] sm:$0xff]   ;;  %v482_v9 = vld [vmem:[%s597_s1] sm:$0xff]  }
  0x17   : > { %430 = vmatprep.subr.bf16.mxu0 %v508_v2  ;;  %v203_v10 = vld [vmem:[%s551_s20] sm:$0xf] }
  0x18   : > { %v407_v12 = vld [vmem:[%s598_s2] ss:$0 sm:$0xff] }
  0x1a   : > { %431 = vmatpush3.bf16.msra.mxu0 %v476_v3  ;;  %v315_v11 = vld [vmem:[#allocation2] sm:$0xff] }
  0x1b   : > { %432 = vmatprep.subr.bf16.mxu0 %v508_v2  ;;  %v316_v13 = vmul.f32 0.3, %v315_v11 }
  0x1e   : > { %433 = vmatpush3.bf16.msra.mxu0 %v477_v4 }
  0x1f   : > { %434 = vmatprep.subr.bf16.mxu0 %v508_v2 }
  0x22   : > { %435 = vmatpush3.bf16.msra.mxu0 %v478_v5 }
  0x23   : > { %436 = vmatprep.subr.bf16.mxu0 %v508_v2 }
  0x26   : > { %437 = vmatpush3.bf16.msra.mxu0 %v479_v6 }
  0x27   : > { %438 = vmatprep.subr.bf16.mxu0 %v508_v2 }
  0x2a   : > { %439 = vmatpush3.bf16.msra.mxu0 %v480_v7 }
  0x2b   : > { %440 = vmatprep.subr.bf16.mxu0 %v508_v2 }
  0x2e   : > { %441 = vmatpush3.bf16.msra.mxu0 %v481_v8 }
  0x2f   : > { %442 = vmatprep.subr.bf16.mxu0 %v508_v2 }
  0x32   : > { %443 = vmatpush3.bf16.msra.mxu0 %v482_v9 }
  0x35   : > { %445 = vmatmul.mubr.bf16.vlgmr.msra.gmra.mxu0 %v203_v10 }
  0xf5   : > { %v309_v14 = vpop.f32.mrf.mxu0 }
  0xf6   : > { %v310_v15 = vadd.f32 %v407_v12, %v309_v14 }
  0xf7   : > { %v446_v16 = vpop.f32.mrf.mxu0 }
  0xf8   : > { %v317_v17 = vadd.f32 %v316_v13, %v310_v15 }
  0xf9   : > { %v312_v18 = vpop.f32.mrf.mxu0 }
  0xfa   : > { %vm318_vm1 = vcmp.ge.f32.partialorder %v317_v17, 0.5 }
  0xfb   : > { %v319_v19 = vsel %vm318_vm1, 0.0, %v317_v17  ;;  %v416_v20 = vsel %vm318_vm1, 1.0, %v508_v2  ;;  %v447_v21 = vpop.f32.mrf.mxu0 }
  0xfc   : > { %320 = vst [vmem:[#allocation2] sm:$0xff] %v319_v19  ;;  %v323_v22 = vpack.c.bf16 %v416_v20, %v416_v20 }
  0xfe   : > { %324 = vst [vmem:[%s556_s23] sm:$0xf] %v323_v22 }
  0xff PF: > { %s13_s14 = sadd.s32 1, %s505_s14   ;;  %s600_s12 = smov %s501_s13 }
 0x100   : > { %p10_p6 = scmp.ge.s32.totalorder %s13_s14, 6   ;;  %s601_s13 = smov %s603_s15 }
 0x102   :  { %12 = sbr.rel (!%p10_p6) target bundleno = 2 (0x2), region = 66 }

// kernel: resnetlif50_forward.83
= control target key start
LH: loop header
LB: loop body
LE: loop exit
PB: predicated region body
PF: predicated region fallthrough
CT: control target
= control target key end

     0   :  { %s609_s15 = smov 0   ;;  %s611_s16 = smov 0   ;;  %s692_s0 = inlined_call_operand.vmem [shape: bf16[4,8,128], index: 0, kind: input, shape index: {}]   ;;  %s693_s1 = inlined_call_operand.vmem [shape: bf16[128,128], index: 1, kind: input, shape index: {}]   ;;  %s694_s2 = inlined_call_operand.vmem [shape: f32[1,128], index: 2, kind: input, shape index: {}]   ;;  %s695_s3 = inlined_call_operand.vmem [shape: bf16[4,8,128], index: 3, kind: input, shape index: {}]   ;;  %s696_s4 = inlined_call_operand.vmem [shape: bf16[4,8,128], index: 4, kind: output, shape index: {}]  }
   0x1   :  { %s613_s17 = smov 0  }
   0x2 LB: > { %s23_s18 = sadd.s32 1, %s575_s16  ;;  %p476_p0 = scmp.ge.s32.totalorder %s579_s17, 1  ;;  %s579_s17 = sphi %s613_s17, %s14_s17   ;;  %s575_s16 = sphi %s611_s16, %s698_s16   ;;  %s571_s15 = sphi %s609_s15, %s697_s15  }
   0x3   : > { %p24_p1 = scmp.ge.s32.totalorder %s23_s18, 4  ;;  %p194_p2 = scmp.lt.s32.totalorder %s579_s17, 5 }
   0x5   : > { %s700_s18 = smov (%p24_p1, %s23_s18), 0  ;;  %p195_p3 = pnand %p476_p0, %p194_p2 }
   0x6   : > { %p231_p4 = scmp.lt.s32.totalorder (!%p195_p3), %s571_s15, 3  ;;  %p480_p5 = scmp.ne.s32.totalorder (!%p195_p3), %s571_s15, 0 }
   0x7   : > { %198 = sbr.rel (%p195_p3) target bundleno = 257 (0x101), region = 36 }
   0xc   : > { %s232_s19 = scalar_select %p231_p4, %s571_s15, 3 }
   0xd   : > { %256 = sbr.rel (%p480_p5) target bundleno = 20 (0x14), region = 40 }
   0xe   : > { %s627_s20 = sshll.u32 %s232_s19, 2 }
   0xf   : > { %s237_s23 = scalar_lea.vmem %s692_s0, %s627_s20  ;;  %s244_s26 = scalar_lea.vmem %s695_s3, %s627_s20 }
  0x10   : > { %s251_s29 = scalar_lea.vmem %s696_s4, %s627_s20 }
  0x12   : > { %v581_v0 = vmov 0.0  }
  0x13   : > { %257 = vst [vmem:[#allocation2] sm:$0xff] %v581_v0 }
  0x14 PF: > { %v549_v1 = vld [vmem:[%s693_s1 + $0x38] sm:$0xff]   ;;  %v582_v2 = vmov 0.0   ;;  %v550_v3 = vld [vmem:[%s693_s1 + $0x30] sm:$0xff]   ;;  %vm583_vm0 = vmmov 0   ;;  %v551_v4 = vld [vmem:[%s693_s1 + $0x28] sm:$0xff]  }
  0x15   : > { %502 = vmatprep.subr.bf16.mxu0 %v582_v2  ;;  %518 = vmatprep.mubr.msk.bf16.mxu0 %vm583_vm0, %v582_v2  ;;  %v552_v5 = vld [vmem:[%s693_s1 + $0x20] sm:$0xff]   ;;  %v553_v6 = vld [vmem:[%s693_s1 + $0x18] sm:$0xff]   ;;  %v554_v7 = vld [vmem:[%s693_s1 + $0x10] sm:$0xff]  }
  0x16   : > { %503 = vmatpush3.bf16.msra.mxu0 %v549_v1  ;;  %v555_v8 = vld [vmem:[%s693_s1 + $0x8] sm:$0xff]   ;;  %v556_v9 = vld [vmem:[%s693_s1] sm:$0xff]  }
  0x17   : > { %504 = vmatprep.subr.bf16.mxu0 %v582_v2  ;;  %v258_v10 = vld [vmem:[%s237_s23] sm:$0xf] }
  0x18   : > { %v370_v11 = vld [vmem:[%s244_s26] sm:$0xf] }
  0x19   : > { %v481_v12 = vld [vmem:[%s694_s2] ss:$0 sm:$0xff]  ;;  %v371_v14 = vunpack.c.l.bf16 %v370_v11 }
  0x1a   : > { %505 = vmatpush3.bf16.msra.mxu0 %v550_v3  ;;  %v373_v13 = vld [vmem:[#allocation2] sm:$0xff] }
  0x1b   : > { %506 = vmatprep.subr.bf16.mxu0 %v582_v2  ;;  %v374_v17 = vmul.f32 0.3, %v373_v13 }
  0x1e   : > { %507 = vmatpush3.bf16.msra.mxu0 %v551_v4 }
  0x1f   : > { %508 = vmatprep.subr.bf16.mxu0 %v582_v2 }
  0x22   : > { %509 = vmatpush3.bf16.msra.mxu0 %v552_v5 }
  0x23   : > { %510 = vmatprep.subr.bf16.mxu0 %v582_v2 }
  0x26   : > { %511 = vmatpush3.bf16.msra.mxu0 %v553_v6 }
  0x27   : > { %512 = vmatprep.subr.bf16.mxu0 %v582_v2 }
  0x2a   : > { %513 = vmatpush3.bf16.msra.mxu0 %v554_v7 }
  0x2b   : > { %514 = vmatprep.subr.bf16.mxu0 %v582_v2 }
  0x2e   : > { %515 = vmatpush3.bf16.msra.mxu0 %v555_v8 }
  0x2f   : > { %516 = vmatprep.subr.bf16.mxu0 %v582_v2 }
  0x32   : > { %517 = vmatpush3.bf16.msra.mxu0 %v556_v9 }
  0x35   : > { %519 = vmatmul.mubr.bf16.vlgmr.msra.gmra.mxu0 %v258_v10 }
  0xf5   : > { %v364_v15 = vpop.f32.mrf.mxu0 }
  0xf6   : > { %v365_v16 = vadd.f32 %v481_v12, %v364_v15 }
  0xf7   : > { %v520_v18 = vpop.f32.mrf.mxu0 }
  0xf8   : > { %v372_v19 = vadd.f32 %v371_v14, %v365_v16 }
  0xf9   : > { %v367_v20 = vpop.f32.mrf.mxu0 }
  0xfa   : > { %v375_v21 = vadd.f32 %v374_v17, %v372_v19 }
  0xfb   : > { %v521_v22 = vpop.f32.mrf.mxu0 }
  0xfc   : > { %vm376_vm1 = vcmp.ge.f32.partialorder %v375_v21, 0.5 }
  0xfd   : > { %v377_v23 = vsel %vm376_vm1, 0.0, %v375_v21  ;;  %v490_v24 = vsel %vm376_vm1, 1.0, %v582_v2 }
  0xfe   : > { %378 = vst [vmem:[#allocation2] sm:$0xff] %v377_v23  ;;  %v381_v25 = vpack.c.bf16 %v490_v24, %v490_v24 }
 0x100   : > { %382 = vst [vmem:[%s251_s29] sm:$0xf] %v381_v25 }
 0x101 PF: > { %s14_s17 = sadd.s32 1, %s579_s17   ;;  %s697_s15 = smov %s575_s16 }
 0x102   : > { %p11_p6 = scmp.ge.s32.totalorder %s14_s17, 6   ;;  %s698_s16 = smov %s700_s18 }
 0x104   :  { %13 = sbr.rel (!%p11_p6) target bundleno = 2 (0x2), region = 73 }

// kernel: resnetlif50_forward.81
= control target key start
LH: loop header
LB: loop body
LE: loop exit
PB: predicated region body
PF: predicated region fallthrough
CT: control target
= control target key end

     0   :  { %s1485_s12 = smov 0   ;;  %s1487_s13 = smov 0   ;;  %s1757_s0 = inlined_call_operand.vmem [shape: bf16[4,8,1152], index: 0, kind: input, shape index: {}]   ;;  %s1758_s1 = inlined_call_operand.vmem [shape: bf16[1152,128], index: 1, kind: input, shape index: {}]   ;;  %s1759_s2 = inlined_call_operand.vmem [shape: f32[1,128], index: 2, kind: input, shape index: {}]   ;;  %s1760_s3 = inlined_call_operand.vmem [shape: bf16[4,8,128], index: 3, kind: output, shape index: {}]  }
   0x1   :  { %s1489_s14 = smov 0  }
   0x2 LB: > { %s22_s15 = sadd.s32 1, %s1456_s13  ;;  %p1123_p0 = scmp.ge.s32.totalorder %s1460_s14, 1  ;;  %s1460_s14 = sphi %s1489_s14, %s13_s14   ;;  %s1456_s13 = sphi %s1487_s13, %s1762_s13   ;;  %s1452_s12 = sphi %s1485_s12, %s1761_s12  }
   0x3   : > { %p23_p1 = scmp.ge.s32.totalorder %s22_s15, 4  ;;  %p157_p2 = scmp.lt.s32.totalorder %s1460_s14, 5 }
   0x5   : > { %s1764_s15 = smov (%p23_p1, %s22_s15), 0  ;;  %p158_p3 = pnand %p1123_p0, %p157_p2 }
   0x6   : > { %p187_p4 = scmp.lt.s32.totalorder (!%p158_p3), %s1452_s12, 3  ;;  %p1126_p5 = scmp.ne.s32.totalorder (!%p158_p3), %s1452_s12, 0 }
   0x7   : > { %161 = sbr.rel (%p158_p3) target bundleno = 319 (0x13f), region = 32 }
   0xc   : > { %s188_s16 = scalar_select %p187_p4, %s1452_s12, 3 }
   0xd   : > { %207 = sbr.rel (%p1126_p5) target bundleno = 20 (0x14), region = 36 }
   0xe   : > { %s1329_s17 = smul.u32 36, %s188_s16  ;;  %s1125_s18 = sshll.u32 %s188_s16, 2 }
   0xf   : > { %s1506_s21 = scalar_lea.vmem %s1760_s3, %s1125_s18 }
  0x10   : > { %s1511_s24 = scalar_lea.vmem %s1757_s0, %s1329_s17 }
  0x12   : > { %v1462_v0 = vmov 0.0  }
  0x13   : > { %208 = vst [vmem:[#allocation2] sm:$0xff] %v1462_v0 }
  0x14 PF: > { %v1357_v1 = vld [vmem:[%s1758_s1 + $0x78] sm:$0xff]   ;;  %v1361_v5 = vld [vmem:[%s1758_s1 + $0x70] sm:$0xff]   ;;  %v1365_v9 = vld [vmem:[%s1758_s1 + $0x68] sm:$0xff]   ;;  %vm1464_vm0 = vmmov 0  }
  0x15   : > { %v1358_v2 = vld [vmem:[%s1758_s1 + $0x38] sm:$0xff]   ;;  %1212 = vmatprep.subr.bf16.mxu0 %v1357_v1  ;;  %v1362_v6 = vld [vmem:[%s1758_s1 + $0x30] sm:$0xff]   ;;  %v1366_v10 = vld [vmem:[%s1758_s1 + $0x28] sm:$0xff]  }
  0x16   : > { %v1359_v3 = vld [vmem:[%s1758_s1 + $0xf8] sm:$0xff]   ;;  %1213 = vmatpush3.bf16.msra.mxu0 %v1358_v2  ;;  %v1363_v7 = vld [vmem:[%s1758_s1 + $0xf0] sm:$0xff]   ;;  %v1367_v11 = vld [vmem:[%s1758_s1 + $0xe8] sm:$0xff]  }
  0x17   : > { %v1360_v4 = vld [vmem:[%s1758_s1 + $0xb8] sm:$0xff]   ;;  %1234 = vmatprep.subr.bf16.mxu1 %v1359_v3  ;;  %1214 = vmatprep.subr.bf16.mxu0 %v1361_v5  ;;  %v1364_v8 = vld [vmem:[%s1758_s1 + $0xb0] sm:$0xff]   ;;  %v1368_v12 = vld [vmem:[%s1758_s1 + $0xa8] sm:$0xff]  }
  0x18   : > { %1235 = vmatpush3.bf16.msra.mxu1 %v1360_v4  ;;  %v1369_v13 = vld [vmem:[%s1758_s1 + $0x60] sm:$0xff]   ;;  %v1373_v17 = vld [vmem:[%s1758_s1 + $0x58] sm:$0xff]   ;;  %v1377_v21 = vld [vmem:[%s1758_s1 + $0x50] sm:$0xff]  }
  0x19   : > { %1236 = vmatprep.subr.bf16.mxu1 %v1363_v7  ;;  %v1370_v14 = vld [vmem:[%s1758_s1 + $0x20] sm:$0xff]   ;;  %v1374_v18 = vld [vmem:[%s1758_s1 + $0x18] sm:$0xff]   ;;  %v1378_v22 = vld [vmem:[%s1758_s1 + $0x10] sm:$0xff]  }
  0x1a   : > { %1215 = vmatpush3.bf16.msra.mxu0 %v1362_v6  ;;  %v1371_v15 = vld [vmem:[%s1758_s1 + $0xe0] sm:$0xff]   ;;  %v1375_v19 = vld [vmem:[%s1758_s1 + $0xd8] sm:$0xff]   ;;  %v1379_v23 = vld [vmem:[%s1758_s1 + $0xd0] sm:$0xff]  }
  0x1b   : > { %1216 = vmatprep.subr.bf16.mxu0 %v1365_v9  ;;  %v1372_v16 = vld [vmem:[%s1758_s1 + $0xa0] sm:$0xff]   ;;  %v1376_v20 = vld [vmem:[%s1758_s1 + $0x98] sm:$0xff]   ;;  %v1380_v24 = vld [vmem:[%s1758_s1 + $0x90] sm:$0xff]  }
  0x1c   : > { %1237 = vmatpush3.bf16.msra.mxu1 %v1364_v8  ;;  %v1381_v25 = vld [vmem:[%s1758_s1 + $0x48] sm:$0xff]   ;;  %v1385_v29 = vld [vmem:[%s1758_s1 + $0x40] sm:$0xff]   ;;  %v1391_v36 = vld [vmem:[%s1758_s1 + $0x178] sm:$0xff]  }
  0x1d   : > { %1238 = vmatprep.subr.bf16.mxu1 %v1367_v11  ;;  %v1382_v26 = vld [vmem:[%s1758_s1 + $0x8] sm:$0xff]   ;;  %v1386_v30 = vld [vmem:[%s1758_s1] sm:$0xff]   ;;  %v1394_v40 = vld [vmem:[%s1758_s1 + $0x138] sm:$0xff]  }
  0x1e   : > { %1217 = vmatpush3.bf16.msra.mxu0 %v1366_v10  ;;  %v1383_v27 = vld [vmem:[%s1758_s1 + $0xc8] sm:$0xff]   ;;  %v1387_v31 = vld [vmem:[%s1758_s1 + $0xc0] sm:$0xff]   ;;  %v1395_v41 = vld [vmem:[%s1758_s1 + $0x1f8] sm:$0xff]   ;;  %v1463_v10 = vmov 0.0  }
  0x1f   : > { %1218 = vmatprep.subr.bf16.mxu0 %v1369_v13  ;;  %v1384_v28 = vld [vmem:[%s1758_s1 + $0x88] sm:$0xff]   ;;  %v209_v32 = vld [vmem:[%s1511_s24] sm:$0xff]  ;;  %v1396_v42 = vld [vmem:[%s1758_s1 + $0x1b8] sm:$0xff]  }
  0x20   : > { %1239 = vmatpush3.bf16.msra.mxu1 %v1368_v12  ;;  %v1128_v33 = vcombine.low %v209_v32, %v209_v32  ;;  %v1129_v34 = vcombine.high %v209_v32, %v209_v32  ;;  %v1390_v35 = vld [vmem:[%s1758_s1 + $0x80] sm:$0xff]   ;;  %v210_v37 = vld [vmem:[%s1511_s24 + $0x8] sm:$0xff]  ;;  %v1397_v43 = vld [vmem:[%s1758_s1 + $0x170] sm:$0xff]  }
  0x21   : > { %1240 = vmatprep.subr.bf16.mxu1 %v1371_v15  ;;  %v1130_v38 = vcombine.low %v210_v37, %v210_v37  ;;  %v1131_v39 = vcombine.high %v210_v37, %v210_v37  ;;  %v1398_v44 = vld [vmem:[%s1758_s1 + $0x130] sm:$0xff]   ;;  %v1401_v47 = vld [vmem:[%s1758_s1 + $0x168] sm:$0xff]   ;;  %v1405_v51 = vld [vmem:[%s1758_s1 + $0x160] sm:$0xff]  }
  0x22   : > { %1219 = vmatpush3.bf16.msra.mxu0 %v1370_v14  ;;  %861 = vmatprep.mubr.bf16.mxu0 %v1129_v34  ;;  %v1399_v45 = vld [vmem:[%s1758_s1 + $0x1f0] sm:$0xff]   ;;  %v1402_v48 = vld [vmem:[%s1758_s1 + $0x128] sm:$0xff]   ;;  %v1406_v52 = vld [vmem:[%s1758_s1 + $0x120] sm:$0xff]  }
  0x23   : > { %1220 = vmatprep.subr.bf16.mxu0 %v1373_v17  ;;  %901 = vmatprep.mubr.bf16.mxu1 %v1131_v39  ;;  %v1400_v46 = vld [vmem:[%s1758_s1 + $0x1b0] sm:$0xff]   ;;  %v1403_v49 = vld [vmem:[%s1758_s1 + $0x1e8] sm:$0xff]   ;;  %v1407_v53 = vld [vmem:[%s1758_s1 + $0x1e0] sm:$0xff]  }
  0x24   : > { %1241 = vmatpush3.bf16.msra.mxu1 %v1372_v16  ;;  %v1404_v50 = vld [vmem:[%s1758_s1 + $0x1a8] sm:$0xff]   ;;  %v1408_v54 = vld [vmem:[%s1758_s1 + $0x1a0] sm:$0xff]   ;;  %v1409_v55 = vld [vmem:[%s1758_s1 + $0x158] sm:$0xff]  }
  0x25   : > { %1242 = vmatprep.subr.bf16.mxu1 %v1375_v19  ;;  %v1410_v56 = vld [vmem:[%s1758_s1 + $0x118] sm:$0xff]   ;;  %v1413_v59 = vld [vmem:[%s1758_s1 + $0x150] sm:$0xff]   ;;  %v1417_v63 = vld [vmem:[%s1758_s1 + $0x148] sm:$0xff]  }
  0x26   : > { %1221 = vmatpush3.bf16.msra.mxu0 %v1374_v18  ;;  %v1411_v57 = vld [vmem:[%s1758_s1 + $0x1d8] sm:$0xff]   ;;  %v1414_v60 = vld [vmem:[%s1758_s1 + $0x110] sm:$0xff]   ;;  %v1418_v0 = vld [vmem:[%s1758_s1 + $0x108] sm:$0xff]  }
  0x27   : > { %1222 = vmatprep.subr.bf16.mxu0 %v1377_v21  ;;  %v1412_v58 = vld [vmem:[%s1758_s1 + $0x198] sm:$0xff]   ;;  %v1415_v61 = vld [vmem:[%s1758_s1 + $0x1d0] sm:$0xff]   ;;  %v1419_v1 = vld [vmem:[%s1758_s1 + $0x1c8] sm:$0xff]  }
  0x28   : > { %1243 = vmatpush3.bf16.msra.mxu1 %v1376_v20  ;;  %v1416_v62 = vld [vmem:[%s1758_s1 + $0x190] sm:$0xff]   ;;  %v1420_v2 = vld [vmem:[%s1758_s1 + $0x188] sm:$0xff]   ;;  %v1421_v3 = vld [vmem:[%s1758_s1 + $0x140] sm:$0xff]  }
  0x29   : > { %1244 = vmatprep.subr.bf16.mxu1 %v1379_v23  ;;  %v1422_v4 = vld [vmem:[%s1758_s1 + $0x100] sm:$0xff]   ;;  %v211_v6 = vld [vmem:[%s1511_s24 + $0x10] sm:$0xff]  ;;  %v212_v11 = vld [vmem:[%s1511_s24 + $0x18] sm:$0xff] }
  0x2a   : > { %1223 = vmatpush3.bf16.msra.mxu0 %v1378_v22  ;;  %v1423_v5 = vld [vmem:[%s1758_s1 + $0x1c0] sm:$0xff]   ;;  %v1132_v7 = vcombine.low %v211_v6, %v211_v6  ;;  %v1133_v8 = vcombine.high %v211_v6, %v211_v6  ;;  %v1134_v12 = vcombine.low %v212_v11, %v212_v11  ;;  %v1135_v13 = vcombine.high %v212_v11, %v212_v11  ;;  %v1429_v14 = vld [vmem:[%s1758_s1 + $0x238] sm:$0xff]   ;;  %v1430_v15 = vld [vmem:[%s1758_s1 + $0x230] sm:$0xff]  }
  0x2b   : > { %1224 = vmatprep.subr.bf16.mxu0 %v1381_v25  ;;  %v1426_v9 = vld [vmem:[%s1758_s1 + $0x180] sm:$0xff]   ;;  %v1431_v16 = vld [vmem:[%s1758_s1 + $0x228] sm:$0xff]   ;;  %v1433_v18 = vld [vmem:[%s1758_s1 + $0x218] sm:$0xff]  }
  0x2c   : > { %1245 = vmatpush3.bf16.msra.mxu1 %v1380_v24  ;;  %v1432_v17 = vld [vmem:[%s1758_s1 + $0x220] sm:$0xff]   ;;  %v1434_v19 = vld [vmem:[%s1758_s1 + $0x210] sm:$0xff]   ;;  %v1435_v20 = vld [vmem:[%s1758_s1 + $0x208] sm:$0xff]  }
  0x2d   : > { %1246 = vmatprep.subr.bf16.mxu1 %v1383_v27  ;;  %v1436_v21 = vld [vmem:[%s1758_s1 + $0x200] sm:$0xff]  }
  0x2e   : > { %1225 = vmatpush3.bf16.msra.mxu0 %v1382_v26  ;;  %v1437_v22 = vld [vmem:[%s1511_s24 + $0x20] ss:$0 sps:$4 sm:$0xff]  }
  0x2f   : > { %1226 = vmatprep.subr.bf16.mxu0 %v1385_v29 }
  0x30   : > { %1247 = vmatpush3.bf16.msra.mxu1 %v1384_v28 }
  0x31   : > { %1248 = vmatprep.subr.bf16.mxu1 %v1387_v31 }
  0x32   : > { %1227 = vmatpush3.bf16.msra.mxu0 %v1386_v30 }
  0x33   : > { %1256 = vmatprep.subr.bf16.mxu0 %v1391_v36 }
  0x34   : > { %1249 = vmatpush3.bf16.msra.mxu1 %v1390_v35 }
  0x35   : > { %862 = vmatmul.mubr.bf16.vlgmr.msra.gmra.mxu0 %v1128_v33  ;;  %1278 = vmatprep.subr.bf16.mxu1 %v1395_v41 }
  0x36   : > { %1257 = vmatpush3.bf16.msra.mxu0 %v1394_v40  ;;  %941 = vmatprep.mubr.bf16.mxu0 %v1133_v8  ;;  %v1127_v40 = vld [vmem:[%s1759_s2] ss:$0 sm:$0xff] }
  0x37   : > { %902 = vmatmul.mubr.bf16.vlgmr.msra.gmra.mxu1 %v1130_v38  ;;  %1258 = vmatprep.subr.bf16.mxu0 %v1397_v43 }
  0x38   : > { %1279 = vmatpush3.bf16.msra.mxu1 %v1396_v42  ;;  %981 = vmatprep.mubr.bf16.mxu1 %v1135_v13 }
  0x39   : > { %1280 = vmatprep.subr.bf16.mxu1 %v1399_v45 }
  0x3a   : > { %1259 = vmatpush3.bf16.msra.mxu0 %v1398_v44 }
  0x3b   : > { %1260 = vmatprep.subr.bf16.mxu0 %v1401_v47  ;;  %v1029_v47 = vld [vmem:[#allocation2] sm:$0xff] }
  0x3c   : > { %1281 = vmatpush3.bf16.msra.mxu1 %v1400_v46 }
  0x3d   : > { %1282 = vmatprep.subr.bf16.mxu1 %v1403_v49  ;;  %v1030_v49 = vmul.f32 0.3, %v1029_v47 }
  0x3e   : > { %1261 = vmatpush3.bf16.msra.mxu0 %v1402_v48 }
  0x3f   : > { %1262 = vmatprep.subr.bf16.mxu0 %v1405_v51 }
  0x40   : > { %1283 = vmatpush3.bf16.msra.mxu1 %v1404_v50 }
  0x41   : > { %1284 = vmatprep.subr.bf16.mxu1 %v1407_v53 }
  0x42   : > { %1263 = vmatpush3.bf16.msra.mxu0 %v1406_v52 }
  0x43   : > { %1264 = vmatprep.subr.bf16.mxu0 %v1409_v55 }
  0x44   : > { %1285 = vmatpush3.bf16.msra.mxu1 %v1408_v54 }
  0x45   : > { %1286 = vmatprep.subr.bf16.mxu1 %v1411_v57 }
  0x46   : > { %1265 = vmatpush3.bf16.msra.mxu0 %v1410_v56 }
  0x47   : > { %1266 = vmatprep.subr.bf16.mxu0 %v1413_v59 }
  0x48   : > { %1287 = vmatpush3.bf16.msra.mxu1 %v1412_v58 }
  0x49   : > { %1288 = vmatprep.subr.bf16.mxu1 %v1415_v61 }
  0x4a   : > { %1267 = vmatpush3.bf16.msra.mxu0 %v1414_v60 }
  0x4b   : > { %1268 = vmatprep.subr.bf16.mxu0 %v1417_v63 }
  0x4c   : > { %1289 = vmatpush3.bf16.msra.mxu1 %v1416_v62 }
  0x4d   : > { %1290 = vmatprep.subr.bf16.mxu1 %v1419_v1 }
  0x4e   : > { %1269 = vmatpush3.bf16.msra.mxu0 %v1418_v0 }
  0x4f   : > { %1270 = vmatprep.subr.bf16.mxu0 %v1421_v3 }
  0x50   : > { %1291 = vmatpush3.bf16.msra.mxu1 %v1420_v2 }
  0x51   : > { %1292 = vmatprep.subr.bf16.mxu1 %v1423_v5 }
  0x52   : > { %1271 = vmatpush3.bf16.msra.mxu0 %v1422_v4 }
  0x53   : > { %1309 = vmatprep.subr.bf16.mxu0 %v1463_v10 }
  0x54   : > { %1293 = vmatpush3.bf16.msra.mxu1 %v1426_v9 }
  0x55   : > { %942 = vmatmul.mubr.bf16.vlgmr.msra.gmra.mxu0 %v1132_v7 }
  0x56   : > { %1310 = vmatpush3.bf16.msra.mxu0 %v1429_v14  ;;  %1325 = vmatprep.mubr.msk.bf16.mxu0 %vm1464_vm0, %v1463_v10 }
  0x57   : > { %982 = vmatmul.mubr.bf16.vlgmr.msra.gmra.mxu1 %v1134_v12  ;;  %1311 = vmatprep.subr.bf16.mxu0 %v1463_v10 }
  0x5a   : > { %1312 = vmatpush3.bf16.msra.mxu0 %v1430_v15 }
  0x5b   : > { %1313 = vmatprep.subr.bf16.mxu0 %v1463_v10 }
  0x5e   : > { %1314 = vmatpush3.bf16.msra.mxu0 %v1431_v16 }
  0x5f   : > { %1315 = vmatprep.subr.bf16.mxu0 %v1463_v10 }
  0x62   : > { %1316 = vmatpush3.bf16.msra.mxu0 %v1432_v17 }
  0x63   : > { %1317 = vmatprep.subr.bf16.mxu0 %v1463_v10 }
  0x66   : > { %1318 = vmatpush3.bf16.msra.mxu0 %v1433_v18 }
  0x67   : > { %1319 = vmatprep.subr.bf16.mxu0 %v1463_v10 }
  0x6a   : > { %1320 = vmatpush3.bf16.msra.mxu0 %v1434_v19 }
  0x6b   : > { %1321 = vmatprep.subr.bf16.mxu0 %v1463_v10 }
  0x6e   : > { %1322 = vmatpush3.bf16.msra.mxu0 %v1435_v20 }
  0x6f   : > { %1323 = vmatprep.subr.bf16.mxu0 %v1463_v10 }
  0x72   : > { %1324 = vmatpush3.bf16.msra.mxu0 %v1436_v21 }
  0x75   : > { %1326 = vmatmul.mubr.bf16.vlgmr.msra.gmra.mxu0 %v1437_v22 }
  0xf5   : > { %v1228_v23 = vpop.f32.mrf.mxu0 }
  0xf7   : > { %v1229_v24 = vpop.f32.mrf.mxu0  ;;  %v1250_v25 = vpop.f32.mrf.mxu1 }
  0xf8   : > { %v1230_v39 = vadd.f32 %v1229_v24, %v1228_v23 }
  0xf9   : > { %v1231_v26 = vpop.f32.mrf.mxu0  ;;  %v1251_v27 = vpop.f32.mrf.mxu1 }
  0xfa   : > { %v864_v41 = vadd.f32 %v1230_v39, %v1127_v40  ;;  %v1252_v42 = vadd.f32 %v1251_v27, %v1250_v25 }
  0xfb   : > { %v1232_v28 = vpop.f32.mrf.mxu0  ;;  %v1253_v29 = vpop.f32.mrf.mxu1 }
  0xfc   : > { %v904_v44 = vadd.f32 %v1252_v42, %v864_v41 }
  0xfd   : > { %v1254_v30 = vpop.f32.mrf.mxu1 }
 0x115   : > { %v1272_v31 = vpop.f32.mrf.mxu0 }
 0x117   : > { %v1273_v32 = vpop.f32.mrf.mxu0  ;;  %v1294_v33 = vpop.f32.mrf.mxu1 }
 0x118   : > { %v1274_v43 = vadd.f32 %v1273_v32, %v1272_v31 }
 0x119   : > { %v1275_v34 = vpop.f32.mrf.mxu0  ;;  %v1295_v35 = vpop.f32.mrf.mxu1 }
 0x11a   : > { %v944_v45 = vadd.f32 %v1274_v43, %v904_v44  ;;  %v1296_v46 = vadd.f32 %v1295_v35, %v1294_v33 }
 0x11b   : > { %v1276_v36 = vpop.f32.mrf.mxu0  ;;  %v1297_v37 = vpop.f32.mrf.mxu1 }
 0x11c   : > { %v984_v48 = vadd.f32 %v1296_v46, %v944_v45 }
 0x11d   : > { %v1298_v38 = vpop.f32.mrf.mxu1 }
 0x135   : > { %v1023_v50 = vpop.f32.mrf.mxu0 }
 0x136   : > { %v1024_v51 = vadd.f32 %v1023_v50, %v984_v48 }
 0x137   : > { %v1327_v52 = vpop.f32.mrf.mxu0 }
 0x138   : > { %v1031_v53 = vadd.f32 %v1030_v49, %v1024_v51 }
 0x139   : > { %v1026_v54 = vpop.f32.mrf.mxu0 }
 0x13a   : > { %vm1032_vm1 = vcmp.ge.f32.partialorder %v1031_v53, 0.5 }
 0x13b   : > { %v1033_v55 = vsel %vm1032_vm1, 0.0, %v1031_v53  ;;  %v1209_v56 = vsel %vm1032_vm1, 1.0, %v1463_v10  ;;  %v1328_v57 = vpop.f32.mrf.mxu0 }
 0x13c   : > { %1034 = vst [vmem:[#allocation2] sm:$0xff] %v1033_v55  ;;  %v1037_v58 = vpack.c.bf16 %v1209_v56, %v1209_v56 }
 0x13e   : > { %1038 = vst [vmem:[%s1506_s21] sm:$0xf] %v1037_v58 }
 0x13f PF: > { %s13_s14 = sadd.s32 1, %s1460_s14   ;;  %s1761_s12 = smov %s1456_s13 }
 0x140   : > { %p10_p6 = scmp.ge.s32.totalorder %s13_s14, 6   ;;  %s1762_s13 = smov %s1764_s15 }
 0x142   :  { %12 = sbr.rel (!%p10_p6) target bundleno = 2 (0x2), region = 66 }

// kernel: resnetlif50_forward.103
= control target key start
LH: loop header
LB: loop body
LE: loop exit
PB: predicated region body
PF: predicated region fallthrough
CT: control target
= control target key end

     0   :  { %s626_s12 = smov 0   ;;  %s628_s13 = smov 0   ;;  %s713_s0 = inlined_call_operand.vmem [shape: bf16[4,8,256], index: 0, kind: input, shape index: {}]   ;;  %s714_s1 = inlined_call_operand.vmem [shape: bf16[256,128], index: 1, kind: input, shape index: {}]   ;;  %s715_s2 = inlined_call_operand.vmem [shape: f32[1,128], index: 2, kind: input, shape index: {}]   ;;  %s716_s3 = inlined_call_operand.vmem [shape: bf16[4,8,128], index: 3, kind: output, shape index: {}]  }
   0x1   :  { %s630_s14 = smov 0  }
   0x2 LB: > { %s22_s15 = sadd.s32 1, %s598_s13  ;;  %p486_p0 = scmp.ge.s32.totalorder %s602_s14, 1  ;;  %s602_s14 = sphi %s630_s14, %s13_s14   ;;  %s598_s13 = sphi %s628_s13, %s718_s13   ;;  %s594_s12 = sphi %s626_s12, %s717_s12  }
   0x3   : > { %p23_p1 = scmp.ge.s32.totalorder %s22_s15, 4  ;;  %p157_p2 = scmp.lt.s32.totalorder %s602_s14, 5 }
   0x5   : > { %s720_s15 = smov (%p23_p1, %s22_s15), 0  ;;  %p158_p3 = pnand %p486_p0, %p157_p2 }
   0x6   : > { %p187_p4 = scmp.lt.s32.totalorder (!%p158_p3), %s594_s12, 3  ;;  %p490_p5 = scmp.ne.s32.totalorder (!%p158_p3), %s594_s12, 0 }
   0x7   : > { %161 = sbr.rel (%p158_p3) target bundleno = 259 (0x103), region = 32 }
   0xc   : > { %s188_s16 = scalar_select %p187_p4, %s594_s12, 3 }
   0xd   : > { %207 = sbr.rel (%p490_p5) target bundleno = 20 (0x14), region = 36 }
   0xe   : > { %s513_s17 = sshll.u32 %s188_s16, 3  ;;  %s489_s18 = sshll.u32 %s188_s16, 2 }
   0xf   : > { %s195_s21 = scalar_lea.vmem %s713_s0, %s513_s17  ;;  %s650_s24 = scalar_lea.vmem %s716_s3, %s489_s18 }
  0x12   : > { %v604_v0 = vmov 0.0  }
  0x13   : > { %208 = vst [vmem:[#allocation2] sm:$0xff] %v604_v0 }
  0x14 PF: > { %v562_v1 = vld [vmem:[%s714_s1 + $0x78] sm:$0xff]   ;;  %v564_v3 = vld [vmem:[%s714_s1 + $0x70] sm:$0xff]   ;;  %v566_v5 = vld [vmem:[%s714_s1 + $0x68] sm:$0xff]   ;;  %v605_v31 = vmov 0.0  }
  0x15   : > { %v563_v2 = vld [vmem:[%s714_s1 + $0x38] sm:$0xff]   ;;  %514 = vmatprep.subr.bf16.mxu0 %v562_v1  ;;  %v565_v4 = vld [vmem:[%s714_s1 + $0x30] sm:$0xff]   ;;  %v567_v6 = vld [vmem:[%s714_s1 + $0x28] sm:$0xff]  }
  0x16   : > { %515 = vmatpush3.bf16.msra.mxu0 %v563_v2  ;;  %v568_v7 = vld [vmem:[%s714_s1 + $0x60] sm:$0xff]   ;;  %v570_v9 = vld [vmem:[%s714_s1 + $0x58] sm:$0xff]   ;;  %v572_v11 = vld [vmem:[%s714_s1 + $0x50] sm:$0xff]  }
  0x17   : > { %516 = vmatprep.subr.bf16.mxu0 %v564_v3  ;;  %v569_v8 = vld [vmem:[%s714_s1 + $0x20] sm:$0xff]   ;;  %v571_v10 = vld [vmem:[%s714_s1 + $0x18] sm:$0xff]   ;;  %v573_v14 = vld [vmem:[%s714_s1 + $0x10] sm:$0xff]  }
  0x18   : > { %v209_v12 = vld [vmem:[%s195_s21] sm:$0xff]  ;;  %v574_v15 = vld [vmem:[%s714_s1 + $0x48] sm:$0xff]  }
  0x19   : > { %v493_v13 = vcombine.high %v209_v12, %v209_v12  ;;  %v575_v16 = vld [vmem:[%s714_s1 + $0x8] sm:$0xff]   ;;  %v576_v17 = vld [vmem:[%s714_s1 + $0x40] sm:$0xff]   ;;  %v492_v19 = vcombine.low %v209_v12, %v209_v12 }
  0x1a   : > { %517 = vmatpush3.bf16.msra.mxu0 %v565_v4  ;;  %v577_v18 = vld [vmem:[%s714_s1] sm:$0xff]  }
  0x1b   : > { %518 = vmatprep.subr.bf16.mxu0 %v566_v5  ;;  %384 = vmatprep.mubr.bf16.mxu0 %v493_v13  ;;  %v392_v21 = vld [vmem:[#allocation2] sm:$0xff] }
  0x1c   : > { %v491_v22 = vld [vmem:[%s715_s2] ss:$0 sm:$0xff]  ;;  %v393_v25 = vmul.f32 0.3, %v392_v21 }
  0x1e   : > { %519 = vmatpush3.bf16.msra.mxu0 %v567_v6 }
  0x1f   : > { %520 = vmatprep.subr.bf16.mxu0 %v568_v7 }
  0x22   : > { %521 = vmatpush3.bf16.msra.mxu0 %v569_v8 }
  0x23   : > { %522 = vmatprep.subr.bf16.mxu0 %v570_v9 }
  0x26   : > { %523 = vmatpush3.bf16.msra.mxu0 %v571_v10 }
  0x27   : > { %524 = vmatprep.subr.bf16.mxu0 %v572_v11 }
  0x2a   : > { %525 = vmatpush3.bf16.msra.mxu0 %v573_v14 }
  0x2b   : > { %526 = vmatprep.subr.bf16.mxu0 %v574_v15 }
  0x2e   : > { %527 = vmatpush3.bf16.msra.mxu0 %v575_v16 }
  0x2f   : > { %528 = vmatprep.subr.bf16.mxu0 %v576_v17 }
  0x32   : > { %529 = vmatpush3.bf16.msra.mxu0 %v577_v18 }
  0x35   : > { %385 = vmatmul.mubr.bf16.vlgmr.msra.gmra.mxu0 %v492_v19 }
  0xf5   : > { %v530_v20 = vpop.f32.mrf.mxu0 }
  0xf7   : > { %v531_v23 = vpop.f32.mrf.mxu0 }
  0xf8   : > { %v532_v24 = vadd.f32 %v531_v23, %v530_v20 }
  0xf9   : > { %v533_v26 = vpop.f32.mrf.mxu0 }
  0xfa   : > { %v387_v27 = vadd.f32 %v532_v24, %v491_v22 }
  0xfb   : > { %v534_v28 = vpop.f32.mrf.mxu0 }
  0xfc   : > { %v394_v29 = vadd.f32 %v393_v25, %v387_v27 }
  0xfe   : > { %vm395_vm0 = vcmp.ge.f32.partialorder %v394_v29, 0.5 }
  0xff   : > { %v396_v30 = vsel %vm395_vm0, 0.0, %v394_v29  ;;  %v510_v32 = vsel %vm395_vm0, 1.0, %v605_v31 }
 0x100   : > { %397 = vst [vmem:[#allocation2] sm:$0xff] %v396_v30  ;;  %v400_v33 = vpack.c.bf16 %v510_v32, %v510_v32 }
 0x102   : > { %401 = vst [vmem:[%s650_s24] sm:$0xf] %v400_v33 }
 0x103 PF: > { %s13_s14 = sadd.s32 1, %s602_s14   ;;  %s717_s12 = smov %s598_s13 }
 0x104   : > { %p10_p6 = scmp.ge.s32.totalorder %s13_s14, 6   ;;  %s718_s13 = smov %s720_s15 }
 0x106   :  { %12 = sbr.rel (!%p10_p6) target bundleno = 2 (0x2), region = 66 }

// kernel: resnetlif50_forward.109
= control target key start
LH: loop header
LB: loop body
LE: loop exit
PB: predicated region body
PF: predicated region fallthrough
CT: control target
= control target key end

     0   :  { %vm25_vm0 = vcmask 1043456   ;;  %s384_s0 = inlined_call_operand.vmem [shape: bf16[2,4,256], index: 0, kind: input, shape index: {}]   ;;  %s385_s1 = inlined_call_operand.vmem [shape: f32[256,128], index: 1, kind: input, shape index: {}]   ;;  %s386_s2 = inlined_call_operand.vmem [shape: f32[1,128], index: 2, kind: input, shape index: {}]   ;;  %s387_s3 = inlined_call_operand.hbm [shape: f32[2,128], index: 3, kind: output, shape index: {}]  }
   0x1   :  { %v89_v0 = vld [vmem:[%s385_s1 + $0xf8] sm:$0xff]  ;;  %v88_v2 = vld [vmem:[%s385_s1 + $0xf0] sm:$0xff]  ;;  %v87_v4 = vld [vmem:[%s385_s1 + $0xe8] sm:$0xff] }
   0x2   :  { %v73_v1 = vld [vmem:[%s385_s1 + $0x78] sm:$0xff]  ;;  %196 = vmatprep.subr.mxu0 %v89_v0  ;;  %v72_v3 = vld [vmem:[%s385_s1 + $0x70] sm:$0xff]  ;;  %v71_v5 = vld [vmem:[%s385_s1 + $0x68] sm:$0xff] }
   0x3   :  { %197 = vmatpush3.msra.mxu0 %v73_v1  ;;  %v86_v6 = vld [vmem:[%s385_s1 + $0xe0] sm:$0xff]  ;;  %v85_v8 = vld [vmem:[%s385_s1 + $0xd8] sm:$0xff]  ;;  %v84_v10 = vld [vmem:[%s385_s1 + $0xd0] sm:$0xff] }
   0x4   :  { %198 = vmatprep.subr.mxu0 %v88_v2  ;;  %v70_v7 = vld [vmem:[%s385_s1 + $0x60] sm:$0xff]  ;;  %v69_v9 = vld [vmem:[%s385_s1 + $0x58] sm:$0xff]  ;;  %v68_v11 = vld [vmem:[%s385_s1 + $0x50] sm:$0xff] }
   0x5   :  { %199 = vmatpush3.msra.mxu0 %v72_v3  ;;  %v83_v12 = vld [vmem:[%s385_s1 + $0xc8] sm:$0xff]  ;;  %v193_v13 = vld [vmem:[%s384_s0] sm:$0xff]  }
   0x6   :  { %200 = vmatprep.subr.mxu0 %v87_v4  ;;  %v67_v14 = vld [vmem:[%s385_s1 + $0x48] sm:$0xff]  ;;  %v194_v15 = vunpack.c.l.bf16 %v193_v13  ;;  %v195_v16 = vunpack.c.h.bf16 %v193_v13 }
   0x7   :  { %201 = vmatpush3.msra.mxu0 %v71_v5 }
   0x8   :  { %202 = vmatprep.subr.mxu0 %v86_v6 }
   0x9   :  { %203 = vmatpush3.msra.mxu0 %v70_v7 }
   0xa   :  { %204 = vmatprep.subr.mxu0 %v85_v8 }
   0xb   :  { %205 = vmatpush3.msra.mxu0 %v69_v9 }
   0xc   :  { %206 = vmatprep.subr.mxu0 %v84_v10 }
   0xd   :  { %8 = vsyncpa [#allocation3], 0  ;;  %207 = vmatpush3.msra.mxu0 %v68_v11  ;;  %v82_v17 = vld [vmem:[%s385_s1 + $0xc0] sm:$0xff]  ;;  %v21_v19 = vcombine.high %v194_v15, %v194_v15  ;;  %v22_v20 = vcombine.high %v195_v16, %v195_v16  ;;  %v26_v21 = vsel %vm25_vm0, %v194_v15, 0.0  ;;  %v40_v22 = vsel %vm25_vm0, %v195_v16, 0.0  ;;  %v81_v23 = vld [vmem:[%s385_s1 + $0xb8] sm:$0xff] }
   0xe   :  { %208 = vmatprep.subr.mxu0 %v83_v12  ;;  %v66_v18 = vld [vmem:[%s385_s1 + $0x40] sm:$0xff]  ;;  %v27_v24 = vrot.slane %v26_v21, 4  ;;  %v41_v25 = vrot.slane %v40_v22, 4  ;;  %v65_v26 = vld [vmem:[%s385_s1 + $0x38] sm:$0xff]  ;;  %v80_v29 = vld [vmem:[%s385_s1 + $0xb0] sm:$0xff]  ;;  %vm101_vm1 = vcmask 1041409  }
   0xf   :  { %209 = vmatpush3.msra.mxu0 %v67_v14  ;;  %v33_v27 = vsel %vm25_vm0, %v21_v19, 0.0  ;;  %v47_v28 = vsel %vm25_vm0, %v22_v20, 0.0  ;;  %v64_v34 = vld [vmem:[%s385_s1 + $0x30] sm:$0xff]  ;;  %v79_v35 = vld [vmem:[%s385_s1 + $0xa8] sm:$0xff]  ;;  %v78_v41 = vld [vmem:[%s385_s1 + $0xa0] sm:$0xff]  ;;  %s254_s24 = smov [#allocation2]  }
  0x10   :  { %210 = vmatprep.subr.mxu0 %v82_v17  ;;  %v34_v30 = vrot.slane %v33_v27, 4  ;;  %v48_v31 = vrot.slane %v47_v28, 4  ;;  %v28_v32 = vadd.f32 %v27_v24, %v26_v21  ;;  %v42_v33 = vadd.f32 %v41_v25, %v40_v22  ;;  %v63_v40 = vld [vmem:[%s385_s1 + $0x28] sm:$0xff]  ;;  %v62_v46 = vld [vmem:[%s385_s1 + $0x20] sm:$0xff]  ;;  %v77_v47 = vld [vmem:[%s385_s1 + $0x98] sm:$0xff]  ;;  %s183_s25 = sshll.u32 %s254_s24, 4  ;;  %s184_s25 = int_to_ptr.vmem [resolvable:$true] %s183_s25 }
  0x11   :  { %211 = vmatpush3.msra.mxu0 %v66_v18  ;;  %v61_v52 = vld [vmem:[%s385_s1 + $0x18] sm:$0xff]  ;;  %v76_v53 = vld [vmem:[%s385_s1 + $0x90] sm:$0xff]  ;;  %v75_v59 = vld [vmem:[%s385_s1 + $0x88] sm:$0xff]  ;;  %p237_p1 = scmp.lt.s32.totalorder %s184_s25, %s184_s25 }
  0x12   :  { %212 = vmatprep.subr.mxu0 %v81_v23  ;;  %v35_v36 = vadd.f32 %v34_v30, %v33_v27  ;;  %v49_v37 = vadd.f32 %v48_v31, %v47_v28  ;;  %v29_v38 = vrot.slane %v28_v32, 2  ;;  %v43_v39 = vrot.slane %v42_v33, 2  ;;  %v60_v58 = vld [vmem:[%s385_s1 + $0x10] sm:$0xff]  ;;  %v59_v0 = vld [vmem:[%s385_s1 + $0x8] sm:$0xff]  ;;  %v74_v1 = vld [vmem:[%s385_s1 + $0x80] sm:$0xff] }
  0x13   :  { %213 = vmatpush3.msra.mxu0 %v65_v26  ;;  %v58_v4 = vld [vmem:[%s385_s1] sm:$0xff]  ;;  %s232_s1 = scalar_lea.vmem %s184_s25, 32 }
  0x14   :  { %214 = vmatprep.subr.mxu0 %v80_v29  ;;  %v36_v42 = vrot.slane %v35_v36, 2  ;;  %v50_v43 = vrot.slane %v49_v37, 2  ;;  %v30_v44 = vadd.f32 %v29_v38, %v28_v32  ;;  %v44_v45 = vadd.f32 %v43_v39, %v42_v33  ;;  %v191_v9 = vld [vmem:[%s386_s2] ss:$0 sm:$0xff]  ;;  %p233_p0 = scmp.ne.s32.totalorder %s184_s25, %s232_s1  ;;  %p238_p2 = scmp.lt.s32.totalorder %s232_s1, %s232_s1 }
  0x15   :  { %215 = vmatpush3.msra.mxu0 %v64_v34 }
  0x16   :  { %216 = vmatprep.subr.mxu0 %v79_v35  ;;  %v37_v48 = vadd.f32 %v36_v42, %v35_v36  ;;  %v51_v49 = vadd.f32 %v50_v43, %v49_v37  ;;  %v31_v50 = vrot.slane %v30_v44, 1  ;;  %v45_v51 = vrot.slane %v44_v45, 1  ;;  %p239_p3 = por %p238_p2, %p237_p1 }
  0x17   :  { %217 = vmatpush3.msra.mxu0 %v63_v40 }
  0x18   :  { %218 = vmatprep.subr.mxu0 %v78_v41  ;;  %v38_v54 = vrot.slane %v37_v48, 1  ;;  %v52_v55 = vrot.slane %v51_v49, 1  ;;  %v32_v56 = vadd.f32 %v31_v50, %v30_v44  ;;  %v46_v57 = vadd.f32 %v45_v51, %v44_v45  ;;  %p240_p4 = pnand %p239_p3, %p233_p0 }
  0x19   :  { %219 = vmatpush3.msra.mxu0 %v62_v46 }
  0x1a   :  { %220 = vmatprep.subr.mxu0 %v77_v47  ;;  %v39_v60 = vadd.f32 %v38_v54, %v37_v48  ;;  %v53_v61 = vadd.f32 %v52_v55, %v51_v49  ;;  %v54_v62 = vmul.f32 0.25, %v32_v56  ;;  %v56_v63 = vmul.f32 0.25, %v46_v57 }
  0x1b   :  { %221 = vmatpush3.msra.mxu0 %v61_v52 }
  0x1c   :  { %222 = vmatprep.subr.mxu0 %v76_v53  ;;  %v55_v2 = vmul.f32 0.25, %v39_v60  ;;  %v57_v3 = vmul.f32 0.25, %v53_v61  ;;  %v102_v6 = vsel %vm101_vm1, %v56_v63, %v54_v62 }
  0x1d   :  { %223 = vmatpush3.msra.mxu0 %v60_v58 }
  0x1e   :  { %224 = vmatprep.subr.mxu0 %v75_v59  ;;  %v103_v5 = vsel %vm101_vm1, %v57_v3, %v55_v2 }
  0x1f   :  { %225 = vmatpush3.msra.mxu0 %v59_v0  ;;  %170 = vmatprep.mubr.f32.mxu0 %v103_v5 }
  0x20   :  { %226 = vmatprep.subr.mxu0 %v74_v1 }
  0x21   :  { %227 = vmatpush3.msra.mxu0 %v58_v4 }
  0x22   :  { %171 = vmatmul.mubr.f32.vlgmr.msra.gmra.mxu0 %v102_v6 }
  0xe2   :  { %v228_v7 = vpop.f32.mrf.mxu0 }
  0xe4   :  { %v229_v8 = vpop.f32.mrf.mxu0 }
  0xe5   :  { %v230_v10 = vadd.f32 %v229_v8, %v228_v7 }
  0xe7   :  { %v173_v11 = vadd.f32 %v230_v10, %v191_v9 }
  0xe9   :  { %176 = vst [vmem:[#allocation2] sm:$0x3] %v173_v11 }
  0xea   :  { %243 = shalt.err (!%p240_p4)
}
  0xeb   :  { %186 = dma.vmem_to_hbm [thread:$0]  %s184_s25, 32, %s387_s3, [#allocation3]  }
  0xec   :  { %252 = dma.done.wait [#allocation3], 32  }
  0xed   :  { %253 = vsyncadd [#allocation3], 4294967264 }
  0xee   :  { %190 = vsyncpa [#allocation3], 1 }

// kernel: resnetlif50_forward.101
= control target key start
LH: loop header
LB: loop body
LE: loop exit
PB: predicated region body
PF: predicated region fallthrough
CT: control target
= control target key end

     0   :  { %v221_v1 = vmov 0   ;;  %v34_v18 = vlaneseq  ;;  %s299_s1 = inlined_call_operand.vmem [shape: bf16[128,256], index: 1, kind: input, shape index: {}]   ;;  %s300_s0 = inlined_call_operand.vmem [shape: bf16[8,128], index: 0, kind: input, shape index: {}]   ;;  %s301_s2 = inlined_call_operand.vmem [shape: f32[1,256], index: 2, kind: input, shape index: {}]   ;;  %s302_s3 = inlined_call_operand.vmem [shape: bf16[8,256], index: 3, kind: output, shape index: {}]  }
   0x1   :  { %v197_v0 = vld [vmem:[%s299_s1 + $0x74] ss:$8 sps:$4 sm:$0xff]   ;;  %156 = vmatprep.mubr.bf16.mxu0 %v221_v1  ;;  %v199_v2 = vld [vmem:[%s299_s1 + $0x70] ss:$8 sps:$4 sm:$0xff]   ;;  %v200_v3 = vld [vmem:[%s299_s1 + $0x64] ss:$8 sps:$4 sm:$0xff]  }
   0x2   :  { %124 = vmatprep.subr.bf16.mxu0 %v197_v0  ;;  %v202_v4 = vld [vmem:[%s299_s1 + $0x60] ss:$8 sps:$4 sm:$0xff]   ;;  %v203_v5 = vld [vmem:[%s299_s1 + $0x54] ss:$8 sps:$4 sm:$0xff]   ;;  %v205_v6 = vld [vmem:[%s299_s1 + $0x50] ss:$8 sps:$4 sm:$0xff]  }
   0x3   :  { %125 = vmatpush1.bf16.msra.mxu0 %v199_v2  ;;  %v206_v7 = vld [vmem:[%s299_s1 + $0x44] ss:$8 sps:$4 sm:$0xff]   ;;  %v208_v8 = vld [vmem:[%s299_s1 + $0x40] ss:$8 sps:$4 sm:$0xff]   ;;  %v209_v9 = vld [vmem:[%s299_s1 + $0x34] ss:$8 sps:$4 sm:$0xff]  }
   0x4   :  { %126 = vmatprep.subr.bf16.mxu0 %v200_v3  ;;  %v211_v10 = vld [vmem:[%s299_s1 + $0x30] ss:$8 sps:$4 sm:$0xff]   ;;  %v212_v11 = vld [vmem:[%s299_s1 + $0x24] ss:$8 sps:$4 sm:$0xff]   ;;  %v214_v12 = vld [vmem:[%s299_s1 + $0x20] ss:$8 sps:$4 sm:$0xff]  }
   0x5   :  { %v215_v13 = vld [vmem:[%s299_s1 + $0x14] ss:$8 sps:$4 sm:$0xff]   ;;  %v217_v14 = vld [vmem:[%s299_s1 + $0x10] ss:$8 sps:$4 sm:$0xff]   ;;  %v218_v15 = vld [vmem:[%s299_s1 + $0x4] ss:$8 sps:$4 sm:$0xff]  }
   0x6   :  { %v220_v16 = vld [vmem:[%s299_s1] ss:$8 sps:$4 sm:$0xff]   ;;  %v35_v19 = vshrl.u32 %v34_v18, 7 }
   0x7   :  { %127 = vmatpush1.bf16.msra.mxu0 %v202_v4  ;;  %v15_v17 = vld [vmem:[%s300_s0] sm:$0xf] }
   0x8   :  { %128 = vmatprep.subr.bf16.mxu0 %v203_v5  ;;  %v36_v20 = vsub.s32 0, %v35_v19  ;;  %v40_v21 = vsub.s32 1, %v35_v19  ;;  %v32_v22 = vld [vmem:[%s301_s2] sm:$0x3] }
   0xa   :  { %v37_v23 = vrot.slane %v32_v22, %v36_v20  ;;  %v41_v24 = vrot.slane %v32_v22, %v40_v21 }
   0xb   :  { %129 = vmatpush1.bf16.msra.mxu0 %v205_v6 }
   0xc   :  { %130 = vmatprep.subr.bf16.mxu0 %v206_v7 }
   0xf   :  { %131 = vmatpush1.bf16.msra.mxu0 %v208_v8 }
  0x10   :  { %132 = vmatprep.subr.bf16.mxu0 %v209_v9 }
  0x13   :  { %133 = vmatpush1.bf16.msra.mxu0 %v211_v10 }
  0x14   :  { %134 = vmatprep.subr.bf16.mxu0 %v212_v11 }
  0x17   :  { %135 = vmatpush1.bf16.msra.mxu0 %v214_v12 }
  0x18   :  { %136 = vmatprep.subr.bf16.mxu0 %v215_v13 }
  0x1b   :  { %137 = vmatpush1.bf16.msra.mxu0 %v217_v14 }
  0x1c   :  { %138 = vmatprep.subr.bf16.mxu0 %v218_v15 }
  0x1f   :  { %139 = vmatpush1.bf16.msra.mxu0 %v220_v16 }
  0x22   :  { %157 = vmatmul.mubr.bf16.vlgmr.msra.gmra.mxu0 %v15_v17 }
  0xe2   :  { %v158_v25 = vpop.f32.mrf.mxu0 }
  0xe3   :  { %v159_v27 = vadd.f32 %v158_v25, %v37_v23 }
  0xe4   :  { %v160_v26 = vpop.f32.mrf.mxu0 }
  0xe5   :  { %v161_v28 = vadd.f32 %v160_v26, %v41_v24 }
  0xe6   :  { %v162_v29 = vpop.f32.mrf.mxu0 }
  0xe7   :  { %v195_v30 = vpack.c.bf16 %v161_v28, %v159_v27 }
  0xe8   :  { %v163_v31 = vpop.f32.mrf.mxu0 }
  0xe9   :  { %173 = vst [vmem:[%s302_s3] sm:$0xff] %v195_v30 }

// kernel: resnetlif50_forward.102
= control target key start
LH: loop header
LB: loop body
LE: loop exit
PB: predicated region body
PF: predicated region fallthrough
CT: control target
= control target key end

     0   :  { %s694_s15 = smov 0   ;;  %s696_s16 = smov 0   ;;  %s790_s0 = inlined_call_operand.vmem [shape: bf16[4,8,128], index: 0, kind: input, shape index: {}]   ;;  %s791_s1 = inlined_call_operand.vmem [shape: bf16[128,256], index: 1, kind: input, shape index: {}]   ;;  %s792_s2 = inlined_call_operand.vmem [shape: f32[1,256], index: 2, kind: input, shape index: {}]   ;;  %s793_s3 = inlined_call_operand.vmem [shape: bf16[4,8,256], index: 3, kind: input, shape index: {}]   ;;  %s794_s4 = inlined_call_operand.vmem [shape: bf16[4,8,256], index: 4, kind: output, shape index: {}]  }
   0x1   :  { %s698_s17 = smov 0  }
   0x2 LB: > { %s23_s18 = sadd.s32 1, %s660_s16  ;;  %p560_p0 = scmp.ge.s32.totalorder %s664_s17, 1  ;;  %s664_s17 = sphi %s698_s17, %s14_s17   ;;  %s660_s16 = sphi %s696_s16, %s796_s16   ;;  %s656_s15 = sphi %s694_s15, %s795_s15  }
   0x3   : > { %p24_p1 = scmp.ge.s32.totalorder %s23_s18, 4  ;;  %p196_p2 = scmp.lt.s32.totalorder %s664_s17, 5 }
   0x5   : > { %s798_s18 = smov (%p24_p1, %s23_s18), 0  ;;  %p197_p3 = pnand %p560_p0, %p196_p2 }
   0x6   : > { %p237_p4 = scmp.lt.s32.totalorder (!%p197_p3), %s656_s15, 3  ;;  %p566_p5 = scmp.ne.s32.totalorder (!%p197_p3), %s656_s15, 0 }
   0x7   : > { %200 = sbr.rel (%p197_p3) target bundleno = 259 (0x103), region = 36 }
   0xc   : > { %s238_s19 = scalar_select %p237_p4, %s656_s15, 3 }
   0xd   : > { %266 = sbr.rel (%p566_p5) target bundleno = 20 (0x14), region = 40 }
   0xe   : > { %s561_s20 = sshll.u32 %s238_s19, 2  ;;  %s588_s21 = sshll.u32 %s238_s19, 3 }
   0xf   : > { %s715_s24 = scalar_lea.vmem %s790_s0, %s561_s20  ;;  %s720_s27 = scalar_lea.vmem %s793_s3, %s588_s21 }
  0x10   : > { %s725_s30 = scalar_lea.vmem %s794_s4, %s588_s21 }
  0x12   : > { %v666_v0 = vmov 0.0  }
  0x13   : > { %267 = vst [vmem:[#allocation2] sm:$0xff] %v666_v0  ;;  %268 = vst [vmem:[#allocation2 + $0x8] sm:$0xff] %v666_v0 }
  0x14 PF: > { %v618_v1 = vld [vmem:[%s791_s1 + $0x74] ss:$8 sps:$4 sm:$0xff]   ;;  %v620_v2 = vld [vmem:[%s791_s1 + $0x70] ss:$8 sps:$4 sm:$0xff]   ;;  %v667_v3 = vmov 0   ;;  %v288_v19 = vlaneseq  ;;  %v419_v24 = vld [vmem:[%s720_s27] sm:$0xff] }
  0x15   : > { %410 = vmatprep.mubr.bf16.mxu0 %v667_v3  ;;  %378 = vmatprep.subr.bf16.mxu0 %v618_v1  ;;  %v621_v4 = vld [vmem:[%s791_s1 + $0x64] ss:$8 sps:$4 sm:$0xff]   ;;  %v623_v5 = vld [vmem:[%s791_s1 + $0x60] ss:$8 sps:$4 sm:$0xff]   ;;  %v624_v6 = vld [vmem:[%s791_s1 + $0x54] ss:$8 sps:$4 sm:$0xff]   ;;  %v420_v27 = vunpack.c.l.bf16 %v419_v24  ;;  %v421_v33 = vunpack.c.h.bf16 %v419_v24 }
  0x16   : > { %379 = vmatpush1.bf16.msra.mxu0 %v620_v2  ;;  %v626_v7 = vld [vmem:[%s791_s1 + $0x50] ss:$8 sps:$4 sm:$0xff]   ;;  %v627_v8 = vld [vmem:[%s791_s1 + $0x44] ss:$8 sps:$4 sm:$0xff]   ;;  %v629_v9 = vld [vmem:[%s791_s1 + $0x40] ss:$8 sps:$4 sm:$0xff]  }
  0x17   : > { %380 = vmatprep.subr.bf16.mxu0 %v621_v4  ;;  %v630_v10 = vld [vmem:[%s791_s1 + $0x34] ss:$8 sps:$4 sm:$0xff]   ;;  %v632_v11 = vld [vmem:[%s791_s1 + $0x30] ss:$8 sps:$4 sm:$0xff]   ;;  %v633_v12 = vld [vmem:[%s791_s1 + $0x24] ss:$8 sps:$4 sm:$0xff]  }
  0x18   : > { %v635_v13 = vld [vmem:[%s791_s1 + $0x20] ss:$8 sps:$4 sm:$0xff]   ;;  %v636_v14 = vld [vmem:[%s791_s1 + $0x14] ss:$8 sps:$4 sm:$0xff]   ;;  %v638_v15 = vld [vmem:[%s791_s1 + $0x10] ss:$8 sps:$4 sm:$0xff]  }
  0x19   : > { %v639_v16 = vld [vmem:[%s791_s1 + $0x4] ss:$8 sps:$4 sm:$0xff]   ;;  %v641_v17 = vld [vmem:[%s791_s1] ss:$8 sps:$4 sm:$0xff]   ;;  %v289_v20 = vshrl.u32 %v288_v19, 7  ;;  %v668_v44 = vmov 0.0  }
  0x1a   : > { %381 = vmatpush1.bf16.msra.mxu0 %v623_v5  ;;  %v269_v18 = vld [vmem:[%s715_s24] sm:$0xf]  ;;  %v425_v30 = vld [vmem:[#allocation2 + $0x8] sm:$0xff] }
  0x1b   : > { %382 = vmatprep.subr.bf16.mxu0 %v624_v6  ;;  %v290_v21 = vsub.s32 0, %v289_v20  ;;  %v286_v22 = vld [vmem:[%s792_s2] sm:$0x3]  ;;  %v294_v23 = vsub.s32 1, %v289_v20  ;;  %v427_v37 = vmul.f32 0.3, %v425_v30 }
  0x1c   : > { %v424_v26 = vld [vmem:[#allocation2] sm:$0xff] }
  0x1d   : > { %v291_v25 = vrot.slane %v286_v22, %v290_v21  ;;  %v295_v28 = vrot.slane %v286_v22, %v294_v23  ;;  %v426_v32 = vmul.f32 0.3, %v424_v26 }
  0x1e   : > { %383 = vmatpush1.bf16.msra.mxu0 %v626_v7 }
  0x1f   : > { %384 = vmatprep.subr.bf16.mxu0 %v627_v8 }
  0x22   : > { %385 = vmatpush1.bf16.msra.mxu0 %v629_v9 }
  0x23   : > { %386 = vmatprep.subr.bf16.mxu0 %v630_v10 }
  0x26   : > { %387 = vmatpush1.bf16.msra.mxu0 %v632_v11 }
  0x27   : > { %388 = vmatprep.subr.bf16.mxu0 %v633_v12 }
  0x2a   : > { %389 = vmatpush1.bf16.msra.mxu0 %v635_v13 }
  0x2b   : > { %390 = vmatprep.subr.bf16.mxu0 %v636_v14 }
  0x2e   : > { %391 = vmatpush1.bf16.msra.mxu0 %v638_v15 }
  0x2f   : > { %392 = vmatprep.subr.bf16.mxu0 %v639_v16 }
  0x32   : > { %393 = vmatpush1.bf16.msra.mxu0 %v641_v17 }
  0x35   : > { %411 = vmatmul.mubr.bf16.vlgmr.msra.gmra.mxu0 %v269_v18 }
  0xf5   : > { %v412_v29 = vpop.f32.mrf.mxu0 }
  0xf6   : > { %v413_v31 = vadd.f32 %v412_v29, %v291_v25 }
  0xf7   : > { %v414_v34 = vpop.f32.mrf.mxu0 }
  0xf8   : > { %v422_v35 = vadd.f32 %v420_v27, %v413_v31  ;;  %v415_v36 = vadd.f32 %v414_v34, %v295_v28 }
  0xf9   : > { %v416_v38 = vpop.f32.mrf.mxu0 }
  0xfa   : > { %v428_v39 = vadd.f32 %v426_v32, %v422_v35  ;;  %v423_v40 = vadd.f32 %v421_v33, %v415_v36 }
  0xfb   : > { %v417_v41 = vpop.f32.mrf.mxu0 }
  0xfc   : > { %vm430_vm0 = vcmp.ge.f32.partialorder %v428_v39, 0.5  ;;  %v429_v42 = vadd.f32 %v427_v37, %v423_v40 }
  0xfd   : > { %v432_v43 = vsel %vm430_vm0, 0.0, %v428_v39  ;;  %v583_v45 = vsel %vm430_vm0, 1.0, %v668_v44 }
  0xfe   : > { %434 = vst [vmem:[#allocation2] sm:$0xff] %v432_v43  ;;  %vm431_vm1 = vcmp.ge.f32.partialorder %v429_v42, 0.5 }
  0xff   : > { %v433_v46 = vsel %vm431_vm1, 0.0, %v429_v42  ;;  %v584_v47 = vsel %vm431_vm1, 1.0, %v668_v44 }
 0x100   : > { %435 = vst [vmem:[#allocation2 + $0x8] sm:$0xff] %v433_v46  ;;  %v590_v48 = vpack.c.bf16 %v584_v47, %v583_v45 }
 0x102   : > { %448 = vst [vmem:[%s725_s30] sm:$0xff] %v590_v48 }
 0x103 PF: > { %s14_s17 = sadd.s32 1, %s664_s17   ;;  %s795_s15 = smov %s660_s16 }
 0x104   : > { %p11_p6 = scmp.ge.s32.totalorder %s14_s17, 6   ;;  %s796_s16 = smov %s798_s18 }
 0x106   :  { %13 = sbr.rel (!%p11_p6) target bundleno = 2 (0x2), region = 73 }

</bundles_post_ra>
